<compile_context>
chip_gen: v7x
topology: tpu7x:2x2x1
jax: 0.10.0
libtpu: 0.0.40
codegen_flags: <defaults>
</compile_context>

<pallas_src>
import functools

import jax
import jax.numpy as jnp
import numpy as np
from jax.experimental import pallas as pl
from jax.experimental.pallas import tpu as pltpu

# ---------------- small "ViT" config (scaled-down vit_base_patch16_224) -------
B = 2            # batch
C = 4            # in_chans
IMG = 16         # H = W
PATCH = 4        # patch size
N = (IMG // PATCH) ** 2          # 16 patches
PD = C * PATCH * PATCH           # 64 patch dim
D = 32           # embed_dim
HEADS = 4
HD = D // HEADS                  # 8
DEPTH = 2        # number of transformer blocks
MLP = 4 * D                      # 128
H1, H2 = 512, 256                # classifier hidden sizes (as in the module)
NC = 102         # num_classes
NC_PAD = 128     # lane-dense padded output width
EPS = 1e-6       # timm ViT LayerNorm eps


def _layernorm(z, g, b):
    mu = jnp.mean(z, axis=-1, keepdims=True)
    var = jnp.mean((z - mu) ** 2, axis=-1, keepdims=True)
    return (z - mu) * jax.lax.rsqrt(var + EPS) * g + b


def _gelu(x):
    # TODO(synk): torch nn.GELU defaults to the exact erf formulation; using the
    # tanh approximation here for Mosaic-safe lowering.
    return jax.nn.gelu(x, approximate=True)


def mae_kernel(patches_ref,
               wpe_ref, qkvw_ref, qkvb_ref, projw_ref,
               dvec_ref, gvec_ref, fc1w_ref, fc1b_ref, fc2w_ref,
               wc1_ref, wc2_ref, wc3_ref, cbias_ref,
               out_ref):
    f32 = jnp.float32
    bb = patches_ref.shape[0]                      # batch rows handled this step
    scale = 1.0 / float(np.sqrt(HD))

    bpe = gvec_ref[0]                              # (1, D)
    ng = gvec_ref[1]
    nb = gvec_ref[2]

    pooled_rows = []
    for b in range(bb):
        x = patches_ref[b]                                   # (N, PD)

        # ---- patch embed (conv-as-matmul) ----
        h = jnp.dot(x, wpe_ref[...], preferred_element_type=f32) + bpe

        # ---- transformer blocks ----
        for d in range(DEPTH):
            # hoist per-block (1, D) vectors once.
            ln1g = dvec_ref[d, 0]
            ln1b = dvec_ref[d, 1]
            bproj = dvec_ref[d, 2]
            ln2g = dvec_ref[d, 3]
            ln2b = dvec_ref[d, 4]
            bfc2 = dvec_ref[d, 5]

            # ---- attention sub-block (per-head weights: no lane slicing) ----
            y = _layernorm(h, ln1g, ln1b)
            attn = bproj                                     # (1, D), broadcast add
            for hh in range(HEADS):
                qh = jnp.dot(y, qkvw_ref[d, 0, hh],
                             preferred_element_type=f32) + qkvb_ref[d, 0, hh]
                kh = jnp.dot(y, qkvw_ref[d, 1, hh],
                             preferred_element_type=f32) + qkvb_ref[d, 1, hh]
                vh = jnp.dot(y, qkvw_ref[d, 2, hh],
                             preferred_element_type=f32) + qkvb_ref[d, 2, hh]
                # (N, HD) x (N, HD)^T -> (N, N), contraction on last dims (no
                # explicit transpose materialized).
                s = jax.lax.dot_general(
                    qh, kh, (((1,), (1,)), ((), ())),
                    preferred_element_type=f32) * scale
                s = s - jnp.max(s, axis=-1, keepdims=True)
                p = jnp.exp(s)
                p = p * pl.reciprocal(jnp.sum(p, axis=-1, keepdims=True),
                                      approx=True)
                ov = jnp.dot(p, vh, preferred_element_type=f32)       # (N, HD)
                # fold the output projection per head (accumulate, no concat)
                attn = attn + jnp.dot(ov, projw_ref[d, hh],
                                      preferred_element_type=f32)     # (N, D)
            h = h + attn

            # ---- MLP sub-block ----
            y = _layernorm(h, ln2g, ln2b)
            m = jnp.dot(y, fc1w_ref[d], preferred_element_type=f32) + fc1b_ref[d]
            m = _gelu(m)
            h = h + jnp.dot(m, fc2w_ref[d], preferred_element_type=f32) + bfc2

        # ---- final norm + mean pool over tokens ----
        h = _layernorm(h, ng, nb)
        pooled_rows.append(jnp.mean(h, axis=0, keepdims=True))       # (1, D)

    pooled = pooled_rows[0] if bb == 1 else jnp.concatenate(pooled_rows, axis=0)

    # ---- classifier head, run once on (bb, D) (Dropout identity in eval) ----
    bc1 = cbias_ref[:, 0:H1]                          # 128-aligned lane slices
    bc2 = cbias_ref[:, H1:H1 + H2]
    bc3 = cbias_ref[:, H1 + H2:H1 + H2 + NC_PAD]
    z = jnp.maximum(jnp.dot(pooled, wc1_ref[...], preferred_element_type=f32) + bc1, 0.0)
    z = jnp.maximum(jnp.dot(z, wc2_ref[...], preferred_element_type=f32) + bc2, 0.0)
    out = jnp.dot(z, wc3_ref[...], preferred_element_type=f32) + bc3
    out_ref[...] = out.astype(out_ref.dtype)          # (bb, NC_PAD) lane-dense


def _full_spec(shape):
    zeros = (0,) * len(shape)
    return pl.BlockSpec(shape, lambda b, _z=zeros: _z)


# Natural (PyTorch-like) parameter layout, used by make_params / the reference.
PARAM_DEFS = [
    ("wpe", (PD, D)), ("bpe", (1, D)),
    ("ln1g", (DEPTH, D)), ("ln1b", (DEPTH, D)),
    ("wqkv", (DEPTH, D, 3 * D)), ("bqkv", (DEPTH, 3 * D)),
    ("wproj", (DEPTH, D, D)), ("bproj", (DEPTH, D)),
    ("ln2g", (DEPTH, D)), ("ln2b", (DEPTH, D)),
    ("wfc1", (DEPTH, D, MLP)), ("bfc1", (DEPTH, MLP)),
    ("wfc2", (DEPTH, MLP, D)), ("bfc2", (DEPTH, D)),
    ("ng", (1, D)), ("nb", (1, D)),
    ("wc1", (D, H1)), ("bc1", (1, H1)),
    ("wc2", (H1, H2)), ("bc2", (1, H2)),
    ("wc3", (H2, NC)), ("bc3", (1, NC)),
]

# Packed / pre-reshaped layout fed to the kernel (order == kernel signature).
PACKED_DEFS = [
    ("wpe", (PD, D)),
    ("qkvw", (DEPTH, 3, HEADS, D, HD)),
    ("qkvb", (DEPTH, 3, HEADS, 1, HD)),
    ("projw", (DEPTH, HEADS, HD, D)),
    ("dvec", (DEPTH, 6, 1, D)),
    ("gvec", (3, 1, D)),
    ("fc1w", (DEPTH, D, MLP)),
    ("fc1b", (DEPTH, 1, MLP)),
    ("fc2w", (DEPTH, MLP, D)),
    ("wc1", (D, H1)),
    ("wc2", (H1, H2)),
    ("wc3", (H2, NC_PAD)),
    ("cbias", (1, H1 + H2 + NC_PAD)),
]


def make_params(key):
    params = {}
    for name, shape in PARAM_DEFS:
        key, sub = jax.random.split(key)
        if name.startswith("b"):                 # biases -> zeros
            params[name] = jnp.zeros(shape, jnp.float32)
        elif name in ("ln1g", "ln2g", "ng"):     # LN gamma -> ones
            params[name] = jnp.ones(shape, jnp.float32)
        elif name in ("ln1b", "ln2b", "nb"):     # LN beta -> zeros
            params[name] = jnp.zeros(shape, jnp.float32)
        else:                                    # weights -> N(0, 0.02)
            params[name] = 0.02 * jax.random.normal(sub, shape, jnp.float32)
    return params


def pack_params(p):
    """Natural params -> per-head / packed layout used by the kernel."""
    packed = {}
    packed["wpe"] = p["wpe"]
    # (DEPTH, D, 3D) -> (DEPTH, 3, HEADS, D, HD): column c = (c//D, (c%D)//HD, c%HD)
    packed["qkvw"] = p["wqkv"].reshape(DEPTH, D, 3, HEADS, HD).transpose(0, 2, 3, 1, 4)
    packed["qkvb"] = p["bqkv"].reshape(DEPTH, 3, HEADS, HD)[:, :, :, None, :]
    # rows of wproj are the concatenated head outputs -> (DEPTH, HEADS, HD, D)
    packed["projw"] = p["wproj"].reshape(DEPTH, HEADS, HD, D)
    # per-depth (1, D)-wide vectors stacked along a leading axis
    packed["dvec"] = jnp.stack(
        [p["ln1g"], p["ln1b"], p["bproj"], p["ln2g"], p["ln2b"], p["bfc2"]],
        axis=1)[:, :, None, :]                                  # (DEPTH, 6, 1, D)
    packed["gvec"] = jnp.stack([p["bpe"], p["ng"], p["nb"]], axis=0)   # (3, 1, D)
    packed["fc1w"] = p["wfc1"]
    packed["fc1b"] = p["bfc1"][:, None, :]                      # (DEPTH, 1, MLP)
    packed["fc2w"] = p["wfc2"]
    packed["wc1"] = p["wc1"]
    packed["wc2"] = p["wc2"]
    packed["wc3"] = jnp.pad(p["wc3"], ((0, 0), (0, NC_PAD - NC)))      # (H2, 128)
    bc3p = jnp.pad(p["bc3"], ((0, 0), (0, NC_PAD - NC)))
    packed["cbias"] = jnp.concatenate([p["bc1"], p["bc2"], bc3p], axis=-1)
    return packed


def patchify(x):
    # (B, C, H, W) -> (B, N, C*P*P), row-major patches, channel-major inside.
    b, c, hh, ww = x.shape
    hp, wp = hh // PATCH, ww // PATCH
    x = x.reshape(b, c, hp, PATCH, wp, PATCH)
    x = x.transpose(0, 2, 4, 1, 3, 5)
    return x.reshape(b, hp * wp, c * PATCH * PATCH)


def _tensorcores_per_chip():
    # v7x has 2 TensorCores per chip; v5e/v6e have 1.
    try:
        kind = jax.devices()[0].device_kind.lower()
    except Exception:
        return 1
    return 2 if ("v7" in kind or "tpu7" in kind or "7x" in kind) else 1


@functools.partial(jax.jit, static_argnames=("bb",))
def _mae_forward(x, params, *, bb):
    patches = patchify(x.astype(jnp.float32))             # (B, N, PD)
    batch = x.shape[0]
    packed = pack_params(params)

    in_specs = [pl.BlockSpec((bb, N, PD), lambda b: (b, 0, 0))]
    args = [patches]
    for name, shape in PACKED_DEFS:
        in_specs.append(_full_spec(shape))
        args.append(packed[name])

    out_padded = pl.pallas_call(
        mae_kernel,
        out_shape=jax.ShapeDtypeStruct((batch, NC_PAD), jnp.float32),
        grid_spec=pltpu.PrefetchScalarGridSpec(
            num_scalar_prefetch=0,
            grid=(batch // bb,),
            in_specs=in_specs,
            out_specs=pl.BlockSpec((bb, NC_PAD), lambda b: (b, 0)),
        ),
        compiler_params=pltpu.CompilerParams(
            dimension_semantics=("parallel",)),
    )(*args)
    return out_padded[:, :NC]


def mae_forward(x, params):
    # Single-TC chips (v5e/v6e): fold the batch into one grid step.
    # Dual-TC v7x: one batch element per grid step, sharded across cores.
    bb = 1 if _tensorcores_per_chip() >= 2 else x.shape[0]
    return _mae_forward(x, params, bb=bb)


def reference_forward(x, p):
    # Pure-JAX reference for correctness checking (same math, batched).
    patches = patchify(x.astype(jnp.float32))             # (B, N, PD)
    h = jnp.einsum("bnp,pd->bnd", patches, p["wpe"]) + p["bpe"]
    scale = 1.0 / float(np.sqrt(HD))
    for d in range(DEPTH):
        y = _layernorm(h, p["ln1g"][d], p["ln1b"][d])
        qkv = jnp.einsum("bnd,de->bne", y, p["wqkv"][d]) + p["bqkv"][d]
        q, k, v = jnp.split(qkv, 3, axis=-1)
        q = q.reshape(B, N, HEADS, HD)
        k = k.reshape(B, N, HEADS, HD)
        v = v.reshape(B, N, HEADS, HD)
        s = jnp.einsum("bnhd,bmhd->bhnm", q, k) * scale
        a = jax.nn.softmax(s, axis=-1)
        ao = jnp.einsum("bhnm,bmhd->bnhd", a, v).reshape(B, N, D)
        h = h + jnp.einsum("bnd,de->bne", ao, p["wproj"][d]) + p["bproj"][d]
        y = _layernorm(h, p["ln2g"][d], p["ln2b"][d])
        m = _gelu(jnp.einsum("bnd,de->bne", y, p["wfc1"][d]) + p["bfc1"][d])
        h = h + jnp.einsum("bne,ed->bnd", m, p["wfc2"][d]) + p["bfc2"][d]
    h = _layernorm(h, p["ng"], p["nb"])
    pooled = jnp.mean(h, axis=1)                           # (B, D)
    z = jnp.maximum(pooled @ p["wc1"] + p["bc1"], 0.0)
    z = jnp.maximum(z @ p["wc2"] + p["bc2"], 0.0)
    return z @ p["wc3"] + p["bc3"]


if __name__ == "__main__":
    key = jax.random.PRNGKey(0)
    kx, kp = jax.random.split(key)
    x = jax.random.normal(kx, (B, C, IMG, IMG), jnp.float32)
    params = make_params(kp)

    out = mae_forward(x, params)
    out = jax.block_until_ready(out)
    assert out.shape == (B, NC), out.shape

    ref = jax.block_until_ready(reference_forward(x, params))
    np.testing.assert_allclose(np.asarray(out), np.asarray(ref), rtol=1e-2, atol=1e-2)

    print("KERNEL_OK")
</pallas_src>

<mosaic_0001>
module attributes {stable_mosaic.version = 11 : i64} {
  func.func @mae_kernel(%arg0: i32, %arg1: memref<2x16x64xf32, #tpu.memory_space<vmem>>, %arg2: memref<64x32xf32, #tpu.memory_space<vmem>>, %arg3: memref<2x3x4x32x8xf32, #tpu.memory_space<vmem>>, %arg4: memref<2x3x4x1x8xf32, #tpu.memory_space<vmem>>, %arg5: memref<2x4x8x32xf32, #tpu.memory_space<vmem>>, %arg6: memref<2x6x1x32xf32, #tpu.memory_space<vmem>>, %arg7: memref<3x1x32xf32, #tpu.memory_space<vmem>>, %arg8: memref<2x32x128xf32, #tpu.memory_space<vmem>>, %arg9: memref<2x1x128xf32, #tpu.memory_space<vmem>>, %arg10: memref<2x128x32xf32, #tpu.memory_space<vmem>>, %arg11: memref<32x512xf32, #tpu.memory_space<vmem>>, %arg12: memref<512x256xf32, #tpu.memory_space<vmem>>, %arg13: memref<256x128xf32, #tpu.memory_space<vmem>>, %arg14: memref<1x896xf32, #tpu.memory_space<vmem>>, %arg15: memref<2x128xf32, #tpu.memory_space<vmem>>) attributes {dimension_semantics = [#tpu.dimension_semantics<parallel>], iteration_bounds = array<i64: 1>, scalar_prefetch = 0 : i64, scratch_operands = 0 : i64, tpu.core_type = #tpu.core_type<tc>, window_params = [{transform_indices = @transform_0, window_bounds = array<i64: 2, 16, 64>}, {pipeline_mode = #tpu.pipeline_mode<synchronous>, transform_indices = @transform_1, window_bounds = array<i64: 64, 32>}, {pipeline_mode = #tpu.pipeline_mode<synchronous>, transform_indices = @transform_2, window_bounds = array<i64: 2, 3, 4, 32, 8>}, {pipeline_mode = #tpu.pipeline_mode<synchronous>, transform_indices = @transform_3, window_bounds = array<i64: 2, 3, 4, 1, 8>}, {pipeline_mode = #tpu.pipeline_mode<synchronous>, transform_indices = @transform_4, window_bounds = array<i64: 2, 4, 8, 32>}, {pipeline_mode = #tpu.pipeline_mode<synchronous>, transform_indices = @transform_5, window_bounds = array<i64: 2, 6, 1, 32>}, {pipeline_mode = #tpu.pipeline_mode<synchronous>, transform_indices = @transform_6, window_bounds = array<i64: 3, 1, 32>}, {pipeline_mode = #tpu.pipeline_mode<synchronous>, transform_indices = @transform_7, window_bounds = array<i64: 2, 32, 128>}, {pipeline_mode = #tpu.pipeline_mode<synchronous>, transform_indices = @transform_8, window_bounds = array<i64: 2, 1, 128>}, {pipeline_mode = #tpu.pipeline_mode<synchronous>, transform_indices = @transform_9, window_bounds = array<i64: 2, 128, 32>}, {pipeline_mode = #tpu.pipeline_mode<synchronous>, transform_indices = @transform_10, window_bounds = array<i64: 32, 512>}, {pipeline_mode = #tpu.pipeline_mode<synchronous>, transform_indices = @transform_11, window_bounds = array<i64: 512, 256>}, {pipeline_mode = #tpu.pipeline_mode<synchronous>, transform_indices = @transform_12, window_bounds = array<i64: 256, 128>}, {pipeline_mode = #tpu.pipeline_mode<synchronous>, transform_indices = @transform_13, window_bounds = array<i64: 1, 896>}, {transform_indices = @transform_14, window_bounds = array<i64: 2, 128>}]} {
    %c0 = arith.constant 0 : index
    %c0_0 = arith.constant 0 : index
    %c0_1 = arith.constant 0 : index
    %0 = vector.load %arg7[%c0, %c0_0, %c0_1] : memref<3x1x32xf32, #tpu.memory_space<vmem>>, vector<1x1x32xf32>
    %1 = vector.shape_cast %0 : vector<1x1x32xf32> to vector<1x32xf32>
    %c1 = arith.constant 1 : index
    %c0_2 = arith.constant 0 : index
    %c0_3 = arith.constant 0 : index
    %2 = vector.load %arg7[%c1, %c0_2, %c0_3] : memref<3x1x32xf32, #tpu.memory_space<vmem>>, vector<1x1x32xf32>
    %3 = vector.shape_cast %2 : vector<1x1x32xf32> to vector<1x32xf32>
    %c2 = arith.constant 2 : index
    %c0_4 = arith.constant 0 : index
    %c0_5 = arith.constant 0 : index
    %4 = vector.load %arg7[%c2, %c0_4, %c0_5] : memref<3x1x32xf32, #tpu.memory_space<vmem>>, vector<1x1x32xf32>
    %5 = vector.shape_cast %4 : vector<1x1x32xf32> to vector<1x32xf32>
    %c0_6 = arith.constant 0 : index
    %c0_7 = arith.constant 0 : index
    %c0_8 = arith.constant 0 : index
    %6 = vector.load %arg1[%c0_6, %c0_7, %c0_8] : memref<2x16x64xf32, #tpu.memory_space<vmem>>, vector<1x16x64xf32>
    %7 = vector.shape_cast %6 : vector<1x16x64xf32> to vector<16x64xf32>
    %c0_9 = arith.constant 0 : index
    %c0_10 = arith.constant 0 : index
    %8 = vector.load %arg2[%c0_9, %c0_10] : memref<64x32xf32, #tpu.memory_space<vmem>>, vector<64x32xf32>
    %cst = arith.constant dense<0.000000e+00> : vector<16x32xf32>
    %9 = tpu.matmul %7, %8, %cst {dimension_numbers = #tpu.dot_dimension_numbers<[1], [0], [0], [1], [0, 0, 1, 1], [], []>} : vector<16x64xf32>, vector<64x32xf32>, vector<16x32xf32> -> vector<16x32xf32>
    %10 = vector.broadcast %1 : vector<1x32xf32> to vector<16x32xf32>
    %11 = arith.addf %9, %10 : vector<16x32xf32>
    %c0_11 = arith.constant 0 : index
    %c0_12 = arith.constant 0 : index
    %c0_13 = arith.constant 0 : index
    %c0_14 = arith.constant 0 : index
    %12 = vector.load %arg6[%c0_11, %c0_12, %c0_13, %c0_14] : memref<2x6x1x32xf32, #tpu.memory_space<vmem>>, vector<1x1x1x32xf32>
    %13 = vector.shape_cast %12 : vector<1x1x1x32xf32> to vector<1x32xf32>
    %c0_15 = arith.constant 0 : index
    %c1_16 = arith.constant 1 : index
    %c0_17 = arith.constant 0 : index
    %c0_18 = arith.constant 0 : index
    %14 = vector.load %arg6[%c0_15, %c1_16, %c0_17, %c0_18] : memref<2x6x1x32xf32, #tpu.memory_space<vmem>>, vector<1x1x1x32xf32>
    %15 = vector.shape_cast %14 : vector<1x1x1x32xf32> to vector<1x32xf32>
    %c0_19 = arith.constant 0 : index
    %c2_20 = arith.constant 2 : index
    %c0_21 = arith.constant 0 : index
    %c0_22 = arith.constant 0 : index
    %16 = vector.load %arg6[%c0_19, %c2_20, %c0_21, %c0_22] : memref<2x6x1x32xf32, #tpu.memory_space<vmem>>, vector<1x1x1x32xf32>
    %17 = vector.shape_cast %16 : vector<1x1x1x32xf32> to vector<1x32xf32>
    %c0_23 = arith.constant 0 : index
    %c3 = arith.constant 3 : index
    %c0_24 = arith.constant 0 : index
    %c0_25 = arith.constant 0 : index
    %18 = vector.load %arg6[%c0_23, %c3, %c0_24, %c0_25] : memref<2x6x1x32xf32, #tpu.memory_space<vmem>>, vector<1x1x1x32xf32>
    %19 = vector.shape_cast %18 : vector<1x1x1x32xf32> to vector<1x32xf32>
    %c0_26 = arith.constant 0 : index
    %c4 = arith.constant 4 : index
    %c0_27 = arith.constant 0 : index
    %c0_28 = arith.constant 0 : index
    %20 = vector.load %arg6[%c0_26, %c4, %c0_27, %c0_28] : memref<2x6x1x32xf32, #tpu.memory_space<vmem>>, vector<1x1x1x32xf32>
    %21 = vector.shape_cast %20 : vector<1x1x1x32xf32> to vector<1x32xf32>
    %c0_29 = arith.constant 0 : index
    %c5 = arith.constant 5 : index
    %c0_30 = arith.constant 0 : index
    %c0_31 = arith.constant 0 : index
    %22 = vector.load %arg6[%c0_29, %c5, %c0_30, %c0_31] : memref<2x6x1x32xf32, #tpu.memory_space<vmem>>, vector<1x1x1x32xf32>
    %23 = vector.shape_cast %22 : vector<1x1x1x32xf32> to vector<1x32xf32>
    %cst_32 = arith.constant dense<0.000000e+00> : vector<16xf32>
    %24 = vector.multi_reduction <add>, %11, %cst_32 [1] : vector<16x32xf32> to vector<16xf32>
    %25 = vector.shape_cast %24 : vector<16xf32> to vector<16x1xf32>
    %cst_33 = arith.constant 3.200000e+01 : f32
    %26 = vector.broadcast %cst_33 : f32 to vector<16x1xf32>
    %27 = arith.divf %25, %26 : vector<16x1xf32>
    %28 = vector.broadcast %27 : vector<16x1xf32> to vector<16x32xf32>
    %29 = arith.subf %11, %28 : vector<16x32xf32>
    %30 = arith.mulf %29, %29 : vector<16x32xf32>
    %cst_34 = arith.constant dense<0.000000e+00> : vector<16xf32>
    %31 = vector.multi_reduction <add>, %30, %cst_34 [1] : vector<16x32xf32> to vector<16xf32>
    %32 = vector.shape_cast %31 : vector<16xf32> to vector<16x1xf32>
    %cst_35 = arith.constant 3.200000e+01 : f32
    %33 = vector.broadcast %cst_35 : f32 to vector<16x1xf32>
    %34 = arith.divf %32, %33 : vector<16x1xf32>
    %35 = vector.broadcast %27 : vector<16x1xf32> to vector<16x32xf32>
    %36 = arith.subf %11, %35 : vector<16x32xf32>
    %cst_36 = arith.constant 9.99999997E-7 : f32
    %37 = vector.broadcast %cst_36 : f32 to vector<16x1xf32>
    %38 = arith.addf %34, %37 : vector<16x1xf32>
    %39 = math.rsqrt %38 : vector<16x1xf32>
    %40 = vector.broadcast %39 : vector<16x1xf32> to vector<16x32xf32>
    %41 = arith.mulf %36, %40 : vector<16x32xf32>
    %42 = vector.broadcast %13 : vector<1x32xf32> to vector<16x32xf32>
    %43 = arith.mulf %41, %42 : vector<16x32xf32>
    %44 = vector.broadcast %15 : vector<1x32xf32> to vector<16x32xf32>
    %45 = arith.addf %43, %44 : vector<16x32xf32>
    %c0_37 = arith.constant 0 : index
    %c0_38 = arith.constant 0 : index
    %c0_39 = arith.constant 0 : index
    %c0_40 = arith.constant 0 : index
    %c0_41 = arith.constant 0 : index
    %46 = vector.load %arg3[%c0_37, %c0_38, %c0_39, %c0_40, %c0_41] : memref<2x3x4x32x8xf32, #tpu.memory_space<vmem>>, vector<1x1x1x32x8xf32>
    %47 = vector.shape_cast %46 : vector<1x1x1x32x8xf32> to vector<32x8xf32>
    %cst_42 = arith.constant dense<0.000000e+00> : vector<16x8xf32>
    %48 = tpu.matmul %45, %47, %cst_42 {dimension_numbers = #tpu.dot_dimension_numbers<[1], [0], [0], [1], [0, 0, 1, 1], [], []>} : vector<16x32xf32>, vector<32x8xf32>, vector<16x8xf32> -> vector<16x8xf32>
    %c0_43 = arith.constant 0 : index
    %c0_44 = arith.constant 0 : index
    %c0_45 = arith.constant 0 : index
    %c0_46 = arith.constant 0 : index
    %c0_47 = arith.constant 0 : index
    %49 = vector.load %arg4[%c0_43, %c0_44, %c0_45, %c0_46, %c0_47] : memref<2x3x4x1x8xf32, #tpu.memory_space<vmem>>, vector<1x1x1x1x8xf32>
    %50 = vector.shape_cast %49 : vector<1x1x1x1x8xf32> to vector<1x8xf32>
    %51 = vector.broadcast %50 : vector<1x8xf32> to vector<16x8xf32>
    %52 = arith.addf %48, %51 : vector<16x8xf32>
    %c0_48 = arith.constant 0 : index
    %c1_49 = arith.constant 1 : index
    %c0_50 = arith.constant 0 : index
    %c0_51 = arith.constant 0 : index
    %c0_52 = arith.constant 0 : index
    %53 = vector.load %arg3[%c0_48, %c1_49, %c0_50, %c0_51, %c0_52] : memref<2x3x4x32x8xf32, #tpu.memory_space<vmem>>, vector<1x1x1x32x8xf32>
    %54 = vector.shape_cast %53 : vector<1x1x1x32x8xf32> to vector<32x8xf32>
    %cst_53 = arith.constant dense<0.000000e+00> : vector<16x8xf32>
    %55 = tpu.matmul %45, %54, %cst_53 {dimension_numbers = #tpu.dot_dimension_numbers<[1], [0], [0], [1], [0, 0, 1, 1], [], []>} : vector<16x32xf32>, vector<32x8xf32>, vector<16x8xf32> -> vector<16x8xf32>
    %c0_54 = arith.constant 0 : index
    %c1_55 = arith.constant 1 : index
    %c0_56 = arith.constant 0 : index
    %c0_57 = arith.constant 0 : index
    %c0_58 = arith.constant 0 : index
    %56 = vector.load %arg4[%c0_54, %c1_55, %c0_56, %c0_57, %c0_58] : memref<2x3x4x1x8xf32, #tpu.memory_space<vmem>>, vector<1x1x1x1x8xf32>
    %57 = vector.shape_cast %56 : vector<1x1x1x1x8xf32> to vector<1x8xf32>
    %58 = vector.broadcast %57 : vector<1x8xf32> to vector<16x8xf32>
    %59 = arith.addf %55, %58 : vector<16x8xf32>
    %c0_59 = arith.constant 0 : index
    %c2_60 = arith.constant 2 : index
    %c0_61 = arith.constant 0 : index
    %c0_62 = arith.constant 0 : index
    %c0_63 = arith.constant 0 : index
    %60 = vector.load %arg3[%c0_59, %c2_60, %c0_61, %c0_62, %c0_63] : memref<2x3x4x32x8xf32, #tpu.memory_space<vmem>>, vector<1x1x1x32x8xf32>
    %61 = vector.shape_cast %60 : vector<1x1x1x32x8xf32> to vector<32x8xf32>
    %cst_64 = arith.constant dense<0.000000e+00> : vector<16x8xf32>
    %62 = tpu.matmul %45, %61, %cst_64 {dimension_numbers = #tpu.dot_dimension_numbers<[1], [0], [0], [1], [0, 0, 1, 1], [], []>} : vector<16x32xf32>, vector<32x8xf32>, vector<16x8xf32> -> vector<16x8xf32>
    %c0_65 = arith.constant 0 : index
    %c2_66 = arith.constant 2 : index
    %c0_67 = arith.constant 0 : index
    %c0_68 = arith.constant 0 : index
    %c0_69 = arith.constant 0 : index
    %63 = vector.load %arg4[%c0_65, %c2_66, %c0_67, %c0_68, %c0_69] : memref<2x3x4x1x8xf32, #tpu.memory_space<vmem>>, vector<1x1x1x1x8xf32>
    %64 = vector.shape_cast %63 : vector<1x1x1x1x8xf32> to vector<1x8xf32>
    %65 = vector.broadcast %64 : vector<1x8xf32> to vector<16x8xf32>
    %66 = arith.addf %62, %65 : vector<16x8xf32>
    %cst_70 = arith.constant dense<0.000000e+00> : vector<16x16xf32>
    %67 = tpu.matmul %52, %59, %cst_70 {dimension_numbers = #tpu.dot_dimension_numbers<[1], [1], [0], [0], [0, 0, 1, 0], [], []>} : vector<16x8xf32>, vector<16x8xf32>, vector<16x16xf32> -> vector<16x16xf32>
    %cst_71 = arith.constant 0.353553385 : f32
    %68 = vector.broadcast %cst_71 : f32 to vector<16x16xf32>
    %69 = arith.mulf %67, %68 : vector<16x16xf32>
    %cst_72 = arith.constant dense<0xFF800000> : vector<16xf32>
    %70 = vector.multi_reduction <maximumf>, %69, %cst_72 [1] : vector<16x16xf32> to vector<16xf32>
    %71 = vector.shape_cast %70 : vector<16xf32> to vector<16x1xf32>
    %72 = vector.broadcast %71 : vector<16x1xf32> to vector<16x16xf32>
    %73 = arith.subf %69, %72 : vector<16x16xf32>
    %74 = math.exp %73 : vector<16x16xf32>
    %cst_73 = arith.constant dense<0.000000e+00> : vector<16xf32>
    %75 = vector.multi_reduction <add>, %74, %cst_73 [1] : vector<16x16xf32> to vector<16xf32>
    %76 = vector.shape_cast %75 : vector<16xf32> to vector<16x1xf32>
    %77 = tpu.reciprocal %76 {approx = true} : vector<16x1xf32> -> vector<16x1xf32>
    %78 = vector.broadcast %77 : vector<16x1xf32> to vector<16x16xf32>
    %79 = arith.mulf %74, %78 : vector<16x16xf32>
    %cst_74 = arith.constant dense<0.000000e+00> : vector<16x8xf32>
    %80 = tpu.matmul %79, %66, %cst_74 {dimension_numbers = #tpu.dot_dimension_numbers<[1], [0], [0], [1], [0, 0, 1, 1], [], []>} : vector<16x16xf32>, vector<16x8xf32>, vector<16x8xf32> -> vector<16x8xf32>
    %c0_75 = arith.constant 0 : index
    %c0_76 = arith.constant 0 : index
    %c0_77 = arith.constant 0 : index
    %c0_78 = arith.constant 0 : index
    %81 = vector.load %arg5[%c0_75, %c0_76, %c0_77, %c0_78] : memref<2x4x8x32xf32, #tpu.memory_space<vmem>>, vector<1x1x8x32xf32>
    %82 = vector.shape_cast %81 : vector<1x1x8x32xf32> to vector<8x32xf32>
    %cst_79 = arith.constant dense<0.000000e+00> : vector<16x32xf32>
    %83 = tpu.matmul %80, %82, %cst_79 {dimension_numbers = #tpu.dot_dimension_numbers<[1], [0], [0], [1], [0, 0, 1, 1], [], []>} : vector<16x8xf32>, vector<8x32xf32>, vector<16x32xf32> -> vector<16x32xf32>
    %84 = vector.broadcast %17 : vector<1x32xf32> to vector<16x32xf32>
    %85 = arith.addf %84, %83 : vector<16x32xf32>
    %c0_80 = arith.constant 0 : index
    %c0_81 = arith.constant 0 : index
    %c1_82 = arith.constant 1 : index
    %c0_83 = arith.constant 0 : index
    %c0_84 = arith.constant 0 : index
    %86 = vector.load %arg3[%c0_80, %c0_81, %c1_82, %c0_83, %c0_84] : memref<2x3x4x32x8xf32, #tpu.memory_space<vmem>>, vector<1x1x1x32x8xf32>
    %87 = vector.shape_cast %86 : vector<1x1x1x32x8xf32> to vector<32x8xf32>
    %cst_85 = arith.constant dense<0.000000e+00> : vector<16x8xf32>
    %88 = tpu.matmul %45, %87, %cst_85 {dimension_numbers = #tpu.dot_dimension_numbers<[1], [0], [0], [1], [0, 0, 1, 1], [], []>} : vector<16x32xf32>, vector<32x8xf32>, vector<16x8xf32> -> vector<16x8xf32>
    %c0_86 = arith.constant 0 : index
    %c0_87 = arith.constant 0 : index
    %c1_88 = arith.constant 1 : index
    %c0_89 = arith.constant 0 : index
    %c0_90 = arith.constant 0 : index
    %89 = vector.load %arg4[%c0_86, %c0_87, %c1_88, %c0_89, %c0_90] : memref<2x3x4x1x8xf32, #tpu.memory_space<vmem>>, vector<1x1x1x1x8xf32>
    %90 = vector.shape_cast %89 : vector<1x1x1x1x8xf32> to vector<1x8xf32>
    %91 = vector.broadcast %90 : vector<1x8xf32> to vector<16x8xf32>
    %92 = arith.addf %88, %91 : vector<16x8xf32>
    %c0_91 = arith.constant 0 : index
    %c1_92 = arith.constant 1 : index
    %c1_93 = arith.constant 1 : index
    %c0_94 = arith.constant 0 : index
    %c0_95 = arith.constant 0 : index
    %93 = vector.load %arg3[%c0_91, %c1_92, %c1_93, %c0_94, %c0_95] : memref<2x3x4x32x8xf32, #tpu.memory_space<vmem>>, vector<1x1x1x32x8xf32>
    %94 = vector.shape_cast %93 : vector<1x1x1x32x8xf32> to vector<32x8xf32>
    %cst_96 = arith.constant dense<0.000000e+00> : vector<16x8xf32>
    %95 = tpu.matmul %45, %94, %cst_96 {dimension_numbers = #tpu.dot_dimension_numbers<[1], [0], [0], [1], [0, 0, 1, 1], [], []>} : vector<16x32xf32>, vector<32x8xf32>, vector<16x8xf32> -> vector<16x8xf32>
    %c0_97 = arith.constant 0 : index
    %c1_98 = arith.constant 1 : index
    %c1_99 = arith.constant 1 : index
    %c0_100 = arith.constant 0 : index
    %c0_101 = arith.constant 0 : index
    %96 = vector.load %arg4[%c0_97, %c1_98, %c1_99, %c0_100, %c0_101] : memref<2x3x4x1x8xf32, #tpu.memory_space<vmem>>, vector<1x1x1x1x8xf32>
    %97 = vector.shape_cast %96 : vector<1x1x1x1x8xf32> to vector<1x8xf32>
    %98 = vector.broadcast %97 : vector<1x8xf32> to vector<16x8xf32>
    %99 = arith.addf %95, %98 : vector<16x8xf32>
    %c0_102 = arith.constant 0 : index
    %c2_103 = arith.constant 2 : index
    %c1_104 = arith.constant 1 : index
    %c0_105 = arith.constant 0 : index
    %c0_106 = arith.constant 0 : index
    %100 = vector.load %arg3[%c0_102, %c2_103, %c1_104, %c0_105, %c0_106] : memref<2x3x4x32x8xf32, #tpu.memory_space<vmem>>, vector<1x1x1x32x8xf32>
    %101 = vector.shape_cast %100 : vector<1x1x1x32x8xf32> to vector<32x8xf32>
    %cst_107 = arith.constant dense<0.000000e+00> : vector<16x8xf32>
    %102 = tpu.matmul %45, %101, %cst_107 {dimension_numbers = #tpu.dot_dimension_numbers<[1], [0], [0], [1], [0, 0, 1, 1], [], []>} : vector<16x32xf32>, vector<32x8xf32>, vector<16x8xf32> -> vector<16x8xf32>
    %c0_108 = arith.constant 0 : index
    %c2_109 = arith.constant 2 : index
    %c1_110 = arith.constant 1 : index
    %c0_111 = arith.constant 0 : index
    %c0_112 = arith.constant 0 : index
    %103 = vector.load %arg4[%c0_108, %c2_109, %c1_110, %c0_111, %c0_112] : memref<2x3x4x1x8xf32, #tpu.memory_space<vmem>>, vector<1x1x1x1x8xf32>
    %104 = vector.shape_cast %103 : vector<1x1x1x1x8xf32> to vector<1x8xf32>
    %105 = vector.broadcast %104 : vector<1x8xf32> to vector<16x8xf32>
    %106 = arith.addf %102, %105 : vector<16x8xf32>
    %cst_113 = arith.constant dense<0.000000e+00> : vector<16x16xf32>
    %107 = tpu.matmul %92, %99, %cst_113 {dimension_numbers = #tpu.dot_dimension_numbers<[1], [1], [0], [0], [0, 0, 1, 0], [], []>} : vector<16x8xf32>, vector<16x8xf32>, vector<16x16xf32> -> vector<16x16xf32>
    %cst_114 = arith.constant 0.353553385 : f32
    %108 = vector.broadcast %cst_114 : f32 to vector<16x16xf32>
    %109 = arith.mulf %107, %108 : vector<16x16xf32>
    %cst_115 = arith.constant dense<0xFF800000> : vector<16xf32>
    %110 = vector.multi_reduction <maximumf>, %109, %cst_115 [1] : vector<16x16xf32> to vector<16xf32>
    %111 = vector.shape_cast %110 : vector<16xf32> to vector<16x1xf32>
    %112 = vector.broadcast %111 : vector<16x1xf32> to vector<16x16xf32>
    %113 = arith.subf %109, %112 : vector<16x16xf32>
    %114 = math.exp %113 : vector<16x16xf32>
    %cst_116 = arith.constant dense<0.000000e+00> : vector<16xf32>
    %115 = vector.multi_reduction <add>, %114, %cst_116 [1] : vector<16x16xf32> to vector<16xf32>
    %116 = vector.shape_cast %115 : vector<16xf32> to vector<16x1xf32>
    %117 = tpu.reciprocal %116 {approx = true} : vector<16x1xf32> -> vector<16x1xf32>
    %118 = vector.broadcast %117 : vector<16x1xf32> to vector<16x16xf32>
    %119 = arith.mulf %114, %118 : vector<16x16xf32>
    %cst_117 = arith.constant dense<0.000000e+00> : vector<16x8xf32>
    %120 = tpu.matmul %119, %106, %cst_117 {dimension_numbers = #tpu.dot_dimension_numbers<[1], [0], [0], [1], [0, 0, 1, 1], [], []>} : vector<16x16xf32>, vector<16x8xf32>, vector<16x8xf32> -> vector<16x8xf32>
    %c0_118 = arith.constant 0 : index
    %c1_119 = arith.constant 1 : index
    %c0_120 = arith.constant 0 : index
    %c0_121 = arith.constant 0 : index
    %121 = vector.load %arg5[%c0_118, %c1_119, %c0_120, %c0_121] : memref<2x4x8x32xf32, #tpu.memory_space<vmem>>, vector<1x1x8x32xf32>
    %122 = vector.shape_cast %121 : vector<1x1x8x32xf32> to vector<8x32xf32>
    %cst_122 = arith.constant dense<0.000000e+00> : vector<16x32xf32>
    %123 = tpu.matmul %120, %122, %cst_122 {dimension_numbers = #tpu.dot_dimension_numbers<[1], [0], [0], [1], [0, 0, 1, 1], [], []>} : vector<16x8xf32>, vector<8x32xf32>, vector<16x32xf32> -> vector<16x32xf32>
    %124 = arith.addf %85, %123 : vector<16x32xf32>
    %c0_123 = arith.constant 0 : index
    %c0_124 = arith.constant 0 : index
    %c2_125 = arith.constant 2 : index
    %c0_126 = arith.constant 0 : index
    %c0_127 = arith.constant 0 : index
    %125 = vector.load %arg3[%c0_123, %c0_124, %c2_125, %c0_126, %c0_127] : memref<2x3x4x32x8xf32, #tpu.memory_space<vmem>>, vector<1x1x1x32x8xf32>
    %126 = vector.shape_cast %125 : vector<1x1x1x32x8xf32> to vector<32x8xf32>
    %cst_128 = arith.constant dense<0.000000e+00> : vector<16x8xf32>
    %127 = tpu.matmul %45, %126, %cst_128 {dimension_numbers = #tpu.dot_dimension_numbers<[1], [0], [0], [1], [0, 0, 1, 1], [], []>} : vector<16x32xf32>, vector<32x8xf32>, vector<16x8xf32> -> vector<16x8xf32>
    %c0_129 = arith.constant 0 : index
    %c0_130 = arith.constant 0 : index
    %c2_131 = arith.constant 2 : index
    %c0_132 = arith.constant 0 : index
    %c0_133 = arith.constant 0 : index
    %128 = vector.load %arg4[%c0_129, %c0_130, %c2_131, %c0_132, %c0_133] : memref<2x3x4x1x8xf32, #tpu.memory_space<vmem>>, vector<1x1x1x1x8xf32>
    %129 = vector.shape_cast %128 : vector<1x1x1x1x8xf32> to vector<1x8xf32>
    %130 = vector.broadcast %129 : vector<1x8xf32> to vector<16x8xf32>
    %131 = arith.addf %127, %130 : vector<16x8xf32>
    %c0_134 = arith.constant 0 : index
    %c1_135 = arith.constant 1 : index
    %c2_136 = arith.constant 2 : index
    %c0_137 = arith.constant 0 : index
    %c0_138 = arith.constant 0 : index
    %132 = vector.load %arg3[%c0_134, %c1_135, %c2_136, %c0_137, %c0_138] : memref<2x3x4x32x8xf32, #tpu.memory_space<vmem>>, vector<1x1x1x32x8xf32>
    %133 = vector.shape_cast %132 : vector<1x1x1x32x8xf32> to vector<32x8xf32>
    %cst_139 = arith.constant dense<0.000000e+00> : vector<16x8xf32>
    %134 = tpu.matmul %45, %133, %cst_139 {dimension_numbers = #tpu.dot_dimension_numbers<[1], [0], [0], [1], [0, 0, 1, 1], [], []>} : vector<16x32xf32>, vector<32x8xf32>, vector<16x8xf32> -> vector<16x8xf32>
    %c0_140 = arith.constant 0 : index
    %c1_141 = arith.constant 1 : index
    %c2_142 = arith.constant 2 : index
    %c0_143 = arith.constant 0 : index
    %c0_144 = arith.constant 0 : index
    %135 = vector.load %arg4[%c0_140, %c1_141, %c2_142, %c0_143, %c0_144] : memref<2x3x4x1x8xf32, #tpu.memory_space<vmem>>, vector<1x1x1x1x8xf32>
    %136 = vector.shape_cast %135 : vector<1x1x1x1x8xf32> to vector<1x8xf32>
    %137 = vector.broadcast %136 : vector<1x8xf32> to vector<16x8xf32>
    %138 = arith.addf %134, %137 : vector<16x8xf32>
    %c0_145 = arith.constant 0 : index
    %c2_146 = arith.constant 2 : index
    %c2_147 = arith.constant 2 : index
    %c0_148 = arith.constant 0 : index
    %c0_149 = arith.constant 0 : index
    %139 = vector.load %arg3[%c0_145, %c2_146, %c2_147, %c0_148, %c0_149] : memref<2x3x4x32x8xf32, #tpu.memory_space<vmem>>, vector<1x1x1x32x8xf32>
    %140 = vector.shape_cast %139 : vector<1x1x1x32x8xf32> to vector<32x8xf32>
    %cst_150 = arith.constant dense<0.000000e+00> : vector<16x8xf32>
    %141 = tpu.matmul %45, %140, %cst_150 {dimension_numbers = #tpu.dot_dimension_numbers<[1], [0], [0], [1], [0, 0, 1, 1], [], []>} : vector<16x32xf32>, vector<32x8xf32>, vector<16x8xf32> -> vector<16x8xf32>
    %c0_151 = arith.constant 0 : index
    %c2_152 = arith.constant 2 : index
    %c2_153 = arith.constant 2 : index
    %c0_154 = arith.constant 0 : index
    %c0_155 = arith.constant 0 : index
    %142 = vector.load %arg4[%c0_151, %c2_152, %c2_153, %c0_154, %c0_155] : memref<2x3x4x1x8xf32, #tpu.memory_space<vmem>>, vector<1x1x1x1x8xf32>
    %143 = vector.shape_cast %142 : vector<1x1x1x1x8xf32> to vector<1x8xf32>
    %144 = vector.broadcast %143 : vector<1x8xf32> to vector<16x8xf32>
    %145 = arith.addf %141, %144 : vector<16x8xf32>
    %cst_156 = arith.constant dense<0.000000e+00> : vector<16x16xf32>
    %146 = tpu.matmul %131, %138, %cst_156 {dimension_numbers = #tpu.dot_dimension_numbers<[1], [1], [0], [0], [0, 0, 1, 0], [], []>} : vector<16x8xf32>, vector<16x8xf32>, vector<16x16xf32> -> vector<16x16xf32>
    %cst_157 = arith.constant 0.353553385 : f32
    %147 = vector.broadcast %cst_157 : f32 to vector<16x16xf32>
    %148 = arith.mulf %146, %147 : vector<16x16xf32>
    %cst_158 = arith.constant dense<0xFF800000> : vector<16xf32>
    %149 = vector.multi_reduction <maximumf>, %148, %cst_158 [1] : vector<16x16xf32> to vector<16xf32>
    %150 = vector.shape_cast %149 : vector<16xf32> to vector<16x1xf32>
    %151 = vector.broadcast %150 : vector<16x1xf32> to vector<16x16xf32>
    %152 = arith.subf %148, %151 : vector<16x16xf32>
    %153 = math.exp %152 : vector<16x16xf32>
    %cst_159 = arith.constant dense<0.000000e+00> : vector<16xf32>
    %154 = vector.multi_reduction <add>, %153, %cst_159 [1] : vector<16x16xf32> to vector<16xf32>
    %155 = vector.shape_cast %154 : vector<16xf32> to vector<16x1xf32>
    %156 = tpu.reciprocal %155 {approx = true} : vector<16x1xf32> -> vector<16x1xf32>
    %157 = vector.broadcast %156 : vector<16x1xf32> to vector<16x16xf32>
    %158 = arith.mulf %153, %157 : vector<16x16xf32>
    %cst_160 = arith.constant dense<0.000000e+00> : vector<16x8xf32>
    %159 = tpu.matmul %158, %145, %cst_160 {dimension_numbers = #tpu.dot_dimension_numbers<[1], [0], [0], [1], [0, 0, 1, 1], [], []>} : vector<16x16xf32>, vector<16x8xf32>, vector<16x8xf32> -> vector<16x8xf32>
    %c0_161 = arith.constant 0 : index
    %c2_162 = arith.constant 2 : index
    %c0_163 = arith.constant 0 : index
    %c0_164 = arith.constant 0 : index
    %160 = vector.load %arg5[%c0_161, %c2_162, %c0_163, %c0_164] : memref<2x4x8x32xf32, #tpu.memory_space<vmem>>, vector<1x1x8x32xf32>
    %161 = vector.shape_cast %160 : vector<1x1x8x32xf32> to vector<8x32xf32>
    %cst_165 = arith.constant dense<0.000000e+00> : vector<16x32xf32>
    %162 = tpu.matmul %159, %161, %cst_165 {dimension_numbers = #tpu.dot_dimension_numbers<[1], [0], [0], [1], [0, 0, 1, 1], [], []>} : vector<16x8xf32>, vector<8x32xf32>, vector<16x32xf32> -> vector<16x32xf32>
    %163 = arith.addf %124, %162 : vector<16x32xf32>
    %c0_166 = arith.constant 0 : index
    %c0_167 = arith.constant 0 : index
    %c3_168 = arith.constant 3 : index
    %c0_169 = arith.constant 0 : index
    %c0_170 = arith.constant 0 : index
    %164 = vector.load %arg3[%c0_166, %c0_167, %c3_168, %c0_169, %c0_170] : memref<2x3x4x32x8xf32, #tpu.memory_space<vmem>>, vector<1x1x1x32x8xf32>
    %165 = vector.shape_cast %164 : vector<1x1x1x32x8xf32> to vector<32x8xf32>
    %cst_171 = arith.constant dense<0.000000e+00> : vector<16x8xf32>
    %166 = tpu.matmul %45, %165, %cst_171 {dimension_numbers = #tpu.dot_dimension_numbers<[1], [0], [0], [1], [0, 0, 1, 1], [], []>} : vector<16x32xf32>, vector<32x8xf32>, vector<16x8xf32> -> vector<16x8xf32>
    %c0_172 = arith.constant 0 : index
    %c0_173 = arith.constant 0 : index
    %c3_174 = arith.constant 3 : index
    %c0_175 = arith.constant 0 : index
    %c0_176 = arith.constant 0 : index
    %167 = vector.load %arg4[%c0_172, %c0_173, %c3_174, %c0_175, %c0_176] : memref<2x3x4x1x8xf32, #tpu.memory_space<vmem>>, vector<1x1x1x1x8xf32>
    %168 = vector.shape_cast %167 : vector<1x1x1x1x8xf32> to vector<1x8xf32>
    %169 = vector.broadcast %168 : vector<1x8xf32> to vector<16x8xf32>
    %170 = arith.addf %166, %169 : vector<16x8xf32>
    %c0_177 = arith.constant 0 : index
    %c1_178 = arith.constant 1 : index
    %c3_179 = arith.constant 3 : index
    %c0_180 = arith.constant 0 : index
    %c0_181 = arith.constant 0 : index
    %171 = vector.load %arg3[%c0_177, %c1_178, %c3_179, %c0_180, %c0_181] : memref<2x3x4x32x8xf32, #tpu.memory_space<vmem>>, vector<1x1x1x32x8xf32>
    %172 = vector.shape_cast %171 : vector<1x1x1x32x8xf32> to vector<32x8xf32>
    %cst_182 = arith.constant dense<0.000000e+00> : vector<16x8xf32>
    %173 = tpu.matmul %45, %172, %cst_182 {dimension_numbers = #tpu.dot_dimension_numbers<[1], [0], [0], [1], [0, 0, 1, 1], [], []>} : vector<16x32xf32>, vector<32x8xf32>, vector<16x8xf32> -> vector<16x8xf32>
    %c0_183 = arith.constant 0 : index
    %c1_184 = arith.constant 1 : index
    %c3_185 = arith.constant 3 : index
    %c0_186 = arith.constant 0 : index
    %c0_187 = arith.constant 0 : index
    %174 = vector.load %arg4[%c0_183, %c1_184, %c3_185, %c0_186, %c0_187] : memref<2x3x4x1x8xf32, #tpu.memory_space<vmem>>, vector<1x1x1x1x8xf32>
    %175 = vector.shape_cast %174 : vector<1x1x1x1x8xf32> to vector<1x8xf32>
    %176 = vector.broadcast %175 : vector<1x8xf32> to vector<16x8xf32>
    %177 = arith.addf %173, %176 : vector<16x8xf32>
    %c0_188 = arith.constant 0 : index
    %c2_189 = arith.constant 2 : index
    %c3_190 = arith.constant 3 : index
    %c0_191 = arith.constant 0 : index
    %c0_192 = arith.constant 0 : index
    %178 = vector.load %arg3[%c0_188, %c2_189, %c3_190, %c0_191, %c0_192] : memref<2x3x4x32x8xf32, #tpu.memory_space<vmem>>, vector<1x1x1x32x8xf32>
    %179 = vector.shape_cast %178 : vector<1x1x1x32x8xf32> to vector<32x8xf32>
    %cst_193 = arith.constant dense<0.000000e+00> : vector<16x8xf32>
    %180 = tpu.matmul %45, %179, %cst_193 {dimension_numbers = #tpu.dot_dimension_numbers<[1], [0], [0], [1], [0, 0, 1, 1], [], []>} : vector<16x32xf32>, vector<32x8xf32>, vector<16x8xf32> -> vector<16x8xf32>
    %c0_194 = arith.constant 0 : index
    %c2_195 = arith.constant 2 : index
    %c3_196 = arith.constant 3 : index
    %c0_197 = arith.constant 0 : index
    %c0_198 = arith.constant 0 : index
    %181 = vector.load %arg4[%c0_194, %c2_195, %c3_196, %c0_197, %c0_198] : memref<2x3x4x1x8xf32, #tpu.memory_space<vmem>>, vector<1x1x1x1x8xf32>
    %182 = vector.shape_cast %181 : vector<1x1x1x1x8xf32> to vector<1x8xf32>
    %183 = vector.broadcast %182 : vector<1x8xf32> to vector<16x8xf32>
    %184 = arith.addf %180, %183 : vector<16x8xf32>
    %cst_199 = arith.constant dense<0.000000e+00> : vector<16x16xf32>
    %185 = tpu.matmul %170, %177, %cst_199 {dimension_numbers = #tpu.dot_dimension_numbers<[1], [1], [0], [0], [0, 0, 1, 0], [], []>} : vector<16x8xf32>, vector<16x8xf32>, vector<16x16xf32> -> vector<16x16xf32>
    %cst_200 = arith.constant 0.353553385 : f32
    %186 = vector.broadcast %cst_200 : f32 to vector<16x16xf32>
    %187 = arith.mulf %185, %186 : vector<16x16xf32>
    %cst_201 = arith.constant dense<0xFF800000> : vector<16xf32>
    %188 = vector.multi_reduction <maximumf>, %187, %cst_201 [1] : vector<16x16xf32> to vector<16xf32>
    %189 = vector.shape_cast %188 : vector<16xf32> to vector<16x1xf32>
    %190 = vector.broadcast %189 : vector<16x1xf32> to vector<16x16xf32>
    %191 = arith.subf %187, %190 : vector<16x16xf32>
    %192 = math.exp %191 : vector<16x16xf32>
    %cst_202 = arith.constant dense<0.000000e+00> : vector<16xf32>
    %193 = vector.multi_reduction <add>, %192, %cst_202 [1] : vector<16x16xf32> to vector<16xf32>
    %194 = vector.shape_cast %193 : vector<16xf32> to vector<16x1xf32>
    %195 = tpu.reciprocal %194 {approx = true} : vector<16x1xf32> -> vector<16x1xf32>
    %196 = vector.broadcast %195 : vector<16x1xf32> to vector<16x16xf32>
    %197 = arith.mulf %192, %196 : vector<16x16xf32>
    %cst_203 = arith.constant dense<0.000000e+00> : vector<16x8xf32>
    %198 = tpu.matmul %197, %184, %cst_203 {dimension_numbers = #tpu.dot_dimension_numbers<[1], [0], [0], [1], [0, 0, 1, 1], [], []>} : vector<16x16xf32>, vector<16x8xf32>, vector<16x8xf32> -> vector<16x8xf32>
    %c0_204 = arith.constant 0 : index
    %c3_205 = arith.constant 3 : index
    %c0_206 = arith.constant 0 : index
    %c0_207 = arith.constant 0 : index
    %199 = vector.load %arg5[%c0_204, %c3_205, %c0_206, %c0_207] : memref<2x4x8x32xf32, #tpu.memory_space<vmem>>, vector<1x1x8x32xf32>
    %200 = vector.shape_cast %199 : vector<1x1x8x32xf32> to vector<8x32xf32>
    %cst_208 = arith.constant dense<0.000000e+00> : vector<16x32xf32>
    %201 = tpu.matmul %198, %200, %cst_208 {dimension_numbers = #tpu.dot_dimension_numbers<[1], [0], [0], [1], [0, 0, 1, 1], [], []>} : vector<16x8xf32>, vector<8x32xf32>, vector<16x32xf32> -> vector<16x32xf32>
    %202 = arith.addf %163, %201 : vector<16x32xf32>
    %203 = arith.addf %11, %202 : vector<16x32xf32>
    %cst_209 = arith.constant dense<0.000000e+00> : vector<16xf32>
    %204 = vector.multi_reduction <add>, %203, %cst_209 [1] : vector<16x32xf32> to vector<16xf32>
    %205 = vector.shape_cast %204 : vector<16xf32> to vector<16x1xf32>
    %cst_210 = arith.constant 3.200000e+01 : f32
    %206 = vector.broadcast %cst_210 : f32 to vector<16x1xf32>
    %207 = arith.divf %205, %206 : vector<16x1xf32>
    %208 = vector.broadcast %207 : vector<16x1xf32> to vector<16x32xf32>
    %209 = arith.subf %203, %208 : vector<16x32xf32>
    %210 = arith.mulf %209, %209 : vector<16x32xf32>
    %cst_211 = arith.constant dense<0.000000e+00> : vector<16xf32>
    %211 = vector.multi_reduction <add>, %210, %cst_211 [1] : vector<16x32xf32> to vector<16xf32>
    %212 = vector.shape_cast %211 : vector<16xf32> to vector<16x1xf32>
    %cst_212 = arith.constant 3.200000e+01 : f32
    %213 = vector.broadcast %cst_212 : f32 to vector<16x1xf32>
    %214 = arith.divf %212, %213 : vector<16x1xf32>
    %215 = vector.broadcast %207 : vector<16x1xf32> to vector<16x32xf32>
    %216 = arith.subf %203, %215 : vector<16x32xf32>
    %cst_213 = arith.constant 9.99999997E-7 : f32
    %217 = vector.broadcast %cst_213 : f32 to vector<16x1xf32>
    %218 = arith.addf %214, %217 : vector<16x1xf32>
    %219 = math.rsqrt %218 : vector<16x1xf32>
    %220 = vector.broadcast %219 : vector<16x1xf32> to vector<16x32xf32>
    %221 = arith.mulf %216, %220 : vector<16x32xf32>
    %222 = vector.broadcast %19 : vector<1x32xf32> to vector<16x32xf32>
    %223 = arith.mulf %221, %222 : vector<16x32xf32>
    %224 = vector.broadcast %21 : vector<1x32xf32> to vector<16x32xf32>
    %225 = arith.addf %223, %224 : vector<16x32xf32>
    %c0_214 = arith.constant 0 : index
    %c0_215 = arith.constant 0 : index
    %c0_216 = arith.constant 0 : index
    %226 = vector.load %arg8[%c0_214, %c0_215, %c0_216] : memref<2x32x128xf32, #tpu.memory_space<vmem>>, vector<1x32x128xf32>
    %227 = vector.shape_cast %226 : vector<1x32x128xf32> to vector<32x128xf32>
    %cst_217 = arith.constant dense<0.000000e+00> : vector<16x128xf32>
    %228 = tpu.matmul %225, %227, %cst_217 {dimension_numbers = #tpu.dot_dimension_numbers<[1], [0], [0], [1], [0, 0, 1, 1], [], []>} : vector<16x32xf32>, vector<32x128xf32>, vector<16x128xf32> -> vector<16x128xf32>
    %c0_218 = arith.constant 0 : index
    %c0_219 = arith.constant 0 : index
    %c0_220 = arith.constant 0 : index
    %229 = vector.load %arg9[%c0_218, %c0_219, %c0_220] : memref<2x1x128xf32, #tpu.memory_space<vmem>>, vector<1x1x128xf32>
    %230 = vector.shape_cast %229 : vector<1x1x128xf32> to vector<1x128xf32>
    %231 = vector.broadcast %230 : vector<1x128xf32> to vector<16x128xf32>
    %232 = arith.addf %228, %231 : vector<16x128xf32>
    %233 = arith.mulf %232, %232 : vector<16x128xf32>
    %234 = arith.mulf %232, %233 : vector<16x128xf32>
    %cst_221 = arith.constant 4.471500e-02 : f32
    %235 = vector.broadcast %cst_221 : f32 to vector<16x128xf32>
    %236 = arith.mulf %235, %234 : vector<16x128xf32>
    %237 = arith.addf %232, %236 : vector<16x128xf32>
    %cst_222 = arith.constant 0.797884583 : f32
    %238 = vector.broadcast %cst_222 : f32 to vector<16x128xf32>
    %239 = arith.mulf %238, %237 : vector<16x128xf32>
    %240 = math.tanh %239 : vector<16x128xf32>
    %cst_223 = arith.constant 1.000000e+00 : f32
    %241 = vector.broadcast %cst_223 : f32 to vector<16x128xf32>
    %242 = arith.addf %241, %240 : vector<16x128xf32>
    %cst_224 = arith.constant 5.000000e-01 : f32
    %243 = vector.broadcast %cst_224 : f32 to vector<16x128xf32>
    %244 = arith.mulf %243, %242 : vector<16x128xf32>
    %245 = arith.mulf %232, %244 : vector<16x128xf32>
    %c0_225 = arith.constant 0 : index
    %c0_226 = arith.constant 0 : index
    %c0_227 = arith.constant 0 : index
    %246 = vector.load %arg10[%c0_225, %c0_226, %c0_227] : memref<2x128x32xf32, #tpu.memory_space<vmem>>, vector<1x128x32xf32>
    %247 = vector.shape_cast %246 : vector<1x128x32xf32> to vector<128x32xf32>
    %cst_228 = arith.constant dense<0.000000e+00> : vector<16x32xf32>
    %248 = tpu.matmul %245, %247, %cst_228 {dimension_numbers = #tpu.dot_dimension_numbers<[1], [0], [0], [1], [0, 0, 1, 1], [], []>} : vector<16x128xf32>, vector<128x32xf32>, vector<16x32xf32> -> vector<16x32xf32>
    %249 = arith.addf %203, %248 : vector<16x32xf32>
    %250 = vector.broadcast %23 : vector<1x32xf32> to vector<16x32xf32>
    %251 = arith.addf %249, %250 : vector<16x32xf32>
    %c1_229 = arith.constant 1 : index
    %c0_230 = arith.constant 0 : index
    %c0_231 = arith.constant 0 : index
    %c0_232 = arith.constant 0 : index
    %252 = vector.load %arg6[%c1_229, %c0_230, %c0_231, %c0_232] : memref<2x6x1x32xf32, #tpu.memory_space<vmem>>, vector<1x1x1x32xf32>
    %253 = vector.shape_cast %252 : vector<1x1x1x32xf32> to vector<1x32xf32>
    %c1_233 = arith.constant 1 : index
    %c1_234 = arith.constant 1 : index
    %c0_235 = arith.constant 0 : index
    %c0_236 = arith.constant 0 : index
    %254 = vector.load %arg6[%c1_233, %c1_234, %c0_235, %c0_236] : memref<2x6x1x32xf32, #tpu.memory_space<vmem>>, vector<1x1x1x32xf32>
    %255 = vector.shape_cast %254 : vector<1x1x1x32xf32> to vector<1x32xf32>
    %c1_237 = arith.constant 1 : index
    %c2_238 = arith.constant 2 : index
    %c0_239 = arith.constant 0 : index
    %c0_240 = arith.constant 0 : index
    %256 = vector.load %arg6[%c1_237, %c2_238, %c0_239, %c0_240] : memref<2x6x1x32xf32, #tpu.memory_space<vmem>>, vector<1x1x1x32xf32>
    %257 = vector.shape_cast %256 : vector<1x1x1x32xf32> to vector<1x32xf32>
    %c1_241 = arith.constant 1 : index
    %c3_242 = arith.constant 3 : index
    %c0_243 = arith.constant 0 : index
    %c0_244 = arith.constant 0 : index
    %258 = vector.load %arg6[%c1_241, %c3_242, %c0_243, %c0_244] : memref<2x6x1x32xf32, #tpu.memory_space<vmem>>, vector<1x1x1x32xf32>
    %259 = vector.shape_cast %258 : vector<1x1x1x32xf32> to vector<1x32xf32>
    %c1_245 = arith.constant 1 : index
    %c4_246 = arith.constant 4 : index
    %c0_247 = arith.constant 0 : index
    %c0_248 = arith.constant 0 : index
    %260 = vector.load %arg6[%c1_245, %c4_246, %c0_247, %c0_248] : memref<2x6x1x32xf32, #tpu.memory_space<vmem>>, vector<1x1x1x32xf32>
    %261 = vector.shape_cast %260 : vector<1x1x1x32xf32> to vector<1x32xf32>
    %c1_249 = arith.constant 1 : index
    %c5_250 = arith.constant 5 : index
    %c0_251 = arith.constant 0 : index
    %c0_252 = arith.constant 0 : index
    %262 = vector.load %arg6[%c1_249, %c5_250, %c0_251, %c0_252] : memref<2x6x1x32xf32, #tpu.memory_space<vmem>>, vector<1x1x1x32xf32>
    %263 = vector.shape_cast %262 : vector<1x1x1x32xf32> to vector<1x32xf32>
    %cst_253 = arith.constant dense<0.000000e+00> : vector<16xf32>
    %264 = vector.multi_reduction <add>, %251, %cst_253 [1] : vector<16x32xf32> to vector<16xf32>
    %265 = vector.shape_cast %264 : vector<16xf32> to vector<16x1xf32>
    %cst_254 = arith.constant 3.200000e+01 : f32
    %266 = vector.broadcast %cst_254 : f32 to vector<16x1xf32>
    %267 = arith.divf %265, %266 : vector<16x1xf32>
    %268 = vector.broadcast %267 : vector<16x1xf32> to vector<16x32xf32>
    %269 = arith.subf %251, %268 : vector<16x32xf32>
    %270 = arith.mulf %269, %269 : vector<16x32xf32>
    %cst_255 = arith.constant dense<0.000000e+00> : vector<16xf32>
    %271 = vector.multi_reduction <add>, %270, %cst_255 [1] : vector<16x32xf32> to vector<16xf32>
    %272 = vector.shape_cast %271 : vector<16xf32> to vector<16x1xf32>
    %cst_256 = arith.constant 3.200000e+01 : f32
    %273 = vector.broadcast %cst_256 : f32 to vector<16x1xf32>
    %274 = arith.divf %272, %273 : vector<16x1xf32>
    %275 = vector.broadcast %267 : vector<16x1xf32> to vector<16x32xf32>
    %276 = arith.subf %251, %275 : vector<16x32xf32>
    %cst_257 = arith.constant 9.99999997E-7 : f32
    %277 = vector.broadcast %cst_257 : f32 to vector<16x1xf32>
    %278 = arith.addf %274, %277 : vector<16x1xf32>
    %279 = math.rsqrt %278 : vector<16x1xf32>
    %280 = vector.broadcast %279 : vector<16x1xf32> to vector<16x32xf32>
    %281 = arith.mulf %276, %280 : vector<16x32xf32>
    %282 = vector.broadcast %253 : vector<1x32xf32> to vector<16x32xf32>
    %283 = arith.mulf %281, %282 : vector<16x32xf32>
    %284 = vector.broadcast %255 : vector<1x32xf32> to vector<16x32xf32>
    %285 = arith.addf %283, %284 : vector<16x32xf32>
    %c1_258 = arith.constant 1 : index
    %c0_259 = arith.constant 0 : index
    %c0_260 = arith.constant 0 : index
    %c0_261 = arith.constant 0 : index
    %c0_262 = arith.constant 0 : index
    %286 = vector.load %arg3[%c1_258, %c0_259, %c0_260, %c0_261, %c0_262] : memref<2x3x4x32x8xf32, #tpu.memory_space<vmem>>, vector<1x1x1x32x8xf32>
    %287 = vector.shape_cast %286 : vector<1x1x1x32x8xf32> to vector<32x8xf32>
    %cst_263 = arith.constant dense<0.000000e+00> : vector<16x8xf32>
    %288 = tpu.matmul %285, %287, %cst_263 {dimension_numbers = #tpu.dot_dimension_numbers<[1], [0], [0], [1], [0, 0, 1, 1], [], []>} : vector<16x32xf32>, vector<32x8xf32>, vector<16x8xf32> -> vector<16x8xf32>
    %c1_264 = arith.constant 1 : index
    %c0_265 = arith.constant 0 : index
    %c0_266 = arith.constant 0 : index
    %c0_267 = arith.constant 0 : index
    %c0_268 = arith.constant 0 : index
    %289 = vector.load %arg4[%c1_264, %c0_265, %c0_266, %c0_267, %c0_268] : memref<2x3x4x1x8xf32, #tpu.memory_space<vmem>>, vector<1x1x1x1x8xf32>
    %290 = vector.shape_cast %289 : vector<1x1x1x1x8xf32> to vector<1x8xf32>
    %291 = vector.broadcast %290 : vector<1x8xf32> to vector<16x8xf32>
    %292 = arith.addf %288, %291 : vector<16x8xf32>
    %c1_269 = arith.constant 1 : index
    %c1_270 = arith.constant 1 : index
    %c0_271 = arith.constant 0 : index
    %c0_272 = arith.constant 0 : index
    %c0_273 = arith.constant 0 : index
    %293 = vector.load %arg3[%c1_269, %c1_270, %c0_271, %c0_272, %c0_273] : memref<2x3x4x32x8xf32, #tpu.memory_space<vmem>>, vector<1x1x1x32x8xf32>
    %294 = vector.shape_cast %293 : vector<1x1x1x32x8xf32> to vector<32x8xf32>
    %cst_274 = arith.constant dense<0.000000e+00> : vector<16x8xf32>
    %295 = tpu.matmul %285, %294, %cst_274 {dimension_numbers = #tpu.dot_dimension_numbers<[1], [0], [0], [1], [0, 0, 1, 1], [], []>} : vector<16x32xf32>, vector<32x8xf32>, vector<16x8xf32> -> vector<16x8xf32>
    %c1_275 = arith.constant 1 : index
    %c1_276 = arith.constant 1 : index
    %c0_277 = arith.constant 0 : index
    %c0_278 = arith.constant 0 : index
    %c0_279 = arith.constant 0 : index
    %296 = vector.load %arg4[%c1_275, %c1_276, %c0_277, %c0_278, %c0_279] : memref<2x3x4x1x8xf32, #tpu.memory_space<vmem>>, vector<1x1x1x1x8xf32>
    %297 = vector.shape_cast %296 : vector<1x1x1x1x8xf32> to vector<1x8xf32>
    %298 = vector.broadcast %297 : vector<1x8xf32> to vector<16x8xf32>
    %299 = arith.addf %295, %298 : vector<16x8xf32>
    %c1_280 = arith.constant 1 : index
    %c2_281 = arith.constant 2 : index
    %c0_282 = arith.constant 0 : index
    %c0_283 = arith.constant 0 : index
    %c0_284 = arith.constant 0 : index
    %300 = vector.load %arg3[%c1_280, %c2_281, %c0_282, %c0_283, %c0_284] : memref<2x3x4x32x8xf32, #tpu.memory_space<vmem>>, vector<1x1x1x32x8xf32>
    %301 = vector.shape_cast %300 : vector<1x1x1x32x8xf32> to vector<32x8xf32>
    %cst_285 = arith.constant dense<0.000000e+00> : vector<16x8xf32>
    %302 = tpu.matmul %285, %301, %cst_285 {dimension_numbers = #tpu.dot_dimension_numbers<[1], [0], [0], [1], [0, 0, 1, 1], [], []>} : vector<16x32xf32>, vector<32x8xf32>, vector<16x8xf32> -> vector<16x8xf32>
    %c1_286 = arith.constant 1 : index
    %c2_287 = arith.constant 2 : index
    %c0_288 = arith.constant 0 : index
    %c0_289 = arith.constant 0 : index
    %c0_290 = arith.constant 0 : index
    %303 = vector.load %arg4[%c1_286, %c2_287, %c0_288, %c0_289, %c0_290] : memref<2x3x4x1x8xf32, #tpu.memory_space<vmem>>, vector<1x1x1x1x8xf32>
    %304 = vector.shape_cast %303 : vector<1x1x1x1x8xf32> to vector<1x8xf32>
    %305 = vector.broadcast %304 : vector<1x8xf32> to vector<16x8xf32>
    %306 = arith.addf %302, %305 : vector<16x8xf32>
    %cst_291 = arith.constant dense<0.000000e+00> : vector<16x16xf32>
    %307 = tpu.matmul %292, %299, %cst_291 {dimension_numbers = #tpu.dot_dimension_numbers<[1], [1], [0], [0], [0, 0, 1, 0], [], []>} : vector<16x8xf32>, vector<16x8xf32>, vector<16x16xf32> -> vector<16x16xf32>
    %cst_292 = arith.constant 0.353553385 : f32
    %308 = vector.broadcast %cst_292 : f32 to vector<16x16xf32>
    %309 = arith.mulf %307, %308 : vector<16x16xf32>
    %cst_293 = arith.constant dense<0xFF800000> : vector<16xf32>
    %310 = vector.multi_reduction <maximumf>, %309, %cst_293 [1] : vector<16x16xf32> to vector<16xf32>
    %311 = vector.shape_cast %310 : vector<16xf32> to vector<16x1xf32>
    %312 = vector.broadcast %311 : vector<16x1xf32> to vector<16x16xf32>
    %313 = arith.subf %309, %312 : vector<16x16xf32>
    %314 = math.exp %313 : vector<16x16xf32>
    %cst_294 = arith.constant dense<0.000000e+00> : vector<16xf32>
    %315 = vector.multi_reduction <add>, %314, %cst_294 [1] : vector<16x16xf32> to vector<16xf32>
    %316 = vector.shape_cast %315 : vector<16xf32> to vector<16x1xf32>
    %317 = tpu.reciprocal %316 {approx = true} : vector<16x1xf32> -> vector<16x1xf32>
    %318 = vector.broadcast %317 : vector<16x1xf32> to vector<16x16xf32>
    %319 = arith.mulf %314, %318 : vector<16x16xf32>
    %cst_295 = arith.constant dense<0.000000e+00> : vector<16x8xf32>
    %320 = tpu.matmul %319, %306, %cst_295 {dimension_numbers = #tpu.dot_dimension_numbers<[1], [0], [0], [1], [0, 0, 1, 1], [], []>} : vector<16x16xf32>, vector<16x8xf32>, vector<16x8xf32> -> vector<16x8xf32>
    %c1_296 = arith.constant 1 : index
    %c0_297 = arith.constant 0 : index
    %c0_298 = arith.constant 0 : index
    %c0_299 = arith.constant 0 : index
    %321 = vector.load %arg5[%c1_296, %c0_297, %c0_298, %c0_299] : memref<2x4x8x32xf32, #tpu.memory_space<vmem>>, vector<1x1x8x32xf32>
    %322 = vector.shape_cast %321 : vector<1x1x8x32xf32> to vector<8x32xf32>
    %cst_300 = arith.constant dense<0.000000e+00> : vector<16x32xf32>
    %323 = tpu.matmul %320, %322, %cst_300 {dimension_numbers = #tpu.dot_dimension_numbers<[1], [0], [0], [1], [0, 0, 1, 1], [], []>} : vector<16x8xf32>, vector<8x32xf32>, vector<16x32xf32> -> vector<16x32xf32>
    %324 = vector.broadcast %257 : vector<1x32xf32> to vector<16x32xf32>
    %325 = arith.addf %324, %323 : vector<16x32xf32>
    %c1_301 = arith.constant 1 : index
    %c0_302 = arith.constant 0 : index
    %c1_303 = arith.constant 1 : index
    %c0_304 = arith.constant 0 : index
    %c0_305 = arith.constant 0 : index
    %326 = vector.load %arg3[%c1_301, %c0_302, %c1_303, %c0_304, %c0_305] : memref<2x3x4x32x8xf32, #tpu.memory_space<vmem>>, vector<1x1x1x32x8xf32>
    %327 = vector.shape_cast %326 : vector<1x1x1x32x8xf32> to vector<32x8xf32>
    %cst_306 = arith.constant dense<0.000000e+00> : vector<16x8xf32>
    %328 = tpu.matmul %285, %327, %cst_306 {dimension_numbers = #tpu.dot_dimension_numbers<[1], [0], [0], [1], [0, 0, 1, 1], [], []>} : vector<16x32xf32>, vector<32x8xf32>, vector<16x8xf32> -> vector<16x8xf32>
    %c1_307 = arith.constant 1 : index
    %c0_308 = arith.constant 0 : index
    %c1_309 = arith.constant 1 : index
    %c0_310 = arith.constant 0 : index
    %c0_311 = arith.constant 0 : index
    %329 = vector.load %arg4[%c1_307, %c0_308, %c1_309, %c0_310, %c0_311] : memref<2x3x4x1x8xf32, #tpu.memory_space<vmem>>, vector<1x1x1x1x8xf32>
    %330 = vector.shape_cast %329 : vector<1x1x1x1x8xf32> to vector<1x8xf32>
    %331 = vector.broadcast %330 : vector<1x8xf32> to vector<16x8xf32>
    %332 = arith.addf %328, %331 : vector<16x8xf32>
    %c1_312 = arith.constant 1 : index
    %c1_313 = arith.constant 1 : index
    %c1_314 = arith.constant 1 : index
    %c0_315 = arith.constant 0 : index
    %c0_316 = arith.constant 0 : index
    %333 = vector.load %arg3[%c1_312, %c1_313, %c1_314, %c0_315, %c0_316] : memref<2x3x4x32x8xf32, #tpu.memory_space<vmem>>, vector<1x1x1x32x8xf32>
    %334 = vector.shape_cast %333 : vector<1x1x1x32x8xf32> to vector<32x8xf32>
    %cst_317 = arith.constant dense<0.000000e+00> : vector<16x8xf32>
    %335 = tpu.matmul %285, %334, %cst_317 {dimension_numbers = #tpu.dot_dimension_numbers<[1], [0], [0], [1], [0, 0, 1, 1], [], []>} : vector<16x32xf32>, vector<32x8xf32>, vector<16x8xf32> -> vector<16x8xf32>
    %c1_318 = arith.constant 1 : index
    %c1_319 = arith.constant 1 : index
    %c1_320 = arith.constant 1 : index
    %c0_321 = arith.constant 0 : index
    %c0_322 = arith.constant 0 : index
    %336 = vector.load %arg4[%c1_318, %c1_319, %c1_320, %c0_321, %c0_322] : memref<2x3x4x1x8xf32, #tpu.memory_space<vmem>>, vector<1x1x1x1x8xf32>
    %337 = vector.shape_cast %336 : vector<1x1x1x1x8xf32> to vector<1x8xf32>
    %338 = vector.broadcast %337 : vector<1x8xf32> to vector<16x8xf32>
    %339 = arith.addf %335, %338 : vector<16x8xf32>
    %c1_323 = arith.constant 1 : index
    %c2_324 = arith.constant 2 : index
    %c1_325 = arith.constant 1 : index
    %c0_326 = arith.constant 0 : index
    %c0_327 = arith.constant 0 : index
    %340 = vector.load %arg3[%c1_323, %c2_324, %c1_325, %c0_326, %c0_327] : memref<2x3x4x32x8xf32, #tpu.memory_space<vmem>>, vector<1x1x1x32x8xf32>
    %341 = vector.shape_cast %340 : vector<1x1x1x32x8xf32> to vector<32x8xf32>
    %cst_328 = arith.constant dense<0.000000e+00> : vector<16x8xf32>
    %342 = tpu.matmul %285, %341, %cst_328 {dimension_numbers = #tpu.dot_dimension_numbers<[1], [0], [0], [1], [0, 0, 1, 1], [], []>} : vector<16x32xf32>, vector<32x8xf32>, vector<16x8xf32> -> vector<16x8xf32>
    %c1_329 = arith.constant 1 : index
    %c2_330 = arith.constant 2 : index
    %c1_331 = arith.constant 1 : index
    %c0_332 = arith.constant 0 : index
    %c0_333 = arith.constant 0 : index
    %343 = vector.load %arg4[%c1_329, %c2_330, %c1_331, %c0_332, %c0_333] : memref<2x3x4x1x8xf32, #tpu.memory_space<vmem>>, vector<1x1x1x1x8xf32>
    %344 = vector.shape_cast %343 : vector<1x1x1x1x8xf32> to vector<1x8xf32>
    %345 = vector.broadcast %344 : vector<1x8xf32> to vector<16x8xf32>
    %346 = arith.addf %342, %345 : vector<16x8xf32>
    %cst_334 = arith.constant dense<0.000000e+00> : vector<16x16xf32>
    %347 = tpu.matmul %332, %339, %cst_334 {dimension_numbers = #tpu.dot_dimension_numbers<[1], [1], [0], [0], [0, 0, 1, 0], [], []>} : vector<16x8xf32>, vector<16x8xf32>, vector<16x16xf32> -> vector<16x16xf32>
    %cst_335 = arith.constant 0.353553385 : f32
    %348 = vector.broadcast %cst_335 : f32 to vector<16x16xf32>
    %349 = arith.mulf %347, %348 : vector<16x16xf32>
    %cst_336 = arith.constant dense<0xFF800000> : vector<16xf32>
    %350 = vector.multi_reduction <maximumf>, %349, %cst_336 [1] : vector<16x16xf32> to vector<16xf32>
    %351 = vector.shape_cast %350 : vector<16xf32> to vector<16x1xf32>
    %352 = vector.broadcast %351 : vector<16x1xf32> to vector<16x16xf32>
    %353 = arith.subf %349, %352 : vector<16x16xf32>
    %354 = math.exp %353 : vector<16x16xf32>
    %cst_337 = arith.constant dense<0.000000e+00> : vector<16xf32>
    %355 = vector.multi_reduction <add>, %354, %cst_337 [1] : vector<16x16xf32> to vector<16xf32>
    %356 = vector.shape_cast %355 : vector<16xf32> to vector<16x1xf32>
    %357 = tpu.reciprocal %356 {approx = true} : vector<16x1xf32> -> vector<16x1xf32>
    %358 = vector.broadcast %357 : vector<16x1xf32> to vector<16x16xf32>
    %359 = arith.mulf %354, %358 : vector<16x16xf32>
    %cst_338 = arith.constant dense<0.000000e+00> : vector<16x8xf32>
    %360 = tpu.matmul %359, %346, %cst_338 {dimension_numbers = #tpu.dot_dimension_numbers<[1], [0], [0], [1], [0, 0, 1, 1], [], []>} : vector<16x16xf32>, vector<16x8xf32>, vector<16x8xf32> -> vector<16x8xf32>
    %c1_339 = arith.constant 1 : index
    %c1_340 = arith.constant 1 : index
    %c0_341 = arith.constant 0 : index
    %c0_342 = arith.constant 0 : index
    %361 = vector.load %arg5[%c1_339, %c1_340, %c0_341, %c0_342] : memref<2x4x8x32xf32, #tpu.memory_space<vmem>>, vector<1x1x8x32xf32>
    %362 = vector.shape_cast %361 : vector<1x1x8x32xf32> to vector<8x32xf32>
    %cst_343 = arith.constant dense<0.000000e+00> : vector<16x32xf32>
    %363 = tpu.matmul %360, %362, %cst_343 {dimension_numbers = #tpu.dot_dimension_numbers<[1], [0], [0], [1], [0, 0, 1, 1], [], []>} : vector<16x8xf32>, vector<8x32xf32>, vector<16x32xf32> -> vector<16x32xf32>
    %364 = arith.addf %325, %363 : vector<16x32xf32>
    %c1_344 = arith.constant 1 : index
    %c0_345 = arith.constant 0 : index
    %c2_346 = arith.constant 2 : index
    %c0_347 = arith.constant 0 : index
    %c0_348 = arith.constant 0 : index
    %365 = vector.load %arg3[%c1_344, %c0_345, %c2_346, %c0_347, %c0_348] : memref<2x3x4x32x8xf32, #tpu.memory_space<vmem>>, vector<1x1x1x32x8xf32>
    %366 = vector.shape_cast %365 : vector<1x1x1x32x8xf32> to vector<32x8xf32>
    %cst_349 = arith.constant dense<0.000000e+00> : vector<16x8xf32>
    %367 = tpu.matmul %285, %366, %cst_349 {dimension_numbers = #tpu.dot_dimension_numbers<[1], [0], [0], [1], [0, 0, 1, 1], [], []>} : vector<16x32xf32>, vector<32x8xf32>, vector<16x8xf32> -> vector<16x8xf32>
    %c1_350 = arith.constant 1 : index
    %c0_351 = arith.constant 0 : index
    %c2_352 = arith.constant 2 : index
    %c0_353 = arith.constant 0 : index
    %c0_354 = arith.constant 0 : index
    %368 = vector.load %arg4[%c1_350, %c0_351, %c2_352, %c0_353, %c0_354] : memref<2x3x4x1x8xf32, #tpu.memory_space<vmem>>, vector<1x1x1x1x8xf32>
    %369 = vector.shape_cast %368 : vector<1x1x1x1x8xf32> to vector<1x8xf32>
    %370 = vector.broadcast %369 : vector<1x8xf32> to vector<16x8xf32>
    %371 = arith.addf %367, %370 : vector<16x8xf32>
    %c1_355 = arith.constant 1 : index
    %c1_356 = arith.constant 1 : index
    %c2_357 = arith.constant 2 : index
    %c0_358 = arith.constant 0 : index
    %c0_359 = arith.constant 0 : index
    %372 = vector.load %arg3[%c1_355, %c1_356, %c2_357, %c0_358, %c0_359] : memref<2x3x4x32x8xf32, #tpu.memory_space<vmem>>, vector<1x1x1x32x8xf32>
    %373 = vector.shape_cast %372 : vector<1x1x1x32x8xf32> to vector<32x8xf32>
    %cst_360 = arith.constant dense<0.000000e+00> : vector<16x8xf32>
    %374 = tpu.matmul %285, %373, %cst_360 {dimension_numbers = #tpu.dot_dimension_numbers<[1], [0], [0], [1], [0, 0, 1, 1], [], []>} : vector<16x32xf32>, vector<32x8xf32>, vector<16x8xf32> -> vector<16x8xf32>
    %c1_361 = arith.constant 1 : index
    %c1_362 = arith.constant 1 : index
    %c2_363 = arith.constant 2 : index
    %c0_364 = arith.constant 0 : index
    %c0_365 = arith.constant 0 : index
    %375 = vector.load %arg4[%c1_361, %c1_362, %c2_363, %c0_364, %c0_365] : memref<2x3x4x1x8xf32, #tpu.memory_space<vmem>>, vector<1x1x1x1x8xf32>
    %376 = vector.shape_cast %375 : vector<1x1x1x1x8xf32> to vector<1x8xf32>
    %377 = vector.broadcast %376 : vector<1x8xf32> to vector<16x8xf32>
    %378 = arith.addf %374, %377 : vector<16x8xf32>
    %c1_366 = arith.constant 1 : index
    %c2_367 = arith.constant 2 : index
    %c2_368 = arith.constant 2 : index
    %c0_369 = arith.constant 0 : index
    %c0_370 = arith.constant 0 : index
    %379 = vector.load %arg3[%c1_366, %c2_367, %c2_368, %c0_369, %c0_370] : memref<2x3x4x32x8xf32, #tpu.memory_space<vmem>>, vector<1x1x1x32x8xf32>
    %380 = vector.shape_cast %379 : vector<1x1x1x32x8xf32> to vector<32x8xf32>
    %cst_371 = arith.constant dense<0.000000e+00> : vector<16x8xf32>
    %381 = tpu.matmul %285, %380, %cst_371 {dimension_numbers = #tpu.dot_dimension_numbers<[1], [0], [0], [1], [0, 0, 1, 1], [], []>} : vector<16x32xf32>, vector<32x8xf32>, vector<16x8xf32> -> vector<16x8xf32>
    %c1_372 = arith.constant 1 : index
    %c2_373 = arith.constant 2 : index
    %c2_374 = arith.constant 2 : index
    %c0_375 = arith.constant 0 : index
    %c0_376 = arith.constant 0 : index
    %382 = vector.load %arg4[%c1_372, %c2_373, %c2_374, %c0_375, %c0_376] : memref<2x3x4x1x8xf32, #tpu.memory_space<vmem>>, vector<1x1x1x1x8xf32>
    %383 = vector.shape_cast %382 : vector<1x1x1x1x8xf32> to vector<1x8xf32>
    %384 = vector.broadcast %383 : vector<1x8xf32> to vector<16x8xf32>
    %385 = arith.addf %381, %384 : vector<16x8xf32>
    %cst_377 = arith.constant dense<0.000000e+00> : vector<16x16xf32>
    %386 = tpu.matmul %371, %378, %cst_377 {dimension_numbers = #tpu.dot_dimension_numbers<[1], [1], [0], [0], [0, 0, 1, 0], [], []>} : vector<16x8xf32>, vector<16x8xf32>, vector<16x16xf32> -> vector<16x16xf32>
    %cst_378 = arith.constant 0.353553385 : f32
    %387 = vector.broadcast %cst_378 : f32 to vector<16x16xf32>
    %388 = arith.mulf %386, %387 : vector<16x16xf32>
    %cst_379 = arith.constant dense<0xFF800000> : vector<16xf32>
    %389 = vector.multi_reduction <maximumf>, %388, %cst_379 [1] : vector<16x16xf32> to vector<16xf32>
    %390 = vector.shape_cast %389 : vector<16xf32> to vector<16x1xf32>
    %391 = vector.broadcast %390 : vector<16x1xf32> to vector<16x16xf32>
    %392 = arith.subf %388, %391 : vector<16x16xf32>
    %393 = math.exp %392 : vector<16x16xf32>
    %cst_380 = arith.constant dense<0.000000e+00> : vector<16xf32>
    %394 = vector.multi_reduction <add>, %393, %cst_380 [1] : vector<16x16xf32> to vector<16xf32>
    %395 = vector.shape_cast %394 : vector<16xf32> to vector<16x1xf32>
    %396 = tpu.reciprocal %395 {approx = true} : vector<16x1xf32> -> vector<16x1xf32>
    %397 = vector.broadcast %396 : vector<16x1xf32> to vector<16x16xf32>
    %398 = arith.mulf %393, %397 : vector<16x16xf32>
    %cst_381 = arith.constant dense<0.000000e+00> : vector<16x8xf32>
    %399 = tpu.matmul %398, %385, %cst_381 {dimension_numbers = #tpu.dot_dimension_numbers<[1], [0], [0], [1], [0, 0, 1, 1], [], []>} : vector<16x16xf32>, vector<16x8xf32>, vector<16x8xf32> -> vector<16x8xf32>
    %c1_382 = arith.constant 1 : index
    %c2_383 = arith.constant 2 : index
    %c0_384 = arith.constant 0 : index
    %c0_385 = arith.constant 0 : index
    %400 = vector.load %arg5[%c1_382, %c2_383, %c0_384, %c0_385] : memref<2x4x8x32xf32, #tpu.memory_space<vmem>>, vector<1x1x8x32xf32>
    %401 = vector.shape_cast %400 : vector<1x1x8x32xf32> to vector<8x32xf32>
    %cst_386 = arith.constant dense<0.000000e+00> : vector<16x32xf32>
    %402 = tpu.matmul %399, %401, %cst_386 {dimension_numbers = #tpu.dot_dimension_numbers<[1], [0], [0], [1], [0, 0, 1, 1], [], []>} : vector<16x8xf32>, vector<8x32xf32>, vector<16x32xf32> -> vector<16x32xf32>
    %403 = arith.addf %364, %402 : vector<16x32xf32>
    %c1_387 = arith.constant 1 : index
    %c0_388 = arith.constant 0 : index
    %c3_389 = arith.constant 3 : index
    %c0_390 = arith.constant 0 : index
    %c0_391 = arith.constant 0 : index
    %404 = vector.load %arg3[%c1_387, %c0_388, %c3_389, %c0_390, %c0_391] : memref<2x3x4x32x8xf32, #tpu.memory_space<vmem>>, vector<1x1x1x32x8xf32>
    %405 = vector.shape_cast %404 : vector<1x1x1x32x8xf32> to vector<32x8xf32>
    %cst_392 = arith.constant dense<0.000000e+00> : vector<16x8xf32>
    %406 = tpu.matmul %285, %405, %cst_392 {dimension_numbers = #tpu.dot_dimension_numbers<[1], [0], [0], [1], [0, 0, 1, 1], [], []>} : vector<16x32xf32>, vector<32x8xf32>, vector<16x8xf32> -> vector<16x8xf32>
    %c1_393 = arith.constant 1 : index
    %c0_394 = arith.constant 0 : index
    %c3_395 = arith.constant 3 : index
    %c0_396 = arith.constant 0 : index
    %c0_397 = arith.constant 0 : index
    %407 = vector.load %arg4[%c1_393, %c0_394, %c3_395, %c0_396, %c0_397] : memref<2x3x4x1x8xf32, #tpu.memory_space<vmem>>, vector<1x1x1x1x8xf32>
    %408 = vector.shape_cast %407 : vector<1x1x1x1x8xf32> to vector<1x8xf32>
    %409 = vector.broadcast %408 : vector<1x8xf32> to vector<16x8xf32>
    %410 = arith.addf %406, %409 : vector<16x8xf32>
    %c1_398 = arith.constant 1 : index
    %c1_399 = arith.constant 1 : index
    %c3_400 = arith.constant 3 : index
    %c0_401 = arith.constant 0 : index
    %c0_402 = arith.constant 0 : index
    %411 = vector.load %arg3[%c1_398, %c1_399, %c3_400, %c0_401, %c0_402] : memref<2x3x4x32x8xf32, #tpu.memory_space<vmem>>, vector<1x1x1x32x8xf32>
    %412 = vector.shape_cast %411 : vector<1x1x1x32x8xf32> to vector<32x8xf32>
    %cst_403 = arith.constant dense<0.000000e+00> : vector<16x8xf32>
    %413 = tpu.matmul %285, %412, %cst_403 {dimension_numbers = #tpu.dot_dimension_numbers<[1], [0], [0], [1], [0, 0, 1, 1], [], []>} : vector<16x32xf32>, vector<32x8xf32>, vector<16x8xf32> -> vector<16x8xf32>
    %c1_404 = arith.constant 1 : index
    %c1_405 = arith.constant 1 : index
    %c3_406 = arith.constant 3 : index
    %c0_407 = arith.constant 0 : index
    %c0_408 = arith.constant 0 : index
    %414 = vector.load %arg4[%c1_404, %c1_405, %c3_406, %c0_407, %c0_408] : memref<2x3x4x1x8xf32, #tpu.memory_space<vmem>>, vector<1x1x1x1x8xf32>
    %415 = vector.shape_cast %414 : vector<1x1x1x1x8xf32> to vector<1x8xf32>
    %416 = vector.broadcast %415 : vector<1x8xf32> to vector<16x8xf32>
    %417 = arith.addf %413, %416 : vector<16x8xf32>
    %c1_409 = arith.constant 1 : index
    %c2_410 = arith.constant 2 : index
    %c3_411 = arith.constant 3 : index
    %c0_412 = arith.constant 0 : index
    %c0_413 = arith.constant 0 : index
    %418 = vector.load %arg3[%c1_409, %c2_410, %c3_411, %c0_412, %c0_413] : memref<2x3x4x32x8xf32, #tpu.memory_space<vmem>>, vector<1x1x1x32x8xf32>
    %419 = vector.shape_cast %418 : vector<1x1x1x32x8xf32> to vector<32x8xf32>
    %cst_414 = arith.constant dense<0.000000e+00> : vector<16x8xf32>
    %420 = tpu.matmul %285, %419, %cst_414 {dimension_numbers = #tpu.dot_dimension_numbers<[1], [0], [0], [1], [0, 0, 1, 1], [], []>} : vector<16x32xf32>, vector<32x8xf32>, vector<16x8xf32> -> vector<16x8xf32>
    %c1_415 = arith.constant 1 : index
    %c2_416 = arith.constant 2 : index
    %c3_417 = arith.constant 3 : index
    %c0_418 = arith.constant 0 : index
    %c0_419 = arith.constant 0 : index
    %421 = vector.load %arg4[%c1_415, %c2_416, %c3_417, %c0_418, %c0_419] : memref<2x3x4x1x8xf32, #tpu.memory_space<vmem>>, vector<1x1x1x1x8xf32>
    %422 = vector.shape_cast %421 : vector<1x1x1x1x8xf32> to vector<1x8xf32>
    %423 = vector.broadcast %422 : vector<1x8xf32> to vector<16x8xf32>
    %424 = arith.addf %420, %423 : vector<16x8xf32>
    %cst_420 = arith.constant dense<0.000000e+00> : vector<16x16xf32>
    %425 = tpu.matmul %410, %417, %cst_420 {dimension_numbers = #tpu.dot_dimension_numbers<[1], [1], [0], [0], [0, 0, 1, 0], [], []>} : vector<16x8xf32>, vector<16x8xf32>, vector<16x16xf32> -> vector<16x16xf32>
    %cst_421 = arith.constant 0.353553385 : f32
    %426 = vector.broadcast %cst_421 : f32 to vector<16x16xf32>
    %427 = arith.mulf %425, %426 : vector<16x16xf32>
    %cst_422 = arith.constant dense<0xFF800000> : vector<16xf32>
    %428 = vector.multi_reduction <maximumf>, %427, %cst_422 [1] : vector<16x16xf32> to vector<16xf32>
    %429 = vector.shape_cast %428 : vector<16xf32> to vector<16x1xf32>
    %430 = vector.broadcast %429 : vector<16x1xf32> to vector<16x16xf32>
    %431 = arith.subf %427, %430 : vector<16x16xf32>
    %432 = math.exp %431 : vector<16x16xf32>
    %cst_423 = arith.constant dense<0.000000e+00> : vector<16xf32>
    %433 = vector.multi_reduction <add>, %432, %cst_423 [1] : vector<16x16xf32> to vector<16xf32>
    %434 = vector.shape_cast %433 : vector<16xf32> to vector<16x1xf32>
    %435 = tpu.reciprocal %434 {approx = true} : vector<16x1xf32> -> vector<16x1xf32>
    %436 = vector.broadcast %435 : vector<16x1xf32> to vector<16x16xf32>
    %437 = arith.mulf %432, %436 : vector<16x16xf32>
    %cst_424 = arith.constant dense<0.000000e+00> : vector<16x8xf32>
    %438 = tpu.matmul %437, %424, %cst_424 {dimension_numbers = #tpu.dot_dimension_numbers<[1], [0], [0], [1], [0, 0, 1, 1], [], []>} : vector<16x16xf32>, vector<16x8xf32>, vector<16x8xf32> -> vector<16x8xf32>
    %c1_425 = arith.constant 1 : index
    %c3_426 = arith.constant 3 : index
    %c0_427 = arith.constant 0 : index
    %c0_428 = arith.constant 0 : index
    %439 = vector.load %arg5[%c1_425, %c3_426, %c0_427, %c0_428] : memref<2x4x8x32xf32, #tpu.memory_space<vmem>>, vector<1x1x8x32xf32>
    %440 = vector.shape_cast %439 : vector<1x1x8x32xf32> to vector<8x32xf32>
    %cst_429 = arith.constant dense<0.000000e+00> : vector<16x32xf32>
    %441 = tpu.matmul %438, %440, %cst_429 {dimension_numbers = #tpu.dot_dimension_numbers<[1], [0], [0], [1], [0, 0, 1, 1], [], []>} : vector<16x8xf32>, vector<8x32xf32>, vector<16x32xf32> -> vector<16x32xf32>
    %442 = arith.addf %403, %441 : vector<16x32xf32>
    %443 = arith.addf %251, %442 : vector<16x32xf32>
    %cst_430 = arith.constant dense<0.000000e+00> : vector<16xf32>
    %444 = vector.multi_reduction <add>, %443, %cst_430 [1] : vector<16x32xf32> to vector<16xf32>
    %445 = vector.shape_cast %444 : vector<16xf32> to vector<16x1xf32>
    %cst_431 = arith.constant 3.200000e+01 : f32
    %446 = vector.broadcast %cst_431 : f32 to vector<16x1xf32>
    %447 = arith.divf %445, %446 : vector<16x1xf32>
    %448 = vector.broadcast %447 : vector<16x1xf32> to vector<16x32xf32>
    %449 = arith.subf %443, %448 : vector<16x32xf32>
    %450 = arith.mulf %449, %449 : vector<16x32xf32>
    %cst_432 = arith.constant dense<0.000000e+00> : vector<16xf32>
    %451 = vector.multi_reduction <add>, %450, %cst_432 [1] : vector<16x32xf32> to vector<16xf32>
    %452 = vector.shape_cast %451 : vector<16xf32> to vector<16x1xf32>
    %cst_433 = arith.constant 3.200000e+01 : f32
    %453 = vector.broadcast %cst_433 : f32 to vector<16x1xf32>
    %454 = arith.divf %452, %453 : vector<16x1xf32>
    %455 = vector.broadcast %447 : vector<16x1xf32> to vector<16x32xf32>
    %456 = arith.subf %443, %455 : vector<16x32xf32>
    %cst_434 = arith.constant 9.99999997E-7 : f32
    %457 = vector.broadcast %cst_434 : f32 to vector<16x1xf32>
    %458 = arith.addf %454, %457 : vector<16x1xf32>
    %459 = math.rsqrt %458 : vector<16x1xf32>
    %460 = vector.broadcast %459 : vector<16x1xf32> to vector<16x32xf32>
    %461 = arith.mulf %456, %460 : vector<16x32xf32>
    %462 = vector.broadcast %259 : vector<1x32xf32> to vector<16x32xf32>
    %463 = arith.mulf %461, %462 : vector<16x32xf32>
    %464 = vector.broadcast %261 : vector<1x32xf32> to vector<16x32xf32>
    %465 = arith.addf %463, %464 : vector<16x32xf32>
    %c1_435 = arith.constant 1 : index
    %c0_436 = arith.constant 0 : index
    %c0_437 = arith.constant 0 : index
    %466 = vector.load %arg8[%c1_435, %c0_436, %c0_437] : memref<2x32x128xf32, #tpu.memory_space<vmem>>, vector<1x32x128xf32>
    %467 = vector.shape_cast %466 : vector<1x32x128xf32> to vector<32x128xf32>
    %cst_438 = arith.constant dense<0.000000e+00> : vector<16x128xf32>
    %468 = tpu.matmul %465, %467, %cst_438 {dimension_numbers = #tpu.dot_dimension_numbers<[1], [0], [0], [1], [0, 0, 1, 1], [], []>} : vector<16x32xf32>, vector<32x128xf32>, vector<16x128xf32> -> vector<16x128xf32>
    %c1_439 = arith.constant 1 : index
    %c0_440 = arith.constant 0 : index
    %c0_441 = arith.constant 0 : index
    %469 = vector.load %arg9[%c1_439, %c0_440, %c0_441] : memref<2x1x128xf32, #tpu.memory_space<vmem>>, vector<1x1x128xf32>
    %470 = vector.shape_cast %469 : vector<1x1x128xf32> to vector<1x128xf32>
    %471 = vector.broadcast %470 : vector<1x128xf32> to vector<16x128xf32>
    %472 = arith.addf %468, %471 : vector<16x128xf32>
    %473 = arith.mulf %472, %472 : vector<16x128xf32>
    %474 = arith.mulf %472, %473 : vector<16x128xf32>
    %cst_442 = arith.constant 4.471500e-02 : f32
    %475 = vector.broadcast %cst_442 : f32 to vector<16x128xf32>
    %476 = arith.mulf %475, %474 : vector<16x128xf32>
    %477 = arith.addf %472, %476 : vector<16x128xf32>
    %cst_443 = arith.constant 0.797884583 : f32
    %478 = vector.broadcast %cst_443 : f32 to vector<16x128xf32>
    %479 = arith.mulf %478, %477 : vector<16x128xf32>
    %480 = math.tanh %479 : vector<16x128xf32>
    %cst_444 = arith.constant 1.000000e+00 : f32
    %481 = vector.broadcast %cst_444 : f32 to vector<16x128xf32>
    %482 = arith.addf %481, %480 : vector<16x128xf32>
    %cst_445 = arith.constant 5.000000e-01 : f32
    %483 = vector.broadcast %cst_445 : f32 to vector<16x128xf32>
    %484 = arith.mulf %483, %482 : vector<16x128xf32>
    %485 = arith.mulf %472, %484 : vector<16x128xf32>
    %c1_446 = arith.constant 1 : index
    %c0_447 = arith.constant 0 : index
    %c0_448 = arith.constant 0 : index
    %486 = vector.load %arg10[%c1_446, %c0_447, %c0_448] : memref<2x128x32xf32, #tpu.memory_space<vmem>>, vector<1x128x32xf32>
    %487 = vector.shape_cast %486 : vector<1x128x32xf32> to vector<128x32xf32>
    %cst_449 = arith.constant dense<0.000000e+00> : vector<16x32xf32>
    %488 = tpu.matmul %485, %487, %cst_449 {dimension_numbers = #tpu.dot_dimension_numbers<[1], [0], [0], [1], [0, 0, 1, 1], [], []>} : vector<16x128xf32>, vector<128x32xf32>, vector<16x32xf32> -> vector<16x32xf32>
    %489 = arith.addf %443, %488 : vector<16x32xf32>
    %490 = vector.broadcast %263 : vector<1x32xf32> to vector<16x32xf32>
    %491 = arith.addf %489, %490 : vector<16x32xf32>
    %cst_450 = arith.constant dense<0.000000e+00> : vector<16xf32>
    %492 = vector.multi_reduction <add>, %491, %cst_450 [1] : vector<16x32xf32> to vector<16xf32>
    %493 = vector.shape_cast %492 : vector<16xf32> to vector<16x1xf32>
    %cst_451 = arith.constant 3.200000e+01 : f32
    %494 = vector.broadcast %cst_451 : f32 to vector<16x1xf32>
    %495 = arith.divf %493, %494 : vector<16x1xf32>
    %496 = vector.broadcast %495 : vector<16x1xf32> to vector<16x32xf32>
    %497 = arith.subf %491, %496 : vector<16x32xf32>
    %498 = arith.mulf %497, %497 : vector<16x32xf32>
    %cst_452 = arith.constant dense<0.000000e+00> : vector<16xf32>
    %499 = vector.multi_reduction <add>, %498, %cst_452 [1] : vector<16x32xf32> to vector<16xf32>
    %500 = vector.shape_cast %499 : vector<16xf32> to vector<16x1xf32>
    %cst_453 = arith.constant 3.200000e+01 : f32
    %501 = vector.broadcast %cst_453 : f32 to vector<16x1xf32>
    %502 = arith.divf %500, %501 : vector<16x1xf32>
    %503 = vector.broadcast %495 : vector<16x1xf32> to vector<16x32xf32>
    %504 = arith.subf %491, %503 : vector<16x32xf32>
    %cst_454 = arith.constant 9.99999997E-7 : f32
    %505 = vector.broadcast %cst_454 : f32 to vector<16x1xf32>
    %506 = arith.addf %502, %505 : vector<16x1xf32>
    %507 = math.rsqrt %506 : vector<16x1xf32>
    %508 = vector.broadcast %507 : vector<16x1xf32> to vector<16x32xf32>
    %509 = arith.mulf %504, %508 : vector<16x32xf32>
    %510 = vector.broadcast %3 : vector<1x32xf32> to vector<16x32xf32>
    %511 = arith.mulf %509, %510 : vector<16x32xf32>
    %512 = vector.broadcast %5 : vector<1x32xf32> to vector<16x32xf32>
    %513 = arith.addf %511, %512 : vector<16x32xf32>
    %cst_455 = arith.constant dense<0.000000e+00> : vector<32xf32>
    %514 = vector.multi_reduction <add>, %513, %cst_455 [0] : vector<16x32xf32> to vector<32xf32>
    %515 = vector.shape_cast %514 : vector<32xf32> to vector<1x32xf32>
    %cst_456 = arith.constant 1.600000e+01 : f32
    %516 = vector.broadcast %cst_456 : f32 to vector<1x32xf32>
    %517 = arith.divf %515, %516 : vector<1x32xf32>
    %c1_457 = arith.constant 1 : index
    %c0_458 = arith.constant 0 : index
    %c0_459 = arith.constant 0 : index
    %518 = vector.load %arg1[%c1_457, %c0_458, %c0_459] : memref<2x16x64xf32, #tpu.memory_space<vmem>>, vector<1x16x64xf32>
    %519 = vector.shape_cast %518 : vector<1x16x64xf32> to vector<16x64xf32>
    %c0_460 = arith.constant 0 : index
    %c0_461 = arith.constant 0 : index
    %520 = vector.load %arg2[%c0_460, %c0_461] : memref<64x32xf32, #tpu.memory_space<vmem>>, vector<64x32xf32>
    %cst_462 = arith.constant dense<0.000000e+00> : vector<16x32xf32>
    %521 = tpu.matmul %519, %520, %cst_462 {dimension_numbers = #tpu.dot_dimension_numbers<[1], [0], [0], [1], [0, 0, 1, 1], [], []>} : vector<16x64xf32>, vector<64x32xf32>, vector<16x32xf32> -> vector<16x32xf32>
    %522 = vector.broadcast %1 : vector<1x32xf32> to vector<16x32xf32>
    %523 = arith.addf %521, %522 : vector<16x32xf32>
    %c0_463 = arith.constant 0 : index
    %c0_464 = arith.constant 0 : index
    %c0_465 = arith.constant 0 : index
    %c0_466 = arith.constant 0 : index
    %524 = vector.load %arg6[%c0_463, %c0_464, %c0_465, %c0_466] : memref<2x6x1x32xf32, #tpu.memory_space<vmem>>, vector<1x1x1x32xf32>
    %525 = vector.shape_cast %524 : vector<1x1x1x32xf32> to vector<1x32xf32>
    %c0_467 = arith.constant 0 : index
    %c1_468 = arith.constant 1 : index
    %c0_469 = arith.constant 0 : index
    %c0_470 = arith.constant 0 : index
    %526 = vector.load %arg6[%c0_467, %c1_468, %c0_469, %c0_470] : memref<2x6x1x32xf32, #tpu.memory_space<vmem>>, vector<1x1x1x32xf32>
    %527 = vector.shape_cast %526 : vector<1x1x1x32xf32> to vector<1x32xf32>
    %c0_471 = arith.constant 0 : index
    %c2_472 = arith.constant 2 : index
    %c0_473 = arith.constant 0 : index
    %c0_474 = arith.constant 0 : index
    %528 = vector.load %arg6[%c0_471, %c2_472, %c0_473, %c0_474] : memref<2x6x1x32xf32, #tpu.memory_space<vmem>>, vector<1x1x1x32xf32>
    %529 = vector.shape_cast %528 : vector<1x1x1x32xf32> to vector<1x32xf32>
    %c0_475 = arith.constant 0 : index
    %c3_476 = arith.constant 3 : index
    %c0_477 = arith.constant 0 : index
    %c0_478 = arith.constant 0 : index
    %530 = vector.load %arg6[%c0_475, %c3_476, %c0_477, %c0_478] : memref<2x6x1x32xf32, #tpu.memory_space<vmem>>, vector<1x1x1x32xf32>
    %531 = vector.shape_cast %530 : vector<1x1x1x32xf32> to vector<1x32xf32>
    %c0_479 = arith.constant 0 : index
    %c4_480 = arith.constant 4 : index
    %c0_481 = arith.constant 0 : index
    %c0_482 = arith.constant 0 : index
    %532 = vector.load %arg6[%c0_479, %c4_480, %c0_481, %c0_482] : memref<2x6x1x32xf32, #tpu.memory_space<vmem>>, vector<1x1x1x32xf32>
    %533 = vector.shape_cast %532 : vector<1x1x1x32xf32> to vector<1x32xf32>
    %c0_483 = arith.constant 0 : index
    %c5_484 = arith.constant 5 : index
    %c0_485 = arith.constant 0 : index
    %c0_486 = arith.constant 0 : index
    %534 = vector.load %arg6[%c0_483, %c5_484, %c0_485, %c0_486] : memref<2x6x1x32xf32, #tpu.memory_space<vmem>>, vector<1x1x1x32xf32>
    %535 = vector.shape_cast %534 : vector<1x1x1x32xf32> to vector<1x32xf32>
    %cst_487 = arith.constant dense<0.000000e+00> : vector<16xf32>
    %536 = vector.multi_reduction <add>, %523, %cst_487 [1] : vector<16x32xf32> to vector<16xf32>
    %537 = vector.shape_cast %536 : vector<16xf32> to vector<16x1xf32>
    %cst_488 = arith.constant 3.200000e+01 : f32
    %538 = vector.broadcast %cst_488 : f32 to vector<16x1xf32>
    %539 = arith.divf %537, %538 : vector<16x1xf32>
    %540 = vector.broadcast %539 : vector<16x1xf32> to vector<16x32xf32>
    %541 = arith.subf %523, %540 : vector<16x32xf32>
    %542 = arith.mulf %541, %541 : vector<16x32xf32>
    %cst_489 = arith.constant dense<0.000000e+00> : vector<16xf32>
    %543 = vector.multi_reduction <add>, %542, %cst_489 [1] : vector<16x32xf32> to vector<16xf32>
    %544 = vector.shape_cast %543 : vector<16xf32> to vector<16x1xf32>
    %cst_490 = arith.constant 3.200000e+01 : f32
    %545 = vector.broadcast %cst_490 : f32 to vector<16x1xf32>
    %546 = arith.divf %544, %545 : vector<16x1xf32>
    %547 = vector.broadcast %539 : vector<16x1xf32> to vector<16x32xf32>
    %548 = arith.subf %523, %547 : vector<16x32xf32>
    %cst_491 = arith.constant 9.99999997E-7 : f32
    %549 = vector.broadcast %cst_491 : f32 to vector<16x1xf32>
    %550 = arith.addf %546, %549 : vector<16x1xf32>
    %551 = math.rsqrt %550 : vector<16x1xf32>
    %552 = vector.broadcast %551 : vector<16x1xf32> to vector<16x32xf32>
    %553 = arith.mulf %548, %552 : vector<16x32xf32>
    %554 = vector.broadcast %525 : vector<1x32xf32> to vector<16x32xf32>
    %555 = arith.mulf %553, %554 : vector<16x32xf32>
    %556 = vector.broadcast %527 : vector<1x32xf32> to vector<16x32xf32>
    %557 = arith.addf %555, %556 : vector<16x32xf32>
    %c0_492 = arith.constant 0 : index
    %c0_493 = arith.constant 0 : index
    %c0_494 = arith.constant 0 : index
    %c0_495 = arith.constant 0 : index
    %c0_496 = arith.constant 0 : index
    %558 = vector.load %arg3[%c0_492, %c0_493, %c0_494, %c0_495, %c0_496] : memref<2x3x4x32x8xf32, #tpu.memory_space<vmem>>, vector<1x1x1x32x8xf32>
    %559 = vector.shape_cast %558 : vector<1x1x1x32x8xf32> to vector<32x8xf32>
    %cst_497 = arith.constant dense<0.000000e+00> : vector<16x8xf32>
    %560 = tpu.matmul %557, %559, %cst_497 {dimension_numbers = #tpu.dot_dimension_numbers<[1], [0], [0], [1], [0, 0, 1, 1], [], []>} : vector<16x32xf32>, vector<32x8xf32>, vector<16x8xf32> -> vector<16x8xf32>
    %c0_498 = arith.constant 0 : index
    %c0_499 = arith.constant 0 : index
    %c0_500 = arith.constant 0 : index
    %c0_501 = arith.constant 0 : index
    %c0_502 = arith.constant 0 : index
    %561 = vector.load %arg4[%c0_498, %c0_499, %c0_500, %c0_501, %c0_502] : memref<2x3x4x1x8xf32, #tpu.memory_space<vmem>>, vector<1x1x1x1x8xf32>
    %562 = vector.shape_cast %561 : vector<1x1x1x1x8xf32> to vector<1x8xf32>
    %563 = vector.broadcast %562 : vector<1x8xf32> to vector<16x8xf32>
    %564 = arith.addf %560, %563 : vector<16x8xf32>
    %c0_503 = arith.constant 0 : index
    %c1_504 = arith.constant 1 : index
    %c0_505 = arith.constant 0 : index
    %c0_506 = arith.constant 0 : index
    %c0_507 = arith.constant 0 : index
    %565 = vector.load %arg3[%c0_503, %c1_504, %c0_505, %c0_506, %c0_507] : memref<2x3x4x32x8xf32, #tpu.memory_space<vmem>>, vector<1x1x1x32x8xf32>
    %566 = vector.shape_cast %565 : vector<1x1x1x32x8xf32> to vector<32x8xf32>
    %cst_508 = arith.constant dense<0.000000e+00> : vector<16x8xf32>
    %567 = tpu.matmul %557, %566, %cst_508 {dimension_numbers = #tpu.dot_dimension_numbers<[1], [0], [0], [1], [0, 0, 1, 1], [], []>} : vector<16x32xf32>, vector<32x8xf32>, vector<16x8xf32> -> vector<16x8xf32>
    %c0_509 = arith.constant 0 : index
    %c1_510 = arith.constant 1 : index
    %c0_511 = arith.constant 0 : index
    %c0_512 = arith.constant 0 : index
    %c0_513 = arith.constant 0 : index
    %568 = vector.load %arg4[%c0_509, %c1_510, %c0_511, %c0_512, %c0_513] : memref<2x3x4x1x8xf32, #tpu.memory_space<vmem>>, vector<1x1x1x1x8xf32>
    %569 = vector.shape_cast %568 : vector<1x1x1x1x8xf32> to vector<1x8xf32>
    %570 = vector.broadcast %569 : vector<1x8xf32> to vector<16x8xf32>
    %571 = arith.addf %567, %570 : vector<16x8xf32>
    %c0_514 = arith.constant 0 : index
    %c2_515 = arith.constant 2 : index
    %c0_516 = arith.constant 0 : index
    %c0_517 = arith.constant 0 : index
    %c0_518 = arith.constant 0 : index
    %572 = vector.load %arg3[%c0_514, %c2_515, %c0_516, %c0_517, %c0_518] : memref<2x3x4x32x8xf32, #tpu.memory_space<vmem>>, vector<1x1x1x32x8xf32>
    %573 = vector.shape_cast %572 : vector<1x1x1x32x8xf32> to vector<32x8xf32>
    %cst_519 = arith.constant dense<0.000000e+00> : vector<16x8xf32>
    %574 = tpu.matmul %557, %573, %cst_519 {dimension_numbers = #tpu.dot_dimension_numbers<[1], [0], [0], [1], [0, 0, 1, 1], [], []>} : vector<16x32xf32>, vector<32x8xf32>, vector<16x8xf32> -> vector<16x8xf32>
    %c0_520 = arith.constant 0 : index
    %c2_521 = arith.constant 2 : index
    %c0_522 = arith.constant 0 : index
    %c0_523 = arith.constant 0 : index
    %c0_524 = arith.constant 0 : index
    %575 = vector.load %arg4[%c0_520, %c2_521, %c0_522, %c0_523, %c0_524] : memref<2x3x4x1x8xf32, #tpu.memory_space<vmem>>, vector<1x1x1x1x8xf32>
    %576 = vector.shape_cast %575 : vector<1x1x1x1x8xf32> to vector<1x8xf32>
    %577 = vector.broadcast %576 : vector<1x8xf32> to vector<16x8xf32>
    %578 = arith.addf %574, %577 : vector<16x8xf32>
    %cst_525 = arith.constant dense<0.000000e+00> : vector<16x16xf32>
    %579 = tpu.matmul %564, %571, %cst_525 {dimension_numbers = #tpu.dot_dimension_numbers<[1], [1], [0], [0], [0, 0, 1, 0], [], []>} : vector<16x8xf32>, vector<16x8xf32>, vector<16x16xf32> -> vector<16x16xf32>
    %cst_526 = arith.constant 0.353553385 : f32
    %580 = vector.broadcast %cst_526 : f32 to vector<16x16xf32>
    %581 = arith.mulf %579, %580 : vector<16x16xf32>
    %cst_527 = arith.constant dense<0xFF800000> : vector<16xf32>
    %582 = vector.multi_reduction <maximumf>, %581, %cst_527 [1] : vector<16x16xf32> to vector<16xf32>
    %583 = vector.shape_cast %582 : vector<16xf32> to vector<16x1xf32>
    %584 = vector.broadcast %583 : vector<16x1xf32> to vector<16x16xf32>
    %585 = arith.subf %581, %584 : vector<16x16xf32>
    %586 = math.exp %585 : vector<16x16xf32>
    %cst_528 = arith.constant dense<0.000000e+00> : vector<16xf32>
    %587 = vector.multi_reduction <add>, %586, %cst_528 [1] : vector<16x16xf32> to vector<16xf32>
    %588 = vector.shape_cast %587 : vector<16xf32> to vector<16x1xf32>
    %589 = tpu.reciprocal %588 {approx = true} : vector<16x1xf32> -> vector<16x1xf32>
    %590 = vector.broadcast %589 : vector<16x1xf32> to vector<16x16xf32>
    %591 = arith.mulf %586, %590 : vector<16x16xf32>
    %cst_529 = arith.constant dense<0.000000e+00> : vector<16x8xf32>
    %592 = tpu.matmul %591, %578, %cst_529 {dimension_numbers = #tpu.dot_dimension_numbers<[1], [0], [0], [1], [0, 0, 1, 1], [], []>} : vector<16x16xf32>, vector<16x8xf32>, vector<16x8xf32> -> vector<16x8xf32>
    %c0_530 = arith.constant 0 : index
    %c0_531 = arith.constant 0 : index
    %c0_532 = arith.constant 0 : index
    %c0_533 = arith.constant 0 : index
    %593 = vector.load %arg5[%c0_530, %c0_531, %c0_532, %c0_533] : memref<2x4x8x32xf32, #tpu.memory_space<vmem>>, vector<1x1x8x32xf32>
    %594 = vector.shape_cast %593 : vector<1x1x8x32xf32> to vector<8x32xf32>
    %cst_534 = arith.constant dense<0.000000e+00> : vector<16x32xf32>
    %595 = tpu.matmul %592, %594, %cst_534 {dimension_numbers = #tpu.dot_dimension_numbers<[1], [0], [0], [1], [0, 0, 1, 1], [], []>} : vector<16x8xf32>, vector<8x32xf32>, vector<16x32xf32> -> vector<16x32xf32>
    %596 = vector.broadcast %529 : vector<1x32xf32> to vector<16x32xf32>
    %597 = arith.addf %596, %595 : vector<16x32xf32>
    %c0_535 = arith.constant 0 : index
    %c0_536 = arith.constant 0 : index
    %c1_537 = arith.constant 1 : index
    %c0_538 = arith.constant 0 : index
    %c0_539 = arith.constant 0 : index
    %598 = vector.load %arg3[%c0_535, %c0_536, %c1_537, %c0_538, %c0_539] : memref<2x3x4x32x8xf32, #tpu.memory_space<vmem>>, vector<1x1x1x32x8xf32>
    %599 = vector.shape_cast %598 : vector<1x1x1x32x8xf32> to vector<32x8xf32>
    %cst_540 = arith.constant dense<0.000000e+00> : vector<16x8xf32>
    %600 = tpu.matmul %557, %599, %cst_540 {dimension_numbers = #tpu.dot_dimension_numbers<[1], [0], [0], [1], [0, 0, 1, 1], [], []>} : vector<16x32xf32>, vector<32x8xf32>, vector<16x8xf32> -> vector<16x8xf32>
    %c0_541 = arith.constant 0 : index
    %c0_542 = arith.constant 0 : index
    %c1_543 = arith.constant 1 : index
    %c0_544 = arith.constant 0 : index
    %c0_545 = arith.constant 0 : index
    %601 = vector.load %arg4[%c0_541, %c0_542, %c1_543, %c0_544, %c0_545] : memref<2x3x4x1x8xf32, #tpu.memory_space<vmem>>, vector<1x1x1x1x8xf32>
    %602 = vector.shape_cast %601 : vector<1x1x1x1x8xf32> to vector<1x8xf32>
    %603 = vector.broadcast %602 : vector<1x8xf32> to vector<16x8xf32>
    %604 = arith.addf %600, %603 : vector<16x8xf32>
    %c0_546 = arith.constant 0 : index
    %c1_547 = arith.constant 1 : index
    %c1_548 = arith.constant 1 : index
    %c0_549 = arith.constant 0 : index
    %c0_550 = arith.constant 0 : index
    %605 = vector.load %arg3[%c0_546, %c1_547, %c1_548, %c0_549, %c0_550] : memref<2x3x4x32x8xf32, #tpu.memory_space<vmem>>, vector<1x1x1x32x8xf32>
    %606 = vector.shape_cast %605 : vector<1x1x1x32x8xf32> to vector<32x8xf32>
    %cst_551 = arith.constant dense<0.000000e+00> : vector<16x8xf32>
    %607 = tpu.matmul %557, %606, %cst_551 {dimension_numbers = #tpu.dot_dimension_numbers<[1], [0], [0], [1], [0, 0, 1, 1], [], []>} : vector<16x32xf32>, vector<32x8xf32>, vector<16x8xf32> -> vector<16x8xf32>
    %c0_552 = arith.constant 0 : index
    %c1_553 = arith.constant 1 : index
    %c1_554 = arith.constant 1 : index
    %c0_555 = arith.constant 0 : index
    %c0_556 = arith.constant 0 : index
    %608 = vector.load %arg4[%c0_552, %c1_553, %c1_554, %c0_555, %c0_556] : memref<2x3x4x1x8xf32, #tpu.memory_space<vmem>>, vector<1x1x1x1x8xf32>
    %609 = vector.shape_cast %608 : vector<1x1x1x1x8xf32> to vector<1x8xf32>
    %610 = vector.broadcast %609 : vector<1x8xf32> to vector<16x8xf32>
    %611 = arith.addf %607, %610 : vector<16x8xf32>
    %c0_557 = arith.constant 0 : index
    %c2_558 = arith.constant 2 : index
    %c1_559 = arith.constant 1 : index
    %c0_560 = arith.constant 0 : index
    %c0_561 = arith.constant 0 : index
    %612 = vector.load %arg3[%c0_557, %c2_558, %c1_559, %c0_560, %c0_561] : memref<2x3x4x32x8xf32, #tpu.memory_space<vmem>>, vector<1x1x1x32x8xf32>
    %613 = vector.shape_cast %612 : vector<1x1x1x32x8xf32> to vector<32x8xf32>
    %cst_562 = arith.constant dense<0.000000e+00> : vector<16x8xf32>
    %614 = tpu.matmul %557, %613, %cst_562 {dimension_numbers = #tpu.dot_dimension_numbers<[1], [0], [0], [1], [0, 0, 1, 1], [], []>} : vector<16x32xf32>, vector<32x8xf32>, vector<16x8xf32> -> vector<16x8xf32>
    %c0_563 = arith.constant 0 : index
    %c2_564 = arith.constant 2 : index
    %c1_565 = arith.constant 1 : index
    %c0_566 = arith.constant 0 : index
    %c0_567 = arith.constant 0 : index
    %615 = vector.load %arg4[%c0_563, %c2_564, %c1_565, %c0_566, %c0_567] : memref<2x3x4x1x8xf32, #tpu.memory_space<vmem>>, vector<1x1x1x1x8xf32>
    %616 = vector.shape_cast %615 : vector<1x1x1x1x8xf32> to vector<1x8xf32>
    %617 = vector.broadcast %616 : vector<1x8xf32> to vector<16x8xf32>
    %618 = arith.addf %614, %617 : vector<16x8xf32>
    %cst_568 = arith.constant dense<0.000000e+00> : vector<16x16xf32>
    %619 = tpu.matmul %604, %611, %cst_568 {dimension_numbers = #tpu.dot_dimension_numbers<[1], [1], [0], [0], [0, 0, 1, 0], [], []>} : vector<16x8xf32>, vector<16x8xf32>, vector<16x16xf32> -> vector<16x16xf32>
    %cst_569 = arith.constant 0.353553385 : f32
    %620 = vector.broadcast %cst_569 : f32 to vector<16x16xf32>
    %621 = arith.mulf %619, %620 : vector<16x16xf32>
    %cst_570 = arith.constant dense<0xFF800000> : vector<16xf32>
    %622 = vector.multi_reduction <maximumf>, %621, %cst_570 [1] : vector<16x16xf32> to vector<16xf32>
    %623 = vector.shape_cast %622 : vector<16xf32> to vector<16x1xf32>
    %624 = vector.broadcast %623 : vector<16x1xf32> to vector<16x16xf32>
    %625 = arith.subf %621, %624 : vector<16x16xf32>
    %626 = math.exp %625 : vector<16x16xf32>
    %cst_571 = arith.constant dense<0.000000e+00> : vector<16xf32>
    %627 = vector.multi_reduction <add>, %626, %cst_571 [1] : vector<16x16xf32> to vector<16xf32>
    %628 = vector.shape_cast %627 : vector<16xf32> to vector<16x1xf32>
    %629 = tpu.reciprocal %628 {approx = true} : vector<16x1xf32> -> vector<16x1xf32>
    %630 = vector.broadcast %629 : vector<16x1xf32> to vector<16x16xf32>
    %631 = arith.mulf %626, %630 : vector<16x16xf32>
    %cst_572 = arith.constant dense<0.000000e+00> : vector<16x8xf32>
    %632 = tpu.matmul %631, %618, %cst_572 {dimension_numbers = #tpu.dot_dimension_numbers<[1], [0], [0], [1], [0, 0, 1, 1], [], []>} : vector<16x16xf32>, vector<16x8xf32>, vector<16x8xf32> -> vector<16x8xf32>
    %c0_573 = arith.constant 0 : index
    %c1_574 = arith.constant 1 : index
    %c0_575 = arith.constant 0 : index
    %c0_576 = arith.constant 0 : index
    %633 = vector.load %arg5[%c0_573, %c1_574, %c0_575, %c0_576] : memref<2x4x8x32xf32, #tpu.memory_space<vmem>>, vector<1x1x8x32xf32>
    %634 = vector.shape_cast %633 : vector<1x1x8x32xf32> to vector<8x32xf32>
    %cst_577 = arith.constant dense<0.000000e+00> : vector<16x32xf32>
    %635 = tpu.matmul %632, %634, %cst_577 {dimension_numbers = #tpu.dot_dimension_numbers<[1], [0], [0], [1], [0, 0, 1, 1], [], []>} : vector<16x8xf32>, vector<8x32xf32>, vector<16x32xf32> -> vector<16x32xf32>
    %636 = arith.addf %597, %635 : vector<16x32xf32>
    %c0_578 = arith.constant 0 : index
    %c0_579 = arith.constant 0 : index
    %c2_580 = arith.constant 2 : index
    %c0_581 = arith.constant 0 : index
    %c0_582 = arith.constant 0 : index
    %637 = vector.load %arg3[%c0_578, %c0_579, %c2_580, %c0_581, %c0_582] : memref<2x3x4x32x8xf32, #tpu.memory_space<vmem>>, vector<1x1x1x32x8xf32>
    %638 = vector.shape_cast %637 : vector<1x1x1x32x8xf32> to vector<32x8xf32>
    %cst_583 = arith.constant dense<0.000000e+00> : vector<16x8xf32>
    %639 = tpu.matmul %557, %638, %cst_583 {dimension_numbers = #tpu.dot_dimension_numbers<[1], [0], [0], [1], [0, 0, 1, 1], [], []>} : vector<16x32xf32>, vector<32x8xf32>, vector<16x8xf32> -> vector<16x8xf32>
    %c0_584 = arith.constant 0 : index
    %c0_585 = arith.constant 0 : index
    %c2_586 = arith.constant 2 : index
    %c0_587 = arith.constant 0 : index
    %c0_588 = arith.constant 0 : index
    %640 = vector.load %arg4[%c0_584, %c0_585, %c2_586, %c0_587, %c0_588] : memref<2x3x4x1x8xf32, #tpu.memory_space<vmem>>, vector<1x1x1x1x8xf32>
    %641 = vector.shape_cast %640 : vector<1x1x1x1x8xf32> to vector<1x8xf32>
    %642 = vector.broadcast %641 : vector<1x8xf32> to vector<16x8xf32>
    %643 = arith.addf %639, %642 : vector<16x8xf32>
    %c0_589 = arith.constant 0 : index
    %c1_590 = arith.constant 1 : index
    %c2_591 = arith.constant 2 : index
    %c0_592 = arith.constant 0 : index
    %c0_593 = arith.constant 0 : index
    %644 = vector.load %arg3[%c0_589, %c1_590, %c2_591, %c0_592, %c0_593] : memref<2x3x4x32x8xf32, #tpu.memory_space<vmem>>, vector<1x1x1x32x8xf32>
    %645 = vector.shape_cast %644 : vector<1x1x1x32x8xf32> to vector<32x8xf32>
    %cst_594 = arith.constant dense<0.000000e+00> : vector<16x8xf32>
    %646 = tpu.matmul %557, %645, %cst_594 {dimension_numbers = #tpu.dot_dimension_numbers<[1], [0], [0], [1], [0, 0, 1, 1], [], []>} : vector<16x32xf32>, vector<32x8xf32>, vector<16x8xf32> -> vector<16x8xf32>
    %c0_595 = arith.constant 0 : index
    %c1_596 = arith.constant 1 : index
    %c2_597 = arith.constant 2 : index
    %c0_598 = arith.constant 0 : index
    %c0_599 = arith.constant 0 : index
    %647 = vector.load %arg4[%c0_595, %c1_596, %c2_597, %c0_598, %c0_599] : memref<2x3x4x1x8xf32, #tpu.memory_space<vmem>>, vector<1x1x1x1x8xf32>
    %648 = vector.shape_cast %647 : vector<1x1x1x1x8xf32> to vector<1x8xf32>
    %649 = vector.broadcast %648 : vector<1x8xf32> to vector<16x8xf32>
    %650 = arith.addf %646, %649 : vector<16x8xf32>
    %c0_600 = arith.constant 0 : index
    %c2_601 = arith.constant 2 : index
    %c2_602 = arith.constant 2 : index
    %c0_603 = arith.constant 0 : index
    %c0_604 = arith.constant 0 : index
    %651 = vector.load %arg3[%c0_600, %c2_601, %c2_602, %c0_603, %c0_604] : memref<2x3x4x32x8xf32, #tpu.memory_space<vmem>>, vector<1x1x1x32x8xf32>
    %652 = vector.shape_cast %651 : vector<1x1x1x32x8xf32> to vector<32x8xf32>
    %cst_605 = arith.constant dense<0.000000e+00> : vector<16x8xf32>
    %653 = tpu.matmul %557, %652, %cst_605 {dimension_numbers = #tpu.dot_dimension_numbers<[1], [0], [0], [1], [0, 0, 1, 1], [], []>} : vector<16x32xf32>, vector<32x8xf32>, vector<16x8xf32> -> vector<16x8xf32>
    %c0_606 = arith.constant 0 : index
    %c2_607 = arith.constant 2 : index
    %c2_608 = arith.constant 2 : index
    %c0_609 = arith.constant 0 : index
    %c0_610 = arith.constant 0 : index
    %654 = vector.load %arg4[%c0_606, %c2_607, %c2_608, %c0_609, %c0_610] : memref<2x3x4x1x8xf32, #tpu.memory_space<vmem>>, vector<1x1x1x1x8xf32>
    %655 = vector.shape_cast %654 : vector<1x1x1x1x8xf32> to vector<1x8xf32>
    %656 = vector.broadcast %655 : vector<1x8xf32> to vector<16x8xf32>
    %657 = arith.addf %653, %656 : vector<16x8xf32>
    %cst_611 = arith.constant dense<0.000000e+00> : vector<16x16xf32>
    %658 = tpu.matmul %643, %650, %cst_611 {dimension_numbers = #tpu.dot_dimension_numbers<[1], [1], [0], [0], [0, 0, 1, 0], [], []>} : vector<16x8xf32>, vector<16x8xf32>, vector<16x16xf32> -> vector<16x16xf32>
    %cst_612 = arith.constant 0.353553385 : f32
    %659 = vector.broadcast %cst_612 : f32 to vector<16x16xf32>
    %660 = arith.mulf %658, %659 : vector<16x16xf32>
    %cst_613 = arith.constant dense<0xFF800000> : vector<16xf32>
    %661 = vector.multi_reduction <maximumf>, %660, %cst_613 [1] : vector<16x16xf32> to vector<16xf32>
    %662 = vector.shape_cast %661 : vector<16xf32> to vector<16x1xf32>
    %663 = vector.broadcast %662 : vector<16x1xf32> to vector<16x16xf32>
    %664 = arith.subf %660, %663 : vector<16x16xf32>
    %665 = math.exp %664 : vector<16x16xf32>
    %cst_614 = arith.constant dense<0.000000e+00> : vector<16xf32>
    %666 = vector.multi_reduction <add>, %665, %cst_614 [1] : vector<16x16xf32> to vector<16xf32>
    %667 = vector.shape_cast %666 : vector<16xf32> to vector<16x1xf32>
    %668 = tpu.reciprocal %667 {approx = true} : vector<16x1xf32> -> vector<16x1xf32>
    %669 = vector.broadcast %668 : vector<16x1xf32> to vector<16x16xf32>
    %670 = arith.mulf %665, %669 : vector<16x16xf32>
    %cst_615 = arith.constant dense<0.000000e+00> : vector<16x8xf32>
    %671 = tpu.matmul %670, %657, %cst_615 {dimension_numbers = #tpu.dot_dimension_numbers<[1], [0], [0], [1], [0, 0, 1, 1], [], []>} : vector<16x16xf32>, vector<16x8xf32>, vector<16x8xf32> -> vector<16x8xf32>
    %c0_616 = arith.constant 0 : index
    %c2_617 = arith.constant 2 : index
    %c0_618 = arith.constant 0 : index
    %c0_619 = arith.constant 0 : index
    %672 = vector.load %arg5[%c0_616, %c2_617, %c0_618, %c0_619] : memref<2x4x8x32xf32, #tpu.memory_space<vmem>>, vector<1x1x8x32xf32>
    %673 = vector.shape_cast %672 : vector<1x1x8x32xf32> to vector<8x32xf32>
    %cst_620 = arith.constant dense<0.000000e+00> : vector<16x32xf32>
    %674 = tpu.matmul %671, %673, %cst_620 {dimension_numbers = #tpu.dot_dimension_numbers<[1], [0], [0], [1], [0, 0, 1, 1], [], []>} : vector<16x8xf32>, vector<8x32xf32>, vector<16x32xf32> -> vector<16x32xf32>
    %675 = arith.addf %636, %674 : vector<16x32xf32>
    %c0_621 = arith.constant 0 : index
    %c0_622 = arith.constant 0 : index
    %c3_623 = arith.constant 3 : index
    %c0_624 = arith.constant 0 : index
    %c0_625 = arith.constant 0 : index
    %676 = vector.load %arg3[%c0_621, %c0_622, %c3_623, %c0_624, %c0_625] : memref<2x3x4x32x8xf32, #tpu.memory_space<vmem>>, vector<1x1x1x32x8xf32>
    %677 = vector.shape_cast %676 : vector<1x1x1x32x8xf32> to vector<32x8xf32>
    %cst_626 = arith.constant dense<0.000000e+00> : vector<16x8xf32>
    %678 = tpu.matmul %557, %677, %cst_626 {dimension_numbers = #tpu.dot_dimension_numbers<[1], [0], [0], [1], [0, 0, 1, 1], [], []>} : vector<16x32xf32>, vector<32x8xf32>, vector<16x8xf32> -> vector<16x8xf32>
    %c0_627 = arith.constant 0 : index
    %c0_628 = arith.constant 0 : index
    %c3_629 = arith.constant 3 : index
    %c0_630 = arith.constant 0 : index
    %c0_631 = arith.constant 0 : index
    %679 = vector.load %arg4[%c0_627, %c0_628, %c3_629, %c0_630, %c0_631] : memref<2x3x4x1x8xf32, #tpu.memory_space<vmem>>, vector<1x1x1x1x8xf32>
    %680 = vector.shape_cast %679 : vector<1x1x1x1x8xf32> to vector<1x8xf32>
    %681 = vector.broadcast %680 : vector<1x8xf32> to vector<16x8xf32>
    %682 = arith.addf %678, %681 : vector<16x8xf32>
    %c0_632 = arith.constant 0 : index
    %c1_633 = arith.constant 1 : index
    %c3_634 = arith.constant 3 : index
    %c0_635 = arith.constant 0 : index
    %c0_636 = arith.constant 0 : index
    %683 = vector.load %arg3[%c0_632, %c1_633, %c3_634, %c0_635, %c0_636] : memref<2x3x4x32x8xf32, #tpu.memory_space<vmem>>, vector<1x1x1x32x8xf32>
    %684 = vector.shape_cast %683 : vector<1x1x1x32x8xf32> to vector<32x8xf32>
    %cst_637 = arith.constant dense<0.000000e+00> : vector<16x8xf32>
    %685 = tpu.matmul %557, %684, %cst_637 {dimension_numbers = #tpu.dot_dimension_numbers<[1], [0], [0], [1], [0, 0, 1, 1], [], []>} : vector<16x32xf32>, vector<32x8xf32>, vector<16x8xf32> -> vector<16x8xf32>
    %c0_638 = arith.constant 0 : index
    %c1_639 = arith.constant 1 : index
    %c3_640 = arith.constant 3 : index
    %c0_641 = arith.constant 0 : index
    %c0_642 = arith.constant 0 : index
    %686 = vector.load %arg4[%c0_638, %c1_639, %c3_640, %c0_641, %c0_642] : memref<2x3x4x1x8xf32, #tpu.memory_space<vmem>>, vector<1x1x1x1x8xf32>
    %687 = vector.shape_cast %686 : vector<1x1x1x1x8xf32> to vector<1x8xf32>
    %688 = vector.broadcast %687 : vector<1x8xf32> to vector<16x8xf32>
    %689 = arith.addf %685, %688 : vector<16x8xf32>
    %c0_643 = arith.constant 0 : index
    %c2_644 = arith.constant 2 : index
    %c3_645 = arith.constant 3 : index
    %c0_646 = arith.constant 0 : index
    %c0_647 = arith.constant 0 : index
    %690 = vector.load %arg3[%c0_643, %c2_644, %c3_645, %c0_646, %c0_647] : memref<2x3x4x32x8xf32, #tpu.memory_space<vmem>>, vector<1x1x1x32x8xf32>
    %691 = vector.shape_cast %690 : vector<1x1x1x32x8xf32> to vector<32x8xf32>
    %cst_648 = arith.constant dense<0.000000e+00> : vector<16x8xf32>
    %692 = tpu.matmul %557, %691, %cst_648 {dimension_numbers = #tpu.dot_dimension_numbers<[1], [0], [0], [1], [0, 0, 1, 1], [], []>} : vector<16x32xf32>, vector<32x8xf32>, vector<16x8xf32> -> vector<16x8xf32>
    %c0_649 = arith.constant 0 : index
    %c2_650 = arith.constant 2 : index
    %c3_651 = arith.constant 3 : index
    %c0_652 = arith.constant 0 : index
    %c0_653 = arith.constant 0 : index
    %693 = vector.load %arg4[%c0_649, %c2_650, %c3_651, %c0_652, %c0_653] : memref<2x3x4x1x8xf32, #tpu.memory_space<vmem>>, vector<1x1x1x1x8xf32>
    %694 = vector.shape_cast %693 : vector<1x1x1x1x8xf32> to vector<1x8xf32>
    %695 = vector.broadcast %694 : vector<1x8xf32> to vector<16x8xf32>
    %696 = arith.addf %692, %695 : vector<16x8xf32>
    %cst_654 = arith.constant dense<0.000000e+00> : vector<16x16xf32>
    %697 = tpu.matmul %682, %689, %cst_654 {dimension_numbers = #tpu.dot_dimension_numbers<[1], [1], [0], [0], [0, 0, 1, 0], [], []>} : vector<16x8xf32>, vector<16x8xf32>, vector<16x16xf32> -> vector<16x16xf32>
    %cst_655 = arith.constant 0.353553385 : f32
    %698 = vector.broadcast %cst_655 : f32 to vector<16x16xf32>
    %699 = arith.mulf %697, %698 : vector<16x16xf32>
    %cst_656 = arith.constant dense<0xFF800000> : vector<16xf32>
    %700 = vector.multi_reduction <maximumf>, %699, %cst_656 [1] : vector<16x16xf32> to vector<16xf32>
    %701 = vector.shape_cast %700 : vector<16xf32> to vector<16x1xf32>
    %702 = vector.broadcast %701 : vector<16x1xf32> to vector<16x16xf32>
    %703 = arith.subf %699, %702 : vector<16x16xf32>
    %704 = math.exp %703 : vector<16x16xf32>
    %cst_657 = arith.constant dense<0.000000e+00> : vector<16xf32>
    %705 = vector.multi_reduction <add>, %704, %cst_657 [1] : vector<16x16xf32> to vector<16xf32>
    %706 = vector.shape_cast %705 : vector<16xf32> to vector<16x1xf32>
    %707 = tpu.reciprocal %706 {approx = true} : vector<16x1xf32> -> vector<16x1xf32>
    %708 = vector.broadcast %707 : vector<16x1xf32> to vector<16x16xf32>
    %709 = arith.mulf %704, %708 : vector<16x16xf32>
    %cst_658 = arith.constant dense<0.000000e+00> : vector<16x8xf32>
    %710 = tpu.matmul %709, %696, %cst_658 {dimension_numbers = #tpu.dot_dimension_numbers<[1], [0], [0], [1], [0, 0, 1, 1], [], []>} : vector<16x16xf32>, vector<16x8xf32>, vector<16x8xf32> -> vector<16x8xf32>
    %c0_659 = arith.constant 0 : index
    %c3_660 = arith.constant 3 : index
    %c0_661 = arith.constant 0 : index
    %c0_662 = arith.constant 0 : index
    %711 = vector.load %arg5[%c0_659, %c3_660, %c0_661, %c0_662] : memref<2x4x8x32xf32, #tpu.memory_space<vmem>>, vector<1x1x8x32xf32>
    %712 = vector.shape_cast %711 : vector<1x1x8x32xf32> to vector<8x32xf32>
    %cst_663 = arith.constant dense<0.000000e+00> : vector<16x32xf32>
    %713 = tpu.matmul %710, %712, %cst_663 {dimension_numbers = #tpu.dot_dimension_numbers<[1], [0], [0], [1], [0, 0, 1, 1], [], []>} : vector<16x8xf32>, vector<8x32xf32>, vector<16x32xf32> -> vector<16x32xf32>
    %714 = arith.addf %675, %713 : vector<16x32xf32>
    %715 = arith.addf %523, %714 : vector<16x32xf32>
    %cst_664 = arith.constant dense<0.000000e+00> : vector<16xf32>
    %716 = vector.multi_reduction <add>, %715, %cst_664 [1] : vector<16x32xf32> to vector<16xf32>
    %717 = vector.shape_cast %716 : vector<16xf32> to vector<16x1xf32>
    %cst_665 = arith.constant 3.200000e+01 : f32
    %718 = vector.broadcast %cst_665 : f32 to vector<16x1xf32>
    %719 = arith.divf %717, %718 : vector<16x1xf32>
    %720 = vector.broadcast %719 : vector<16x1xf32> to vector<16x32xf32>
    %721 = arith.subf %715, %720 : vector<16x32xf32>
    %722 = arith.mulf %721, %721 : vector<16x32xf32>
    %cst_666 = arith.constant dense<0.000000e+00> : vector<16xf32>
    %723 = vector.multi_reduction <add>, %722, %cst_666 [1] : vector<16x32xf32> to vector<16xf32>
    %724 = vector.shape_cast %723 : vector<16xf32> to vector<16x1xf32>
    %cst_667 = arith.constant 3.200000e+01 : f32
    %725 = vector.broadcast %cst_667 : f32 to vector<16x1xf32>
    %726 = arith.divf %724, %725 : vector<16x1xf32>
    %727 = vector.broadcast %719 : vector<16x1xf32> to vector<16x32xf32>
    %728 = arith.subf %715, %727 : vector<16x32xf32>
    %cst_668 = arith.constant 9.99999997E-7 : f32
    %729 = vector.broadcast %cst_668 : f32 to vector<16x1xf32>
    %730 = arith.addf %726, %729 : vector<16x1xf32>
    %731 = math.rsqrt %730 : vector<16x1xf32>
    %732 = vector.broadcast %731 : vector<16x1xf32> to vector<16x32xf32>
    %733 = arith.mulf %728, %732 : vector<16x32xf32>
    %734 = vector.broadcast %531 : vector<1x32xf32> to vector<16x32xf32>
    %735 = arith.mulf %733, %734 : vector<16x32xf32>
    %736 = vector.broadcast %533 : vector<1x32xf32> to vector<16x32xf32>
    %737 = arith.addf %735, %736 : vector<16x32xf32>
    %c0_669 = arith.constant 0 : index
    %c0_670 = arith.constant 0 : index
    %c0_671 = arith.constant 0 : index
    %738 = vector.load %arg8[%c0_669, %c0_670, %c0_671] : memref<2x32x128xf32, #tpu.memory_space<vmem>>, vector<1x32x128xf32>
    %739 = vector.shape_cast %738 : vector<1x32x128xf32> to vector<32x128xf32>
    %cst_672 = arith.constant dense<0.000000e+00> : vector<16x128xf32>
    %740 = tpu.matmul %737, %739, %cst_672 {dimension_numbers = #tpu.dot_dimension_numbers<[1], [0], [0], [1], [0, 0, 1, 1], [], []>} : vector<16x32xf32>, vector<32x128xf32>, vector<16x128xf32> -> vector<16x128xf32>
    %c0_673 = arith.constant 0 : index
    %c0_674 = arith.constant 0 : index
    %c0_675 = arith.constant 0 : index
    %741 = vector.load %arg9[%c0_673, %c0_674, %c0_675] : memref<2x1x128xf32, #tpu.memory_space<vmem>>, vector<1x1x128xf32>
    %742 = vector.shape_cast %741 : vector<1x1x128xf32> to vector<1x128xf32>
    %743 = vector.broadcast %742 : vector<1x128xf32> to vector<16x128xf32>
    %744 = arith.addf %740, %743 : vector<16x128xf32>
    %745 = arith.mulf %744, %744 : vector<16x128xf32>
    %746 = arith.mulf %744, %745 : vector<16x128xf32>
    %cst_676 = arith.constant 4.471500e-02 : f32
    %747 = vector.broadcast %cst_676 : f32 to vector<16x128xf32>
    %748 = arith.mulf %747, %746 : vector<16x128xf32>
    %749 = arith.addf %744, %748 : vector<16x128xf32>
    %cst_677 = arith.constant 0.797884583 : f32
    %750 = vector.broadcast %cst_677 : f32 to vector<16x128xf32>
    %751 = arith.mulf %750, %749 : vector<16x128xf32>
    %752 = math.tanh %751 : vector<16x128xf32>
    %cst_678 = arith.constant 1.000000e+00 : f32
    %753 = vector.broadcast %cst_678 : f32 to vector<16x128xf32>
    %754 = arith.addf %753, %752 : vector<16x128xf32>
    %cst_679 = arith.constant 5.000000e-01 : f32
    %755 = vector.broadcast %cst_679 : f32 to vector<16x128xf32>
    %756 = arith.mulf %755, %754 : vector<16x128xf32>
    %757 = arith.mulf %744, %756 : vector<16x128xf32>
    %c0_680 = arith.constant 0 : index
    %c0_681 = arith.constant 0 : index
    %c0_682 = arith.constant 0 : index
    %758 = vector.load %arg10[%c0_680, %c0_681, %c0_682] : memref<2x128x32xf32, #tpu.memory_space<vmem>>, vector<1x128x32xf32>
    %759 = vector.shape_cast %758 : vector<1x128x32xf32> to vector<128x32xf32>
    %cst_683 = arith.constant dense<0.000000e+00> : vector<16x32xf32>
    %760 = tpu.matmul %757, %759, %cst_683 {dimension_numbers = #tpu.dot_dimension_numbers<[1], [0], [0], [1], [0, 0, 1, 1], [], []>} : vector<16x128xf32>, vector<128x32xf32>, vector<16x32xf32> -> vector<16x32xf32>
    %761 = arith.addf %715, %760 : vector<16x32xf32>
    %762 = vector.broadcast %535 : vector<1x32xf32> to vector<16x32xf32>
    %763 = arith.addf %761, %762 : vector<16x32xf32>
    %c1_684 = arith.constant 1 : index
    %c0_685 = arith.constant 0 : index
    %c0_686 = arith.constant 0 : index
    %c0_687 = arith.constant 0 : index
    %764 = vector.load %arg6[%c1_684, %c0_685, %c0_686, %c0_687] : memref<2x6x1x32xf32, #tpu.memory_space<vmem>>, vector<1x1x1x32xf32>
    %765 = vector.shape_cast %764 : vector<1x1x1x32xf32> to vector<1x32xf32>
    %c1_688 = arith.constant 1 : index
    %c1_689 = arith.constant 1 : index
    %c0_690 = arith.constant 0 : index
    %c0_691 = arith.constant 0 : index
    %766 = vector.load %arg6[%c1_688, %c1_689, %c0_690, %c0_691] : memref<2x6x1x32xf32, #tpu.memory_space<vmem>>, vector<1x1x1x32xf32>
    %767 = vector.shape_cast %766 : vector<1x1x1x32xf32> to vector<1x32xf32>
    %c1_692 = arith.constant 1 : index
    %c2_693 = arith.constant 2 : index
    %c0_694 = arith.constant 0 : index
    %c0_695 = arith.constant 0 : index
    %768 = vector.load %arg6[%c1_692, %c2_693, %c0_694, %c0_695] : memref<2x6x1x32xf32, #tpu.memory_space<vmem>>, vector<1x1x1x32xf32>
    %769 = vector.shape_cast %768 : vector<1x1x1x32xf32> to vector<1x32xf32>
    %c1_696 = arith.constant 1 : index
    %c3_697 = arith.constant 3 : index
    %c0_698 = arith.constant 0 : index
    %c0_699 = arith.constant 0 : index
    %770 = vector.load %arg6[%c1_696, %c3_697, %c0_698, %c0_699] : memref<2x6x1x32xf32, #tpu.memory_space<vmem>>, vector<1x1x1x32xf32>
    %771 = vector.shape_cast %770 : vector<1x1x1x32xf32> to vector<1x32xf32>
    %c1_700 = arith.constant 1 : index
    %c4_701 = arith.constant 4 : index
    %c0_702 = arith.constant 0 : index
    %c0_703 = arith.constant 0 : index
    %772 = vector.load %arg6[%c1_700, %c4_701, %c0_702, %c0_703] : memref<2x6x1x32xf32, #tpu.memory_space<vmem>>, vector<1x1x1x32xf32>
    %773 = vector.shape_cast %772 : vector<1x1x1x32xf32> to vector<1x32xf32>
    %c1_704 = arith.constant 1 : index
    %c5_705 = arith.constant 5 : index
    %c0_706 = arith.constant 0 : index
    %c0_707 = arith.constant 0 : index
    %774 = vector.load %arg6[%c1_704, %c5_705, %c0_706, %c0_707] : memref<2x6x1x32xf32, #tpu.memory_space<vmem>>, vector<1x1x1x32xf32>
    %775 = vector.shape_cast %774 : vector<1x1x1x32xf32> to vector<1x32xf32>
    %cst_708 = arith.constant dense<0.000000e+00> : vector<16xf32>
    %776 = vector.multi_reduction <add>, %763, %cst_708 [1] : vector<16x32xf32> to vector<16xf32>
    %777 = vector.shape_cast %776 : vector<16xf32> to vector<16x1xf32>
    %cst_709 = arith.constant 3.200000e+01 : f32
    %778 = vector.broadcast %cst_709 : f32 to vector<16x1xf32>
    %779 = arith.divf %777, %778 : vector<16x1xf32>
    %780 = vector.broadcast %779 : vector<16x1xf32> to vector<16x32xf32>
    %781 = arith.subf %763, %780 : vector<16x32xf32>
    %782 = arith.mulf %781, %781 : vector<16x32xf32>
    %cst_710 = arith.constant dense<0.000000e+00> : vector<16xf32>
    %783 = vector.multi_reduction <add>, %782, %cst_710 [1] : vector<16x32xf32> to vector<16xf32>
    %784 = vector.shape_cast %783 : vector<16xf32> to vector<16x1xf32>
    %cst_711 = arith.constant 3.200000e+01 : f32
    %785 = vector.broadcast %cst_711 : f32 to vector<16x1xf32>
    %786 = arith.divf %784, %785 : vector<16x1xf32>
    %787 = vector.broadcast %779 : vector<16x1xf32> to vector<16x32xf32>
    %788 = arith.subf %763, %787 : vector<16x32xf32>
    %cst_712 = arith.constant 9.99999997E-7 : f32
    %789 = vector.broadcast %cst_712 : f32 to vector<16x1xf32>
    %790 = arith.addf %786, %789 : vector<16x1xf32>
    %791 = math.rsqrt %790 : vector<16x1xf32>
    %792 = vector.broadcast %791 : vector<16x1xf32> to vector<16x32xf32>
    %793 = arith.mulf %788, %792 : vector<16x32xf32>
    %794 = vector.broadcast %765 : vector<1x32xf32> to vector<16x32xf32>
    %795 = arith.mulf %793, %794 : vector<16x32xf32>
    %796 = vector.broadcast %767 : vector<1x32xf32> to vector<16x32xf32>
    %797 = arith.addf %795, %796 : vector<16x32xf32>
    %c1_713 = arith.constant 1 : index
    %c0_714 = arith.constant 0 : index
    %c0_715 = arith.constant 0 : index
    %c0_716 = arith.constant 0 : index
    %c0_717 = arith.constant 0 : index
    %798 = vector.load %arg3[%c1_713, %c0_714, %c0_715, %c0_716, %c0_717] : memref<2x3x4x32x8xf32, #tpu.memory_space<vmem>>, vector<1x1x1x32x8xf32>
    %799 = vector.shape_cast %798 : vector<1x1x1x32x8xf32> to vector<32x8xf32>
    %cst_718 = arith.constant dense<0.000000e+00> : vector<16x8xf32>
    %800 = tpu.matmul %797, %799, %cst_718 {dimension_numbers = #tpu.dot_dimension_numbers<[1], [0], [0], [1], [0, 0, 1, 1], [], []>} : vector<16x32xf32>, vector<32x8xf32>, vector<16x8xf32> -> vector<16x8xf32>
    %c1_719 = arith.constant 1 : index
    %c0_720 = arith.constant 0 : index
    %c0_721 = arith.constant 0 : index
    %c0_722 = arith.constant 0 : index
    %c0_723 = arith.constant 0 : index
    %801 = vector.load %arg4[%c1_719, %c0_720, %c0_721, %c0_722, %c0_723] : memref<2x3x4x1x8xf32, #tpu.memory_space<vmem>>, vector<1x1x1x1x8xf32>
    %802 = vector.shape_cast %801 : vector<1x1x1x1x8xf32> to vector<1x8xf32>
    %803 = vector.broadcast %802 : vector<1x8xf32> to vector<16x8xf32>
    %804 = arith.addf %800, %803 : vector<16x8xf32>
    %c1_724 = arith.constant 1 : index
    %c1_725 = arith.constant 1 : index
    %c0_726 = arith.constant 0 : index
    %c0_727 = arith.constant 0 : index
    %c0_728 = arith.constant 0 : index
    %805 = vector.load %arg3[%c1_724, %c1_725, %c0_726, %c0_727, %c0_728] : memref<2x3x4x32x8xf32, #tpu.memory_space<vmem>>, vector<1x1x1x32x8xf32>
    %806 = vector.shape_cast %805 : vector<1x1x1x32x8xf32> to vector<32x8xf32>
    %cst_729 = arith.constant dense<0.000000e+00> : vector<16x8xf32>
    %807 = tpu.matmul %797, %806, %cst_729 {dimension_numbers = #tpu.dot_dimension_numbers<[1], [0], [0], [1], [0, 0, 1, 1], [], []>} : vector<16x32xf32>, vector<32x8xf32>, vector<16x8xf32> -> vector<16x8xf32>
    %c1_730 = arith.constant 1 : index
    %c1_731 = arith.constant 1 : index
    %c0_732 = arith.constant 0 : index
    %c0_733 = arith.constant 0 : index
    %c0_734 = arith.constant 0 : index
    %808 = vector.load %arg4[%c1_730, %c1_731, %c0_732, %c0_733, %c0_734] : memref<2x3x4x1x8xf32, #tpu.memory_space<vmem>>, vector<1x1x1x1x8xf32>
    %809 = vector.shape_cast %808 : vector<1x1x1x1x8xf32> to vector<1x8xf32>
    %810 = vector.broadcast %809 : vector<1x8xf32> to vector<16x8xf32>
    %811 = arith.addf %807, %810 : vector<16x8xf32>
    %c1_735 = arith.constant 1 : index
    %c2_736 = arith.constant 2 : index
    %c0_737 = arith.constant 0 : index
    %c0_738 = arith.constant 0 : index
    %c0_739 = arith.constant 0 : index
    %812 = vector.load %arg3[%c1_735, %c2_736, %c0_737, %c0_738, %c0_739] : memref<2x3x4x32x8xf32, #tpu.memory_space<vmem>>, vector<1x1x1x32x8xf32>
    %813 = vector.shape_cast %812 : vector<1x1x1x32x8xf32> to vector<32x8xf32>
    %cst_740 = arith.constant dense<0.000000e+00> : vector<16x8xf32>
    %814 = tpu.matmul %797, %813, %cst_740 {dimension_numbers = #tpu.dot_dimension_numbers<[1], [0], [0], [1], [0, 0, 1, 1], [], []>} : vector<16x32xf32>, vector<32x8xf32>, vector<16x8xf32> -> vector<16x8xf32>
    %c1_741 = arith.constant 1 : index
    %c2_742 = arith.constant 2 : index
    %c0_743 = arith.constant 0 : index
    %c0_744 = arith.constant 0 : index
    %c0_745 = arith.constant 0 : index
    %815 = vector.load %arg4[%c1_741, %c2_742, %c0_743, %c0_744, %c0_745] : memref<2x3x4x1x8xf32, #tpu.memory_space<vmem>>, vector<1x1x1x1x8xf32>
    %816 = vector.shape_cast %815 : vector<1x1x1x1x8xf32> to vector<1x8xf32>
    %817 = vector.broadcast %816 : vector<1x8xf32> to vector<16x8xf32>
    %818 = arith.addf %814, %817 : vector<16x8xf32>
    %cst_746 = arith.constant dense<0.000000e+00> : vector<16x16xf32>
    %819 = tpu.matmul %804, %811, %cst_746 {dimension_numbers = #tpu.dot_dimension_numbers<[1], [1], [0], [0], [0, 0, 1, 0], [], []>} : vector<16x8xf32>, vector<16x8xf32>, vector<16x16xf32> -> vector<16x16xf32>
    %cst_747 = arith.constant 0.353553385 : f32
    %820 = vector.broadcast %cst_747 : f32 to vector<16x16xf32>
    %821 = arith.mulf %819, %820 : vector<16x16xf32>
    %cst_748 = arith.constant dense<0xFF800000> : vector<16xf32>
    %822 = vector.multi_reduction <maximumf>, %821, %cst_748 [1] : vector<16x16xf32> to vector<16xf32>
    %823 = vector.shape_cast %822 : vector<16xf32> to vector<16x1xf32>
    %824 = vector.broadcast %823 : vector<16x1xf32> to vector<16x16xf32>
    %825 = arith.subf %821, %824 : vector<16x16xf32>
    %826 = math.exp %825 : vector<16x16xf32>
    %cst_749 = arith.constant dense<0.000000e+00> : vector<16xf32>
    %827 = vector.multi_reduction <add>, %826, %cst_749 [1] : vector<16x16xf32> to vector<16xf32>
    %828 = vector.shape_cast %827 : vector<16xf32> to vector<16x1xf32>
    %829 = tpu.reciprocal %828 {approx = true} : vector<16x1xf32> -> vector<16x1xf32>
    %830 = vector.broadcast %829 : vector<16x1xf32> to vector<16x16xf32>
    %831 = arith.mulf %826, %830 : vector<16x16xf32>
    %cst_750 = arith.constant dense<0.000000e+00> : vector<16x8xf32>
    %832 = tpu.matmul %831, %818, %cst_750 {dimension_numbers = #tpu.dot_dimension_numbers<[1], [0], [0], [1], [0, 0, 1, 1], [], []>} : vector<16x16xf32>, vector<16x8xf32>, vector<16x8xf32> -> vector<16x8xf32>
    %c1_751 = arith.constant 1 : index
    %c0_752 = arith.constant 0 : index
    %c0_753 = arith.constant 0 : index
    %c0_754 = arith.constant 0 : index
    %833 = vector.load %arg5[%c1_751, %c0_752, %c0_753, %c0_754] : memref<2x4x8x32xf32, #tpu.memory_space<vmem>>, vector<1x1x8x32xf32>
    %834 = vector.shape_cast %833 : vector<1x1x8x32xf32> to vector<8x32xf32>
    %cst_755 = arith.constant dense<0.000000e+00> : vector<16x32xf32>
    %835 = tpu.matmul %832, %834, %cst_755 {dimension_numbers = #tpu.dot_dimension_numbers<[1], [0], [0], [1], [0, 0, 1, 1], [], []>} : vector<16x8xf32>, vector<8x32xf32>, vector<16x32xf32> -> vector<16x32xf32>
    %836 = vector.broadcast %769 : vector<1x32xf32> to vector<16x32xf32>
    %837 = arith.addf %836, %835 : vector<16x32xf32>
    %c1_756 = arith.constant 1 : index
    %c0_757 = arith.constant 0 : index
    %c1_758 = arith.constant 1 : index
    %c0_759 = arith.constant 0 : index
    %c0_760 = arith.constant 0 : index
    %838 = vector.load %arg3[%c1_756, %c0_757, %c1_758, %c0_759, %c0_760] : memref<2x3x4x32x8xf32, #tpu.memory_space<vmem>>, vector<1x1x1x32x8xf32>
    %839 = vector.shape_cast %838 : vector<1x1x1x32x8xf32> to vector<32x8xf32>
    %cst_761 = arith.constant dense<0.000000e+00> : vector<16x8xf32>
    %840 = tpu.matmul %797, %839, %cst_761 {dimension_numbers = #tpu.dot_dimension_numbers<[1], [0], [0], [1], [0, 0, 1, 1], [], []>} : vector<16x32xf32>, vector<32x8xf32>, vector<16x8xf32> -> vector<16x8xf32>
    %c1_762 = arith.constant 1 : index
    %c0_763 = arith.constant 0 : index
    %c1_764 = arith.constant 1 : index
    %c0_765 = arith.constant 0 : index
    %c0_766 = arith.constant 0 : index
    %841 = vector.load %arg4[%c1_762, %c0_763, %c1_764, %c0_765, %c0_766] : memref<2x3x4x1x8xf32, #tpu.memory_space<vmem>>, vector<1x1x1x1x8xf32>
    %842 = vector.shape_cast %841 : vector<1x1x1x1x8xf32> to vector<1x8xf32>
    %843 = vector.broadcast %842 : vector<1x8xf32> to vector<16x8xf32>
    %844 = arith.addf %840, %843 : vector<16x8xf32>
    %c1_767 = arith.constant 1 : index
    %c1_768 = arith.constant 1 : index
    %c1_769 = arith.constant 1 : index
    %c0_770 = arith.constant 0 : index
    %c0_771 = arith.constant 0 : index
    %845 = vector.load %arg3[%c1_767, %c1_768, %c1_769, %c0_770, %c0_771] : memref<2x3x4x32x8xf32, #tpu.memory_space<vmem>>, vector<1x1x1x32x8xf32>
    %846 = vector.shape_cast %845 : vector<1x1x1x32x8xf32> to vector<32x8xf32>
    %cst_772 = arith.constant dense<0.000000e+00> : vector<16x8xf32>
    %847 = tpu.matmul %797, %846, %cst_772 {dimension_numbers = #tpu.dot_dimension_numbers<[1], [0], [0], [1], [0, 0, 1, 1], [], []>} : vector<16x32xf32>, vector<32x8xf32>, vector<16x8xf32> -> vector<16x8xf32>
    %c1_773 = arith.constant 1 : index
    %c1_774 = arith.constant 1 : index
    %c1_775 = arith.constant 1 : index
    %c0_776 = arith.constant 0 : index
    %c0_777 = arith.constant 0 : index
    %848 = vector.load %arg4[%c1_773, %c1_774, %c1_775, %c0_776, %c0_777] : memref<2x3x4x1x8xf32, #tpu.memory_space<vmem>>, vector<1x1x1x1x8xf32>
    %849 = vector.shape_cast %848 : vector<1x1x1x1x8xf32> to vector<1x8xf32>
    %850 = vector.broadcast %849 : vector<1x8xf32> to vector<16x8xf32>
    %851 = arith.addf %847, %850 : vector<16x8xf32>
    %c1_778 = arith.constant 1 : index
    %c2_779 = arith.constant 2 : index
    %c1_780 = arith.constant 1 : index
    %c0_781 = arith.constant 0 : index
    %c0_782 = arith.constant 0 : index
    %852 = vector.load %arg3[%c1_778, %c2_779, %c1_780, %c0_781, %c0_782] : memref<2x3x4x32x8xf32, #tpu.memory_space<vmem>>, vector<1x1x1x32x8xf32>
    %853 = vector.shape_cast %852 : vector<1x1x1x32x8xf32> to vector<32x8xf32>
    %cst_783 = arith.constant dense<0.000000e+00> : vector<16x8xf32>
    %854 = tpu.matmul %797, %853, %cst_783 {dimension_numbers = #tpu.dot_dimension_numbers<[1], [0], [0], [1], [0, 0, 1, 1], [], []>} : vector<16x32xf32>, vector<32x8xf32>, vector<16x8xf32> -> vector<16x8xf32>
    %c1_784 = arith.constant 1 : index
    %c2_785 = arith.constant 2 : index
    %c1_786 = arith.constant 1 : index
    %c0_787 = arith.constant 0 : index
    %c0_788 = arith.constant 0 : index
    %855 = vector.load %arg4[%c1_784, %c2_785, %c1_786, %c0_787, %c0_788] : memref<2x3x4x1x8xf32, #tpu.memory_space<vmem>>, vector<1x1x1x1x8xf32>
    %856 = vector.shape_cast %855 : vector<1x1x1x1x8xf32> to vector<1x8xf32>
    %857 = vector.broadcast %856 : vector<1x8xf32> to vector<16x8xf32>
    %858 = arith.addf %854, %857 : vector<16x8xf32>
    %cst_789 = arith.constant dense<0.000000e+00> : vector<16x16xf32>
    %859 = tpu.matmul %844, %851, %cst_789 {dimension_numbers = #tpu.dot_dimension_numbers<[1], [1], [0], [0], [0, 0, 1, 0], [], []>} : vector<16x8xf32>, vector<16x8xf32>, vector<16x16xf32> -> vector<16x16xf32>
    %cst_790 = arith.constant 0.353553385 : f32
    %860 = vector.broadcast %cst_790 : f32 to vector<16x16xf32>
    %861 = arith.mulf %859, %860 : vector<16x16xf32>
    %cst_791 = arith.constant dense<0xFF800000> : vector<16xf32>
    %862 = vector.multi_reduction <maximumf>, %861, %cst_791 [1] : vector<16x16xf32> to vector<16xf32>
    %863 = vector.shape_cast %862 : vector<16xf32> to vector<16x1xf32>
    %864 = vector.broadcast %863 : vector<16x1xf32> to vector<16x16xf32>
    %865 = arith.subf %861, %864 : vector<16x16xf32>
    %866 = math.exp %865 : vector<16x16xf32>
    %cst_792 = arith.constant dense<0.000000e+00> : vector<16xf32>
    %867 = vector.multi_reduction <add>, %866, %cst_792 [1] : vector<16x16xf32> to vector<16xf32>
    %868 = vector.shape_cast %867 : vector<16xf32> to vector<16x1xf32>
    %869 = tpu.reciprocal %868 {approx = true} : vector<16x1xf32> -> vector<16x1xf32>
    %870 = vector.broadcast %869 : vector<16x1xf32> to vector<16x16xf32>
    %871 = arith.mulf %866, %870 : vector<16x16xf32>
    %cst_793 = arith.constant dense<0.000000e+00> : vector<16x8xf32>
    %872 = tpu.matmul %871, %858, %cst_793 {dimension_numbers = #tpu.dot_dimension_numbers<[1], [0], [0], [1], [0, 0, 1, 1], [], []>} : vector<16x16xf32>, vector<16x8xf32>, vector<16x8xf32> -> vector<16x8xf32>
    %c1_794 = arith.constant 1 : index
    %c1_795 = arith.constant 1 : index
    %c0_796 = arith.constant 0 : index
    %c0_797 = arith.constant 0 : index
    %873 = vector.load %arg5[%c1_794, %c1_795, %c0_796, %c0_797] : memref<2x4x8x32xf32, #tpu.memory_space<vmem>>, vector<1x1x8x32xf32>
    %874 = vector.shape_cast %873 : vector<1x1x8x32xf32> to vector<8x32xf32>
    %cst_798 = arith.constant dense<0.000000e+00> : vector<16x32xf32>
    %875 = tpu.matmul %872, %874, %cst_798 {dimension_numbers = #tpu.dot_dimension_numbers<[1], [0], [0], [1], [0, 0, 1, 1], [], []>} : vector<16x8xf32>, vector<8x32xf32>, vector<16x32xf32> -> vector<16x32xf32>
    %876 = arith.addf %837, %875 : vector<16x32xf32>
    %c1_799 = arith.constant 1 : index
    %c0_800 = arith.constant 0 : index
    %c2_801 = arith.constant 2 : index
    %c0_802 = arith.constant 0 : index
    %c0_803 = arith.constant 0 : index
    %877 = vector.load %arg3[%c1_799, %c0_800, %c2_801, %c0_802, %c0_803] : memref<2x3x4x32x8xf32, #tpu.memory_space<vmem>>, vector<1x1x1x32x8xf32>
    %878 = vector.shape_cast %877 : vector<1x1x1x32x8xf32> to vector<32x8xf32>
    %cst_804 = arith.constant dense<0.000000e+00> : vector<16x8xf32>
    %879 = tpu.matmul %797, %878, %cst_804 {dimension_numbers = #tpu.dot_dimension_numbers<[1], [0], [0], [1], [0, 0, 1, 1], [], []>} : vector<16x32xf32>, vector<32x8xf32>, vector<16x8xf32> -> vector<16x8xf32>
    %c1_805 = arith.constant 1 : index
    %c0_806 = arith.constant 0 : index
    %c2_807 = arith.constant 2 : index
    %c0_808 = arith.constant 0 : index
    %c0_809 = arith.constant 0 : index
    %880 = vector.load %arg4[%c1_805, %c0_806, %c2_807, %c0_808, %c0_809] : memref<2x3x4x1x8xf32, #tpu.memory_space<vmem>>, vector<1x1x1x1x8xf32>
    %881 = vector.shape_cast %880 : vector<1x1x1x1x8xf32> to vector<1x8xf32>
    %882 = vector.broadcast %881 : vector<1x8xf32> to vector<16x8xf32>
    %883 = arith.addf %879, %882 : vector<16x8xf32>
    %c1_810 = arith.constant 1 : index
    %c1_811 = arith.constant 1 : index
    %c2_812 = arith.constant 2 : index
    %c0_813 = arith.constant 0 : index
    %c0_814 = arith.constant 0 : index
    %884 = vector.load %arg3[%c1_810, %c1_811, %c2_812, %c0_813, %c0_814] : memref<2x3x4x32x8xf32, #tpu.memory_space<vmem>>, vector<1x1x1x32x8xf32>
    %885 = vector.shape_cast %884 : vector<1x1x1x32x8xf32> to vector<32x8xf32>
    %cst_815 = arith.constant dense<0.000000e+00> : vector<16x8xf32>
    %886 = tpu.matmul %797, %885, %cst_815 {dimension_numbers = #tpu.dot_dimension_numbers<[1], [0], [0], [1], [0, 0, 1, 1], [], []>} : vector<16x32xf32>, vector<32x8xf32>, vector<16x8xf32> -> vector<16x8xf32>
    %c1_816 = arith.constant 1 : index
    %c1_817 = arith.constant 1 : index
    %c2_818 = arith.constant 2 : index
    %c0_819 = arith.constant 0 : index
    %c0_820 = arith.constant 0 : index
    %887 = vector.load %arg4[%c1_816, %c1_817, %c2_818, %c0_819, %c0_820] : memref<2x3x4x1x8xf32, #tpu.memory_space<vmem>>, vector<1x1x1x1x8xf32>
    %888 = vector.shape_cast %887 : vector<1x1x1x1x8xf32> to vector<1x8xf32>
    %889 = vector.broadcast %888 : vector<1x8xf32> to vector<16x8xf32>
    %890 = arith.addf %886, %889 : vector<16x8xf32>
    %c1_821 = arith.constant 1 : index
    %c2_822 = arith.constant 2 : index
    %c2_823 = arith.constant 2 : index
    %c0_824 = arith.constant 0 : index
    %c0_825 = arith.constant 0 : index
    %891 = vector.load %arg3[%c1_821, %c2_822, %c2_823, %c0_824, %c0_825] : memref<2x3x4x32x8xf32, #tpu.memory_space<vmem>>, vector<1x1x1x32x8xf32>
    %892 = vector.shape_cast %891 : vector<1x1x1x32x8xf32> to vector<32x8xf32>
    %cst_826 = arith.constant dense<0.000000e+00> : vector<16x8xf32>
    %893 = tpu.matmul %797, %892, %cst_826 {dimension_numbers = #tpu.dot_dimension_numbers<[1], [0], [0], [1], [0, 0, 1, 1], [], []>} : vector<16x32xf32>, vector<32x8xf32>, vector<16x8xf32> -> vector<16x8xf32>
    %c1_827 = arith.constant 1 : index
    %c2_828 = arith.constant 2 : index
    %c2_829 = arith.constant 2 : index
    %c0_830 = arith.constant 0 : index
    %c0_831 = arith.constant 0 : index
    %894 = vector.load %arg4[%c1_827, %c2_828, %c2_829, %c0_830, %c0_831] : memref<2x3x4x1x8xf32, #tpu.memory_space<vmem>>, vector<1x1x1x1x8xf32>
    %895 = vector.shape_cast %894 : vector<1x1x1x1x8xf32> to vector<1x8xf32>
    %896 = vector.broadcast %895 : vector<1x8xf32> to vector<16x8xf32>
    %897 = arith.addf %893, %896 : vector<16x8xf32>
    %cst_832 = arith.constant dense<0.000000e+00> : vector<16x16xf32>
    %898 = tpu.matmul %883, %890, %cst_832 {dimension_numbers = #tpu.dot_dimension_numbers<[1], [1], [0], [0], [0, 0, 1, 0], [], []>} : vector<16x8xf32>, vector<16x8xf32>, vector<16x16xf32> -> vector<16x16xf32>
    %cst_833 = arith.constant 0.353553385 : f32
    %899 = vector.broadcast %cst_833 : f32 to vector<16x16xf32>
    %900 = arith.mulf %898, %899 : vector<16x16xf32>
    %cst_834 = arith.constant dense<0xFF800000> : vector<16xf32>
    %901 = vector.multi_reduction <maximumf>, %900, %cst_834 [1] : vector<16x16xf32> to vector<16xf32>
    %902 = vector.shape_cast %901 : vector<16xf32> to vector<16x1xf32>
    %903 = vector.broadcast %902 : vector<16x1xf32> to vector<16x16xf32>
    %904 = arith.subf %900, %903 : vector<16x16xf32>
    %905 = math.exp %904 : vector<16x16xf32>
    %cst_835 = arith.constant dense<0.000000e+00> : vector<16xf32>
    %906 = vector.multi_reduction <add>, %905, %cst_835 [1] : vector<16x16xf32> to vector<16xf32>
    %907 = vector.shape_cast %906 : vector<16xf32> to vector<16x1xf32>
    %908 = tpu.reciprocal %907 {approx = true} : vector<16x1xf32> -> vector<16x1xf32>
    %909 = vector.broadcast %908 : vector<16x1xf32> to vector<16x16xf32>
    %910 = arith.mulf %905, %909 : vector<16x16xf32>
    %cst_836 = arith.constant dense<0.000000e+00> : vector<16x8xf32>
    %911 = tpu.matmul %910, %897, %cst_836 {dimension_numbers = #tpu.dot_dimension_numbers<[1], [0], [0], [1], [0, 0, 1, 1], [], []>} : vector<16x16xf32>, vector<16x8xf32>, vector<16x8xf32> -> vector<16x8xf32>
    %c1_837 = arith.constant 1 : index
    %c2_838 = arith.constant 2 : index
    %c0_839 = arith.constant 0 : index
    %c0_840 = arith.constant 0 : index
    %912 = vector.load %arg5[%c1_837, %c2_838, %c0_839, %c0_840] : memref<2x4x8x32xf32, #tpu.memory_space<vmem>>, vector<1x1x8x32xf32>
    %913 = vector.shape_cast %912 : vector<1x1x8x32xf32> to vector<8x32xf32>
    %cst_841 = arith.constant dense<0.000000e+00> : vector<16x32xf32>
    %914 = tpu.matmul %911, %913, %cst_841 {dimension_numbers = #tpu.dot_dimension_numbers<[1], [0], [0], [1], [0, 0, 1, 1], [], []>} : vector<16x8xf32>, vector<8x32xf32>, vector<16x32xf32> -> vector<16x32xf32>
    %915 = arith.addf %876, %914 : vector<16x32xf32>
    %c1_842 = arith.constant 1 : index
    %c0_843 = arith.constant 0 : index
    %c3_844 = arith.constant 3 : index
    %c0_845 = arith.constant 0 : index
    %c0_846 = arith.constant 0 : index
    %916 = vector.load %arg3[%c1_842, %c0_843, %c3_844, %c0_845, %c0_846] : memref<2x3x4x32x8xf32, #tpu.memory_space<vmem>>, vector<1x1x1x32x8xf32>
    %917 = vector.shape_cast %916 : vector<1x1x1x32x8xf32> to vector<32x8xf32>
    %cst_847 = arith.constant dense<0.000000e+00> : vector<16x8xf32>
    %918 = tpu.matmul %797, %917, %cst_847 {dimension_numbers = #tpu.dot_dimension_numbers<[1], [0], [0], [1], [0, 0, 1, 1], [], []>} : vector<16x32xf32>, vector<32x8xf32>, vector<16x8xf32> -> vector<16x8xf32>
    %c1_848 = arith.constant 1 : index
    %c0_849 = arith.constant 0 : index
    %c3_850 = arith.constant 3 : index
    %c0_851 = arith.constant 0 : index
    %c0_852 = arith.constant 0 : index
    %919 = vector.load %arg4[%c1_848, %c0_849, %c3_850, %c0_851, %c0_852] : memref<2x3x4x1x8xf32, #tpu.memory_space<vmem>>, vector<1x1x1x1x8xf32>
    %920 = vector.shape_cast %919 : vector<1x1x1x1x8xf32> to vector<1x8xf32>
    %921 = vector.broadcast %920 : vector<1x8xf32> to vector<16x8xf32>
    %922 = arith.addf %918, %921 : vector<16x8xf32>
    %c1_853 = arith.constant 1 : index
    %c1_854 = arith.constant 1 : index
    %c3_855 = arith.constant 3 : index
    %c0_856 = arith.constant 0 : index
    %c0_857 = arith.constant 0 : index
    %923 = vector.load %arg3[%c1_853, %c1_854, %c3_855, %c0_856, %c0_857] : memref<2x3x4x32x8xf32, #tpu.memory_space<vmem>>, vector<1x1x1x32x8xf32>
    %924 = vector.shape_cast %923 : vector<1x1x1x32x8xf32> to vector<32x8xf32>
    %cst_858 = arith.constant dense<0.000000e+00> : vector<16x8xf32>
    %925 = tpu.matmul %797, %924, %cst_858 {dimension_numbers = #tpu.dot_dimension_numbers<[1], [0], [0], [1], [0, 0, 1, 1], [], []>} : vector<16x32xf32>, vector<32x8xf32>, vector<16x8xf32> -> vector<16x8xf32>
    %c1_859 = arith.constant 1 : index
    %c1_860 = arith.constant 1 : index
    %c3_861 = arith.constant 3 : index
    %c0_862 = arith.constant 0 : index
    %c0_863 = arith.constant 0 : index
    %926 = vector.load %arg4[%c1_859, %c1_860, %c3_861, %c0_862, %c0_863] : memref<2x3x4x1x8xf32, #tpu.memory_space<vmem>>, vector<1x1x1x1x8xf32>
    %927 = vector.shape_cast %926 : vector<1x1x1x1x8xf32> to vector<1x8xf32>
    %928 = vector.broadcast %927 : vector<1x8xf32> to vector<16x8xf32>
    %929 = arith.addf %925, %928 : vector<16x8xf32>
    %c1_864 = arith.constant 1 : index
    %c2_865 = arith.constant 2 : index
    %c3_866 = arith.constant 3 : index
    %c0_867 = arith.constant 0 : index
    %c0_868 = arith.constant 0 : index
    %930 = vector.load %arg3[%c1_864, %c2_865, %c3_866, %c0_867, %c0_868] : memref<2x3x4x32x8xf32, #tpu.memory_space<vmem>>, vector<1x1x1x32x8xf32>
    %931 = vector.shape_cast %930 : vector<1x1x1x32x8xf32> to vector<32x8xf32>
    %cst_869 = arith.constant dense<0.000000e+00> : vector<16x8xf32>
    %932 = tpu.matmul %797, %931, %cst_869 {dimension_numbers = #tpu.dot_dimension_numbers<[1], [0], [0], [1], [0, 0, 1, 1], [], []>} : vector<16x32xf32>, vector<32x8xf32>, vector<16x8xf32> -> vector<16x8xf32>
    %c1_870 = arith.constant 1 : index
    %c2_871 = arith.constant 2 : index
    %c3_872 = arith.constant 3 : index
    %c0_873 = arith.constant 0 : index
    %c0_874 = arith.constant 0 : index
    %933 = vector.load %arg4[%c1_870, %c2_871, %c3_872, %c0_873, %c0_874] : memref<2x3x4x1x8xf32, #tpu.memory_space<vmem>>, vector<1x1x1x1x8xf32>
    %934 = vector.shape_cast %933 : vector<1x1x1x1x8xf32> to vector<1x8xf32>
    %935 = vector.broadcast %934 : vector<1x8xf32> to vector<16x8xf32>
    %936 = arith.addf %932, %935 : vector<16x8xf32>
    %cst_875 = arith.constant dense<0.000000e+00> : vector<16x16xf32>
    %937 = tpu.matmul %922, %929, %cst_875 {dimension_numbers = #tpu.dot_dimension_numbers<[1], [1], [0], [0], [0, 0, 1, 0], [], []>} : vector<16x8xf32>, vector<16x8xf32>, vector<16x16xf32> -> vector<16x16xf32>
    %cst_876 = arith.constant 0.353553385 : f32
    %938 = vector.broadcast %cst_876 : f32 to vector<16x16xf32>
    %939 = arith.mulf %937, %938 : vector<16x16xf32>
    %cst_877 = arith.constant dense<0xFF800000> : vector<16xf32>
    %940 = vector.multi_reduction <maximumf>, %939, %cst_877 [1] : vector<16x16xf32> to vector<16xf32>
    %941 = vector.shape_cast %940 : vector<16xf32> to vector<16x1xf32>
    %942 = vector.broadcast %941 : vector<16x1xf32> to vector<16x16xf32>
    %943 = arith.subf %939, %942 : vector<16x16xf32>
    %944 = math.exp %943 : vector<16x16xf32>
    %cst_878 = arith.constant dense<0.000000e+00> : vector<16xf32>
    %945 = vector.multi_reduction <add>, %944, %cst_878 [1] : vector<16x16xf32> to vector<16xf32>
    %946 = vector.shape_cast %945 : vector<16xf32> to vector<16x1xf32>
    %947 = tpu.reciprocal %946 {approx = true} : vector<16x1xf32> -> vector<16x1xf32>
    %948 = vector.broadcast %947 : vector<16x1xf32> to vector<16x16xf32>
    %949 = arith.mulf %944, %948 : vector<16x16xf32>
    %cst_879 = arith.constant dense<0.000000e+00> : vector<16x8xf32>
    %950 = tpu.matmul %949, %936, %cst_879 {dimension_numbers = #tpu.dot_dimension_numbers<[1], [0], [0], [1], [0, 0, 1, 1], [], []>} : vector<16x16xf32>, vector<16x8xf32>, vector<16x8xf32> -> vector<16x8xf32>
    %c1_880 = arith.constant 1 : index
    %c3_881 = arith.constant 3 : index
    %c0_882 = arith.constant 0 : index
    %c0_883 = arith.constant 0 : index
    %951 = vector.load %arg5[%c1_880, %c3_881, %c0_882, %c0_883] : memref<2x4x8x32xf32, #tpu.memory_space<vmem>>, vector<1x1x8x32xf32>
    %952 = vector.shape_cast %951 : vector<1x1x8x32xf32> to vector<8x32xf32>
    %cst_884 = arith.constant dense<0.000000e+00> : vector<16x32xf32>
    %953 = tpu.matmul %950, %952, %cst_884 {dimension_numbers = #tpu.dot_dimension_numbers<[1], [0], [0], [1], [0, 0, 1, 1], [], []>} : vector<16x8xf32>, vector<8x32xf32>, vector<16x32xf32> -> vector<16x32xf32>
    %954 = arith.addf %915, %953 : vector<16x32xf32>
    %955 = arith.addf %763, %954 : vector<16x32xf32>
    %cst_885 = arith.constant dense<0.000000e+00> : vector<16xf32>
    %956 = vector.multi_reduction <add>, %955, %cst_885 [1] : vector<16x32xf32> to vector<16xf32>
    %957 = vector.shape_cast %956 : vector<16xf32> to vector<16x1xf32>
    %cst_886 = arith.constant 3.200000e+01 : f32
    %958 = vector.broadcast %cst_886 : f32 to vector<16x1xf32>
    %959 = arith.divf %957, %958 : vector<16x1xf32>
    %960 = vector.broadcast %959 : vector<16x1xf32> to vector<16x32xf32>
    %961 = arith.subf %955, %960 : vector<16x32xf32>
    %962 = arith.mulf %961, %961 : vector<16x32xf32>
    %cst_887 = arith.constant dense<0.000000e+00> : vector<16xf32>
    %963 = vector.multi_reduction <add>, %962, %cst_887 [1] : vector<16x32xf32> to vector<16xf32>
    %964 = vector.shape_cast %963 : vector<16xf32> to vector<16x1xf32>
    %cst_888 = arith.constant 3.200000e+01 : f32
    %965 = vector.broadcast %cst_888 : f32 to vector<16x1xf32>
    %966 = arith.divf %964, %965 : vector<16x1xf32>
    %967 = vector.broadcast %959 : vector<16x1xf32> to vector<16x32xf32>
    %968 = arith.subf %955, %967 : vector<16x32xf32>
    %cst_889 = arith.constant 9.99999997E-7 : f32
    %969 = vector.broadcast %cst_889 : f32 to vector<16x1xf32>
    %970 = arith.addf %966, %969 : vector<16x1xf32>
    %971 = math.rsqrt %970 : vector<16x1xf32>
    %972 = vector.broadcast %971 : vector<16x1xf32> to vector<16x32xf32>
    %973 = arith.mulf %968, %972 : vector<16x32xf32>
    %974 = vector.broadcast %771 : vector<1x32xf32> to vector<16x32xf32>
    %975 = arith.mulf %973, %974 : vector<16x32xf32>
    %976 = vector.broadcast %773 : vector<1x32xf32> to vector<16x32xf32>
    %977 = arith.addf %975, %976 : vector<16x32xf32>
    %c1_890 = arith.constant 1 : index
    %c0_891 = arith.constant 0 : index
    %c0_892 = arith.constant 0 : index
    %978 = vector.load %arg8[%c1_890, %c0_891, %c0_892] : memref<2x32x128xf32, #tpu.memory_space<vmem>>, vector<1x32x128xf32>
    %979 = vector.shape_cast %978 : vector<1x32x128xf32> to vector<32x128xf32>
    %cst_893 = arith.constant dense<0.000000e+00> : vector<16x128xf32>
    %980 = tpu.matmul %977, %979, %cst_893 {dimension_numbers = #tpu.dot_dimension_numbers<[1], [0], [0], [1], [0, 0, 1, 1], [], []>} : vector<16x32xf32>, vector<32x128xf32>, vector<16x128xf32> -> vector<16x128xf32>
    %c1_894 = arith.constant 1 : index
    %c0_895 = arith.constant 0 : index
    %c0_896 = arith.constant 0 : index
    %981 = vector.load %arg9[%c1_894, %c0_895, %c0_896] : memref<2x1x128xf32, #tpu.memory_space<vmem>>, vector<1x1x128xf32>
    %982 = vector.shape_cast %981 : vector<1x1x128xf32> to vector<1x128xf32>
    %983 = vector.broadcast %982 : vector<1x128xf32> to vector<16x128xf32>
    %984 = arith.addf %980, %983 : vector<16x128xf32>
    %985 = arith.mulf %984, %984 : vector<16x128xf32>
    %986 = arith.mulf %984, %985 : vector<16x128xf32>
    %cst_897 = arith.constant 4.471500e-02 : f32
    %987 = vector.broadcast %cst_897 : f32 to vector<16x128xf32>
    %988 = arith.mulf %987, %986 : vector<16x128xf32>
    %989 = arith.addf %984, %988 : vector<16x128xf32>
    %cst_898 = arith.constant 0.797884583 : f32
    %990 = vector.broadcast %cst_898 : f32 to vector<16x128xf32>
    %991 = arith.mulf %990, %989 : vector<16x128xf32>
    %992 = math.tanh %991 : vector<16x128xf32>
    %cst_899 = arith.constant 1.000000e+00 : f32
    %993 = vector.broadcast %cst_899 : f32 to vector<16x128xf32>
    %994 = arith.addf %993, %992 : vector<16x128xf32>
    %cst_900 = arith.constant 5.000000e-01 : f32
    %995 = vector.broadcast %cst_900 : f32 to vector<16x128xf32>
    %996 = arith.mulf %995, %994 : vector<16x128xf32>
    %997 = arith.mulf %984, %996 : vector<16x128xf32>
    %c1_901 = arith.constant 1 : index
    %c0_902 = arith.constant 0 : index
    %c0_903 = arith.constant 0 : index
    %998 = vector.load %arg10[%c1_901, %c0_902, %c0_903] : memref<2x128x32xf32, #tpu.memory_space<vmem>>, vector<1x128x32xf32>
    %999 = vector.shape_cast %998 : vector<1x128x32xf32> to vector<128x32xf32>
    %cst_904 = arith.constant dense<0.000000e+00> : vector<16x32xf32>
    %1000 = tpu.matmul %997, %999, %cst_904 {dimension_numbers = #tpu.dot_dimension_numbers<[1], [0], [0], [1], [0, 0, 1, 1], [], []>} : vector<16x128xf32>, vector<128x32xf32>, vector<16x32xf32> -> vector<16x32xf32>
    %1001 = arith.addf %955, %1000 : vector<16x32xf32>
    %1002 = vector.broadcast %775 : vector<1x32xf32> to vector<16x32xf32>
    %1003 = arith.addf %1001, %1002 : vector<16x32xf32>
    %cst_905 = arith.constant dense<0.000000e+00> : vector<16xf32>
    %1004 = vector.multi_reduction <add>, %1003, %cst_905 [1] : vector<16x32xf32> to vector<16xf32>
    %1005 = vector.shape_cast %1004 : vector<16xf32> to vector<16x1xf32>
    %cst_906 = arith.constant 3.200000e+01 : f32
    %1006 = vector.broadcast %cst_906 : f32 to vector<16x1xf32>
    %1007 = arith.divf %1005, %1006 : vector<16x1xf32>
    %1008 = vector.broadcast %1007 : vector<16x1xf32> to vector<16x32xf32>
    %1009 = arith.subf %1003, %1008 : vector<16x32xf32>
    %1010 = arith.mulf %1009, %1009 : vector<16x32xf32>
    %cst_907 = arith.constant dense<0.000000e+00> : vector<16xf32>
    %1011 = vector.multi_reduction <add>, %1010, %cst_907 [1] : vector<16x32xf32> to vector<16xf32>
    %1012 = vector.shape_cast %1011 : vector<16xf32> to vector<16x1xf32>
    %cst_908 = arith.constant 3.200000e+01 : f32
    %1013 = vector.broadcast %cst_908 : f32 to vector<16x1xf32>
    %1014 = arith.divf %1012, %1013 : vector<16x1xf32>
    %1015 = vector.broadcast %1007 : vector<16x1xf32> to vector<16x32xf32>
    %1016 = arith.subf %1003, %1015 : vector<16x32xf32>
    %cst_909 = arith.constant 9.99999997E-7 : f32
    %1017 = vector.broadcast %cst_909 : f32 to vector<16x1xf32>
    %1018 = arith.addf %1014, %1017 : vector<16x1xf32>
    %1019 = math.rsqrt %1018 : vector<16x1xf32>
    %1020 = vector.broadcast %1019 : vector<16x1xf32> to vector<16x32xf32>
    %1021 = arith.mulf %1016, %1020 : vector<16x32xf32>
    %1022 = vector.broadcast %3 : vector<1x32xf32> to vector<16x32xf32>
    %1023 = arith.mulf %1021, %1022 : vector<16x32xf32>
    %1024 = vector.broadcast %5 : vector<1x32xf32> to vector<16x32xf32>
    %1025 = arith.addf %1023, %1024 : vector<16x32xf32>
    %cst_910 = arith.constant dense<0.000000e+00> : vector<32xf32>
    %1026 = vector.multi_reduction <add>, %1025, %cst_910 [0] : vector<16x32xf32> to vector<32xf32>
    %1027 = vector.shape_cast %1026 : vector<32xf32> to vector<1x32xf32>
    %cst_911 = arith.constant 1.600000e+01 : f32
    %1028 = vector.broadcast %cst_911 : f32 to vector<1x32xf32>
    %1029 = arith.divf %1027, %1028 : vector<1x32xf32>
    %1030 = tpu.concatenate %517, %1029 in 0 : vector<1x32xf32>, vector<1x32xf32> -> vector<2x32xf32>
    %c0_912 = arith.constant 0 : index
    %c0_913 = arith.constant 0 : index
    %1031 = vector.load %arg14[%c0_912, %c0_913] : memref<1x896xf32, #tpu.memory_space<vmem>>, vector<1x512xf32>
    %c0_914 = arith.constant 0 : index
    %c512 = arith.constant 512 : index
    %1032 = vector.load %arg14[%c0_914, %c512] : memref<1x896xf32, #tpu.memory_space<vmem>>, vector<1x256xf32>
    %c0_915 = arith.constant 0 : index
    %c768 = arith.constant 768 : index
    %1033 = vector.load %arg14[%c0_915, %c768] : memref<1x896xf32, #tpu.memory_space<vmem>>, vector<1x128xf32>
    %c0_916 = arith.constant 0 : index
    %c0_917 = arith.constant 0 : index
    %1034 = vector.load %arg11[%c0_916, %c0_917] : memref<32x512xf32, #tpu.memory_space<vmem>>, vector<32x512xf32>
    %cst_918 = arith.constant dense<0.000000e+00> : vector<2x512xf32>
    %1035 = tpu.matmul %1030, %1034, %cst_918 {dimension_numbers = #tpu.dot_dimension_numbers<[1], [0], [0], [1], [0, 0, 1, 1], [], []>} : vector<2x32xf32>, vector<32x512xf32>, vector<2x512xf32> -> vector<2x512xf32>
    %1036 = vector.broadcast %1031 : vector<1x512xf32> to vector<2x512xf32>
    %1037 = arith.addf %1035, %1036 : vector<2x512xf32>
    %cst_919 = arith.constant 0.000000e+00 : f32
    %1038 = vector.broadcast %cst_919 : f32 to vector<2x512xf32>
    %1039 = arith.maximumf %1037, %1038 : vector<2x512xf32>
    %c0_920 = arith.constant 0 : index
    %c0_921 = arith.constant 0 : index
    %1040 = vector.load %arg12[%c0_920, %c0_921] : memref<512x256xf32, #tpu.memory_space<vmem>>, vector<512x256xf32>
    %cst_922 = arith.constant dense<0.000000e+00> : vector<2x256xf32>
    %1041 = tpu.matmul %1039, %1040, %cst_922 {dimension_numbers = #tpu.dot_dimension_numbers<[1], [0], [0], [1], [0, 0, 1, 1], [], []>} : vector<2x512xf32>, vector<512x256xf32>, vector<2x256xf32> -> vector<2x256xf32>
    %1042 = vector.broadcast %1032 : vector<1x256xf32> to vector<2x256xf32>
    %1043 = arith.addf %1041, %1042 : vector<2x256xf32>
    %cst_923 = arith.constant 0.000000e+00 : f32
    %1044 = vector.broadcast %cst_923 : f32 to vector<2x256xf32>
    %1045 = arith.maximumf %1043, %1044 : vector<2x256xf32>
    %c0_924 = arith.constant 0 : index
    %c0_925 = arith.constant 0 : index
    %1046 = vector.load %arg13[%c0_924, %c0_925] : memref<256x128xf32, #tpu.memory_space<vmem>>, vector<256x128xf32>
    %cst_926 = arith.constant dense<0.000000e+00> : vector<2x128xf32>
    %1047 = tpu.matmul %1045, %1046, %cst_926 {dimension_numbers = #tpu.dot_dimension_numbers<[1], [0], [0], [1], [0, 0, 1, 1], [], []>} : vector<2x256xf32>, vector<256x128xf32>, vector<2x128xf32> -> vector<2x128xf32>
    %1048 = vector.broadcast %1033 : vector<1x128xf32> to vector<2x128xf32>
    %1049 = arith.addf %1047, %1048 : vector<2x128xf32>
    %c0_927 = arith.constant 0 : index
    %c0_928 = arith.constant 0 : index
    %1050 = vector.load %arg15[%c0_927, %c0_928] : memref<2x128xf32, #tpu.memory_space<vmem>>, vector<2x128xf32>
    tpu.vector_store %arg15[%c0_927, %c0_928], %1049 {strides = array<i32>} : memref<2x128xf32, #tpu.memory_space<vmem>>, vector<2x128xf32>,
    return
  }
  func.func @transform_0(%arg0: i32) -> (i32, i32, i32) {
    %c0_i32 = arith.constant 0 : i32
    %c0_i32_0 = arith.constant 0 : i32
    %c0_i32_1 = arith.constant 0 : i32
    return %arg0, %c0_i32, %c0_i32_0 : i32, i32, i32
  }
  func.func @transform_1(%arg0: i32) -> (i32, i32) {
    %c0_i32 = arith.constant 0 : i32
    %c0_i32_0 = arith.constant 0 : i32
    %c0_i32_1 = arith.constant 0 : i32
    return %c0_i32, %c0_i32_0 : i32, i32
  }
  func.func @transform_2(%arg0: i32) -> (i32, i32, i32, i32, i32) {
    %c0_i32 = arith.constant 0 : i32
    %c0_i32_0 = arith.constant 0 : i32
    %c0_i32_1 = arith.constant 0 : i32
    %c0_i32_2 = arith.constant 0 : i32
    %c0_i32_3 = arith.constant 0 : i32
    %c0_i32_4 = arith.constant 0 : i32
    return %c0_i32, %c0_i32_0, %c0_i32_1, %c0_i32_2, %c0_i32_3 : i32, i32, i32, i32, i32
  }
  func.func @transform_3(%arg0: i32) -> (i32, i32, i32, i32, i32) {
    %c0_i32 = arith.constant 0 : i32
    %c0_i32_0 = arith.constant 0 : i32
    %c0_i32_1 = arith.constant 0 : i32
    %c0_i32_2 = arith.constant 0 : i32
    %c0_i32_3 = arith.constant 0 : i32
    %c0_i32_4 = arith.constant 0 : i32
    return %c0_i32, %c0_i32_0, %c0_i32_1, %c0_i32_2, %c0_i32_3 : i32, i32, i32, i32, i32
  }
  func.func @transform_4(%arg0: i32) -> (i32, i32, i32, i32) {
    %c0_i32 = arith.constant 0 : i32
    %c0_i32_0 = arith.constant 0 : i32
    %c0_i32_1 = arith.constant 0 : i32
    %c0_i32_2 = arith.constant 0 : i32
    %c0_i32_3 = arith.constant 0 : i32
    return %c0_i32, %c0_i32_0, %c0_i32_1, %c0_i32_2 : i32, i32, i32, i32
  }
  func.func @transform_5(%arg0: i32) -> (i32, i32, i32, i32) {
    %c0_i32 = arith.constant 0 : i32
    %c0_i32_0 = arith.constant 0 : i32
    %c0_i32_1 = arith.constant 0 : i32
    %c0_i32_2 = arith.constant 0 : i32
    %c0_i32_3 = arith.constant 0 : i32
    return %c0_i32, %c0_i32_0, %c0_i32_1, %c0_i32_2 : i32, i32, i32, i32
  }
  func.func @transform_6(%arg0: i32) -> (i32, i32, i32) {
    %c0_i32 = arith.constant 0 : i32
    %c0_i32_0 = arith.constant 0 : i32
    %c0_i32_1 = arith.constant 0 : i32
    %c0_i32_2 = arith.constant 0 : i32
    return %c0_i32, %c0_i32_0, %c0_i32_1 : i32, i32, i32
  }
  func.func @transform_7(%arg0: i32) -> (i32, i32, i32) {
    %c0_i32 = arith.constant 0 : i32
    %c0_i32_0 = arith.constant 0 : i32
    %c0_i32_1 = arith.constant 0 : i32
    %c0_i32_2 = arith.constant 0 : i32
    return %c0_i32, %c0_i32_0, %c0_i32_1 : i32, i32, i32
  }
  func.func @transform_8(%arg0: i32) -> (i32, i32, i32) {
    %c0_i32 = arith.constant 0 : i32
    %c0_i32_0 = arith.constant 0 : i32
    %c0_i32_1 = arith.constant 0 : i32
    %c0_i32_2 = arith.constant 0 : i32
    return %c0_i32, %c0_i32_0, %c0_i32_1 : i32, i32, i32
  }
  func.func @transform_9(%arg0: i32) -> (i32, i32, i32) {
    %c0_i32 = arith.constant 0 : i32
    %c0_i32_0 = arith.constant 0 : i32
    %c0_i32_1 = arith.constant 0 : i32
    %c0_i32_2 = arith.constant 0 : i32
    return %c0_i32, %c0_i32_0, %c0_i32_1 : i32, i32, i32
  }
  func.func @transform_10(%arg0: i32) -> (i32, i32) {
    %c0_i32 = arith.constant 0 : i32
    %c0_i32_0 = arith.constant 0 : i32
    %c0_i32_1 = arith.constant 0 : i32
    return %c0_i32, %c0_i32_0 : i32, i32
  }
  func.func @transform_11(%arg0: i32) -> (i32, i32) {
    %c0_i32 = arith.constant 0 : i32
    %c0_i32_0 = arith.constant 0 : i32
    %c0_i32_1 = arith.constant 0 : i32
    return %c0_i32, %c0_i32_0 : i32, i32
  }
  func.func @transform_12(%arg0: i32) -> (i32, i32) {
    %c0_i32 = arith.constant 0 : i32
    %c0_i32_0 = arith.constant 0 : i32
    %c0_i32_1 = arith.constant 0 : i32
    return %c0_i32, %c0_i32_0 : i32, i32
  }
  func.func @transform_13(%arg0: i32) -> (i32, i32) {
    %c0_i32 = arith.constant 0 : i32
    %c0_i32_0 = arith.constant 0 : i32
    %c0_i32_1 = arith.constant 0 : i32
    return %c0_i32, %c0_i32_0 : i32, i32
  }
  func.func @transform_14(%arg0: i32) -> (i32, i32) {
    %c0_i32 = arith.constant 0 : i32
    %c0_i32_0 = arith.constant 0 : i32
    return %arg0, %c0_i32 : i32, i32
  }
}

</mosaic_0001>

<bundles_post_ra>
// kernel: _mae_forward.1
= control target key start
LH: loop header
LB: loop body
LE: loop exit
PB: predicated region body
PF: predicated region fallthrough
CT: control target
= control target key end

     0   :  { %vm69_vm0 = vcmask 523264   ;;  %s16125_s0 = inlined_call_operand.vmem [shape: f32[2,16,64], index: 0, kind: input, shape index: {}]   ;;  %s16126_s1 = inlined_call_operand.vmem [shape: f32[64,32], index: 1, kind: input, shape index: {}]   ;;  %s16127_s2 = inlined_call_operand.vmem [shape: f32[2,3,4,32,8], index: 2, kind: input, shape index: {}]   ;;  %s16128_s3 = inlined_call_operand.vmem [shape: f32[2,3,4,1,8], index: 3, kind: input, shape index: {}]   ;;  %s16129_s4 = inlined_call_operand.vmem [shape: f32[2,4,8,32], index: 4, kind: input, shape index: {}]   ;;  %s16130_s5 = inlined_call_operand.vmem [shape: f32[2,6,1,32], index: 5, kind: input, shape index: {}]   ;;  %s16131_s6 = inlined_call_operand.vmem [shape: f32[3,1,32], index: 6, kind: input, shape index: {}]   ;;  %s16132_s7 = inlined_call_operand.vmem [shape: f32[2,32,128], index: 7, kind: input, shape index: {}]   ;;  %s16133_s8 = inlined_call_operand.vmem [shape: f32[2,1,128], index: 8, kind: input, shape index: {}]   ;;  %s16134_s9 = inlined_call_operand.vmem [shape: f32[2,128,32], index: 9, kind: input, shape index: {}]   ;;  %s16135_s10 = inlined_call_operand.vmem [shape: f32[32,512], index: 10, kind: input, shape index: {}]   ;;  %s16136_s11 = inlined_call_operand.vmem [shape: f32[512,256], index: 11, kind: input, shape index: {}]   ;;  %s16137_s12 = inlined_call_operand.vmem [shape: f32[256,128], index: 12, kind: input, shape index: {}]   ;;  %s16138_s13 = inlined_call_operand.vmem [shape: f32[1,896], index: 13, kind: input, shape index: {}]   ;;  %s16139_s14 = inlined_call_operand.hbm [shape: f32[2,128], index: 14, kind: output, shape index: {}]  }
   0x1   :  { %v55_v0 = vld [vmem:[%s16126_s1] sm:$0xff]  ;;  %v56_v1 = vld [vmem:[%s16126_s1 + $0x8] sm:$0xff]  ;;  %v57_v2 = vld [vmem:[%s16126_s1 + $0x10] sm:$0xff] }
   0x2   :  { %v13787_v3 = vpack.c.bf16 %v56_v1, %v55_v0  ;;  %v58_v4 = vld [vmem:[%s16126_s1 + $0x18] sm:$0xff]  ;;  %v59_v6 = vld [vmem:[%s16126_s1 + $0x20] sm:$0xff]  ;;  %v60_v7 = vld [vmem:[%s16126_s1 + $0x28] sm:$0xff] }
   0x3   :  { %v13792_v5 = vpack.c.bf16 %v58_v4, %v57_v2  ;;  %v53_v8 = vld [vmem:[%s16125_s0] sm:$0xff] }
   0x4   :  { %12498 = vmatprep.subr.bf16.mxu0 %v13787_v3  ;;  %11459 = vmatprep.mubr.msk.f32.mxu0 %vm69_vm0, %v53_v8 }
   0x5   :  { %19 = vsyncpa [#allocation3], 0  ;;  %12500 = vmatpush3.bf16.msra.mxu0 %v13787_v3  ;;  %v13807_v9 = vpack.c.bf16 %v60_v7, %v59_v6  ;;  %v61_v10 = vld [vmem:[%s16126_s1 + $0x30] sm:$0xff]  ;;  %v62_v11 = vld [vmem:[%s16126_s1 + $0x38] sm:$0xff]  ;;  %vm162_vm1 = vcmask 261120   ;;  %vm474_vm2 = vcmask 64512  }
   0x6   :  { %12502 = vmatprep.subr.bf16.mxu0 %v13792_v5  ;;  %v13817_v12 = vpack.c.bf16 %v62_v11, %v61_v10  ;;  %v54_v13 = vld [vmem:[%s16125_s0 + $0x8] sm:$0xff]  ;;  %v10392_v14 = vld [vmem:[%s16131_s6] ss:$0 sm:$0xff]  ;;  %v208_v34 = vld [vmem:[%s16127_s2 + $0x10] sm:$0xff]  ;;  %vm564_vm4 = vcmask 130048   ;;  %vm9793_vm5 = vcmask 1040384  }
   0x7   :  { %v206_v31 = vld [vmem:[%s16127_s2] sm:$0xff]  ;;  %v207_v32 = vld [vmem:[%s16127_s2 + $0x8] sm:$0xff]  ;;  %v209_v35 = vld [vmem:[%s16127_s2 + $0x18] sm:$0xff] }
   0x8   :  { %v13847_v33 = vpack.c.bf16 %v207_v32, %v206_v31  ;;  %v13857_v36 = vpack.c.bf16 %v209_v35, %v208_v34  ;;  %v10405_v37 = vld [vmem:[%s16127_s2 + $0x80] sm:$0xff]  ;;  %v10406_v38 = vld [vmem:[%s16127_s2 + $0x88] sm:$0xff]  ;;  %v10407_v54 = vld [vmem:[%s16127_s2 + $0x90] sm:$0xff] }
   0x9   :  { %12504 = vmatpush3.bf16.msra.mxu0 %v13792_v5  ;;  %v13867_v39 = vpack.c.bf16 %v10406_v38, %v10405_v37  ;;  %v10400_v47 = vld [vmem:[%s16130_s5] ss:$0 sm:$0xff]  ;;  %v10401_v49 = vld [vmem:[%s16130_s5 + $0x1] ss:$0 sm:$0xff]  ;;  %v10408_v55 = vld [vmem:[%s16127_s2 + $0x98] sm:$0xff] }
   0xa   :  { %12506 = vmatprep.subr.bf16.mxu0 %v13807_v9  ;;  %v13888_v58 = vpack.c.bf16 %v10408_v55, %v10407_v54  ;;  %v10413_v59 = vld [vmem:[%s16127_s2 + $0x100] sm:$0xff]  ;;  %v10414_v60 = vld [vmem:[%s16127_s2 + $0x108] sm:$0xff]  ;;  %v10415_v62 = vld [vmem:[%s16127_s2 + $0x110] sm:$0xff] }
   0xb   :  { %v13902_v61 = vpack.c.bf16 %v10414_v60, %v10413_v59  ;;  %v10416_v63 = vld [vmem:[%s16127_s2 + $0x118] sm:$0xff]  ;;  %v10402_v1 = vld [vmem:[%s16128_s3] ss:$0 sm:$0xff]  ;;  %v10410_v7 = vld [vmem:[%s16128_s3 + $0x4] ss:$0 sm:$0xff] }
   0xc   :  { %v13912_v0 = vpack.c.bf16 %v10416_v63, %v10415_v62  ;;  %vm13938_vm3 = vmpackc.low %vm474_vm2, %vm474_vm2  ;;  %v668_v59 = vld [vmem:[%s16129_s4] sm:$0xff] }
   0xd   :  { %12508 = vmatpush3.bf16.msra.mxu0 %v13807_v9 }
   0xe   :  { %12510 = vmatprep.subr.bf16.mxu0 %v13817_v12 }
  0x11   :  { %12512 = vmatpush3.bf16.msra.mxu0 %v13817_v12 }
  0x12   :  { %12514 = vmatprep.subr.bf16.mxu0 %v13847_v33 }
  0x14   :  { %11460 = vmatmul.mubr.msk.f32.vlgmr.msra.gmra.mrb[0].mxu0 %vm69_vm0, %v54_v13  ;;  %v10438_v13 = vld [vmem:[%s16127_s2 + $0xa0] sm:$0xff] }
  0x15   :  { %12516 = vmatpush3.bf16.msra.mxu0 %v13847_v33 }
  0x16   :  { %12518 = vmatprep.subr.bf16.mxu0 %v13857_v36 }
  0x19   :  { %12520 = vmatpush3.bf16.msra.mxu0 %v13857_v36 }
  0x1a   :  { %12522 = vmatprep.subr.bf16.mxu0 %v13867_v39 }
  0xe7   :  { %v11461_v15 = vpop.f32.mrb[0].mxu0 }
  0xe8   :  { %v142_v16 = vpop.f32.mrb[1].mxu0  ;;  %v13831_v18 = vadd.f32 %v11461_v15, %v10392_v14 }
  0xe9   :  { %v13829_v17 = vadd.f32 %v10392_v14, %v142_v16  ;;  %v10439_v14 = vld [vmem:[%s16127_s2 + $0xa8] sm:$0xff] }
  0xea   :  { %v166_v20 = vsel %vm162_vm1, %v13831_v18, 0.0 }
  0xeb   :  { %v163_v19 = vsel %vm162_vm1, %v13829_v17, 0.0 }
  0xec   :  { %164 = vadd.xlane.f32.xlu0 %v163_v19 }
  0xf0   :  { %167 = vadd.xlane.f32.xlu0 %v166_v20  ;;  %v13942_v20 = vpack.c.bf16 %v10439_v14, %v10438_v13 }
 0x179   :  { %v165_v21 = vpop.xlane.xlu0 %164 }
 0x17a   :  { %v170_v22 = vmul.f32 0.03125, %v165_v21  ;;  %v10418_v21 = vld [vmem:[%s16128_s3 + $0x8] ss:$0 sm:$0xff] }
 0x17c   :  { %v172_v23 = vsub.f32 %v13829_v17, %v170_v22 }
 0x17d   :  { %v168_v24 = vpop.xlane.xlu0 %167 }
 0x17e   :  { %v171_v25 = vmul.f32 0.03125, %v168_v24  ;;  %v174_v26 = vmul.f32 %v172_v23, %v172_v23 }
 0x180   :  { %v173_v27 = vsub.f32 %v13831_v18, %v171_v25  ;;  %v176_v28 = vsel %vm162_vm1, %v174_v26, 0.0  ;;  %v10440_v25 = vld [vmem:[%s16127_s2 + $0xb0] sm:$0xff]  ;;  %v10441_v26 = vld [vmem:[%s16127_s2 + $0xb8] sm:$0xff] }
 0x181   :  { %177 = vadd.xlane.f32.xlu1 %v176_v28 }
 0x182   :  { %v175_v29 = vmul.f32 %v173_v27, %v173_v27 }
 0x184   :  { %v179_v30 = vsel %vm162_vm1, %v175_v29, 0.0 }
 0x185   :  { %180 = vadd.xlane.f32.xlu1 %v179_v30  ;;  %v13958_v30 = vpack.c.bf16 %v10441_v26, %v10440_v25 }
 0x20e   :  { %v178_v40 = vpop.xlane.xlu1 %177 }
 0x20f   :  { %v182_v41 = vmul.f32 0.03125, %v178_v40  ;;  %v10443_v40 = vld [vmem:[%s16128_s3 + $0x5] ss:$0 sm:$0xff] }
 0x211   :  { %v184_v42 = vadd.f32 1e-06, %v182_v41 }
 0x212   :  { %v181_v43 = vpop.xlane.xlu1 %180 }
 0x213   :  { %13447 = vrsqrt.f32 %v184_v42  ;;  %v183_v44 = vmul.f32 0.03125, %v181_v43 }
 0x215   :  { %v185_v45 = vadd.f32 1e-06, %v183_v44 }
 0x217   :  { %13449 = vrsqrt.f32 %v185_v45 }
 0x21d   :  { %v13448_v46 = vpop.eup %13447 }
 0x21e   :  { %v188_v48 = vmul.f32 %v13448_v46, %v172_v23 }
 0x220   :  { %v196_v50 = vmul.f32 %v10400_v47, %v188_v48 }
 0x221   :  { %v13450_v51 = vpop.eup %13449 }
 0x222   :  { %v13876_v52 = vadd.f32 %v10401_v49, %v196_v50  ;;  %v189_v53 = vmul.f32 %v13450_v51, %v173_v27 }
 0x224   :  { %v197_v56 = vmul.f32 %v10400_v47, %v189_v53  ;;  %11470 = vmatprep.mubr.msk.f32.mxu0 %vm162_vm1, %v13876_v52 }
 0x226   :  { %v13886_v57 = vadd.f32 %v10401_v49, %v197_v56 }
 0x228   :  { %11471 = vmatmul.mubr.msk.f32.vlgmr.msra.gmra.mrb[2].mxu0 %vm162_vm1, %v13886_v57 }
 0x229   :  { %12524 = vmatpush3.bf16.msra.mxu0 %v13867_v39  ;;  %11481 = vmatprep.mubr.msk.f32.mxu0 %vm162_vm1, %v13876_v52 }
 0x22a   :  { %12526 = vmatprep.subr.bf16.mxu0 %v13888_v58 }
 0x22d   :  { %12528 = vmatpush3.bf16.msra.mxu0 %v13888_v58 }
 0x22e   :  { %12530 = vmatprep.subr.bf16.mxu0 %v13902_v61 }
 0x230   :  { %11482 = vmatmul.mubr.msk.f32.vlgmr.msra.gmra.mrb[4].mxu0 %vm162_vm1, %v13886_v57 }
 0x231   :  { %12532 = vmatpush3.bf16.msra.mxu0 %v13902_v61  ;;  %11492 = vmatprep.mubr.msk.f32.mxu0 %vm162_vm1, %v13876_v52 }
 0x232   :  { %12534 = vmatprep.subr.bf16.mxu0 %v13912_v0 }
 0x235   :  { %12536 = vmatpush3.bf16.msra.mxu0 %v13912_v0 }
 0x238   :  { %11493 = vmatmul.mubr.msk.f32.vlgmr.msra.gmra.mrb[6].mxu0 %vm162_vm1, %v13886_v57 }
 0x2fb   :  { %v11472_v2 = vpop.f32.mrb[2].mxu0 }
 0x2fc   :  { %v289_v4 = vpop.f32.mrb[3].mxu0  ;;  %v295_v28 = vadd.f32 %v11472_v2, %v10402_v1 }
 0x2fd   :  { %v290_v6 = vadd.f32 %v10402_v1, %v289_v4 }
 0x2ff   :  { %11499 = vmatprep.mubr.msk.f32.mxu1 %vm474_vm2, %v290_v6  ;;  %v10430_v6 = vld [vmem:[%s16127_s2 + $0x20] sm:$0xff] }
 0x303   :  { %v11483_v8 = vpop.f32.mrb[4].mxu0 }
 0x304   :  { %v383_v10 = vadd.f32 %v11483_v8, %v10410_v7  ;;  %v377_v11 = vpop.f32.mrb[5].mxu0 }
 0x305   :  { %v378_v15 = vadd.f32 %v10410_v7, %v377_v11  ;;  %v10431_v7 = vld [vmem:[%s16127_s2 + $0x28] sm:$0xff]  ;;  %v10433_v11 = vld [vmem:[%s16127_s2 + $0x38] sm:$0xff] }
 0x306   :  { %v13990_v8 = vpack.c.bf16 %v10431_v7, %v10430_v6 }
 0x307   :  { %v12537_v19 = vpack.c.bf16 %v383_v10, %v378_v15  ;;  %v10432_v10 = vld [vmem:[%s16127_s2 + $0x30] sm:$0xff] }
 0x308   :  { %v13999_v15 = vpack.c.bf16 %v10433_v11, %v10432_v10  ;;  %v10465_v11 = vld [vmem:[%s16127_s2 + $0x50] sm:$0xff] }
 0x309   :  { %12539 = vmatprep.subr.msk.bf16.mxu1 %vm13938_vm3, %v12537_v19 }
 0x30a   :  { %12542 = vmatpush3.bf16.xpose.msk.msra.mxu1 %vm13938_vm3, %v12537_v19  ;;  %v10446_v19 = vld [vmem:[%s16127_s2 + $0x120] sm:$0xff] }
 0x30b   :  { %v11494_v22 = vpop.f32.mrb[6].mxu0  ;;  %12556 = vmatprep.subr.bf16.mxu1 %v13942_v20 }
 0x30c   :  { %v471_v23 = vadd.f32 %v11494_v22, %v10418_v21  ;;  %v465_v24 = vpop.f32.mrb[7].mxu0 }
 0x30d   :  { %v466_v27 = vadd.f32 %v10418_v21, %v465_v24  ;;  %v10447_v21 = vld [vmem:[%s16127_s2 + $0x128] sm:$0xff]  ;;  %v10449_v24 = vld [vmem:[%s16127_s2 + $0x138] sm:$0xff] }
 0x30e   :  { %v14013_v22 = vpack.c.bf16 %v10447_v21, %v10446_v19 }
 0x30f   :  { %v12543_v29 = vpack.c.bf16 %v471_v23, %v466_v27  ;;  %v10448_v23 = vld [vmem:[%s16127_s2 + $0x130] sm:$0xff] }
 0x310   :  { %v14023_v25 = vpack.c.bf16 %v10449_v24, %v10448_v23  ;;  %v10479_v24 = vld [vmem:[%s16127_s2 + $0x140] sm:$0xff] }
 0x311   :  { %11500 = vmatmul.mubr.msk.f32.vlgmr.msra.gmra.mrb[0].mxu1 %vm474_vm2, %v295_v28  ;;  %12544 = vmatprep.subr.bf16.mxu0 %v12543_v29  ;;  %v10435_v28 = vld [vmem:[%s16128_s3 + $0x1] ss:$0 sm:$0xff] }
 0x312   :  { %12546 = vmatpush3.bf16.msra.mxu0 %v12543_v29  ;;  %12558 = vmatpush3.bf16.msra.mxu1 %v13942_v20 }
 0x313   :  { %11533 = vmatprep.mubr.msk.f32.mxu1 %vm162_vm1, %v13876_v52  ;;  %12560 = vmatprep.subr.bf16.mxu1 %v13958_v30 }
 0x314   :  { %11509 = vmatprep.subr.mxu0 %v668_v59 }
 0x316   :  { %12562 = vmatpush3.bf16.msra.mxu1 %v13958_v30 }
 0x319   :  { %11534 = vmatmul.mubr.msk.f32.vlgmr.msra.gmra.mrb[2].mxu1 %vm162_vm1, %v13886_v57 }
 0x3e4   :  { %v11501_v31 = vpop.f32.mrb[0].mxu1 }
 0x3e5   :  { %v563_v32 = vmul.f32 0.35355338, %v11501_v31  ;;  %v553_v34 = vpop.f32.mrb[1].mxu1 }
 0x3e6   :  { %v562_v35 = vmul.f32 0.35355338, %v553_v34 }
 0x3e7   :  { %v568_v37 = vsel %vm564_vm4, %v563_v32, -inf }
 0x3e8   :  { %569 = vmax.xlane.f32.xlu1 %v568_v37  ;;  %v565_v38 = vsel %vm564_vm4, %v562_v35, -inf }
 0x3e9   :  { %566 = vmax.xlane.f32.xlu0 %v565_v38 }
 0x3ec   :  { %v11535_v41 = vpop.f32.mrb[2].mxu1 }
 0x3ed   :  { %v931_v42 = vadd.f32 %v11535_v41, %v10443_v40  ;;  %v925_v43 = vpop.f32.mrb[3].mxu1 }
 0x3ee   :  { %v926_v44 = vadd.f32 %v10443_v40, %v925_v43 }
 0x3f0   :  { %v12571_v45 = vpack.c.bf16 %v931_v42, %v926_v44 }
 0x3f2   :  { %12573 = vmatprep.subr.msk.bf16.mxu1 %vm13938_vm3, %v12571_v45 }
 0x3f3   :  { %12576 = vmatpush3.bf16.xpose.msk.msra.mxu1 %vm13938_vm3, %v12571_v45 }
 0x475   :  { %v570_v46 = vpop.xlane.xlu1 %569 }
 0x476   :  { %v572_v47 = vsub.f32 %v563_v32, %v570_v46  ;;  %v567_v48 = vpop.xlane.xlu0 %566 }
 0x477   :  { %v571_v49 = vsub.f32 %v562_v35, %v567_v48  ;;  %v10451_v35 = vld [vmem:[%s16128_s3 + $0x9] ss:$0 sm:$0xff] }
 0x478   :  { %v575_v50 = vmul.f32 1.442695, %v572_v47 }
 0x479   :  { %v573_v51 = vmul.f32 1.442695, %v571_v49 }
 0x47a   :  { %13451 = vpow2.f32 %v575_v50 }
 0x47b   :  { %13453 = vpow2.f32 %v573_v51 }
 0x484   :  { %v13452_v53 = vpop.eup %13451 }
 0x485   :  { %v13454_v54 = vpop.eup %13453  ;;  %v580_v55 = vsel %vm564_vm4, %v13452_v53, 0.0 }
 0x486   :  { %581 = vadd.xlane.f32.xlu1 %v580_v55  ;;  %v577_v56 = vsel %vm564_vm4, %v13454_v54, 0.0 }
 0x487   :  { %578 = vadd.xlane.f32.xlu0 %v577_v56 }
 0x513   :  { %v582_v60 = vpop.xlane.xlu1 %581 }
 0x514   :  { %13455 = vrcp.f32 %v582_v60  ;;  %v579_v62 = vpop.xlane.xlu0 %578 }
 0x515   :  { %13457 = vrcp.f32 %v579_v62 }
 0x51e   :  { %v13456_v63 = vpop.eup %13455 }
 0x51f   :  { %v13458_v1 = vpop.eup %13457  ;;  %v586_v4 = vmul.f32 %v13456_v63, %v13452_v53  ;;  %v10463_v63 = vld [vmem:[%s16127_s2 + $0x40] sm:$0xff] }
 0x520   :  { %v585_v2 = vmul.f32 %v13458_v1, %v13454_v54  ;;  %v10464_v1 = vld [vmem:[%s16127_s2 + $0x48] sm:$0xff] }
 0x522   :  { %11506 = vmatprep.mubr.msk.f32.mxu0 %vm564_vm4, %v585_v2  ;;  %v14056_v2 = vpack.c.bf16 %v10464_v1, %v10463_v63 }
 0x523   :  { %11507 = vmatmul.mubr.msk.f32.vlgmr.msra.gmra.mrb[8].mxu0 %vm564_vm4, %v586_v4  ;;  %v10460_v4 = vld [vmem:[%s16129_s4 + $0x8] sm:$0xff] }
 0x524   :  { %11510 = vmatpush3.msra.mxu0 %v668_v59  ;;  %11561 = vmatprep.subr.mxu1 %v10460_v4 }
 0x525   :  { %12548 = vmatprep.subr.bf16.mxu0 %v13990_v8 }
 0x5f6   :  { %v11508_v13 = vpop.f32.mrb[8].mxu0 }
 0x5f7   :  { %v659_v14 = vpop.f32.mrb[9].mxu0 }
 0x5f8   :  { %11511 = vmatprep.mubr.msk.f32.mxu0 %vm474_vm2, %v659_v14 }
 0x5f9   :  { %11512 = vmatmul.mubr.msk.f32.vlgmr.msra.gmra.mrb[10].mxu0 %vm474_vm2, %v11508_v13  ;;  %v10466_v13 = vld [vmem:[%s16127_s2 + $0x58] sm:$0xff] }
 0x5fa   :  { %12550 = vmatpush3.bf16.msra.mxu0 %v13990_v8  ;;  %11522 = vmatprep.mubr.msk.f32.mxu0 %vm162_vm1, %v13876_v52  ;;  %v14068_v23 = vpack.c.bf16 %v10466_v13, %v10465_v11 }
 0x5fb   :  { %12552 = vmatprep.subr.bf16.mxu0 %v13999_v15 }
 0x5fe   :  { %12554 = vmatpush3.bf16.msra.mxu0 %v13999_v15 }
 0x5ff   :  { %12564 = vmatprep.subr.bf16.mxu0 %v14013_v22 }
 0x601   :  { %11523 = vmatmul.mubr.msk.f32.vlgmr.msra.gmra.mrb[12].mxu0 %vm162_vm1, %v13886_v57 }
 0x602   :  { %12566 = vmatpush3.bf16.msra.mxu0 %v14013_v22  ;;  %11544 = vmatprep.mubr.msk.f32.mxu0 %vm162_vm1, %v13876_v52 }
 0x603   :  { %12568 = vmatprep.subr.bf16.mxu0 %v14023_v25 }
 0x606   :  { %12570 = vmatpush3.bf16.msra.mxu0 %v14023_v25 }
 0x609   :  { %11545 = vmatmul.mubr.msk.f32.vlgmr.msra.gmra.mrb[14].mxu0 %vm162_vm1, %v13886_v57 }
 0x6cc   :  { %v14034_v26 = vpop.f32.mrb[10].mxu0 }
 0x6cd   :  { %v14036_v27 = vpop.f32.mrb[11].mxu0 }
 0x6d4   :  { %v11524_v29 = vpop.f32.mrb[12].mxu0 }
 0x6d5   :  { %v837_v31 = vpop.f32.mrb[13].mxu0  ;;  %v843_v34 = vadd.f32 %v11524_v29, %v10435_v28 }
 0x6d6   :  { %v838_v32 = vadd.f32 %v10435_v28, %v837_v31  ;;  %v10480_v28 = vld [vmem:[%s16127_s2 + $0x148] sm:$0xff]  ;;  %v10481_v31 = vld [vmem:[%s16127_s2 + $0x150] sm:$0xff] }
 0x6d7   :  { %v14082_v29 = vpack.c.bf16 %v10480_v28, %v10479_v24 }
 0x6d8   :  { %11551 = vmatprep.mubr.msk.f32.mxu1 %vm474_vm2, %v838_v32  ;;  %v10482_v32 = vld [vmem:[%s16127_s2 + $0x158] sm:$0xff] }
 0x6d9   :  { %11552 = vmatmul.mubr.msk.f32.vlgmr.msra.gmra.mrb[4].mxu1 %vm474_vm2, %v843_v34  ;;  %v14092_v34 = vpack.c.bf16 %v10482_v32, %v10481_v31 }
 0x6da   :  { %11562 = vmatpush3.msra.mxu1 %v10460_v4 }
 0x6dc   :  { %v11546_v37 = vpop.f32.mrb[14].mxu0 }
 0x6dd   :  { %v1019_v38 = vadd.f32 %v11546_v37, %v10451_v35  ;;  %v1013_v40 = vpop.f32.mrb[15].mxu0  ;;  %v10472_v37 = vld [vmem:[%s16127_s2 + $0xc8] sm:$0xff] }
 0x6de   :  { %v1014_v41 = vadd.f32 %v10451_v35, %v1013_v40  ;;  %v10471_v35 = vld [vmem:[%s16127_s2 + $0xc0] sm:$0xff]  ;;  %v10473_v40 = vld [vmem:[%s16127_s2 + $0xd0] sm:$0xff] }
 0x6e0   :  { %v12577_v42 = vpack.c.bf16 %v1019_v38, %v1014_v41  ;;  %v14109_v38 = vpack.c.bf16 %v10472_v37, %v10471_v35  ;;  %v10474_v41 = vld [vmem:[%s16127_s2 + $0xd8] sm:$0xff] }
 0x6e2   :  { %12578 = vmatprep.subr.bf16.mxu0 %v12577_v42  ;;  %12590 = vmatprep.subr.bf16.mxu1 %v14109_v38 }
 0x6e3   :  { %12580 = vmatpush3.bf16.msra.mxu0 %v12577_v42 }
 0x6e4   :  { %12582 = vmatprep.subr.bf16.mxu0 %v14056_v2 }
 0x7ac   :  { %v11553_v43 = vpop.f32.mrb[4].mxu1 }
 0x7ad   :  { %v1110_v44 = vmul.f32 0.35355338, %v11553_v43  ;;  %v1100_v45 = vpop.f32.mrb[5].mxu1 }
 0x7ae   :  { %v1109_v46 = vmul.f32 0.35355338, %v1100_v45  ;;  %v10468_v45 = vld [vmem:[%s16128_s3 + $0x2] ss:$0 sm:$0xff] }
 0x7af   :  { %v1114_v47 = vsel %vm564_vm4, %v1110_v44, -inf }
 0x7b0   :  { %1115 = vmax.xlane.f32.xlu1 %v1114_v47  ;;  %v1111_v48 = vsel %vm564_vm4, %v1109_v46, -inf }
 0x7b1   :  { %1112 = vmax.xlane.f32.xlu0 %v1111_v48 }
 0x83d   :  { %v1116_v49 = vpop.xlane.xlu1 %1115 }
 0x83e   :  { %v1118_v50 = vsub.f32 %v1110_v44, %v1116_v49  ;;  %v1113_v51 = vpop.xlane.xlu0 %1112  ;;  %v14118_v44 = vpack.c.bf16 %v10474_v41, %v10473_v40  ;;  %v10484_v49 = vld [vmem:[%s16128_s3 + $0xa] ss:$0 sm:$0xff] }
 0x83f   :  { %v1117_v53 = vsub.f32 %v1109_v46, %v1113_v51 }
 0x840   :  { %v1121_v54 = vmul.f32 1.442695, %v1118_v50 }
 0x841   :  { %v1119_v55 = vmul.f32 1.442695, %v1117_v53 }
 0x842   :  { %13459 = vpow2.f32 %v1121_v54 }
 0x843   :  { %13461 = vpow2.f32 %v1119_v55 }
 0x84c   :  { %v13460_v56 = vpop.eup %13459 }
 0x84d   :  { %v13462_v59 = vpop.eup %13461  ;;  %v1126_v60 = vsel %vm564_vm4, %v13460_v56, 0.0 }
 0x84e   :  { %1127 = vadd.xlane.f32.xlu1 %v1126_v60  ;;  %v1123_v62 = vsel %vm564_vm4, %v13462_v59, 0.0 }
 0x84f   :  { %1124 = vadd.xlane.f32.xlu0 %v1123_v62 }
 0x8db   :  { %v1128_v6 = vpop.xlane.xlu1 %1127 }
 0x8dc   :  { %13463 = vrcp.f32 %v1128_v6  ;;  %v1125_v7 = vpop.xlane.xlu0 %1124 }
 0x8dd   :  { %13465 = vrcp.f32 %v1125_v7 }
 0x8e6   :  { %v13464_v10 = vpop.eup %13463 }
 0x8e7   :  { %v13466_v14 = vpop.eup %13465  ;;  %v1132_v21 = vmul.f32 %v13464_v10, %v13460_v56  ;;  %v10476_v56 = vld [vmem:[%s16128_s3 + $0x6] ss:$0 sm:$0xff] }
 0x8e8   :  { %v1131_v19 = vmul.f32 %v13466_v14, %v13462_v59 }
 0x8ea   :  { %11558 = vmatprep.mubr.msk.f32.mxu0 %vm564_vm4, %v1131_v19 }
 0x8eb   :  { %11559 = vmatmul.mubr.msk.f32.vlgmr.msra.gmra.mrb[16].mxu0 %vm564_vm4, %v1132_v21 }
 0x8ec   :  { %12584 = vmatpush3.bf16.msra.mxu0 %v14056_v2  ;;  %11574 = vmatprep.mubr.msk.f32.mxu0 %vm162_vm1, %v13876_v52 }
 0x8ed   :  { %12586 = vmatprep.subr.bf16.mxu0 %v14068_v23 }
 0x8f0   :  { %12588 = vmatpush3.bf16.msra.mxu0 %v14068_v23 }
 0x8f1   :  { %12598 = vmatprep.subr.bf16.mxu0 %v14082_v29 }
 0x8f3   :  { %11575 = vmatmul.mubr.msk.f32.vlgmr.msra.gmra.mrb[18].mxu0 %vm162_vm1, %v13886_v57 }
 0x8f4   :  { %12600 = vmatpush3.bf16.msra.mxu0 %v14082_v29  ;;  %11596 = vmatprep.mubr.msk.f32.mxu0 %vm162_vm1, %v13876_v52 }
 0x8f5   :  { %12602 = vmatprep.subr.bf16.mxu0 %v14092_v34 }
 0x8f8   :  { %12604 = vmatpush3.bf16.msra.mxu0 %v14092_v34 }
 0x8fb   :  { %11597 = vmatmul.mubr.msk.f32.vlgmr.msra.gmra.mrb[20].mxu0 %vm162_vm1, %v13886_v57 }
 0x9be   :  { %v11560_v42 = vpop.f32.mrb[16].mxu0 }
 0x9bf   :  { %v1205_v43 = vpop.f32.mrb[17].mxu0 }
 0x9c0   :  { %11563 = vmatprep.mubr.msk.f32.mxu1 %vm474_vm2, %v1205_v43  ;;  %v10497_v43 = vld [vmem:[%s16127_s2 + $0x68] sm:$0xff] }
 0x9c1   :  { %11564 = vmatmul.mubr.msk.f32.vlgmr.msra.gmra.mrb[6].mxu1 %vm474_vm2, %v11560_v42  ;;  %v10496_v42 = vld [vmem:[%s16127_s2 + $0x60] sm:$0xff] }
 0x9c2   :  { %12592 = vmatpush3.bf16.msra.mxu1 %v14109_v38  ;;  %11585 = vmatprep.mubr.msk.f32.mxu1 %vm162_vm1, %v13876_v52 }
 0x9c3   :  { %12594 = vmatprep.subr.bf16.mxu1 %v14118_v44 }
 0x9c6   :  { %v11576_v46 = vpop.f32.mrb[18].mxu0  ;;  %12596 = vmatpush3.bf16.msra.mxu1 %v14118_v44 }
 0x9c7   :  { %v1378_v47 = vpop.f32.mrb[19].mxu0  ;;  %v1384_v4 = vadd.f32 %v11576_v46, %v10468_v45  ;;  %v10493_v46 = vld [vmem:[%s16129_s4 + $0x10] sm:$0xff] }
 0x9c8   :  { %v1379_v48 = vadd.f32 %v10468_v45, %v1378_v47  ;;  %v14154_v45 = vpack.c.bf16 %v10497_v43, %v10496_v42  ;;  %v10509_v43 = vld [vmem:[%s16128_s3 + $0x7] ss:$0 sm:$0xff] }
 0x9c9   :  { %11586 = vmatmul.mubr.msk.f32.vlgmr.msra.gmra.mrb[8].mxu1 %vm162_vm1, %v13886_v57 }
 0x9ca   :  { %11603 = vmatprep.mubr.msk.f32.mxu1 %vm474_vm2, %v1379_v48 }
 0x9ce   :  { %v11598_v50 = vpop.f32.mrb[20].mxu0 }
 0x9cf   :  { %v1560_v51 = vadd.f32 %v11598_v50, %v10484_v49  ;;  %v1554_v53 = vpop.f32.mrb[21].mxu0  ;;  %v10498_v50 = vld [vmem:[%s16127_s2 + $0x70] sm:$0xff] }
 0x9d0   :  { %v1555_v54 = vadd.f32 %v10484_v49, %v1554_v53 }
 0x9d2   :  { %v12611_v55 = vpack.c.bf16 %v1560_v51, %v1555_v54  ;;  %v10499_v51 = vld [vmem:[%s16127_s2 + $0x78] sm:$0xff] }
 0x9d4   :  { %12612 = vmatprep.subr.bf16.mxu0 %v12611_v55 }
 0x9d5   :  { %12614 = vmatpush3.bf16.msra.mxu0 %v12611_v55 }
 0x9d6   :  { %12616 = vmatprep.subr.bf16.mxu0 %v14154_v45 }
 0xa9c   :  { %v11587_v59 = vpop.f32.mrb[8].mxu1 }
 0xa9d   :  { %v1472_v60 = vadd.f32 %v11587_v59, %v10476_v56  ;;  %v1466_v62 = vpop.f32.mrb[9].mxu1  ;;  %v10512_v59 = vld [vmem:[%s16127_s2 + $0x160] sm:$0xff] }
 0xa9e   :  { %v1467_v63 = vadd.f32 %v10476_v56, %v1466_v62  ;;  %v14166_v56 = vpack.c.bf16 %v10499_v51, %v10498_v50 }
 0xaa0   :  { %v12605_v1 = vpack.c.bf16 %v1472_v60, %v1467_v63  ;;  %v10513_v60 = vld [vmem:[%s16127_s2 + $0x168] sm:$0xff]  ;;  %v10514_v63 = vld [vmem:[%s16127_s2 + $0x170] sm:$0xff] }
 0xaa1   :  { %v14180_v62 = vpack.c.bf16 %v10513_v60, %v10512_v59 }
 0xaa2   :  { %12607 = vmatprep.subr.msk.bf16.mxu1 %vm13938_vm3, %v12605_v1 }
 0xaa3   :  { %12610 = vmatpush3.bf16.xpose.msk.msra.mxu1 %vm13938_vm3, %v12605_v1  ;;  %v10515_v1 = vld [vmem:[%s16127_s2 + $0x178] sm:$0xff] }
 0xaa4   :  { %11613 = vmatprep.subr.mxu1 %v10493_v46 }
 0xaaa   :  { %11604 = vmatmul.mubr.msk.f32.vlgmr.msra.gmra.mrb[10].mxu1 %vm474_vm2, %v1384_v4  ;;  %v14190_v4 = vpack.c.bf16 %v10515_v1, %v10514_v63 }
 0xaab   :  { %11614 = vmatpush3.msra.mxu1 %v10493_v46 }
 0xb7d   :  { %v11605_v6 = vpop.f32.mrb[10].mxu1 }
 0xb7e   :  { %v1651_v7 = vmul.f32 0.35355338, %v11605_v6  ;;  %v1641_v10 = vpop.f32.mrb[11].mxu1  ;;  %v10504_v6 = vld [vmem:[%s16127_s2 + $0xe0] sm:$0xff] }
 0xb7f   :  { %v1650_v11 = vmul.f32 0.35355338, %v1641_v10 }
 0xb80   :  { %v1655_v13 = vsel %vm564_vm4, %v1651_v7, -inf }
 0xb81   :  { %1656 = vmax.xlane.f32.xlu1 %v1655_v13  ;;  %v1652_v14 = vsel %vm564_vm4, %v1650_v11, -inf  ;;  %v10507_v13 = vld [vmem:[%s16127_s2 + $0xf8] sm:$0xff] }
 0xb82   :  { %1653 = vmax.xlane.f32.xlu0 %v1652_v14 }
 0xc0e   :  { %v1657_v19 = vpop.xlane.xlu1 %1656 }
 0xc0f   :  { %v1659_v21 = vsub.f32 %v1651_v7, %v1657_v19  ;;  %v1654_v24 = vpop.xlane.xlu0 %1653  ;;  %v10505_v7 = vld [vmem:[%s16127_s2 + $0xe8] sm:$0xff] }
 0xc10   :  { %v1658_v28 = vsub.f32 %v1650_v11, %v1654_v24  ;;  %v14207_v10 = vpack.c.bf16 %v10505_v7, %v10504_v6  ;;  %v10506_v11 = vld [vmem:[%s16127_s2 + $0xf0] sm:$0xff]  ;;  %v10501_v24 = vld [vmem:[%s16128_s3 + $0x3] ss:$0 sm:$0xff] }
 0xc11   :  { %v1662_v31 = vmul.f32 1.442695, %v1659_v21  ;;  %v14216_v21 = vpack.c.bf16 %v10507_v13, %v10506_v11 }
 0xc12   :  { %v1660_v32 = vmul.f32 1.442695, %v1658_v28  ;;  %12624 = vmatprep.subr.bf16.mxu1 %v14207_v10 }
 0xc13   :  { %13467 = vpow2.f32 %v1662_v31 }
 0xc14   :  { %13469 = vpow2.f32 %v1660_v32 }
 0xc1d   :  { %v13468_v35 = vpop.eup %13467 }
 0xc1e   :  { %v13470_v37 = vpop.eup %13469  ;;  %v1667_v40 = vsel %vm564_vm4, %v13468_v35, 0.0 }
 0xc1f   :  { %1668 = vadd.xlane.f32.xlu1 %v1667_v40  ;;  %v1664_v41 = vsel %vm564_vm4, %v13470_v37, 0.0 }
 0xc20   :  { %1665 = vadd.xlane.f32.xlu0 %v1664_v41 }
 0xcac   :  { %v1669_v47 = vpop.xlane.xlu1 %1668 }
 0xcad   :  { %13471 = vrcp.f32 %v1669_v47  ;;  %v1666_v48 = vpop.xlane.xlu0 %1665 }
 0xcae   :  { %13473 = vrcp.f32 %v1666_v48 }
 0xcb7   :  { %v13472_v49 = vpop.eup %13471 }
 0xcb8   :  { %v13474_v53 = vpop.eup %13473  ;;  %v1673_v55 = vmul.f32 %v13472_v49, %v13468_v35 }
 0xcb9   :  { %v1672_v54 = vmul.f32 %v13474_v53, %v13470_v37 }
 0xcbb   :  { %11610 = vmatprep.mubr.msk.f32.mxu0 %vm564_vm4, %v1672_v54 }
 0xcbc   :  { %11611 = vmatmul.mubr.msk.f32.vlgmr.msra.gmra.mrb[22].mxu0 %vm564_vm4, %v1673_v55 }
 0xcbd   :  { %12618 = vmatpush3.bf16.msra.mxu0 %v14154_v45  ;;  %11626 = vmatprep.mubr.msk.f32.mxu0 %vm162_vm1, %v13876_v52 }
 0xcbe   :  { %12620 = vmatprep.subr.bf16.mxu0 %v14166_v56 }
 0xcc1   :  { %12622 = vmatpush3.bf16.msra.mxu0 %v14166_v56 }
 0xcc2   :  { %12632 = vmatprep.subr.bf16.mxu0 %v14180_v62 }
 0xcc4   :  { %11627 = vmatmul.mubr.msk.f32.vlgmr.msra.gmra.mrb[24].mxu0 %vm162_vm1, %v13886_v57 }
 0xcc5   :  { %12634 = vmatpush3.bf16.msra.mxu0 %v14180_v62  ;;  %11648 = vmatprep.mubr.msk.f32.mxu0 %vm162_vm1, %v13876_v52 }
 0xcc6   :  { %12636 = vmatprep.subr.bf16.mxu0 %v14190_v4 }
 0xcc9   :  { %12638 = vmatpush3.bf16.msra.mxu0 %v14190_v4 }
 0xccc   :  { %11649 = vmatmul.mubr.msk.f32.vlgmr.msra.gmra.mrb[26].mxu0 %vm162_vm1, %v13886_v57 }
 0xd8f   :  { %v11612_v14 = vpop.f32.mrb[22].mxu0 }
 0xd90   :  { %v1746_v19 = vpop.f32.mrb[23].mxu0 }
 0xd91   :  { %11615 = vmatprep.mubr.msk.f32.mxu1 %vm474_vm2, %v1746_v19 }
 0xd92   :  { %11616 = vmatmul.mubr.msk.f32.vlgmr.msra.gmra.mrb[6].mxu1 %vm474_vm2, %v11612_v14 }
 0xd93   :  { %12626 = vmatpush3.bf16.msra.mxu1 %v14207_v10  ;;  %11637 = vmatprep.mubr.msk.f32.mxu1 %vm162_vm1, %v13876_v52  ;;  %v10517_v52 = vld [vmem:[%s16128_s3 + $0xb] ss:$0 sm:$0xff] }
 0xd94   :  { %12628 = vmatprep.subr.bf16.mxu1 %v14216_v21 }
 0xd97   :  { %v11628_v28 = vpop.f32.mrb[24].mxu0  ;;  %12630 = vmatpush3.bf16.msra.mxu1 %v14216_v21 }
 0xd98   :  { %v1919_v31 = vpop.f32.mrb[25].mxu0  ;;  %v1925_v50 = vadd.f32 %v11628_v28, %v10501_v24 }
 0xd99   :  { %v1920_v32 = vadd.f32 %v10501_v24, %v1919_v31  ;;  %v10526_v31 = vld [vmem:[%s16129_s4 + $0x18] sm:$0xff] }
 0xd9a   :  { %11638 = vmatmul.mubr.msk.f32.vlgmr.msra.gmra.mrb[12].mxu1 %vm162_vm1, %v13886_v57 }
 0xd9b   :  { %11655 = vmatprep.mubr.msk.f32.mxu1 %vm474_vm2, %v1920_v32 }
 0xd9f   :  { %v11650_v35 = vpop.f32.mrb[26].mxu0 }
 0xda0   :  { %v2101_v37 = vadd.f32 %v11650_v35, %v10517_v52  ;;  %v2095_v40 = vpop.f32.mrb[27].mxu0 }
 0xda1   :  { %v2096_v41 = vadd.f32 %v10517_v52, %v2095_v40 }
 0xda3   :  { %v12645_v42 = vpack.c.bf16 %v2101_v37, %v2096_v41 }
 0xda5   :  { %12646 = vmatprep.subr.bf16.mxu0 %v12645_v42 }
 0xda6   :  { %12648 = vmatpush3.bf16.msra.mxu0 %v12645_v42 }
 0xe6d   :  { %v11639_v46 = vpop.f32.mrb[12].mxu1 }
 0xe6e   :  { %v2013_v47 = vadd.f32 %v11639_v46, %v10509_v43  ;;  %v2007_v57 = vpop.f32.mrb[13].mxu1  ;;  %v10429_v46 = vld [vmem:[%s16130_s5 + $0x2] ss:$0 sm:$0xff] }
 0xe6f   :  { %v2008_v48 = vadd.f32 %v10509_v43, %v2007_v57  ;;  %v756_v57 = vadd.f32 %v10429_v46, %v14036_v27 }
 0xe71   :  { %v12639_v49 = vpack.c.bf16 %v2013_v47, %v2008_v48  ;;  %v757_v47 = vadd.f32 %v14034_v26, %v10429_v46 }
 0xe73   :  { %12641 = vmatprep.subr.msk.bf16.mxu1 %vm13938_vm3, %v12639_v49 }
 0xe74   :  { %12644 = vmatpush3.bf16.xpose.msk.msra.mxu1 %vm13938_vm3, %v12639_v49 }
 0xe75   :  { %11665 = vmatprep.subr.mxu1 %v10526_v31 }
 0xe7b   :  { %11656 = vmatmul.mubr.msk.f32.vlgmr.msra.gmra.mrb[14].mxu1 %vm474_vm2, %v1925_v50 }
 0xe7c   :  { %11666 = vmatpush3.msra.mxu1 %v10526_v31 }
 0xf4e   :  { %v11657_v51 = vpop.f32.mrb[14].mxu1 }
 0xf4f   :  { %v2192_v53 = vmul.f32 0.35355338, %v11657_v51  ;;  %v2182_v54 = vpop.f32.mrb[15].mxu1 }
 0xf50   :  { %v2191_v55 = vmul.f32 0.35355338, %v2182_v54 }
 0xf51   :  { %v2196_v59 = vsel %vm564_vm4, %v2192_v53, -inf }
 0xf52   :  { %2197 = vmax.xlane.f32.xlu1 %v2196_v59  ;;  %v2193_v60 = vsel %vm564_vm4, %v2191_v55, -inf }
 0xf53   :  { %2194 = vmax.xlane.f32.xlu0 %v2193_v60 }
 0xfdf   :  { %v2198_v63 = vpop.xlane.xlu1 %2197 }
 0xfe0   :  { %v2200_v1 = vsub.f32 %v2192_v53, %v2198_v63  ;;  %v2195_v6 = vpop.xlane.xlu0 %2194 }
 0xfe1   :  { %v2199_v7 = vsub.f32 %v2191_v55, %v2195_v6 }
 0xfe2   :  { %v2203_v11 = vmul.f32 1.442695, %v2200_v1 }
 0xfe3   :  { %v2201_v13 = vmul.f32 1.442695, %v2199_v7 }
 0xfe4   :  { %13475 = vpow2.f32 %v2203_v11 }
 0xfe5   :  { %13477 = vpow2.f32 %v2201_v13  ;;  %v2425_v13 = vld [vmem:[%s16132_s7] sm:$0xff] }
 0xfee   :  { %v13476_v14 = vpop.eup %13475 }
 0xfef   :  { %v13478_v19 = vpop.eup %13477  ;;  %v2208_v24 = vsel %vm564_vm4, %v13476_v14, 0.0 }
 0xff0   :  { %2209 = vadd.xlane.f32.xlu1 %v2208_v24  ;;  %v2205_v28 = vsel %vm564_vm4, %v13478_v19, 0.0  ;;  %v2427_v24 = vld [vmem:[%s16132_s7 + $0x10] sm:$0xff] }
 0xff1   :  { %2206 = vadd.xlane.f32.xlu0 %v2205_v28  ;;  %v2428_v28 = vld [vmem:[%s16132_s7 + $0x18] sm:$0xff] }
 0xff2   :  { %v14288_v31 = vpack.c.bf16 %v2428_v28, %v2427_v24  ;;  %v2544_v24 = vld [vmem:[%s16134_s9 + $0x48] sm:$0xff]  ;;  %v2545_v28 = vld [vmem:[%s16134_s9 + $0x50] sm:$0xff] }
0x107d   :  { %v2210_v32 = vpop.xlane.xlu1 %2209 }
0x107e   :  { %13479 = vrcp.f32 %v2210_v32  ;;  %v2207_v52 = vpop.xlane.xlu0 %2206 }
0x107f   :  { %13481 = vrcp.f32 %v2207_v52 }
0x1088   :  { %v13480_v35 = vpop.eup %13479 }
0x1089   :  { %v13482_v37 = vpop.eup %13481  ;;  %v2214_v41 = vmul.f32 %v13480_v35, %v13476_v14  ;;  %v2426_v14 = vld [vmem:[%s16132_s7 + $0x8] sm:$0xff] }
0x108a   :  { %v2213_v40 = vmul.f32 %v13482_v37, %v13478_v19  ;;  %v14278_v19 = vpack.c.bf16 %v2426_v14, %v2425_v13  ;;  %v2543_v14 = vld [vmem:[%s16134_s9 + $0x40] sm:$0xff] }
0x108c   :  { %11662 = vmatprep.mubr.msk.f32.mxu0 %vm564_vm4, %v2213_v40  ;;  %12650 = vmatprep.subr.bf16.mxu0 %v14278_v19 }
0x108d   :  { %11663 = vmatmul.mubr.msk.f32.vlgmr.msra.gmra.mrb[28].mxu0 %vm564_vm4, %v2214_v41 }
0x108e   :  { %12652 = vmatpush3.bf16.msra.mxu0 %v14278_v19 }
0x108f   :  { %12654 = vmatprep.subr.bf16.mxu0 %v14288_v31 }
0x1092   :  { %12656 = vmatpush3.bf16.msra.mxu0 %v14288_v31 }
0x1160   :  { %v11664_v42 = vpop.f32.mrb[28].mxu0 }
0x1161   :  { %v2287_v43 = vpop.f32.mrb[29].mxu0 }
0x1162   :  { %11667 = vmatprep.mubr.msk.f32.mxu1 %vm474_vm2, %v2287_v43  ;;  %v10529_v43 = vld [vmem:[%s16130_s5 + $0x3] ss:$0 sm:$0xff] }
0x1163   :  { %11668 = vmatmul.mubr.msk.f32.vlgmr.msra.gmra.mrb[6].mxu1 %vm474_vm2, %v11664_v42 }
0x1236   :  { %v11669_v48 = vpop.f32.mrb[6].mxu1 }
0x1237   :  { %v13410_v49 = vadd.f32 %v11669_v48, %v757_v47  ;;  %v2370_v50 = vpop.f32.mrb[7].mxu1  ;;  %v10530_v48 = vld [vmem:[%s16130_s5 + $0x4] ss:$0 sm:$0xff] }
0x1238   :  { %v13412_v51 = vadd.f32 %v2370_v50, %v756_v57 }
0x1239   :  { %v14259_v53 = vadd.f32 %v13410_v49, %v13831_v18 }
0x123a   :  { %v14262_v54 = vadd.f32 %v13412_v51, %v13829_v17 }
0x123b   :  { %v2386_v55 = vsel %vm162_vm1, %v14259_v53, 0.0 }
0x123c   :  { %2387 = vadd.xlane.f32.xlu1 %v2386_v55  ;;  %v2383_v59 = vsel %vm162_vm1, %v14262_v54, 0.0 }
0x123d   :  { %2384 = vadd.xlane.f32.xlu0 %v2383_v59  ;;  %v2535_v59 = vld [vmem:[%s16134_s9] sm:$0xff] }
0x12c9   :  { %v2388_v26 = vpop.xlane.xlu1 %2387 }
0x12ca   :  { %v2390_v27 = vmul.f32 0.03125, %v2388_v26  ;;  %v2385_v60 = vpop.xlane.xlu0 %2384  ;;  %v2536_v26 = vld [vmem:[%s16134_s9 + $0x8] sm:$0xff] }
0x12cb   :  { %v2389_v63 = vmul.f32 0.03125, %v2385_v60  ;;  %v2537_v60 = vld [vmem:[%s16134_s9 + $0x10] sm:$0xff] }
0x12cc   :  { %v2392_v1 = vsub.f32 %v14259_v53, %v2390_v27  ;;  %v14306_v27 = vpack.c.bf16 %v2536_v26, %v2535_v59 }
0x12cd   :  { %v2391_v18 = vsub.f32 %v14262_v54, %v2389_v63  ;;  %v2538_v63 = vld [vmem:[%s16134_s9 + $0x18] sm:$0xff] }
0x12ce   :  { %v2394_v6 = vmul.f32 %v2392_v1, %v2392_v1  ;;  %12658 = vmatprep.subr.bf16.mxu1 %v14306_v27 }
0x12cf   :  { %v2393_v7 = vmul.f32 %v2391_v18, %v2391_v18  ;;  %12660 = vmatpush3.bf16.msra.mxu1 %v14306_v27 }
0x12d0   :  { %v2398_v17 = vsel %vm162_vm1, %v2394_v6, 0.0  ;;  %v2540_v6 = vld [vmem:[%s16134_s9 + $0x28] sm:$0xff] }
0x12d1   :  { %2399 = vadd.xlane.f32.xlu1 %v2398_v17  ;;  %v2395_v11 = vsel %vm162_vm1, %v2393_v7, 0.0  ;;  %v2541_v17 = vld [vmem:[%s16134_s9 + $0x30] sm:$0xff] }
0x12d2   :  { %2396 = vadd.xlane.f32.xlu0 %v2395_v11  ;;  %v2542_v11 = vld [vmem:[%s16134_s9 + $0x38] sm:$0xff] }
0x12d3   :  { %v14336_v13 = vpack.c.bf16 %v2542_v11, %v2541_v17 }
0x135e   :  { %v2400_v32 = vpop.xlane.xlu1 %2399 }
0x135f   :  { %v2402_v52 = vmul.f32 0.03125, %v2400_v32  ;;  %v2397_v35 = vpop.xlane.xlu0 %2396  ;;  %v14349_v32 = vpack.c.bf16 %v2544_v24, %v2543_v14 }
0x1360   :  { %v2401_v37 = vmul.f32 0.03125, %v2397_v35 }
0x1361   :  { %v2404_v40 = vadd.f32 1e-06, %v2402_v52  ;;  %v2546_v52 = vld [vmem:[%s16134_s9 + $0x58] sm:$0xff] }
0x1362   :  { %v2403_v41 = vadd.f32 1e-06, %v2401_v37  ;;  %v14354_v35 = vpack.c.bf16 %v2546_v52, %v2545_v28  ;;  %v2547_v37 = vld [vmem:[%s16134_s9 + $0x60] sm:$0xff] }
0x1363   :  { %13483 = vrsqrt.f32 %v2404_v40  ;;  %v2548_v40 = vld [vmem:[%s16134_s9 + $0x68] sm:$0xff] }
0x1364   :  { %13485 = vrsqrt.f32 %v2403_v41  ;;  %v14365_v41 = vpack.c.bf16 %v2548_v40, %v2547_v37 }
0x136d   :  { %v13484_v42 = vpop.eup %13483 }
0x136e   :  { %v13486_v46 = vpop.eup %13485  ;;  %v2408_v47 = vmul.f32 %v13484_v42, %v2392_v1  ;;  %v14316_v1 = vpack.c.bf16 %v2538_v63, %v2537_v60  ;;  %v2549_v42 = vld [vmem:[%s16134_s9 + $0x70] sm:$0xff] }
0x136f   :  { %v2407_v57 = vmul.f32 %v13486_v46, %v2391_v18  ;;  %v2539_v18 = vld [vmem:[%s16134_s9 + $0x20] sm:$0xff] }
0x1370   :  { %v2416_v49 = vmul.f32 %v10529_v43, %v2408_v47  ;;  %12662 = vmatprep.subr.bf16.mxu1 %v14316_v1  ;;  %v14326_v7 = vpack.c.bf16 %v2540_v6, %v2539_v18  ;;  %v10531_v47 = vld [vmem:[%s16133_s8] ss:$0 sm:$0xff] }
0x1371   :  { %v2415_v50 = vmul.f32 %v10529_v43, %v2407_v57  ;;  %12664 = vmatpush3.bf16.msra.mxu1 %v14316_v1  ;;  %v2550_v43 = vld [vmem:[%s16134_s9 + $0x78] sm:$0xff] }
0x1372   :  { %v2424_v55 = vadd.f32 %v10530_v48, %v2416_v49  ;;  %12666 = vmatprep.subr.bf16.mxu1 %v14326_v7  ;;  %v14375_v46 = vpack.c.bf16 %v2550_v43, %v2549_v42 }
0x1373   :  { %v2423_v51 = vadd.f32 %v10530_v48, %v2415_v50 }
0x1375   :  { %11678 = vmatprep.mubr.msk.f32.mxu0 %vm162_vm1, %v2423_v51  ;;  %12668 = vmatpush3.bf16.msra.mxu1 %v14326_v7 }
0x1376   :  { %11679 = vmatmul.mubr.msk.f32.vlgmr.msra.gmra.mrb[30].mxu0 %vm162_vm1, %v2424_v55  ;;  %12670 = vmatprep.subr.bf16.mxu1 %v14336_v13 }
0x1379   :  { %12672 = vmatpush3.bf16.msra.mxu1 %v14336_v13 }
0x137a   :  { %12674 = vmatprep.subr.bf16.mxu1 %v14349_v32 }
0x137d   :  { %12676 = vmatpush3.bf16.msra.mxu1 %v14349_v32 }
0x137e   :  { %12678 = vmatprep.subr.bf16.mxu1 %v14354_v35 }
0x1381   :  { %12680 = vmatpush3.bf16.msra.mxu1 %v14354_v35 }
0x1382   :  { %12682 = vmatprep.subr.bf16.mxu1 %v14365_v41 }
0x1385   :  { %12684 = vmatpush3.bf16.msra.mxu1 %v14365_v41 }
0x1386   :  { %12686 = vmatprep.subr.bf16.mxu1 %v14375_v46 }
0x1389   :  { %12688 = vmatpush3.bf16.msra.mxu1 %v14375_v46 }
0x1449   :  { %v11680_v57 = vpop.f32.mrb[30].mxu0 }
0x144a   :  { %v2514_v48 = vadd.f32 %v11680_v57, %v10531_v47  ;;  %v2508_v49 = vpop.f32.mrb[31].mxu0 }
0x144b   :  { %v2509_v50 = vadd.f32 %v10531_v47, %v2508_v49  ;;  %v10534_v47 = vld [vmem:[%s16130_s5 + $0x5] ss:$0 sm:$0xff] }
0x144c   :  { %v2518_v51 = vmul.f32 %v2514_v48, %v2514_v48 }
0x144d   :  { %v2517_v55 = vmul.f32 %v2509_v50, %v2509_v50 }
0x144e   :  { %v2520_v59 = vmul.f32 %v2518_v51, %v2514_v48 }
0x144f   :  { %v2519_v26 = vmul.f32 %v2517_v55, %v2509_v50 }
0x1450   :  { %v2522_v60 = vmul.f32 0.044715, %v2520_v59 }
0x1451   :  { %v2521_v63 = vmul.f32 0.044715, %v2519_v26 }
0x1452   :  { %v2524_v18 = vadd.f32 %v2522_v60, %v2514_v48 }
0x1453   :  { %v2523_v6 = vadd.f32 %v2521_v63, %v2509_v50 }
0x1454   :  { %v2526_v17 = vmul.f32 0.7978846, %v2524_v18 }
0x1455   :  { %v2525_v11 = vmul.f32 0.7978846, %v2523_v6 }
0x1456   :  { %13487 = vtanh.f32 %v2526_v17 }
0x1457   :  { %13489 = vtanh.f32 %v2525_v11 }
0x1460   :  { %v13488_v14 = vpop.eup %13487 }
0x1461   :  { %v13490_v24 = vpop.eup %13489  ;;  %v2530_v28 = vadd.f32 1.0, %v13488_v14 }
0x1462   :  { %v2529_v52 = vadd.f32 1.0, %v13490_v24 }
0x1463   :  { %v2532_v37 = vmul.f32 0.5, %v2530_v28  ;;  %v10543_v28 = vld [vmem:[%s16127_s2 + $0x180] sm:$0xff] }
0x1464   :  { %v2531_v40 = vmul.f32 0.5, %v2529_v52  ;;  %v10544_v52 = vld [vmem:[%s16127_s2 + $0x188] sm:$0xff] }
0x1465   :  { %v2534_v43 = vmul.f32 %v2532_v37, %v2514_v48  ;;  %v14406_v37 = vpack.c.bf16 %v10544_v52, %v10543_v28 }
0x1466   :  { %v2533_v42 = vmul.f32 %v2531_v40, %v2509_v50  ;;  %v10545_v40 = vld [vmem:[%s16127_s2 + $0x190] sm:$0xff] }
0x1467   :  { %12690 = vmatprep.subr.bf16.mxu0 %v14406_v37 }
0x1468   :  { %11713 = vmatprep.mubr.f32.mxu1 %v2533_v42  ;;  %12692 = vmatpush3.bf16.msra.mxu0 %v14406_v37  ;;  %v10546_v42 = vld [vmem:[%s16127_s2 + $0x198] sm:$0xff] }
0x1469   :  { %11714 = vmatmul.mubr.f32.vlgmr.msra.gmra.mrb[16].mxu1 %v2534_v43  ;;  %v14416_v43 = vpack.c.bf16 %v10546_v42, %v10545_v40  ;;  %v10553_v40 = vld [vmem:[%s16127_s2 + $0x210] sm:$0xff]  ;;  %v10554_v42 = vld [vmem:[%s16127_s2 + $0x218] sm:$0xff] }
0x146b   :  { %12694 = vmatprep.subr.bf16.mxu0 %v14416_v43 }
0x146c   :  { %12696 = vmatpush3.bf16.msra.mxu0 %v14416_v43 }
0x153c   :  { %v11715_v57 = vpop.f32.mrb[16].mxu1 }
0x153d   :  { %v2627_v49 = vadd.f32 %v11715_v57, %v14259_v53  ;;  %v2617_v51 = vpop.f32.mrb[17].mxu1  ;;  %v10552_v57 = vld [vmem:[%s16127_s2 + $0x208] sm:$0xff] }
0x153e   :  { %v2626_v55 = vadd.f32 %v2617_v51, %v14262_v54 }
0x153f   :  { %v14388_v59 = vadd.f32 %v10534_v47, %v2627_v49 }
0x1540   :  { %v14390_v26 = vadd.f32 %v10534_v47, %v2626_v55  ;;  %v10551_v47 = vld [vmem:[%s16127_s2 + $0x200] sm:$0xff] }
0x1541   :  { %v2651_v50 = vsel %vm162_vm1, %v14388_v59, 0.0  ;;  %v14426_v49 = vpack.c.bf16 %v10552_v57, %v10551_v47 }
0x1542   :  { %2652 = vadd.xlane.f32.xlu1 %v2651_v50  ;;  %v2648_v48 = vsel %vm162_vm1, %v14390_v26, 0.0 }
0x1543   :  { %2649 = vadd.xlane.f32.xlu0 %v2648_v48  ;;  %16184 = vst [vmem:[#allocation5_spill] sm:$0xff] %v14426_v49  ;;  %12698 = vmatprep.subr.bf16.mxu0 %v14426_v49 }
0x15cf   :  { %v2653_v60 = vpop.xlane.xlu1 %2652 }
0x15d0   :  { %v2655_v63 = vmul.f32 0.03125, %v2653_v60  ;;  %v2650_v18 = vpop.xlane.xlu0 %2649 }
0x15d1   :  { %v2654_v6 = vmul.f32 0.03125, %v2650_v18 }
0x15d2   :  { %v2657_v53 = vsub.f32 %v14388_v59, %v2655_v63 }
0x15d3   :  { %v2656_v54 = vsub.f32 %v14390_v26, %v2654_v6  ;;  %v10541_v6 = vld [vmem:[%s16130_s5 + $0x6] ss:$0 sm:$0xff] }
0x15d4   :  { %v2659_v17 = vmul.f32 %v2657_v53, %v2657_v53 }
0x15d5   :  { %v2658_v11 = vmul.f32 %v2656_v54, %v2656_v54 }
0x15d6   :  { %v2663_v14 = vsel %vm162_vm1, %v2659_v17, 0.0 }
0x15d7   :  { %2664 = vadd.xlane.f32.xlu1 %v2663_v14  ;;  %v2660_v24 = vsel %vm162_vm1, %v2658_v11, 0.0 }
0x15d8   :  { %2661 = vadd.xlane.f32.xlu0 %v2660_v24  ;;  %v10542_v24 = vld [vmem:[%s16130_s5 + $0x7] ss:$0 sm:$0xff] }
0x1664   :  { %v2665_v51 = vpop.xlane.xlu1 %2664 }
0x1665   :  { %v2667_v55 = vmul.f32 0.03125, %v2665_v51  ;;  %v2662_v50 = vpop.xlane.xlu0 %2661  ;;  %v10560_v51 = vld [vmem:[%s16127_s2 + $0x288] sm:$0xff] }
0x1666   :  { %v2666_v48 = vmul.f32 0.03125, %v2662_v50  ;;  %v10561_v50 = vld [vmem:[%s16127_s2 + $0x290] sm:$0xff] }
0x1667   :  { %v2669_v60 = vadd.f32 1e-06, %v2667_v55 }
0x1668   :  { %v2668_v63 = vadd.f32 1e-06, %v2666_v48  ;;  %v10562_v48 = vld [vmem:[%s16127_s2 + $0x298] sm:$0xff] }
0x1669   :  { %13491 = vrsqrt.f32 %v2669_v60  ;;  %v14471_v60 = vpack.c.bf16 %v10562_v48, %v10561_v50  ;;  %v10564_v50 = vld [vmem:[%s16128_s3 + $0x14] ss:$0 sm:$0xff] }
0x166a   :  { %13493 = vrsqrt.f32 %v2668_v63  ;;  %v10548_v63 = vld [vmem:[%s16128_s3 + $0xc] ss:$0 sm:$0xff] }
0x166b   :  { %16187 = vst [vmem:[#allocation8_spill] sm:$0xff] %v14471_v60 }
0x1673   :  { %v13492_v18 = vpop.eup %13491 }
0x1674   :  { %v13494_v17 = vpop.eup %13493  ;;  %v2673_v11 = vmul.f32 %v13492_v18, %v2657_v53  ;;  %v14445_v53 = vpack.c.bf16 %v10554_v42, %v10553_v40  ;;  %v10578_v40 = vld [vmem:[%s16127_s2 + $0x1a8] sm:$0xff] }
0x1675   :  { %v2672_v14 = vmul.f32 %v13494_v17, %v2656_v54  ;;  %v10559_v54 = vld [vmem:[%s16127_s2 + $0x280] sm:$0xff] }
0x1676   :  { %v2681_v28 = vmul.f32 %v10541_v6, %v2673_v11  ;;  %16185 = vst [vmem:[#allocation6_spill] sm:$0xff] %v14445_v53  ;;  %v14461_v55 = vpack.c.bf16 %v10560_v51, %v10559_v54  ;;  %v10556_v11 = vld [vmem:[%s16128_s3 + $0x10] ss:$0 sm:$0xff] }
0x1677   :  { %v2680_v52 = vmul.f32 %v10541_v6, %v2672_v14 }
0x1678   :  { %v14443_v57 = vadd.f32 %v10542_v24, %v2681_v28  ;;  %16186 = vst [vmem:[#allocation7_spill] sm:$0xff] %v14461_v55 }
0x1679   :  { %v14441_v47 = vadd.f32 %v10542_v24, %v2680_v52  ;;  %v10577_v52 = vld [vmem:[%s16127_s2 + $0x1a0] sm:$0xff] }
0x167a   :  { %v14495_v51 = vpack.c.bf16 %v10578_v40, %v10577_v52 }
0x167b   :  { %11724 = vmatprep.mubr.msk.f32.mxu0 %vm162_vm1, %v14441_v47 }
0x167c   :  { %11725 = vmatmul.mubr.msk.f32.vlgmr.msra.gmra.mrb[32].mxu0 %vm162_vm1, %v14443_v57  ;;  %16188 = vst [vmem:[#allocation9_spill] sm:$0xff] %v14495_v51 }
0x167d   :  { %12700 = vmatpush3.bf16.msra.mxu0 %v14426_v49  ;;  %11735 = vmatprep.mubr.msk.f32.mxu0 %vm162_vm1, %v14441_v47 }
0x167e   :  { %12702 = vmatprep.subr.bf16.mxu0 %v14445_v53 }
0x1681   :  { %12704 = vmatpush3.bf16.msra.mxu0 %v14445_v53 }
0x1682   :  { %12706 = vmatprep.subr.bf16.mxu0 %v14461_v55 }
0x1684   :  { %11736 = vmatmul.mubr.msk.f32.vlgmr.msra.gmra.mrb[34].mxu0 %vm162_vm1, %v14443_v57 }
0x1685   :  { %12708 = vmatpush3.bf16.msra.mxu0 %v14461_v55  ;;  %11746 = vmatprep.mubr.msk.f32.mxu0 %vm162_vm1, %v14441_v47 }
0x1686   :  { %12710 = vmatprep.subr.bf16.mxu0 %v14471_v60 }
0x1689   :  { %12712 = vmatpush3.bf16.msra.mxu0 %v14471_v60 }
0x168c   :  { %11747 = vmatmul.mubr.msk.f32.vlgmr.msra.gmra.mrb[36].mxu0 %vm162_vm1, %v14443_v57 }
0x174f   :  { %v11726_v18 = vpop.f32.mrb[32].mxu0 }
0x1750   :  { %v2775_v6 = vpop.f32.mrb[33].mxu0 }
0x1751   :  { %v2776_v17 = vadd.f32 %v10548_v63, %v2775_v6 }
0x1753   :  { %11753 = vmatprep.mubr.msk.f32.mxu0 %vm474_vm2, %v2776_v17 }
0x1757   :  { %v11737_v14 = vpop.f32.mrb[34].mxu0 }
0x1758   :  { %v2869_v24 = vadd.f32 %v11737_v14, %v10556_v11  ;;  %v2863_v28 = vpop.f32.mrb[35].mxu0  ;;  %v10580_v14 = vld [vmem:[%s16127_s2 + $0x1b8] sm:$0xff] }
0x1759   :  { %v2864_v42 = vadd.f32 %v10556_v11, %v2863_v28  ;;  %v10579_v11 = vld [vmem:[%s16127_s2 + $0x1b0] sm:$0xff]  ;;  %v2781_v28 = vadd.f32 %v11726_v18, %v10548_v63 }
0x175a   :  { %v14511_v40 = vpack.c.bf16 %v10580_v14, %v10579_v11  ;;  %v10595_v18 = vld [vmem:[%s16127_s2 + $0x2b0] sm:$0xff] }
0x175b   :  { %v12713_v54 = vpack.c.bf16 %v2869_v24, %v2864_v42  ;;  %v10593_v42 = vld [vmem:[%s16127_s2 + $0x2a0] sm:$0xff] }
0x175c   :  { %16189 = vst [vmem:[#allocation10_spill] sm:$0xff] %v14511_v40 }
0x175d   :  { %12715 = vmatprep.subr.msk.bf16.mxu0 %vm13938_vm3, %v12713_v54 }
0x175e   :  { %12718 = vmatpush3.bf16.xpose.msk.msra.mxu0 %vm13938_vm3, %v12713_v54  ;;  %v10594_v54 = vld [vmem:[%s16127_s2 + $0x2a8] sm:$0xff] }
0x175f   :  { %v11748_v48 = vpop.f32.mrb[36].mxu0  ;;  %12724 = vmatprep.subr.bf16.mxu0 %v14495_v51  ;;  %v14524_v63 = vpack.c.bf16 %v10594_v54, %v10593_v42  ;;  %v10598_v54 = vld [vmem:[%s16128_s3 + $0x15] ss:$0 sm:$0xff] }
0x1760   :  { %v2957_v6 = vadd.f32 %v11748_v48, %v10564_v50  ;;  %v2951_v17 = vpop.f32.mrb[37].mxu0 }
0x1761   :  { %v2952_v24 = vadd.f32 %v10564_v50, %v2951_v17  ;;  %16190 = vst [vmem:[#allocation11_spill] sm:$0xff] %v14524_v63  ;;  %v10596_v50 = vld [vmem:[%s16127_s2 + $0x2b8] sm:$0xff] }
0x1762   :  { %v14534_v48 = vpack.c.bf16 %v10596_v50, %v10595_v18 }
0x1763   :  { %v12719_v52 = vpack.c.bf16 %v2957_v6, %v2952_v24 }
0x1764   :  { %16191 = vst [vmem:[#allocation12_spill] sm:$0xff] %v14534_v48 }
0x1765   :  { %11754 = vmatmul.mubr.msk.f32.vlgmr.msra.gmra.mrb[38].mxu0 %vm474_vm2, %v2781_v28  ;;  %12720 = vmatprep.subr.bf16.mxu1 %v12719_v52 }
0x1766   :  { %12722 = vmatpush3.bf16.msra.mxu1 %v12719_v52  ;;  %12726 = vmatpush3.bf16.msra.mxu0 %v14495_v51 }
0x1767   :  { %11776 = vmatprep.mubr.msk.f32.mxu0 %vm162_vm1, %v14441_v47  ;;  %12728 = vmatprep.subr.bf16.mxu0 %v14511_v40 }
0x176a   :  { %12730 = vmatpush3.bf16.msra.mxu0 %v14511_v40 }
0x176b   :  { %12740 = vmatprep.subr.bf16.mxu0 %v14524_v63 }
0x176d   :  { %11777 = vmatmul.mubr.msk.f32.vlgmr.msra.gmra.mrb[40].mxu0 %vm162_vm1, %v14443_v57 }
0x176e   :  { %12742 = vmatpush3.bf16.msra.mxu0 %v14524_v63  ;;  %11798 = vmatprep.mubr.msk.f32.mxu0 %vm162_vm1, %v14441_v47 }
0x176f   :  { %12744 = vmatprep.subr.bf16.mxu0 %v14534_v48 }
0x1772   :  { %12746 = vmatpush3.bf16.msra.mxu0 %v14534_v48 }
0x1775   :  { %11799 = vmatmul.mubr.msk.f32.vlgmr.msra.gmra.mrb[42].mxu0 %vm162_vm1, %v14443_v57 }
0x1838   :  { %v11755_v6 = vpop.f32.mrb[38].mxu0 }
0x1839   :  { %v3048_v17 = vmul.f32 0.35355338, %v11755_v6  ;;  %v3038_v11 = vpop.f32.mrb[39].mxu0 }
0x183a   :  { %v3047_v14 = vmul.f32 0.35355338, %v3038_v11 }
0x183b   :  { %v3052_v24 = vsel %vm564_vm4, %v3048_v17, -inf }
0x183c   :  { %3053 = vmax.xlane.f32.xlu1 %v3052_v24  ;;  %v3049_v28 = vsel %vm564_vm4, %v3047_v14, -inf }
0x183d   :  { %3050 = vmax.xlane.f32.xlu0 %v3049_v28 }
0x1840   :  { %v14547_v52 = vpop.f32.mrb[40].mxu0 }
0x1841   :  { %v3322_v42 = vpop.f32.mrb[41].mxu0 }
0x1848   :  { %v11800_v18 = vpop.f32.mrb[42].mxu0 }
0x1849   :  { %v3504_v50 = vadd.f32 %v11800_v18, %v10598_v54  ;;  %v3498_v48 = vpop.f32.mrb[43].mxu0 }
0x184a   :  { %v3499_v63 = vadd.f32 %v10598_v54, %v3498_v48  ;;  %v10586_v54 = vld [vmem:[%s16127_s2 + $0x228] sm:$0xff] }
0x184c   :  { %v12753_v6 = vpack.c.bf16 %v3504_v50, %v3499_v63  ;;  %v10573_v63 = vld [vmem:[%s16129_s4 + $0x20] sm:$0xff] }
0x184d   :  { %11763 = vmatprep.subr.mxu1 %v10573_v63 }
0x184e   :  { %12754 = vmatprep.subr.bf16.mxu0 %v12753_v6 }
0x184f   :  { %12756 = vmatpush3.bf16.msra.mxu0 %v12753_v6 }
0x18c9   :  { %v3054_v11 = vpop.xlane.xlu1 %3053 }
0x18ca   :  { %v3056_v40 = vsub.f32 %v3048_v17, %v3054_v11  ;;  %v3051_v24 = vpop.xlane.xlu0 %3050 }
0x18cb   :  { %v3055_v51 = vsub.f32 %v3047_v14, %v3051_v24 }
0x18cc   :  { %v3059_v60 = vmul.f32 1.442695, %v3056_v40 }
0x18cd   :  { %v3057_v28 = vmul.f32 1.442695, %v3055_v51 }
0x18ce   :  { %13495 = vpow2.f32 %v3059_v60 }
0x18cf   :  { %13497 = vpow2.f32 %v3057_v28  ;;  %v10582_v28 = vld [vmem:[%s16128_s3 + $0xd] ss:$0 sm:$0xff] }
0x18d8   :  { %v13496_v55 = vpop.eup %13495 }
0x18d9   :  { %v13498_v53 = vpop.eup %13497  ;;  %v3064_v49 = vsel %vm564_vm4, %v13496_v55, 0.0 }
0x18da   :  { %3065 = vadd.xlane.f32.xlu1 %v3064_v49  ;;  %v3061_v18 = vsel %vm564_vm4, %v13498_v53, 0.0  ;;  %v10585_v49 = vld [vmem:[%s16127_s2 + $0x220] sm:$0xff] }
0x18db   :  { %3062 = vadd.xlane.f32.xlu0 %v3061_v18  ;;  %v14565_v50 = vpack.c.bf16 %v10586_v54, %v10585_v49  ;;  %v3323_v18 = vadd.f32 %v10582_v28, %v3322_v42  ;;  %v3328_v42 = vadd.f32 %v14547_v52, %v10582_v28 }
0x1967   :  { %v3066_v48 = vpop.xlane.xlu1 %3065 }
0x1968   :  { %13499 = vrcp.f32 %v3066_v48  ;;  %v3063_v17 = vpop.xlane.xlu0 %3062 }
0x1969   :  { %13501 = vrcp.f32 %v3063_v17 }
0x1972   :  { %v13500_v51 = vpop.eup %13499 }
0x1973   :  { %v13502_v60 = vpop.eup %13501  ;;  %v3070_v14 = vmul.f32 %v13500_v51, %v13496_v55  ;;  %v10588_v55 = vld [vmem:[%s16127_s2 + $0x238] sm:$0xff] }
0x1974   :  { %v3069_v40 = vmul.f32 %v13502_v60, %v13498_v53  ;;  %v10587_v53 = vld [vmem:[%s16127_s2 + $0x230] sm:$0xff] }
0x1975   :  { %v14574_v24 = vpack.c.bf16 %v10588_v55, %v10587_v53 }
0x1976   :  { %11760 = vmatprep.mubr.msk.f32.mxu1 %vm564_vm4, %v3069_v40 }
0x1977   :  { %11761 = vmatmul.mubr.msk.f32.vlgmr.msra.gmra.mrb[18].mxu1 %vm564_vm4, %v3070_v14 }
0x1978   :  { %11764 = vmatpush3.msra.mxu1 %v10573_v63  ;;  %v10590_v63 = vld [vmem:[%s16128_s3 + $0x11] ss:$0 sm:$0xff] }
0x1979   :  { %12732 = vmatprep.subr.bf16.mxu1 %v14565_v50 }
0x1a4a   :  { %v11762_v6 = vpop.f32.mrb[18].mxu1 }
0x1a4b   :  { %v3143_v11 = vpop.f32.mrb[19].mxu1 }
0x1a4c   :  { %11765 = vmatprep.mubr.msk.f32.mxu1 %vm474_vm2, %v3143_v11 }
0x1a4d   :  { %11766 = vmatmul.mubr.msk.f32.vlgmr.msra.gmra.mrb[20].mxu1 %vm474_vm2, %v11762_v6 }
0x1a4e   :  { %12734 = vmatpush3.bf16.msra.mxu1 %v14565_v50  ;;  %11787 = vmatprep.mubr.msk.f32.mxu1 %vm162_vm1, %v14441_v47 }
0x1a4f   :  { %12736 = vmatprep.subr.bf16.mxu1 %v14574_v24 }
0x1a52   :  { %12738 = vmatpush3.bf16.msra.mxu1 %v14574_v24 }
0x1a55   :  { %11788 = vmatmul.mubr.msk.f32.vlgmr.msra.gmra.mrb[22].mxu1 %vm162_vm1, %v14443_v57 }
0x1a56   :  { %11805 = vmatprep.mubr.msk.f32.mxu1 %vm474_vm2, %v3323_v18 }
0x1b28   :  { %v11789_v48 = vpop.f32.mrb[22].mxu1 }
0x1b29   :  { %v3416_v17 = vadd.f32 %v11789_v48, %v10590_v63  ;;  %v3410_v51 = vpop.f32.mrb[23].mxu1 }
0x1b2a   :  { %v3411_v60 = vadd.f32 %v10590_v63, %v3410_v51 }
0x1b2c   :  { %v12747_v40 = vpack.c.bf16 %v3416_v17, %v3411_v60 }
0x1b2e   :  { %12749 = vmatprep.subr.msk.bf16.mxu1 %vm13938_vm3, %v12747_v40 }
0x1b2f   :  { %12752 = vmatpush3.bf16.xpose.msk.msra.mxu1 %vm13938_vm3, %v12747_v40 }
0x1b36   :  { %11806 = vmatmul.mubr.msk.f32.vlgmr.msra.gmra.mrb[24].mxu1 %vm474_vm2, %v3328_v42  ;;  %v10610_v42 = vld [vmem:[%s16127_s2 + $0x1c0] sm:$0xff] }
0x1c09   :  { %v11807_v14 = vpop.f32.mrb[24].mxu1 }
0x1c0a   :  { %v3595_v49 = vmul.f32 0.35355338, %v11807_v14  ;;  %v3585_v54 = vpop.f32.mrb[25].mxu1  ;;  %v10611_v14 = vld [vmem:[%s16127_s2 + $0x1c8] sm:$0xff] }
0x1c0b   :  { %v3594_v53 = vmul.f32 0.35355338, %v3585_v54  ;;  %v10607_v54 = vld [vmem:[%s16129_s4 + $0x28] sm:$0xff] }
0x1c0c   :  { %v3599_v55 = vsel %vm564_vm4, %v3595_v49, -inf  ;;  %11815 = vmatprep.subr.mxu1 %v10607_v54 }
0x1c0d   :  { %3600 = vmax.xlane.f32.xlu1 %v3599_v55  ;;  %v3596_v6 = vsel %vm564_vm4, %v3594_v53, -inf  ;;  %11816 = vmatpush3.msra.mxu1 %v10607_v54  ;;  %v10618_v54 = vld [vmem:[%s16127_s2 + $0x240] sm:$0xff] }
0x1c0e   :  { %3597 = vmax.xlane.f32.xlu0 %v3596_v6 }
0x1c9a   :  { %v3601_v11 = vpop.xlane.xlu1 %3600 }
0x1c9b   :  { %v3603_v18 = vsub.f32 %v3595_v49, %v3601_v11  ;;  %v3598_v63 = vpop.xlane.xlu0 %3597  ;;  %v14608_v49 = vpack.c.bf16 %v10611_v14, %v10610_v42  ;;  %v10612_v11 = vld [vmem:[%s16127_s2 + $0x1d0] sm:$0xff]  ;;  %v10629_v42 = vld [vmem:[%s16127_s2 + $0x2d8] sm:$0xff] }
0x1c9c   :  { %v3602_v48 = vsub.f32 %v3594_v53, %v3598_v63 }
0x1c9d   :  { %v3606_v17 = vmul.f32 1.442695, %v3603_v18  ;;  %12758 = vmatprep.subr.bf16.mxu0 %v14608_v49  ;;  %v10613_v18 = vld [vmem:[%s16127_s2 + $0x1d8] sm:$0xff] }
0x1c9e   :  { %v3604_v51 = vmul.f32 1.442695, %v3602_v48 }
0x1c9f   :  { %13503 = vpow2.f32 %v3606_v17 }
0x1ca0   :  { %13505 = vpow2.f32 %v3604_v51  ;;  %v14620_v51 = vpack.c.bf16 %v10613_v18, %v10612_v11  ;;  %v10621_v11 = vld [vmem:[%s16127_s2 + $0x258] sm:$0xff] }
0x1ca2   :  { %16192 = vst [vmem:[#allocation13_spill] sm:$0xff] %v14620_v51 }
0x1ca9   :  { %v13504_v52 = vpop.eup %13503 }
0x1caa   :  { %v13506_v28 = vpop.eup %13505  ;;  %v3611_v60 = vsel %vm564_vm4, %v13504_v52, 0.0 }
0x1cab   :  { %3612 = vadd.xlane.f32.xlu1 %v3611_v60  ;;  %v3608_v40 = vsel %vm564_vm4, %v13506_v28, 0.0  ;;  %v10626_v60 = vld [vmem:[%s16127_s2 + $0x2c0] sm:$0xff] }
0x1cac   :  { %3609 = vadd.xlane.f32.xlu0 %v3608_v40  ;;  %v10627_v40 = vld [vmem:[%s16127_s2 + $0x2c8] sm:$0xff] }
0x1d38   :  { %v3613_v53 = vpop.xlane.xlu1 %3612 }
0x1d39   :  { %13507 = vrcp.f32 %v3613_v53  ;;  %v3610_v55 = vpop.xlane.xlu0 %3609  ;;  %v10619_v53 = vld [vmem:[%s16127_s2 + $0x248] sm:$0xff] }
0x1d3a   :  { %13509 = vrcp.f32 %v3610_v55  ;;  %v14661_v55 = vpack.c.bf16 %v10619_v53, %v10618_v54 }
0x1d3c   :  { %16195 = vst [vmem:[#allocation16_spill] sm:$0xff] %v14661_v55  ;;  %12766 = vmatprep.subr.bf16.mxu1 %v14661_v55 }
0x1d43   :  { %v13508_v6 = vpop.eup %13507 }
0x1d44   :  { %v13510_v63 = vpop.eup %13509  ;;  %v3617_v17 = vmul.f32 %v13508_v6, %v13504_v52  ;;  %v14634_v52 = vpack.c.bf16 %v10627_v40, %v10626_v60  ;;  %v10620_v6 = vld [vmem:[%s16127_s2 + $0x250] sm:$0xff] }
0x1d45   :  { %v3616_v48 = vmul.f32 %v13510_v63, %v13506_v28  ;;  %v10628_v28 = vld [vmem:[%s16127_s2 + $0x2d0] sm:$0xff] }
0x1d46   :  { %16193 = vst [vmem:[#allocation14_spill] sm:$0xff] %v14634_v52  ;;  %v14644_v14 = vpack.c.bf16 %v10629_v42, %v10628_v28  ;;  %v10631_v42 = vld [vmem:[%s16128_s3 + $0x16] ss:$0 sm:$0xff] }
0x1d47   :  { %11812 = vmatprep.mubr.msk.f32.mxu0 %vm564_vm4, %v3616_v48  ;;  %v14670_v48 = vpack.c.bf16 %v10621_v11, %v10620_v6 }
0x1d48   :  { %11813 = vmatmul.mubr.msk.f32.vlgmr.msra.gmra.mrb[44].mxu0 %vm564_vm4, %v3617_v17  ;;  %16194 = vst [vmem:[#allocation15_spill] sm:$0xff] %v14644_v14  ;;  %v10615_v17 = vld [vmem:[%s16128_s3 + $0xe] ss:$0 sm:$0xff] }
0x1d49   :  { %12760 = vmatpush3.bf16.msra.mxu0 %v14608_v49  ;;  %11828 = vmatprep.mubr.msk.f32.mxu0 %vm162_vm1, %v14441_v47  ;;  %16196 = vst [vmem:[#allocation17_spill] sm:$0xff] %v14670_v48 }
0x1d4a   :  { %12762 = vmatprep.subr.bf16.mxu0 %v14620_v51 }
0x1d4d   :  { %12764 = vmatpush3.bf16.msra.mxu0 %v14620_v51 }
0x1d4e   :  { %12774 = vmatprep.subr.bf16.mxu0 %v14634_v52 }
0x1d50   :  { %11829 = vmatmul.mubr.msk.f32.vlgmr.msra.gmra.mrb[46].mxu0 %vm162_vm1, %v14443_v57 }
0x1d51   :  { %12776 = vmatpush3.bf16.msra.mxu0 %v14634_v52  ;;  %11850 = vmatprep.mubr.msk.f32.mxu0 %vm162_vm1, %v14441_v47 }
0x1d52   :  { %12778 = vmatprep.subr.bf16.mxu0 %v14644_v14 }
0x1d55   :  { %12780 = vmatpush3.bf16.msra.mxu0 %v14644_v14 }
0x1d58   :  { %11851 = vmatmul.mubr.msk.f32.vlgmr.msra.gmra.mrb[48].mxu0 %vm162_vm1, %v14443_v57 }
0x1e1b   :  { %v11814_v18 = vpop.f32.mrb[44].mxu0 }
0x1e1c   :  { %v3690_v63 = vpop.f32.mrb[45].mxu0 }
0x1e1d   :  { %11817 = vmatprep.mubr.msk.f32.mxu1 %vm474_vm2, %v3690_v63  ;;  %v10623_v63 = vld [vmem:[%s16128_s3 + $0x12] ss:$0 sm:$0xff] }
0x1e1e   :  { %11818 = vmatmul.mubr.msk.f32.vlgmr.msra.gmra.mrb[20].mxu1 %vm474_vm2, %v11814_v18 }
0x1e1f   :  { %12768 = vmatpush3.bf16.msra.mxu1 %v14661_v55  ;;  %11839 = vmatprep.mubr.msk.f32.mxu1 %vm162_vm1, %v14441_v47 }
0x1e20   :  { %12770 = vmatprep.subr.bf16.mxu1 %v14670_v48 }
0x1e23   :  { %v11830_v60 = vpop.f32.mrb[46].mxu0  ;;  %12772 = vmatpush3.bf16.msra.mxu1 %v14670_v48 }
0x1e24   :  { %v3863_v40 = vpop.f32.mrb[47].mxu0 }
0x1e25   :  { %v3864_v28 = vadd.f32 %v10615_v17, %v3863_v40 }
0x1e26   :  { %11840 = vmatmul.mubr.msk.f32.vlgmr.msra.gmra.mrb[26].mxu1 %vm162_vm1, %v14443_v57 }
0x1e27   :  { %11857 = vmatprep.mubr.msk.f32.mxu1 %vm474_vm2, %v3864_v28 }
0x1e2b   :  { %v11852_v54 = vpop.f32.mrb[48].mxu0 }
0x1e2c   :  { %v4045_v53 = vadd.f32 %v11852_v54, %v10631_v42  ;;  %v4039_v6 = vpop.f32.mrb[49].mxu0  ;;  %v3869_v54 = vadd.f32 %v11830_v60, %v10615_v17 }
0x1e2d   :  { %v4040_v11 = vadd.f32 %v10631_v42, %v4039_v6 }
0x1e2f   :  { %v12787_v18 = vpack.c.bf16 %v4045_v53, %v4040_v11 }
0x1e31   :  { %12788 = vmatprep.subr.bf16.mxu0 %v12787_v18 }
0x1e32   :  { %12790 = vmatpush3.bf16.msra.mxu0 %v12787_v18 }
0x1ef9   :  { %v11841_v40 = vpop.f32.mrb[26].mxu1 }
0x1efa   :  { %v3957_v48 = vadd.f32 %v11841_v40, %v10623_v63  ;;  %v3951_v14 = vpop.f32.mrb[27].mxu1 }
0x1efb   :  { %v3952_v52 = vadd.f32 %v10623_v63, %v3951_v14 }
0x1efd   :  { %v12781_v28 = vpack.c.bf16 %v3957_v48, %v3952_v52 }
0x1eff   :  { %12783 = vmatprep.subr.msk.bf16.mxu1 %vm13938_vm3, %v12781_v28 }
0x1f00   :  { %12786 = vmatpush3.bf16.xpose.msk.msra.mxu1 %vm13938_vm3, %v12781_v28 }
0x1f07   :  { %11858 = vmatmul.mubr.msk.f32.vlgmr.msra.gmra.mrb[28].mxu1 %vm474_vm2, %v3869_v54 }
0x1fda   :  { %v11859_v42 = vpop.f32.mrb[28].mxu1 }
0x1fdb   :  { %v4136_v53 = vmul.f32 0.35355338, %v11859_v42  ;;  %v4126_v6 = vpop.f32.mrb[29].mxu1  ;;  %v10643_v42 = vld [vmem:[%s16127_s2 + $0x1e0] sm:$0xff] }
0x1fdc   :  { %v4135_v11 = vmul.f32 0.35355338, %v4126_v6 }
0x1fdd   :  { %v4140_v18 = vsel %vm564_vm4, %v4136_v53, -inf }
0x1fde   :  { %4141 = vmax.xlane.f32.xlu1 %v4140_v18  ;;  %v4137_v40 = vsel %vm564_vm4, %v4135_v11, -inf }
0x1fdf   :  { %4138 = vmax.xlane.f32.xlu0 %v4137_v40  ;;  %v10645_v40 = vld [vmem:[%s16127_s2 + $0x1f0] sm:$0xff] }
0x206b   :  { %v4142_v52 = vpop.xlane.xlu1 %4141 }
0x206c   :  { %v4144_v14 = vsub.f32 %v4136_v53, %v4142_v52  ;;  %v4139_v48 = vpop.xlane.xlu0 %4138  ;;  %v10644_v53 = vld [vmem:[%s16127_s2 + $0x1e8] sm:$0xff]  ;;  %v10646_v52 = vld [vmem:[%s16127_s2 + $0x1f8] sm:$0xff] }
0x206d   :  { %v4143_v63 = vsub.f32 %v4135_v11, %v4139_v48  ;;  %v14706_v6 = vpack.c.bf16 %v10644_v53, %v10643_v42  ;;  %v10660_v42 = vld [vmem:[%s16127_s2 + $0x2e8] sm:$0xff]  ;;  %v10662_v53 = vld [vmem:[%s16127_s2 + $0x2f8] sm:$0xff] }
0x206e   :  { %v4147_v51 = vmul.f32 1.442695, %v4144_v14 }
0x206f   :  { %v4145_v55 = vmul.f32 1.442695, %v4143_v63  ;;  %12792 = vmatprep.subr.bf16.mxu0 %v14706_v6 }
0x2070   :  { %13511 = vpow2.f32 %v4147_v51  ;;  %v10640_v51 = vld [vmem:[%s16129_s4 + $0x30] sm:$0xff] }
0x2071   :  { %13513 = vpow2.f32 %v4145_v55  ;;  %11867 = vmatprep.subr.mxu1 %v10640_v51 }
0x2072   :  { %11868 = vmatpush3.msra.mxu1 %v10640_v51 }
0x207a   :  { %v13512_v17 = vpop.eup %13511 }
0x207b   :  { %v13514_v60 = vpop.eup %13513  ;;  %v4152_v28 = vsel %vm564_vm4, %v13512_v17, 0.0 }
0x207c   :  { %4153 = vadd.xlane.f32.xlu1 %v4152_v28  ;;  %v4149_v54 = vsel %vm564_vm4, %v13514_v60, 0.0  ;;  %v14718_v28 = vpack.c.bf16 %v10646_v52, %v10645_v40  ;;  %v10653_v40 = vld [vmem:[%s16127_s2 + $0x270] sm:$0xff]  ;;  %v10654_v52 = vld [vmem:[%s16127_s2 + $0x278] sm:$0xff] }
0x207d   :  { %4150 = vadd.xlane.f32.xlu0 %v4149_v54  ;;  %v10659_v54 = vld [vmem:[%s16127_s2 + $0x2e0] sm:$0xff] }
0x207e   :  { %16197 = vst [vmem:[#allocation18_spill] sm:$0xff] %v14718_v28 }
0x2109   :  { %v4154_v55 = vpop.xlane.xlu1 %4153 }
0x210a   :  { %13515 = vrcp.f32 %v4154_v55  ;;  %v4151_v11 = vpop.xlane.xlu0 %4150  ;;  %v10651_v55 = vld [vmem:[%s16127_s2 + $0x260] sm:$0xff] }
0x210b   :  { %13517 = vrcp.f32 %v4151_v11  ;;  %v10652_v11 = vld [vmem:[%s16127_s2 + $0x268] sm:$0xff] }
0x2114   :  { %v13516_v18 = vpop.eup %13515 }
0x2115   :  { %v13518_v14 = vpop.eup %13517  ;;  %v4158_v63 = vmul.f32 %v13516_v18, %v13512_v17  ;;  %v14732_v17 = vpack.c.bf16 %v10660_v42, %v10659_v54  ;;  %v14759_v18 = vpack.c.bf16 %v10652_v11, %v10651_v55  ;;  %v10648_v54 = vld [vmem:[%s16128_s3 + $0xf] ss:$0 sm:$0xff] }
0x2116   :  { %v4157_v48 = vmul.f32 %v13518_v14, %v13514_v60  ;;  %v10661_v60 = vld [vmem:[%s16127_s2 + $0x2f0] sm:$0xff] }
0x2117   :  { %16198 = vst [vmem:[#allocation19_spill] sm:$0xff] %v14732_v17  ;;  %v14742_v51 = vpack.c.bf16 %v10662_v53, %v10661_v60  ;;  %12800 = vmatprep.subr.bf16.mxu1 %v14759_v18 }
0x2118   :  { %11864 = vmatprep.mubr.msk.f32.mxu0 %vm564_vm4, %v4157_v48 }
0x2119   :  { %11865 = vmatmul.mubr.msk.f32.vlgmr.msra.gmra.mrb[50].mxu0 %vm564_vm4, %v4158_v63  ;;  %16199 = vst [vmem:[#allocation20_spill] sm:$0xff] %v14742_v51  ;;  %v14768_v63 = vpack.c.bf16 %v10654_v52, %v10653_v40 }
0x211a   :  { %12794 = vmatpush3.bf16.msra.mxu0 %v14706_v6  ;;  %11880 = vmatprep.mubr.msk.f32.mxu0 %vm162_vm1, %v14441_v47 }
0x211b   :  { %12796 = vmatprep.subr.bf16.mxu0 %v14718_v28  ;;  %16200 = vst [vmem:[#allocation21_spill] sm:$0xff] %v14768_v63 }
0x211e   :  { %12798 = vmatpush3.bf16.msra.mxu0 %v14718_v28 }
0x211f   :  { %12808 = vmatprep.subr.bf16.mxu0 %v14732_v17 }
0x2121   :  { %11881 = vmatmul.mubr.msk.f32.vlgmr.msra.gmra.mrb[52].mxu0 %vm162_vm1, %v14443_v57 }
0x2122   :  { %12810 = vmatpush3.bf16.msra.mxu0 %v14732_v17  ;;  %11902 = vmatprep.mubr.msk.f32.mxu0 %vm162_vm1, %v14441_v47 }
0x2123   :  { %12812 = vmatprep.subr.bf16.mxu0 %v14742_v51 }
0x2126   :  { %12814 = vmatpush3.bf16.msra.mxu0 %v14742_v51 }
0x2129   :  { %11903 = vmatmul.mubr.msk.f32.vlgmr.msra.gmra.mrb[54].mxu0 %vm162_vm1, %v14443_v57 }
0x21ec   :  { %v11866_v14 = vpop.f32.mrb[50].mxu0 }
0x21ed   :  { %v4231_v48 = vpop.f32.mrb[51].mxu0 }
0x21ee   :  { %11869 = vmatprep.mubr.msk.f32.mxu1 %vm474_vm2, %v4231_v48  ;;  %v10656_v48 = vld [vmem:[%s16128_s3 + $0x13] ss:$0 sm:$0xff] }
0x21ef   :  { %11870 = vmatmul.mubr.msk.f32.vlgmr.msra.gmra.mrb[20].mxu1 %vm474_vm2, %v11866_v14 }
0x21f0   :  { %12802 = vmatpush3.bf16.msra.mxu1 %v14759_v18  ;;  %11891 = vmatprep.mubr.msk.f32.mxu1 %vm162_vm1, %v14441_v47  ;;  %v10664_v47 = vld [vmem:[%s16128_s3 + $0x17] ss:$0 sm:$0xff] }
0x21f1   :  { %12804 = vmatprep.subr.bf16.mxu1 %v14768_v63 }
0x21f4   :  { %v11882_v42 = vpop.f32.mrb[52].mxu0  ;;  %12806 = vmatpush3.bf16.msra.mxu1 %v14768_v63 }
0x21f5   :  { %v4404_v60 = vpop.f32.mrb[53].mxu0 }
0x21f6   :  { %v4405_v53 = vadd.f32 %v10648_v54, %v4404_v60 }
0x21f7   :  { %11892 = vmatmul.mubr.msk.f32.vlgmr.msra.gmra.mrb[30].mxu1 %vm162_vm1, %v14443_v57 }
0x21f8   :  { %11909 = vmatprep.mubr.msk.f32.mxu1 %vm474_vm2, %v4405_v53 }
0x21fc   :  { %v11904_v55 = vpop.f32.mrb[54].mxu0 }
0x21fd   :  { %v4586_v11 = vadd.f32 %v11904_v55, %v10664_v47  ;;  %v4580_v40 = vpop.f32.mrb[55].mxu0  ;;  %v4410_v55 = vadd.f32 %v11882_v42, %v10648_v54 }
0x21fe   :  { %v4581_v52 = vadd.f32 %v10664_v47, %v4580_v40 }
0x2200   :  { %v12821_v14 = vpack.c.bf16 %v4586_v11, %v4581_v52 }
0x2202   :  { %12822 = vmatprep.subr.bf16.mxu0 %v12821_v14 }
0x2203   :  { %12824 = vmatpush3.bf16.msra.mxu0 %v12821_v14 }
0x22ca   :  { %v11893_v60 = vpop.f32.mrb[30].mxu1 }
0x22cb   :  { %v4498_v63 = vadd.f32 %v11893_v60, %v10656_v48  ;;  %v4492_v57 = vpop.f32.mrb[31].mxu1 }
0x22cc   :  { %v4493_v51 = vadd.f32 %v10656_v48, %v4492_v57 }
0x22ce   :  { %v12815_v53 = vpack.c.bf16 %v4498_v63, %v4493_v51 }
0x22d0   :  { %12817 = vmatprep.subr.msk.bf16.mxu1 %vm13938_vm3, %v12815_v53 }
0x22d1   :  { %12820 = vmatpush3.bf16.xpose.msk.msra.mxu1 %vm13938_vm3, %v12815_v53 }
0x22d8   :  { %11910 = vmatmul.mubr.msk.f32.vlgmr.msra.gmra.mrb[32].mxu1 %vm474_vm2, %v4410_v55 }
0x23ab   :  { %v11911_v47 = vpop.f32.mrb[32].mxu1 }
0x23ac   :  { %v4677_v11 = vmul.f32 0.35355338, %v11911_v47  ;;  %v4667_v40 = vpop.f32.mrb[33].mxu1  ;;  %v10673_v47 = vld [vmem:[%s16129_s4 + $0x38] sm:$0xff] }
0x23ad   :  { %v4676_v52 = vmul.f32 0.35355338, %v4667_v40  ;;  %11919 = vmatprep.subr.mxu1 %v10673_v47 }
0x23ae   :  { %v4681_v14 = vsel %vm564_vm4, %v4677_v11, -inf  ;;  %11920 = vmatpush3.msra.mxu1 %v10673_v47 }
0x23af   :  { %4682 = vmax.xlane.f32.xlu1 %v4681_v14  ;;  %v4678_v60 = vsel %vm564_vm4, %v4676_v52, -inf }
0x23b0   :  { %4679 = vmax.xlane.f32.xlu0 %v4678_v60 }
0x243c   :  { %v4683_v51 = vpop.xlane.xlu1 %4682 }
0x243d   :  { %v4685_v63 = vsub.f32 %v4677_v11, %v4683_v51  ;;  %v4680_v48 = vpop.xlane.xlu0 %4679 }
0x243e   :  { %v4684_v57 = vsub.f32 %v4676_v52, %v4680_v48 }
0x243f   :  { %v4688_v17 = vmul.f32 1.442695, %v4685_v63  ;;  %v10576_v63 = vld [vmem:[%s16130_s5 + $0x8] ss:$0 sm:$0xff] }
0x2440   :  { %v4686_v28 = vmul.f32 1.442695, %v4684_v57 }
0x2441   :  { %13519 = vpow2.f32 %v4688_v17 }
0x2442   :  { %13521 = vpow2.f32 %v4686_v28 }
0x244b   :  { %v13520_v54 = vpop.eup %13519 }
0x244c   :  { %v13522_v42 = vpop.eup %13521  ;;  %v4693_v53 = vsel %vm564_vm4, %v13520_v54, 0.0 }
0x244d   :  { %4694 = vadd.xlane.f32.xlu1 %v4693_v53  ;;  %v4690_v55 = vsel %vm564_vm4, %v13522_v42, 0.0 }
0x244e   :  { %4691 = vadd.xlane.f32.xlu0 %v4690_v55 }
0x24da   :  { %v4695_v11 = vpop.xlane.xlu1 %4694 }
0x24db   :  { %13523 = vrcp.f32 %v4695_v11  ;;  %v4692_v40 = vpop.xlane.xlu0 %4691 }
0x24dc   :  { %13525 = vrcp.f32 %v4692_v40 }
0x24e5   :  { %v13524_v17 = vpop.eup %13523 }
0x24e6   :  { %v13526_v28 = vpop.eup %13525  ;;  %v4699_v14 = vmul.f32 %v13524_v17, %v13520_v54 }
0x24e7   :  { %v4698_v52 = vmul.f32 %v13526_v28, %v13522_v42 }
0x24e9   :  { %11916 = vmatprep.mubr.msk.f32.mxu0 %vm564_vm4, %v4698_v52 }
0x24ea   :  { %11917 = vmatmul.mubr.msk.f32.vlgmr.msra.gmra.mrb[56].mxu0 %vm564_vm4, %v4699_v14 }
0x25bd   :  { %v11918_v60 = vpop.f32.mrb[56].mxu0 }
0x25be   :  { %v4772_v51 = vpop.f32.mrb[57].mxu0 }
0x25bf   :  { %11921 = vmatprep.mubr.msk.f32.mxu1 %vm474_vm2, %v4772_v51 }
0x25c0   :  { %11922 = vmatmul.mubr.msk.f32.vlgmr.msra.gmra.mrb[20].mxu1 %vm474_vm2, %v11918_v60 }
0x2693   :  { %v11923_v48 = vpop.f32.mrb[20].mxu1 }
0x2694   :  { %v13413_v57 = vadd.f32 %v11923_v48, %v10576_v63  ;;  %v4855_v53 = vpop.f32.mrb[21].mxu1  ;;  %v10678_v48 = vld [vmem:[%s16132_s7 + $0x20] sm:$0xff] }
0x2695   :  { %v13414_v55 = vadd.f32 %v10576_v63, %v4855_v53 }
0x2696   :  { %v14809_v54 = vadd.f32 %v13413_v57, %v14388_v59  ;;  %v10679_v57 = vld [vmem:[%s16132_s7 + $0x28] sm:$0xff] }
0x2697   :  { %v14812_v42 = vadd.f32 %v13414_v55, %v14390_v26  ;;  %v14828_v53 = vpack.c.bf16 %v10679_v57, %v10678_v48  ;;  %v10680_v55 = vld [vmem:[%s16132_s7 + $0x30] sm:$0xff] }
0x2698   :  { %16201 = vst [vmem:[#allocation22_spill] sm:$0xff] %v14809_v54  ;;  %v4871_v47 = vsel %vm162_vm1, %v14809_v54, 0.0 }
0x2699   :  { %16202 = vst [vmem:[#allocation23_spill] sm:$0xff] %v14812_v42  ;;  %4872 = vadd.xlane.f32.xlu1 %v4871_v47  ;;  %v4868_v11 = vsel %vm162_vm1, %v14812_v42, 0.0  ;;  %12826 = vmatprep.subr.bf16.mxu0 %v14828_v53  ;;  %v10681_v47 = vld [vmem:[%s16132_s7 + $0x38] sm:$0xff] }
0x269a   :  { %4869 = vadd.xlane.f32.xlu0 %v4868_v11  ;;  %12828 = vmatpush3.bf16.msra.mxu0 %v14828_v53  ;;  %v14838_v11 = vpack.c.bf16 %v10681_v47, %v10680_v55  ;;  %v10677_v47 = vld [vmem:[%s16130_s5 + $0xa] ss:$0 sm:$0xff] }
0x269c   :  { %12830 = vmatprep.subr.bf16.mxu0 %v14838_v11 }
0x269e   :  { %12832 = vmatpush3.bf16.msra.mxu0 %v14838_v11 }
0x269f   :  { %12866 = vmatprep.subr.bf16.mxu0 %v13787_v3 }
0x2726   :  { %v4873_v40 = vpop.xlane.xlu1 %4872 }
0x2727   :  { %v4875_v17 = vmul.f32 0.03125, %v4873_v40  ;;  %v4870_v28 = vpop.xlane.xlu0 %4869 }
0x2728   :  { %v4874_v52 = vmul.f32 0.03125, %v4870_v28 }
0x2729   :  { %v4877_v14 = vsub.f32 %v14809_v54, %v4875_v17 }
0x272a   :  { %v4876_v59 = vsub.f32 %v14812_v42, %v4874_v52 }
0x272b   :  { %v4879_v60 = vmul.f32 %v4877_v14, %v4877_v14 }
0x272c   :  { %v4878_v51 = vmul.f32 %v4876_v59, %v4876_v59 }
0x272d   :  { %v4883_v26 = vsel %vm162_vm1, %v4879_v60, 0.0 }
0x272e   :  { %4884 = vadd.xlane.f32.xlu1 %v4883_v26  ;;  %v4880_v63 = vsel %vm162_vm1, %v4878_v51, 0.0 }
0x272f   :  { %4881 = vadd.xlane.f32.xlu0 %v4880_v63  ;;  %v10676_v63 = vld [vmem:[%s16130_s5 + $0x9] ss:$0 sm:$0xff] }
0x27bb   :  { %v4885_v40 = vpop.xlane.xlu1 %4884 }
0x27bc   :  { %v4887_v17 = vmul.f32 0.03125, %v4885_v40  ;;  %v4882_v28 = vpop.xlane.xlu0 %4881 }
0x27bd   :  { %v4886_v52 = vmul.f32 0.03125, %v4882_v28 }
0x27be   :  { %v4889_v60 = vadd.f32 1e-06, %v4887_v17  ;;  %v10705_v17 = vld [vmem:[%s16125_s0 + $0x10] sm:$0xff] }
0x27bf   :  { %v4888_v51 = vadd.f32 1e-06, %v4886_v52  ;;  %v10692_v52 = vld [vmem:[%s16134_s9 + $0xb0] sm:$0xff] }
0x27c0   :  { %13527 = vrsqrt.f32 %v4889_v60  ;;  %v10693_v60 = vld [vmem:[%s16134_s9 + $0xb8] sm:$0xff] }
0x27c1   :  { %13529 = vrsqrt.f32 %v4888_v51  ;;  %v14907_v51 = vpack.c.bf16 %v10693_v60, %v10692_v52 }
0x27ca   :  { %v13528_v26 = vpop.eup %13527 }
0x27cb   :  { %v13530_v48 = vpop.eup %13529  ;;  %v4893_v57 = vmul.f32 %v13528_v26, %v4877_v14  ;;  %v10691_v14 = vld [vmem:[%s16134_s9 + $0xa8] sm:$0xff]  ;;  %v10694_v26 = vld [vmem:[%s16134_s9 + $0xc0] sm:$0xff] }
0x27cc   :  { %v4892_v55 = vmul.f32 %v13530_v48, %v4876_v59 }
0x27cd   :  { %v4901_v42 = vmul.f32 %v10676_v63, %v4893_v57  ;;  %v10696_v57 = vld [vmem:[%s16134_s9 + $0xd0] sm:$0xff] }
0x27ce   :  { %v4900_v40 = vmul.f32 %v10676_v63, %v4892_v55  ;;  %v10695_v63 = vld [vmem:[%s16134_s9 + $0xc8] sm:$0xff]  ;;  %v10697_v55 = vld [vmem:[%s16134_s9 + $0xd8] sm:$0xff] }
0x27cf   :  { %v4909_v28 = vadd.f32 %v10677_v47, %v4901_v42  ;;  %v10690_v42 = vld [vmem:[%s16134_s9 + $0xa0] sm:$0xff]  ;;  %v14917_v48 = vpack.c.bf16 %v10695_v63, %v10694_v26 }
0x27d0   :  { %v4908_v54 = vadd.f32 %v10677_v47, %v4900_v40  ;;  %v14897_v59 = vpack.c.bf16 %v10691_v14, %v10690_v42  ;;  %v14927_v47 = vpack.c.bf16 %v10697_v55, %v10696_v57  ;;  %v10698_v40 = vld [vmem:[%s16134_s9 + $0xe0] sm:$0xff] }
0x27d2   :  { %11932 = vmatprep.mubr.msk.f32.mxu0 %vm162_vm1, %v4908_v54  ;;  %v10706_v54 = vld [vmem:[%s16125_s0 + $0x18] sm:$0xff]  ;;  %16203 = vst [vmem:[#allocation24_spill] sm:$0xff] %v14927_v47 }
0x27d3   :  { %11933 = vmatmul.mubr.msk.f32.vlgmr.msra.gmra.mrb[58].mxu0 %vm162_vm1, %v4909_v28  ;;  %v10699_v28 = vld [vmem:[%s16134_s9 + $0xe8] sm:$0xff] }
0x27d4   :  { %12868 = vmatpush3.bf16.msra.mxu0 %v13787_v3  ;;  %11986 = vmatprep.mubr.msk.f32.mxu0 %vm69_vm0, %v10705_v17  ;;  %v10686_v3 = vld [vmem:[%s16134_s9 + $0x80] sm:$0xff]  ;;  %v10700_v17 = vld [vmem:[%s16134_s9 + $0xf0] sm:$0xff] }
0x27d5   :  { %12870 = vmatprep.subr.bf16.mxu0 %v13792_v5 }
0x27d8   :  { %12872 = vmatpush3.bf16.msra.mxu0 %v13792_v5  ;;  %v10687_v5 = vld [vmem:[%s16134_s9 + $0x88] sm:$0xff] }
0x27d9   :  { %12874 = vmatprep.subr.bf16.mxu0 %v13807_v9 }
0x27dc   :  { %12876 = vmatpush3.bf16.msra.mxu0 %v13807_v9  ;;  %v14877_v9 = vpack.c.bf16 %v10687_v5, %v10686_v3  ;;  %v10701_v3 = vld [vmem:[%s16134_s9 + $0xf8] sm:$0xff] }
0x27dd   :  { %12878 = vmatprep.subr.bf16.mxu0 %v13817_v12  ;;  %v14945_v5 = vpack.c.bf16 %v10701_v3, %v10700_v17 }
0x27de   :  { %12834 = vmatprep.subr.bf16.mxu1 %v14877_v9 }
0x27df   :  { %12836 = vmatpush3.bf16.msra.mxu1 %v14877_v9  ;;  %16205 = vst [vmem:[#allocation26_spill] sm:$0xff] %v14945_v5 }
0x27e0   :  { %12880 = vmatpush3.bf16.msra.mxu0 %v13817_v12  ;;  %v10688_v12 = vld [vmem:[%s16134_s9 + $0x90] sm:$0xff] }
0x27e1   :  { %12882 = vmatprep.subr.bf16.mxu0 %v13847_v33 }
0x27e3   :  { %11987 = vmatmul.mubr.msk.f32.vlgmr.msra.gmra.mrb[60].mxu0 %vm69_vm0, %v10706_v54  ;;  %v14940_v54 = vpack.c.bf16 %v10699_v28, %v10698_v40 }
0x27e4   :  { %12884 = vmatpush3.bf16.msra.mxu0 %v13847_v33  ;;  %v10689_v33 = vld [vmem:[%s16134_s9 + $0x98] sm:$0xff] }
0x27e5   :  { %12886 = vmatprep.subr.bf16.mxu0 %v13857_v36  ;;  %16204 = vst [vmem:[#allocation25_spill] sm:$0xff] %v14940_v54 }
0x27e8   :  { %12888 = vmatpush3.bf16.msra.mxu0 %v13857_v36  ;;  %v14887_v36 = vpack.c.bf16 %v10689_v33, %v10688_v12  ;;  %v10683_v12 = vld [vmem:[%s16133_s8 + $0x1] ss:$0 sm:$0xff] }
0x27e9   :  { %12890 = vmatprep.subr.bf16.mxu0 %v13867_v39 }
0x27ea   :  { %12838 = vmatprep.subr.bf16.mxu1 %v14887_v36 }
0x27eb   :  { %12840 = vmatpush3.bf16.msra.mxu1 %v14887_v36 }
0x27ec   :  { %12842 = vmatprep.subr.bf16.mxu1 %v14897_v59 }
0x27ef   :  { %12844 = vmatpush3.bf16.msra.mxu1 %v14897_v59 }
0x27f0   :  { %12846 = vmatprep.subr.bf16.mxu1 %v14907_v51 }
0x27f3   :  { %12848 = vmatpush3.bf16.msra.mxu1 %v14907_v51 }
0x27f4   :  { %12850 = vmatprep.subr.bf16.mxu1 %v14917_v48 }
0x27f7   :  { %12852 = vmatpush3.bf16.msra.mxu1 %v14917_v48 }
0x27f8   :  { %12854 = vmatprep.subr.bf16.mxu1 %v14927_v47 }
0x27fb   :  { %12856 = vmatpush3.bf16.msra.mxu1 %v14927_v47  ;;  %v13631_v47 = vld [vmem:[%s16131_s6] ss:$0 sm:$0xff] }
0x27fc   :  { %12858 = vmatprep.subr.bf16.mxu1 %v14940_v54 }
0x27ff   :  { %12860 = vmatpush3.bf16.msra.mxu1 %v14940_v54 }
0x2800   :  { %12862 = vmatprep.subr.bf16.mxu1 %v14945_v5 }
0x2803   :  { %12864 = vmatpush3.bf16.msra.mxu1 %v14945_v5 }
0x2804   :  { %12898 = vmatprep.subr.bf16.mxu1 %v13902_v61 }
0x28a6   :  { %v11934_v33 = vpop.f32.mrb[58].mxu0 }
0x28a7   :  { %v5001_v42 = vadd.f32 %v11934_v33, %v10683_v12  ;;  %v4995_v14 = vpop.f32.mrb[59].mxu0 }
0x28a8   :  { %v4996_v52 = vadd.f32 %v10683_v12, %v4995_v14 }
0x28a9   :  { %v5005_v60 = vmul.f32 %v5001_v42, %v5001_v42 }
0x28aa   :  { %v5004_v26 = vmul.f32 %v4996_v52, %v4996_v52 }
0x28ab   :  { %v5007_v63 = vmul.f32 %v5005_v60, %v5001_v42 }
0x28ac   :  { %v5006_v57 = vmul.f32 %v5004_v26, %v4996_v52 }
0x28ad   :  { %v5009_v55 = vmul.f32 0.044715, %v5007_v63 }
0x28ae   :  { %v5008_v40 = vmul.f32 0.044715, %v5006_v57 }
0x28af   :  { %v5011_v28 = vadd.f32 %v5009_v55, %v5001_v42 }
0x28b0   :  { %v5010_v17 = vadd.f32 %v5008_v40, %v4996_v52 }
0x28b1   :  { %v5013_v3 = vmul.f32 0.7978846, %v5011_v28 }
0x28b2   :  { %v5012_v5 = vmul.f32 0.7978846, %v5010_v17 }
0x28b3   :  { %13531 = vtanh.f32 %v5013_v3 }
0x28b4   :  { %13533 = vtanh.f32 %v5012_v5 }
0x28b6   :  { %v11988_v54 = vpop.f32.mrb[60].mxu0 }
0x28b7   :  { %v14958_v33 = vadd.f32 %v13631_v47, %v11988_v54  ;;  %v5252_v12 = vpop.f32.mrb[61].mxu0 }
0x28b8   :  { %v14960_v14 = vadd.f32 %v13631_v47, %v5252_v12 }
0x28b9   :  { %v5264_v60 = vsel %vm162_vm1, %v14958_v33, 0.0 }
0x28ba   :  { %5265 = vadd.xlane.f32.xlu1 %v5264_v60  ;;  %v5261_v26 = vsel %vm162_vm1, %v14960_v14, 0.0 }
0x28bb   :  { %5262 = vadd.xlane.f32.xlu0 %v5261_v26 }
0x28bd   :  { %v13532_v63 = vpop.eup %13531 }
0x28be   :  { %v13534_v5 = vpop.eup %13533  ;;  %v5017_v57 = vadd.f32 1.0, %v13532_v63 }
0x28bf   :  { %v5016_v55 = vadd.f32 1.0, %v13534_v5 }
0x28c0   :  { %v5019_v40 = vmul.f32 0.5, %v5017_v57 }
0x28c1   :  { %v5018_v28 = vmul.f32 0.5, %v5016_v55 }
0x28c2   :  { %v5021_v54 = vmul.f32 %v5019_v40, %v5001_v42 }
0x28c3   :  { %v5020_v17 = vmul.f32 %v5018_v28, %v4996_v52 }
0x28c5   :  { %11967 = vmatprep.mubr.f32.mxu1 %v5020_v17 }
0x28c6   :  { %11968 = vmatmul.mubr.f32.vlgmr.msra.gmra.mrb[34].mxu1 %v5021_v54 }
0x28c7   :  { %12900 = vmatpush3.bf16.msra.mxu1 %v13902_v61 }
0x28c8   :  { %12902 = vmatprep.subr.bf16.mxu1 %v13912_v0 }
0x28cb   :  { %12904 = vmatpush3.bf16.msra.mxu1 %v13912_v0 }
0x2947   :  { %v5266_v47 = vpop.xlane.xlu1 %5265 }
0x2948   :  { %v5268_v3 = vmul.f32 0.03125, %v5266_v47  ;;  %v5263_v12 = vpop.xlane.xlu0 %5262 }
0x2949   :  { %v5267_v60 = vmul.f32 0.03125, %v5263_v12 }
0x294a   :  { %v5270_v26 = vsub.f32 %v14958_v33, %v5268_v3 }
0x294b   :  { %v5269_v63 = vsub.f32 %v14960_v14, %v5267_v60 }
0x294c   :  { %v5272_v5 = vmul.f32 %v5270_v26, %v5270_v26 }
0x294d   :  { %v5271_v57 = vmul.f32 %v5269_v63, %v5269_v63 }
0x294e   :  { %v5276_v42 = vsel %vm162_vm1, %v5272_v5, 0.0 }
0x294f   :  { %5277 = vadd.xlane.f32.xlu1 %v5276_v42  ;;  %v5273_v52 = vsel %vm162_vm1, %v5271_v57, 0.0  ;;  %v13632_v57 = vld [vmem:[%s16130_s5] ss:$0 sm:$0xff] }
0x2950   :  { %5274 = vadd.xlane.f32.xlu0 %v5273_v52 }
0x2999   :  { %v14973_v61 = vpop.f32.mrb[34].mxu1 }
0x299a   :  { %v14975_v55 = vpop.f32.mrb[35].mxu1 }
0x299b   :  { %16206 = vst [vmem:[#allocation27_spill] sm:$0xff] %v14975_v55 }
0x29dc   :  { %v5278_v0 = vpop.xlane.xlu1 %5277 }
0x29dd   :  { %v5280_v40 = vmul.f32 0.03125, %v5278_v0  ;;  %v5275_v28 = vpop.xlane.xlu0 %5274  ;;  %v13633_v0 = vld [vmem:[%s16130_s5 + $0x1] ss:$0 sm:$0xff] }
0x29de   :  { %v5279_v17 = vmul.f32 0.03125, %v5275_v28  ;;  %v13634_v28 = vld [vmem:[%s16128_s3 + $0x8] ss:$0 sm:$0xff] }
0x29df   :  { %v5282_v54 = vadd.f32 1e-06, %v5280_v40 }
0x29e0   :  { %v5281_v47 = vadd.f32 1e-06, %v5279_v17 }
0x29e1   :  { %13535 = vrsqrt.f32 %v5282_v54 }
0x29e2   :  { %13537 = vrsqrt.f32 %v5281_v47 }
0x29eb   :  { %v13536_v3 = vpop.eup %13535 }
0x29ec   :  { %v13538_v12 = vpop.eup %13537  ;;  %v5286_v60 = vmul.f32 %v13536_v3, %v5270_v26 }
0x29ed   :  { %v5285_v5 = vmul.f32 %v13538_v12, %v5269_v63 }
0x29ee   :  { %v5288_v42 = vmul.f32 %v13632_v57, %v5286_v60 }
0x29ef   :  { %v5287_v52 = vmul.f32 %v13632_v57, %v5285_v5  ;;  %v15012_v5 = vld [vmem:[%s16129_s4] sm:$0xff] }
0x29f0   :  { %v14985_v40 = vadd.f32 %v13633_v0, %v5288_v42  ;;  %v13637_v57 = vld [vmem:[%s16128_s3 + $0x4] ss:$0 sm:$0xff] }
0x29f1   :  { %v14983_v55 = vadd.f32 %v13633_v0, %v5287_v52 }
0x29f3   :  { %11997 = vmatprep.mubr.msk.f32.mxu0 %vm162_vm1, %v14983_v55  ;;  %12019 = vmatprep.mubr.msk.f32.mxu1 %vm162_vm1, %v14983_v55 }
0x29f4   :  { %11998 = vmatmul.mubr.msk.f32.vlgmr.msra.gmra.mrb[62].mxu0 %vm162_vm1, %v14985_v40  ;;  %12020 = vmatmul.mubr.msk.f32.vlgmr.msra.gmra.mrb[36].mxu1 %vm162_vm1, %v14985_v40 }
0x29f5   :  { %12892 = vmatpush3.bf16.msra.mxu0 %v13867_v39  ;;  %12008 = vmatprep.mubr.msk.f32.mxu0 %vm162_vm1, %v14983_v55  ;;  %v13635_v39 = vld [vmem:[%s16128_s3] ss:$0 sm:$0xff] }
0x29f6   :  { %12894 = vmatprep.subr.bf16.mxu0 %v13888_v58 }
0x29f9   :  { %12896 = vmatpush3.bf16.msra.mxu0 %v13888_v58 }
0x29fc   :  { %12009 = vmatmul.mubr.msk.f32.vlgmr.msra.gmra.mrb[64].mxu0 %vm162_vm1, %v14985_v40 }
0x2ac7   :  { %v11999_v26 = vpop.f32.mrb[62].mxu0  ;;  %v12021_v63 = vpop.f32.mrb[36].mxu1 }
0x2ac8   :  { %v5519_v17 = vadd.f32 %v13634_v28, %v12021_v63  ;;  %v5363_v54 = vpop.f32.mrb[63].mxu0  ;;  %v5513_v47 = vpop.f32.mrb[37].mxu1 }
0x2ac9   :  { %v5364_v3 = vadd.f32 %v13635_v39, %v5363_v54  ;;  %v5514_v12 = vadd.f32 %v13634_v28, %v5513_v47  ;;  %v5369_v28 = vadd.f32 %v13635_v39, %v11999_v26 }
0x2acb   :  { %v12911_v60 = vpack.c.bf16 %v5519_v17, %v5514_v12  ;;  %12026 = vmatprep.mubr.msk.f32.mxu0 %vm474_vm2, %v5364_v3 }
0x2acd   :  { %12912 = vmatprep.subr.bf16.mxu1 %v12911_v60 }
0x2ace   :  { %12914 = vmatpush3.bf16.msra.mxu1 %v12911_v60 }
0x2acf   :  { %v12010_v58 = vpop.f32.mrb[64].mxu0  ;;  %12036 = vmatprep.subr.mxu1 %v15012_v5 }
0x2ad0   :  { %v5444_v42 = vadd.f32 %v13637_v57, %v12010_v58  ;;  %v5438_v52 = vpop.f32.mrb[65].mxu0 }
0x2ad1   :  { %v5439_v0 = vadd.f32 %v13637_v57, %v5438_v52 }
0x2ad3   :  { %v12905_v63 = vpack.c.bf16 %v5444_v42, %v5439_v0 }
0x2ad5   :  { %12907 = vmatprep.subr.msk.bf16.mxu0 %vm13938_vm3, %v12905_v63 }
0x2ad6   :  { %12910 = vmatpush3.bf16.xpose.msk.msra.mxu0 %vm13938_vm3, %v12905_v63 }
0x2ad7   :  { %12916 = vmatprep.subr.bf16.mxu0 %v13990_v8 }
0x2add   :  { %12027 = vmatmul.mubr.msk.f32.vlgmr.msra.gmra.mrb[66].mxu0 %vm474_vm2, %v5369_v28 }
0x2ade   :  { %12918 = vmatpush3.bf16.msra.mxu0 %v13990_v8  ;;  %12049 = vmatprep.mubr.msk.f32.mxu0 %vm162_vm1, %v14983_v55 }
0x2adf   :  { %12920 = vmatprep.subr.bf16.mxu0 %v13999_v15 }
0x2ae2   :  { %12922 = vmatpush3.bf16.msra.mxu0 %v13999_v15 }
0x2ae3   :  { %12932 = vmatprep.subr.bf16.mxu0 %v14013_v22 }
0x2ae5   :  { %12050 = vmatmul.mubr.msk.f32.vlgmr.msra.gmra.mrb[68].mxu0 %vm162_vm1, %v14985_v40 }
0x2ae6   :  { %12934 = vmatpush3.bf16.msra.mxu0 %v14013_v22  ;;  %12071 = vmatprep.mubr.msk.f32.mxu0 %vm162_vm1, %v14983_v55 }
0x2ae7   :  { %12936 = vmatprep.subr.bf16.mxu0 %v14023_v25 }
0x2aea   :  { %12938 = vmatpush3.bf16.msra.mxu0 %v14023_v25  ;;  %v13638_v25 = vld [vmem:[%s16128_s3 + $0x9] ss:$0 sm:$0xff] }
0x2aed   :  { %12072 = vmatmul.mubr.msk.f32.vlgmr.msra.gmra.mrb[70].mxu0 %vm162_vm1, %v14985_v40 }
0x2bb0   :  { %v12028_v8 = vpop.f32.mrb[66].mxu0 }
0x2bb1   :  { %v5610_v26 = vmul.f32 0.35355338, %v12028_v8  ;;  %v5600_v15 = vpop.f32.mrb[67].mxu0 }
0x2bb2   :  { %v5609_v17 = vmul.f32 0.35355338, %v5600_v15 }
0x2bb3   :  { %v5614_v54 = vsel %vm564_vm4, %v5610_v26, -inf }
0x2bb4   :  { %5615 = vmax.xlane.f32.xlu1 %v5614_v54  ;;  %v5611_v47 = vsel %vm564_vm4, %v5609_v17, -inf }
0x2bb5   :  { %5612 = vmax.xlane.f32.xlu0 %v5611_v47 }
0x2bb8   :  { %v12051_v22 = vpop.f32.mrb[68].mxu0 }
0x2bb9   :  { %v5863_v39 = vpop.f32.mrb[69].mxu0 }
0x2bc0   :  { %v12073_v3 = vpop.f32.mrb[70].mxu0 }
0x2bc1   :  { %v6019_v12 = vadd.f32 %v13638_v25, %v12073_v3  ;;  %v6013_v60 = vpop.f32.mrb[71].mxu0 }
0x2bc2   :  { %v6014_v58 = vadd.f32 %v13638_v25, %v6013_v60 }
0x2bc4   :  { %v12945_v57 = vpack.c.bf16 %v6019_v12, %v6014_v58 }
0x2bc6   :  { %12946 = vmatprep.subr.bf16.mxu0 %v12945_v57 }
0x2bc7   :  { %12948 = vmatpush3.bf16.msra.mxu0 %v12945_v57 }
0x2bc8   :  { %12950 = vmatprep.subr.bf16.mxu0 %v14056_v2 }
0x2c41   :  { %v5616_v42 = vpop.xlane.xlu1 %5615 }
0x2c42   :  { %v5618_v52 = vsub.f32 %v5610_v26, %v5616_v42  ;;  %v5613_v0 = vpop.xlane.xlu0 %5612 }
0x2c43   :  { %v5617_v63 = vsub.f32 %v5609_v17, %v5613_v0 }
0x2c44   :  { %v5621_v28 = vmul.f32 1.442695, %v5618_v52 }
0x2c45   :  { %v5619_v8 = vmul.f32 1.442695, %v5617_v63 }
0x2c46   :  { %13539 = vpow2.f32 %v5621_v28 }
0x2c47   :  { %13541 = vpow2.f32 %v5619_v8 }
0x2c50   :  { %v13540_v15 = vpop.eup %13539 }
0x2c51   :  { %v13542_v54 = vpop.eup %13541  ;;  %v5626_v47 = vsel %vm564_vm4, %v13540_v15, 0.0 }
0x2c52   :  { %5627 = vadd.xlane.f32.xlu1 %v5626_v47  ;;  %v5623_v3 = vsel %vm564_vm4, %v13542_v54, 0.0 }
0x2c53   :  { %5624 = vadd.xlane.f32.xlu0 %v5623_v3 }
0x2cdf   :  { %v5628_v25 = vpop.xlane.xlu1 %5627 }
0x2ce0   :  { %13543 = vrcp.f32 %v5628_v25  ;;  %v5625_v12 = vpop.xlane.xlu0 %5624 }
0x2ce1   :  { %13545 = vrcp.f32 %v5625_v12 }
0x2cea   :  { %v13544_v60 = vpop.eup %13543 }
0x2ceb   :  { %v13546_v26 = vpop.eup %13545  ;;  %v5632_v17 = vmul.f32 %v13544_v60, %v13540_v15 }
0x2cec   :  { %v5631_v58 = vmul.f32 %v13546_v26, %v13542_v54 }
0x2cee   :  { %12033 = vmatprep.mubr.msk.f32.mxu1 %vm564_vm4, %v5631_v58 }
0x2cef   :  { %12034 = vmatmul.mubr.msk.f32.vlgmr.msra.gmra.mrb[38].mxu1 %vm564_vm4, %v5632_v17 }
0x2cf0   :  { %12037 = vmatpush3.msra.mxu1 %v15012_v5  ;;  %v13639_v5 = vld [vmem:[%s16128_s3 + $0x1] ss:$0 sm:$0xff] }
0x2cf1   :  { %12924 = vmatprep.subr.bf16.mxu1 %v13942_v20  ;;  %v5864_v52 = vadd.f32 %v13639_v5, %v5863_v39  ;;  %v5869_v39 = vadd.f32 %v13639_v5, %v12051_v22 }
0x2dc2   :  { %v12035_v57 = vpop.f32.mrb[38].mxu1 }
0x2dc3   :  { %v5705_v42 = vpop.f32.mrb[39].mxu1 }
0x2dc4   :  { %12038 = vmatprep.mubr.msk.f32.mxu1 %vm474_vm2, %v5705_v42 }
0x2dc5   :  { %12039 = vmatmul.mubr.msk.f32.vlgmr.msra.gmra.mrb[40].mxu1 %vm474_vm2, %v12035_v57 }
0x2dc6   :  { %12926 = vmatpush3.bf16.msra.mxu1 %v13942_v20  ;;  %12060 = vmatprep.mubr.msk.f32.mxu1 %vm162_vm1, %v14983_v55  ;;  %v13640_v20 = vld [vmem:[%s16128_s3 + $0x5] ss:$0 sm:$0xff] }
0x2dc7   :  { %12928 = vmatprep.subr.bf16.mxu1 %v13958_v30 }
0x2dca   :  { %12930 = vmatpush3.bf16.msra.mxu1 %v13958_v30  ;;  %v13641_v30 = vld [vmem:[%s16129_s4 + $0x8] sm:$0xff] }
0x2dcd   :  { %12061 = vmatmul.mubr.msk.f32.vlgmr.msra.gmra.mrb[42].mxu1 %vm162_vm1, %v14985_v40 }
0x2dce   :  { %12078 = vmatprep.mubr.msk.f32.mxu1 %vm474_vm2, %v5864_v52 }
0x2ea0   :  { %v12062_v0 = vpop.f32.mrb[42].mxu1 }
0x2ea1   :  { %v5944_v63 = vadd.f32 %v13640_v20, %v12062_v0  ;;  %v5938_v28 = vpop.f32.mrb[43].mxu1 }
0x2ea2   :  { %v5939_v8 = vadd.f32 %v13640_v20, %v5938_v28 }
0x2ea4   :  { %v12939_v15 = vpack.c.bf16 %v5944_v63, %v5939_v8 }
0x2ea6   :  { %12941 = vmatprep.subr.msk.bf16.mxu1 %vm13938_vm3, %v12939_v15 }
0x2ea7   :  { %12944 = vmatpush3.bf16.xpose.msk.msra.mxu1 %vm13938_vm3, %v12939_v15 }
0x2ea8   :  { %12088 = vmatprep.subr.mxu1 %v13641_v30 }
0x2eae   :  { %12079 = vmatmul.mubr.msk.f32.vlgmr.msra.gmra.mrb[44].mxu1 %vm474_vm2, %v5869_v39 }
0x2eaf   :  { %12089 = vmatpush3.msra.mxu1 %v13641_v30 }
0x2eb0   :  { %12958 = vmatprep.subr.bf16.mxu1 %v14109_v38 }
0x2f81   :  { %v12080_v54 = vpop.f32.mrb[44].mxu1 }
0x2f82   :  { %v6110_v47 = vmul.f32 0.35355338, %v12080_v54  ;;  %v6100_v3 = vpop.f32.mrb[45].mxu1 }
0x2f83   :  { %v6109_v25 = vmul.f32 0.35355338, %v6100_v3  ;;  %v13643_v3 = vld [vmem:[%s16128_s3 + $0xa] ss:$0 sm:$0xff] }
0x2f84   :  { %v6114_v12 = vsel %vm564_vm4, %v6110_v47, -inf }
0x2f85   :  { %6115 = vmax.xlane.f32.xlu1 %v6114_v12  ;;  %v6111_v60 = vsel %vm564_vm4, %v6109_v25, -inf }
0x2f86   :  { %6112 = vmax.xlane.f32.xlu0 %v6111_v60 }
0x3012   :  { %v6116_v26 = vpop.xlane.xlu1 %6115 }
0x3013   :  { %v6118_v58 = vsub.f32 %v6110_v47, %v6116_v26  ;;  %v6113_v17 = vpop.xlane.xlu0 %6112 }
0x3014   :  { %v6117_v57 = vsub.f32 %v6109_v25, %v6113_v17 }
0x3015   :  { %v6121_v22 = vmul.f32 1.442695, %v6118_v58  ;;  %v13644_v58 = vld [vmem:[%s16128_s3 + $0x6] ss:$0 sm:$0xff] }
0x3016   :  { %v6119_v42 = vmul.f32 1.442695, %v6117_v57 }
0x3017   :  { %13547 = vpow2.f32 %v6121_v22 }
0x3018   :  { %13549 = vpow2.f32 %v6119_v42 }
0x3021   :  { %v13548_v5 = vpop.eup %13547 }
0x3022   :  { %v13550_v52 = vpop.eup %13549  ;;  %v6126_v0 = vsel %vm564_vm4, %v13548_v5, 0.0 }
0x3023   :  { %6127 = vadd.xlane.f32.xlu1 %v6126_v0  ;;  %v6123_v20 = vsel %vm564_vm4, %v13550_v52, 0.0 }
0x3024   :  { %6124 = vadd.xlane.f32.xlu0 %v6123_v20 }
0x30b0   :  { %v6128_v63 = vpop.xlane.xlu1 %6127 }
0x30b1   :  { %13551 = vrcp.f32 %v6128_v63  ;;  %v6125_v28 = vpop.xlane.xlu0 %6124 }
0x30b2   :  { %13553 = vrcp.f32 %v6125_v28 }
0x30bb   :  { %v13552_v8 = vpop.eup %13551 }
0x30bc   :  { %v13554_v15 = vpop.eup %13553  ;;  %v6132_v39 = vmul.f32 %v13552_v8, %v13548_v5  ;;  %v13645_v5 = vld [vmem:[%s16129_s4 + $0x10] sm:$0xff] }
0x30bd   :  { %v6131_v30 = vmul.f32 %v13554_v15, %v13550_v52 }
0x30bf   :  { %12085 = vmatprep.mubr.msk.f32.mxu0 %vm564_vm4, %v6131_v30 }
0x30c0   :  { %12086 = vmatmul.mubr.msk.f32.vlgmr.msra.gmra.mrb[72].mxu0 %vm564_vm4, %v6132_v39 }
0x30c1   :  { %12952 = vmatpush3.bf16.msra.mxu0 %v14056_v2  ;;  %12101 = vmatprep.mubr.msk.f32.mxu0 %vm162_vm1, %v14983_v55 }
0x30c2   :  { %12954 = vmatprep.subr.bf16.mxu0 %v14068_v23 }
0x30c5   :  { %12956 = vmatpush3.bf16.msra.mxu0 %v14068_v23 }
0x30c6   :  { %12966 = vmatprep.subr.bf16.mxu0 %v14082_v29 }
0x30c8   :  { %12102 = vmatmul.mubr.msk.f32.vlgmr.msra.gmra.mrb[74].mxu0 %vm162_vm1, %v14985_v40 }
0x30c9   :  { %12968 = vmatpush3.bf16.msra.mxu0 %v14082_v29  ;;  %12123 = vmatprep.mubr.msk.f32.mxu0 %vm162_vm1, %v14983_v55 }
0x30ca   :  { %12970 = vmatprep.subr.bf16.mxu0 %v14092_v34 }
0x30cd   :  { %12972 = vmatpush3.bf16.msra.mxu0 %v14092_v34  ;;  %v13642_v34 = vld [vmem:[%s16128_s3 + $0x2] ss:$0 sm:$0xff] }
0x30d0   :  { %12124 = vmatmul.mubr.msk.f32.vlgmr.msra.gmra.mrb[76].mxu0 %vm162_vm1, %v14985_v40 }
0x3193   :  { %v12087_v2 = vpop.f32.mrb[72].mxu0 }
0x3194   :  { %v6205_v54 = vpop.f32.mrb[73].mxu0 }
0x3195   :  { %12090 = vmatprep.mubr.msk.f32.mxu1 %vm474_vm2, %v6205_v54 }
0x3196   :  { %12091 = vmatmul.mubr.msk.f32.vlgmr.msra.gmra.mrb[40].mxu1 %vm474_vm2, %v12087_v2 }
0x3197   :  { %12960 = vmatpush3.bf16.msra.mxu1 %v14109_v38  ;;  %12112 = vmatprep.mubr.msk.f32.mxu1 %vm162_vm1, %v14983_v55 }
0x3198   :  { %12962 = vmatprep.subr.bf16.mxu1 %v14118_v44 }
0x319b   :  { %v12103_v23 = vpop.f32.mrb[74].mxu0  ;;  %12964 = vmatpush3.bf16.msra.mxu1 %v14118_v44 }
0x319c   :  { %v6363_v29 = vpop.f32.mrb[75].mxu0  ;;  %v6369_v52 = vadd.f32 %v13642_v34, %v12103_v23 }
0x319d   :  { %v6364_v47 = vadd.f32 %v13642_v34, %v6363_v29 }
0x319e   :  { %12113 = vmatmul.mubr.msk.f32.vlgmr.msra.gmra.mrb[46].mxu1 %vm162_vm1, %v14985_v40 }
0x319f   :  { %12130 = vmatprep.mubr.msk.f32.mxu1 %vm474_vm2, %v6364_v47 }
0x31a3   :  { %v12125_v38 = vpop.f32.mrb[76].mxu0 }
0x31a4   :  { %v6519_v25 = vadd.f32 %v13643_v3, %v12125_v38  ;;  %v6513_v12 = vpop.f32.mrb[77].mxu0 }
0x31a5   :  { %v6514_v60 = vadd.f32 %v13643_v3, %v6513_v12 }
0x31a7   :  { %v12979_v44 = vpack.c.bf16 %v6519_v25, %v6514_v60 }
0x31a9   :  { %12980 = vmatprep.subr.bf16.mxu0 %v12979_v44 }
0x31aa   :  { %12982 = vmatpush3.bf16.msra.mxu0 %v12979_v44 }
0x31ab   :  { %12984 = vmatprep.subr.bf16.mxu0 %v14154_v45 }
0x3271   :  { %v12114_v26 = vpop.f32.mrb[46].mxu1 }
0x3272   :  { %v6444_v17 = vadd.f32 %v13644_v58, %v12114_v26  ;;  %v6438_v57 = vpop.f32.mrb[47].mxu1 }
0x3273   :  { %v6439_v22 = vadd.f32 %v13644_v58, %v6438_v57 }
0x3275   :  { %v12973_v42 = vpack.c.bf16 %v6444_v17, %v6439_v22 }
0x3277   :  { %12975 = vmatprep.subr.msk.bf16.mxu1 %vm13938_vm3, %v12973_v42 }
0x3278   :  { %12978 = vmatpush3.bf16.xpose.msk.msra.mxu1 %vm13938_vm3, %v12973_v42 }
0x3279   :  { %12140 = vmatprep.subr.mxu1 %v13645_v5 }
0x327f   :  { %12131 = vmatmul.mubr.msk.f32.vlgmr.msra.gmra.mrb[48].mxu1 %vm474_vm2, %v6369_v52 }
0x3280   :  { %12141 = vmatpush3.msra.mxu1 %v13645_v5 }
0x3281   :  { %12992 = vmatprep.subr.bf16.mxu1 %v14207_v10 }
0x3352   :  { %v12132_v0 = vpop.f32.mrb[48].mxu1 }
0x3353   :  { %v6610_v20 = vmul.f32 0.35355338, %v12132_v0  ;;  %v6600_v63 = vpop.f32.mrb[49].mxu1 }
0x3354   :  { %v6609_v28 = vmul.f32 0.35355338, %v6600_v63 }
0x3355   :  { %v6614_v8 = vsel %vm564_vm4, %v6610_v20, -inf }
0x3356   :  { %6615 = vmax.xlane.f32.xlu1 %v6614_v8  ;;  %v6611_v15 = vsel %vm564_vm4, %v6609_v28, -inf  ;;  %v13649_v8 = vld [vmem:[%s16129_s4 + $0x18] sm:$0xff] }
0x3357   :  { %6612 = vmax.xlane.f32.xlu0 %v6611_v15 }
0x33e3   :  { %v6616_v30 = vpop.xlane.xlu1 %6615 }
0x33e4   :  { %v6618_v39 = vsub.f32 %v6610_v20, %v6616_v30  ;;  %v6613_v2 = vpop.xlane.xlu0 %6612 }
0x33e5   :  { %v6617_v54 = vsub.f32 %v6609_v28, %v6613_v2 }
0x33e6   :  { %v6621_v23 = vmul.f32 1.442695, %v6618_v39 }
0x33e7   :  { %v6619_v29 = vmul.f32 1.442695, %v6617_v54 }
0x33e8   :  { %13555 = vpow2.f32 %v6621_v23 }
0x33e9   :  { %13557 = vpow2.f32 %v6619_v29 }
0x33f2   :  { %v13556_v34 = vpop.eup %13555 }
0x33f3   :  { %v13558_v47 = vpop.eup %13557  ;;  %v6626_v38 = vsel %vm564_vm4, %v13556_v34, 0.0 }
0x33f4   :  { %6627 = vadd.xlane.f32.xlu1 %v6626_v38  ;;  %v6623_v3 = vsel %vm564_vm4, %v13558_v47, 0.0 }
0x33f5   :  { %6624 = vadd.xlane.f32.xlu0 %v6623_v3 }
0x3481   :  { %v6628_v25 = vpop.xlane.xlu1 %6627 }
0x3482   :  { %13559 = vrcp.f32 %v6628_v25  ;;  %v6625_v12 = vpop.xlane.xlu0 %6624 }
0x3483   :  { %13561 = vrcp.f32 %v6625_v12 }
0x348c   :  { %v13560_v60 = vpop.eup %13559 }
0x348d   :  { %v13562_v44 = vpop.eup %13561  ;;  %v6632_v58 = vmul.f32 %v13560_v60, %v13556_v34 }
0x348e   :  { %v6631_v26 = vmul.f32 %v13562_v44, %v13558_v47 }
0x3490   :  { %12137 = vmatprep.mubr.msk.f32.mxu0 %vm564_vm4, %v6631_v26 }
0x3491   :  { %12138 = vmatmul.mubr.msk.f32.vlgmr.msra.gmra.mrb[78].mxu0 %vm564_vm4, %v6632_v58 }
0x3492   :  { %12986 = vmatpush3.bf16.msra.mxu0 %v14154_v45  ;;  %12153 = vmatprep.mubr.msk.f32.mxu0 %vm162_vm1, %v14983_v55 }
0x3493   :  { %12988 = vmatprep.subr.bf16.mxu0 %v14166_v56 }
0x3496   :  { %12990 = vmatpush3.bf16.msra.mxu0 %v14166_v56 }
0x3497   :  { %13000 = vmatprep.subr.bf16.mxu0 %v14180_v62 }
0x3499   :  { %12154 = vmatmul.mubr.msk.f32.vlgmr.msra.gmra.mrb[80].mxu0 %vm162_vm1, %v14985_v40 }
0x349a   :  { %13002 = vmatpush3.bf16.msra.mxu0 %v14180_v62  ;;  %12175 = vmatprep.mubr.msk.f32.mxu0 %vm162_vm1, %v14983_v55 }
0x349b   :  { %13004 = vmatprep.subr.bf16.mxu0 %v14190_v4 }
0x349e   :  { %13006 = vmatpush3.bf16.msra.mxu0 %v14190_v4  ;;  %v13646_v4 = vld [vmem:[%s16128_s3 + $0x3] ss:$0 sm:$0xff] }
0x34a1   :  { %12176 = vmatmul.mubr.msk.f32.vlgmr.msra.gmra.mrb[82].mxu0 %vm162_vm1, %v14985_v40 }
0x3564   :  { %v12139_v45 = vpop.f32.mrb[78].mxu0 }
0x3565   :  { %v6705_v17 = vpop.f32.mrb[79].mxu0 }
0x3566   :  { %12142 = vmatprep.mubr.msk.f32.mxu1 %vm474_vm2, %v6705_v17 }
0x3567   :  { %12143 = vmatmul.mubr.msk.f32.vlgmr.msra.gmra.mrb[40].mxu1 %vm474_vm2, %v12139_v45 }
0x3568   :  { %12994 = vmatpush3.bf16.msra.mxu1 %v14207_v10  ;;  %12164 = vmatprep.mubr.msk.f32.mxu1 %vm162_vm1, %v14983_v55  ;;  %v13647_v55 = vld [vmem:[%s16128_s3 + $0xb] ss:$0 sm:$0xff] }
0x3569   :  { %12996 = vmatprep.subr.bf16.mxu1 %v14216_v21 }
0x356c   :  { %v12155_v56 = vpop.f32.mrb[80].mxu0  ;;  %12998 = vmatpush3.bf16.msra.mxu1 %v14216_v21 }
0x356d   :  { %v6863_v62 = vpop.f32.mrb[81].mxu0  ;;  %v6869_v15 = vadd.f32 %v13646_v4, %v12155_v56 }
0x356e   :  { %v6864_v57 = vadd.f32 %v13646_v4, %v6863_v62 }
0x356f   :  { %12165 = vmatmul.mubr.msk.f32.vlgmr.msra.gmra.mrb[50].mxu1 %vm162_vm1, %v14985_v40  ;;  %v13648_v40 = vld [vmem:[%s16128_s3 + $0x7] ss:$0 sm:$0xff] }
0x3570   :  { %12182 = vmatprep.mubr.msk.f32.mxu1 %vm474_vm2, %v6864_v57 }
0x3574   :  { %v12177_v10 = vpop.f32.mrb[82].mxu0 }
0x3575   :  { %v7019_v22 = vadd.f32 %v13647_v55, %v12177_v10  ;;  %v7013_v42 = vpop.f32.mrb[83].mxu0 }
0x3576   :  { %v7014_v5 = vadd.f32 %v13647_v55, %v7013_v42 }
0x3578   :  { %v13013_v21 = vpack.c.bf16 %v7019_v22, %v7014_v5 }
0x357a   :  { %13014 = vmatprep.subr.bf16.mxu0 %v13013_v21 }
0x357b   :  { %13016 = vmatpush3.bf16.msra.mxu0 %v13013_v21 }
0x357c   :  { %13018 = vmatprep.subr.bf16.mxu0 %v14278_v19 }
0x3642   :  { %v12166_v52 = vpop.f32.mrb[50].mxu1 }
0x3643   :  { %v6944_v0 = vadd.f32 %v13648_v40, %v12166_v52  ;;  %v6938_v20 = vpop.f32.mrb[51].mxu1 }
0x3644   :  { %v6939_v63 = vadd.f32 %v13648_v40, %v6938_v20 }
0x3646   :  { %v13007_v28 = vpack.c.bf16 %v6944_v0, %v6939_v63 }
0x3648   :  { %13009 = vmatprep.subr.msk.bf16.mxu1 %vm13938_vm3, %v13007_v28 }
0x3649   :  { %13012 = vmatpush3.bf16.xpose.msk.msra.mxu1 %vm13938_vm3, %v13007_v28 }
0x364a   :  { %12192 = vmatprep.subr.mxu1 %v13649_v8 }
0x3650   :  { %12183 = vmatmul.mubr.msk.f32.vlgmr.msra.gmra.mrb[52].mxu1 %vm474_vm2, %v6869_v15 }
0x3651   :  { %12193 = vmatpush3.msra.mxu1 %v13649_v8 }
0x3652   :  { %13026 = vmatprep.subr.bf16.mxu1 %v14306_v27 }
0x3723   :  { %v12184_v30 = vpop.f32.mrb[52].mxu1 }
0x3724   :  { %v7110_v39 = vmul.f32 0.35355338, %v12184_v30  ;;  %v7100_v2 = vpop.f32.mrb[53].mxu1 }
0x3725   :  { %v7109_v54 = vmul.f32 0.35355338, %v7100_v2 }
0x3726   :  { %v7114_v23 = vsel %vm564_vm4, %v7110_v39, -inf }
0x3727   :  { %7115 = vmax.xlane.f32.xlu1 %v7114_v23  ;;  %v7111_v29 = vsel %vm564_vm4, %v7109_v54, -inf }
0x3728   :  { %7112 = vmax.xlane.f32.xlu0 %v7111_v29  ;;  %v13651_v29 = vld [vmem:[%s16130_s5 + $0x3] ss:$0 sm:$0xff] }
0x37b4   :  { %v7116_v34 = vpop.xlane.xlu1 %7115 }
0x37b5   :  { %v7118_v47 = vsub.f32 %v7110_v39, %v7116_v34  ;;  %v7113_v38 = vpop.xlane.xlu0 %7112 }
0x37b6   :  { %v7117_v3 = vsub.f32 %v7109_v54, %v7113_v38  ;;  %v13652_v38 = vld [vmem:[%s16130_s5 + $0x4] ss:$0 sm:$0xff] }
0x37b7   :  { %v7121_v25 = vmul.f32 1.442695, %v7118_v47 }
0x37b8   :  { %v7119_v12 = vmul.f32 1.442695, %v7117_v3 }
0x37b9   :  { %13563 = vpow2.f32 %v7121_v25 }
0x37ba   :  { %13565 = vpow2.f32 %v7119_v12  ;;  %v16207_v12 = vld [vmem:[#allocation5_spill] sm:$0xff] }
0x37c3   :  { %v13564_v60 = vpop.eup %13563 }
0x37c4   :  { %v13566_v44 = vpop.eup %13565  ;;  %v7126_v26 = vsel %vm564_vm4, %v13564_v60, 0.0 }
0x37c5   :  { %7127 = vadd.xlane.f32.xlu1 %v7126_v26  ;;  %v7123_v58 = vsel %vm564_vm4, %v13566_v44, 0.0 }
0x37c6   :  { %7124 = vadd.xlane.f32.xlu0 %v7123_v58 }
0x3852   :  { %v7128_v45 = vpop.xlane.xlu1 %7127 }
0x3853   :  { %13567 = vrcp.f32 %v7128_v45  ;;  %v7125_v17 = vpop.xlane.xlu0 %7124 }
0x3854   :  { %13569 = vrcp.f32 %v7125_v17 }
0x385d   :  { %v13568_v56 = vpop.eup %13567 }
0x385e   :  { %v13570_v62 = vpop.eup %13569  ;;  %v7132_v57 = vmul.f32 %v13568_v56, %v13564_v60 }
0x385f   :  { %v7131_v4 = vmul.f32 %v13570_v62, %v13566_v44  ;;  %v13653_v44 = vld [vmem:[%s16133_s8] ss:$0 sm:$0xff] }
0x3861   :  { %12189 = vmatprep.mubr.msk.f32.mxu0 %vm564_vm4, %v7131_v4 }
0x3862   :  { %12190 = vmatmul.mubr.msk.f32.vlgmr.msra.gmra.mrb[84].mxu0 %vm564_vm4, %v7132_v57 }
0x3863   :  { %13020 = vmatpush3.bf16.msra.mxu0 %v14278_v19 }
0x3864   :  { %13022 = vmatprep.subr.bf16.mxu0 %v14288_v31 }
0x3867   :  { %13024 = vmatpush3.bf16.msra.mxu0 %v14288_v31  ;;  %v13650_v31 = vld [vmem:[%s16130_s5 + $0x2] ss:$0 sm:$0xff] }
0x3868   :  { %13058 = vmatprep.subr.bf16.mxu0 %v14406_v37 }
0x3935   :  { %v12191_v10 = vpop.f32.mrb[84].mxu0 }
0x3936   :  { %v7205_v55 = vpop.f32.mrb[85].mxu0 }
0x3937   :  { %12194 = vmatprep.mubr.msk.f32.mxu1 %vm474_vm2, %v7205_v55 }
0x3938   :  { %12195 = vmatmul.mubr.msk.f32.vlgmr.msra.gmra.mrb[40].mxu1 %vm474_vm2, %v12191_v10 }
0x3939   :  { %13028 = vmatpush3.bf16.msra.mxu1 %v14306_v27 }
0x393a   :  { %13030 = vmatprep.subr.bf16.mxu1 %v14316_v1 }
0x393d   :  { %13032 = vmatpush3.bf16.msra.mxu1 %v14316_v1 }
0x393e   :  { %13034 = vmatprep.subr.bf16.mxu1 %v14326_v7 }
0x3941   :  { %13036 = vmatpush3.bf16.msra.mxu1 %v14326_v7 }
0x3942   :  { %13038 = vmatprep.subr.bf16.mxu1 %v14336_v13 }
0x3945   :  { %13040 = vmatpush3.bf16.msra.mxu1 %v14336_v13 }
0x3946   :  { %13042 = vmatprep.subr.bf16.mxu1 %v14349_v32 }
0x3949   :  { %13044 = vmatpush3.bf16.msra.mxu1 %v14349_v32 }
0x394a   :  { %13046 = vmatprep.subr.bf16.mxu1 %v14354_v35 }
0x394d   :  { %13048 = vmatpush3.bf16.msra.mxu1 %v14354_v35 }
0x394e   :  { %13050 = vmatprep.subr.bf16.mxu1 %v14365_v41 }
0x3951   :  { %13052 = vmatpush3.bf16.msra.mxu1 %v14365_v41 }
0x3952   :  { %13054 = vmatprep.subr.bf16.mxu1 %v14375_v46 }
0x3955   :  { %13056 = vmatpush3.bf16.msra.mxu1 %v14375_v46 }
0x3a0b   :  { %v12196_v19 = vpop.f32.mrb[40].mxu1 }
0x3a0c   :  { %v13415_v27 = vadd.f32 %v13650_v31, %v12196_v19  ;;  %v7286_v1 = vpop.f32.mrb[41].mxu1 }
0x3a0d   :  { %v13416_v7 = vadd.f32 %v13650_v31, %v7286_v1 }
0x3a0e   :  { %v15207_v13 = vadd.f32 %v13415_v27, %v14958_v33 }
0x3a0f   :  { %v15210_v32 = vadd.f32 %v13416_v7, %v14960_v14 }
0x3a10   :  { %v7302_v35 = vsel %vm162_vm1, %v15207_v13, 0.0 }
0x3a11   :  { %7303 = vadd.xlane.f32.xlu1 %v7302_v35  ;;  %v7299_v41 = vsel %vm162_vm1, %v15210_v32, 0.0 }
0x3a12   :  { %7300 = vadd.xlane.f32.xlu0 %v7299_v41 }
0x3a9e   :  { %v7304_v46 = vpop.xlane.xlu1 %7303 }
0x3a9f   :  { %v7306_v22 = vmul.f32 0.03125, %v7304_v46  ;;  %v7301_v42 = vpop.xlane.xlu0 %7300 }
0x3aa0   :  { %v7305_v5 = vmul.f32 0.03125, %v7301_v42 }
0x3aa1   :  { %v7308_v21 = vsub.f32 %v15207_v13, %v7306_v22 }
0x3aa2   :  { %v7307_v33 = vsub.f32 %v15210_v32, %v7305_v5 }
0x3aa3   :  { %v7310_v52 = vmul.f32 %v7308_v21, %v7308_v21 }
0x3aa4   :  { %v7309_v40 = vmul.f32 %v7307_v33, %v7307_v33 }
0x3aa5   :  { %v7314_v14 = vsel %vm162_vm1, %v7310_v52, 0.0  ;;  %v13654_v52 = vld [vmem:[%s16130_s5 + $0x5] ss:$0 sm:$0xff] }
0x3aa6   :  { %7315 = vadd.xlane.f32.xlu1 %v7314_v14  ;;  %v7311_v0 = vsel %vm162_vm1, %v7309_v40, 0.0 }
0x3aa7   :  { %7312 = vadd.xlane.f32.xlu0 %v7311_v0 }
0x3b33   :  { %v7316_v20 = vpop.xlane.xlu1 %7315 }
0x3b34   :  { %v7318_v63 = vmul.f32 0.03125, %v7316_v20  ;;  %v7313_v28 = vpop.xlane.xlu0 %7312 }
0x3b35   :  { %v7317_v8 = vmul.f32 0.03125, %v7313_v28 }
0x3b36   :  { %v7320_v15 = vadd.f32 1e-06, %v7318_v63 }
0x3b37   :  { %v7319_v30 = vadd.f32 1e-06, %v7317_v8 }
0x3b38   :  { %13571 = vrsqrt.f32 %v7320_v15 }
0x3b39   :  { %13573 = vrsqrt.f32 %v7319_v30 }
0x3b42   :  { %v13572_v39 = vpop.eup %13571 }
0x3b43   :  { %v13574_v2 = vpop.eup %13573  ;;  %v7324_v54 = vmul.f32 %v13572_v39, %v7308_v21 }
0x3b44   :  { %v7323_v23 = vmul.f32 %v13574_v2, %v7307_v33 }
0x3b45   :  { %v7326_v34 = vmul.f32 %v13651_v29, %v7324_v54 }
0x3b46   :  { %v7325_v47 = vmul.f32 %v13651_v29, %v7323_v23 }
0x3b47   :  { %v7328_v25 = vadd.f32 %v13652_v38, %v7326_v34 }
0x3b48   :  { %v7327_v3 = vadd.f32 %v13652_v38, %v7325_v47 }
0x3b4a   :  { %12205 = vmatprep.mubr.msk.f32.mxu0 %vm162_vm1, %v7327_v3 }
0x3b4b   :  { %12206 = vmatmul.mubr.msk.f32.vlgmr.msra.gmra.mrb[86].mxu0 %vm162_vm1, %v7328_v25 }
0x3b4c   :  { %13060 = vmatpush3.bf16.msra.mxu0 %v14406_v37 }
0x3b4d   :  { %13062 = vmatprep.subr.bf16.mxu0 %v14416_v43 }
0x3b50   :  { %13064 = vmatpush3.bf16.msra.mxu0 %v14416_v43 }
0x3b51   :  { %13066 = vmatprep.subr.bf16.mxu0 %v16207_v12 }
0x3c1e   :  { %v12207_v60 = vpop.f32.mrb[86].mxu0 }
0x3c1f   :  { %v7407_v26 = vadd.f32 %v13653_v44, %v12207_v60  ;;  %v7401_v58 = vpop.f32.mrb[87].mxu0 }
0x3c20   :  { %v7402_v45 = vadd.f32 %v13653_v44, %v7401_v58  ;;  %v13655_v58 = vld [vmem:[%s16130_s5 + $0x6] ss:$0 sm:$0xff] }
0x3c21   :  { %v7411_v17 = vmul.f32 %v7407_v26, %v7407_v26 }
0x3c22   :  { %v7410_v56 = vmul.f32 %v7402_v45, %v7402_v45 }
0x3c23   :  { %v7413_v62 = vmul.f32 %v7411_v17, %v7407_v26 }
0x3c24   :  { %v7412_v4 = vmul.f32 %v7410_v56, %v7402_v45  ;;  %v13656_v56 = vld [vmem:[%s16130_s5 + $0x7] ss:$0 sm:$0xff] }
0x3c25   :  { %v7415_v57 = vmul.f32 0.044715, %v7413_v62 }
0x3c26   :  { %v7414_v37 = vmul.f32 0.044715, %v7412_v4 }
0x3c27   :  { %v7417_v10 = vadd.f32 %v7415_v57, %v7407_v26  ;;  %v16208_v57 = vld [vmem:[#allocation6_spill] sm:$0xff] }
0x3c28   :  { %v7416_v55 = vadd.f32 %v7414_v37, %v7402_v45  ;;  %v16209_v37 = vld [vmem:[#allocation7_spill] sm:$0xff] }
0x3c29   :  { %v7419_v19 = vmul.f32 0.7978846, %v7417_v10  ;;  %v16210_v10 = vld [vmem:[#allocation8_spill] sm:$0xff] }
0x3c2a   :  { %v7418_v43 = vmul.f32 0.7978846, %v7416_v55 }
0x3c2b   :  { %13575 = vtanh.f32 %v7419_v19  ;;  %v13657_v19 = vld [vmem:[%s16128_s3 + $0xc] ss:$0 sm:$0xff] }
0x3c2c   :  { %13577 = vtanh.f32 %v7418_v43 }
0x3c35   :  { %v13576_v31 = vpop.eup %13575 }
0x3c36   :  { %v13578_v27 = vpop.eup %13577  ;;  %v7423_v1 = vadd.f32 1.0, %v13576_v31 }
0x3c37   :  { %v7422_v7 = vadd.f32 1.0, %v13578_v27  ;;  %v13658_v27 = vld [vmem:[%s16128_s3 + $0x10] ss:$0 sm:$0xff] }
0x3c38   :  { %v7425_v35 = vmul.f32 0.5, %v7423_v1 }
0x3c39   :  { %v7424_v41 = vmul.f32 0.5, %v7422_v7 }
0x3c3a   :  { %v7427_v22 = vmul.f32 %v7425_v35, %v7407_v26 }
0x3c3b   :  { %v7426_v46 = vmul.f32 %v7424_v41, %v7402_v45 }
0x3c3d   :  { %12240 = vmatprep.mubr.f32.mxu1 %v7426_v46 }
0x3c3e   :  { %12241 = vmatmul.mubr.f32.vlgmr.msra.gmra.mrb[54].mxu1 %v7427_v22  ;;  %v16211_v22 = vld [vmem:[#allocation9_spill] sm:$0xff] }
0x3d11   :  { %v12242_v42 = vpop.f32.mrb[54].mxu1 }
0x3d12   :  { %v7504_v5 = vadd.f32 %v12242_v42, %v15207_v13  ;;  %v7494_v21 = vpop.f32.mrb[55].mxu1  ;;  %v13659_v42 = vld [vmem:[%s16128_s3 + $0x14] ss:$0 sm:$0xff] }
0x3d13   :  { %v7503_v33 = vadd.f32 %v7494_v21, %v15210_v32 }
0x3d14   :  { %v15240_v40 = vadd.f32 %v13654_v52, %v7504_v5 }
0x3d15   :  { %v15242_v14 = vadd.f32 %v13654_v52, %v7503_v33 }
0x3d16   :  { %v7510_v0 = vsel %vm162_vm1, %v15240_v40, 0.0 }
0x3d17   :  { %7511 = vadd.xlane.f32.xlu1 %v7510_v0  ;;  %v7507_v20 = vsel %vm162_vm1, %v15242_v14, 0.0 }
0x3d18   :  { %7508 = vadd.xlane.f32.xlu0 %v7507_v20  ;;  %v16212_v20 = vld [vmem:[#allocation10_spill] sm:$0xff] }
0x3da4   :  { %v7512_v13 = vpop.xlane.xlu1 %7511 }
0x3da5   :  { %v7514_v63 = vmul.f32 0.03125, %v7512_v13  ;;  %v7509_v28 = vpop.xlane.xlu0 %7508  ;;  %v13660_v13 = vld [vmem:[%s16129_s4 + $0x20] sm:$0xff] }
0x3da6   :  { %v7513_v32 = vmul.f32 0.03125, %v7509_v28  ;;  %v16214_v28 = vld [vmem:[#allocation12_spill] sm:$0xff] }
0x3da7   :  { %v7516_v8 = vsub.f32 %v15240_v40, %v7514_v63  ;;  %v16213_v63 = vld [vmem:[#allocation11_spill] sm:$0xff] }
0x3da8   :  { %v7515_v15 = vsub.f32 %v15242_v14, %v7513_v32 }
0x3da9   :  { %v7518_v30 = vmul.f32 %v7516_v8, %v7516_v8 }
0x3daa   :  { %v7517_v39 = vmul.f32 %v7515_v15, %v7515_v15 }
0x3dab   :  { %v7522_v2 = vsel %vm162_vm1, %v7518_v30, 0.0 }
0x3dac   :  { %7523 = vadd.xlane.f32.xlu1 %v7522_v2  ;;  %v7519_v54 = vsel %vm162_vm1, %v7517_v39, 0.0 }
0x3dad   :  { %7520 = vadd.xlane.f32.xlu0 %v7519_v54 }
0x3e39   :  { %v7524_v23 = vpop.xlane.xlu1 %7523 }
0x3e3a   :  { %v7526_v29 = vmul.f32 0.03125, %v7524_v23  ;;  %v7521_v34 = vpop.xlane.xlu0 %7520 }
0x3e3b   :  { %v7525_v47 = vmul.f32 0.03125, %v7521_v34  ;;  %v13661_v34 = vld [vmem:[%s16128_s3 + $0x15] ss:$0 sm:$0xff] }
0x3e3c   :  { %v7528_v38 = vadd.f32 1e-06, %v7526_v29 }
0x3e3d   :  { %v7527_v3 = vadd.f32 1e-06, %v7525_v47 }
0x3e3e   :  { %13579 = vrsqrt.f32 %v7528_v38 }
0x3e3f   :  { %13581 = vrsqrt.f32 %v7527_v3 }
0x3e48   :  { %v13580_v25 = vpop.eup %13579 }
0x3e49   :  { %v13582_v60 = vpop.eup %13581  ;;  %v7532_v44 = vmul.f32 %v13580_v25, %v7516_v8 }
0x3e4a   :  { %v7531_v26 = vmul.f32 %v13582_v60, %v7515_v15 }
0x3e4b   :  { %v7534_v45 = vmul.f32 %v13655_v58, %v7532_v44 }
0x3e4c   :  { %v7533_v17 = vmul.f32 %v13655_v58, %v7531_v26 }
0x3e4d   :  { %v15260_v4 = vadd.f32 %v13656_v56, %v7534_v45 }
0x3e4e   :  { %v15258_v62 = vadd.f32 %v13656_v56, %v7533_v17 }
0x3e50   :  { %12251 = vmatprep.mubr.msk.f32.mxu0 %vm162_vm1, %v15258_v62 }
0x3e51   :  { %12252 = vmatmul.mubr.msk.f32.vlgmr.msra.gmra.mrb[88].mxu0 %vm162_vm1, %v15260_v4 }
0x3e52   :  { %13068 = vmatpush3.bf16.msra.mxu0 %v16207_v12  ;;  %12262 = vmatprep.mubr.msk.f32.mxu0 %vm162_vm1, %v15258_v62 }
0x3e53   :  { %13070 = vmatprep.subr.bf16.mxu0 %v16208_v57 }
0x3e56   :  { %13072 = vmatpush3.bf16.msra.mxu0 %v16208_v57 }
0x3e57   :  { %13074 = vmatprep.subr.bf16.mxu0 %v16209_v37 }
0x3e59   :  { %12263 = vmatmul.mubr.msk.f32.vlgmr.msra.gmra.mrb[90].mxu0 %vm162_vm1, %v15260_v4 }
0x3e5a   :  { %13076 = vmatpush3.bf16.msra.mxu0 %v16209_v37  ;;  %12273 = vmatprep.mubr.msk.f32.mxu0 %vm162_vm1, %v15258_v62 }
0x3e5b   :  { %13078 = vmatprep.subr.bf16.mxu0 %v16210_v10 }
0x3e5e   :  { %13080 = vmatpush3.bf16.msra.mxu0 %v16210_v10 }
0x3e61   :  { %12274 = vmatmul.mubr.msk.f32.vlgmr.msra.gmra.mrb[92].mxu0 %vm162_vm1, %v15260_v4 }
0x3f24   :  { %v12253_v12 = vpop.f32.mrb[88].mxu0 }
0x3f25   :  { %v7609_v55 = vpop.f32.mrb[89].mxu0  ;;  %v7615_v52 = vadd.f32 %v13657_v19, %v12253_v12 }
0x3f26   :  { %v7610_v43 = vadd.f32 %v13657_v19, %v7609_v55 }
0x3f28   :  { %12280 = vmatprep.mubr.msk.f32.mxu0 %vm474_vm2, %v7610_v43 }
0x3f2c   :  { %v12264_v31 = vpop.f32.mrb[90].mxu0 }
0x3f2d   :  { %v7690_v1 = vadd.f32 %v13658_v27, %v12264_v31  ;;  %v7684_v7 = vpop.f32.mrb[91].mxu0 }
0x3f2e   :  { %v7685_v35 = vadd.f32 %v13658_v27, %v7684_v7 }
0x3f30   :  { %v13081_v41 = vpack.c.bf16 %v7690_v1, %v7685_v35  ;;  %v13662_v35 = vld [vmem:[%s16128_s3 + $0xd] ss:$0 sm:$0xff] }
0x3f32   :  { %13083 = vmatprep.subr.msk.bf16.mxu0 %vm13938_vm3, %v13081_v41 }
0x3f33   :  { %13086 = vmatpush3.bf16.xpose.msk.msra.mxu0 %vm13938_vm3, %v13081_v41 }
0x3f34   :  { %v12275_v46 = vpop.f32.mrb[92].mxu0  ;;  %13092 = vmatprep.subr.bf16.mxu0 %v16211_v22 }
0x3f35   :  { %v7765_v5 = vadd.f32 %v13659_v42, %v12275_v46  ;;  %v7759_v21 = vpop.f32.mrb[93].mxu0 }
0x3f36   :  { %v7760_v33 = vadd.f32 %v13659_v42, %v7759_v21 }
0x3f38   :  { %v13087_v0 = vpack.c.bf16 %v7765_v5, %v7760_v33 }
0x3f3a   :  { %12281 = vmatmul.mubr.msk.f32.vlgmr.msra.gmra.mrb[94].mxu0 %vm474_vm2, %v7615_v52  ;;  %13088 = vmatprep.subr.bf16.mxu1 %v13087_v0  ;;  %v16215_v52 = vld [vmem:[#allocation16_spill] sm:$0xff] }
0x3f3b   :  { %13090 = vmatpush3.bf16.msra.mxu1 %v13087_v0  ;;  %13094 = vmatpush3.bf16.msra.mxu0 %v16211_v22 }
0x3f3c   :  { %12303 = vmatprep.mubr.msk.f32.mxu0 %vm162_vm1, %v15258_v62  ;;  %13096 = vmatprep.subr.bf16.mxu0 %v16212_v20 }
0x3f3d   :  { %12290 = vmatprep.subr.mxu1 %v13660_v13 }
0x3f3f   :  { %13098 = vmatpush3.bf16.msra.mxu0 %v16212_v20 }
0x3f40   :  { %13108 = vmatprep.subr.bf16.mxu0 %v16213_v63 }
0x3f42   :  { %12304 = vmatmul.mubr.msk.f32.vlgmr.msra.gmra.mrb[96].mxu0 %vm162_vm1, %v15260_v4 }
0x3f43   :  { %13110 = vmatpush3.bf16.msra.mxu0 %v16213_v63  ;;  %12325 = vmatprep.mubr.msk.f32.mxu0 %vm162_vm1, %v15258_v62 }
0x3f44   :  { %13112 = vmatprep.subr.bf16.mxu0 %v16214_v28 }
0x3f47   :  { %13114 = vmatpush3.bf16.msra.mxu0 %v16214_v28 }
0x3f4a   :  { %12326 = vmatmul.mubr.msk.f32.vlgmr.msra.gmra.mrb[98].mxu0 %vm162_vm1, %v15260_v4 }
0x400d   :  { %v12282_v32 = vpop.f32.mrb[94].mxu0 }
0x400e   :  { %v7856_v8 = vmul.f32 0.35355338, %v12282_v32  ;;  %v7846_v15 = vpop.f32.mrb[95].mxu0 }
0x400f   :  { %v7855_v30 = vmul.f32 0.35355338, %v7846_v15 }
0x4010   :  { %v7860_v39 = vsel %vm564_vm4, %v7856_v8, -inf }
0x4011   :  { %7861 = vmax.xlane.f32.xlu1 %v7860_v39  ;;  %v7857_v2 = vsel %vm564_vm4, %v7855_v30, -inf }
0x4012   :  { %7858 = vmax.xlane.f32.xlu0 %v7857_v2 }
0x4015   :  { %v12305_v54 = vpop.f32.mrb[96].mxu0 }
0x4016   :  { %v8109_v23 = vpop.f32.mrb[97].mxu0  ;;  %v8115_v33 = vadd.f32 %v13662_v35, %v12305_v54 }
0x4017   :  { %v8110_v41 = vadd.f32 %v13662_v35, %v8109_v23 }
0x401d   :  { %v12327_v29 = vpop.f32.mrb[98].mxu0 }
0x401e   :  { %v8265_v47 = vadd.f32 %v13661_v34, %v12327_v29  ;;  %v8259_v38 = vpop.f32.mrb[99].mxu0 }
0x401f   :  { %v8260_v3 = vadd.f32 %v13661_v34, %v8259_v38 }
0x4021   :  { %v13121_v25 = vpack.c.bf16 %v8265_v47, %v8260_v3 }
0x4023   :  { %13122 = vmatprep.subr.bf16.mxu0 %v13121_v25 }
0x4024   :  { %13124 = vmatpush3.bf16.msra.mxu0 %v13121_v25 }
0x4025   :  { %13126 = vmatprep.subr.bf16.mxu0 %v14608_v49 }
0x409e   :  { %v7862_v60 = vpop.xlane.xlu1 %7861 }
0x409f   :  { %v7864_v44 = vsub.f32 %v7856_v8, %v7862_v60  ;;  %v7859_v26 = vpop.xlane.xlu0 %7858 }
0x40a0   :  { %v7863_v58 = vsub.f32 %v7855_v30, %v7859_v26 }
0x40a1   :  { %v7867_v45 = vmul.f32 1.442695, %v7864_v44 }
0x40a2   :  { %v7865_v17 = vmul.f32 1.442695, %v7863_v58  ;;  %v16216_v58 = vld [vmem:[#allocation13_spill] sm:$0xff] }
0x40a3   :  { %13583 = vpow2.f32 %v7867_v45  ;;  %v16217_v45 = vld [vmem:[#allocation14_spill] sm:$0xff] }
0x40a4   :  { %13585 = vpow2.f32 %v7865_v17  ;;  %v16218_v17 = vld [vmem:[#allocation15_spill] sm:$0xff] }
0x40ad   :  { %v13584_v56 = vpop.eup %13583 }
0x40ae   :  { %v13586_v57 = vpop.eup %13585  ;;  %v7872_v37 = vsel %vm564_vm4, %v13584_v56, 0.0 }
0x40af   :  { %7873 = vadd.xlane.f32.xlu1 %v7872_v37  ;;  %v7869_v10 = vsel %vm564_vm4, %v13586_v57, 0.0 }
0x40b0   :  { %7870 = vadd.xlane.f32.xlu0 %v7869_v10 }
0x413c   :  { %v7874_v12 = vpop.xlane.xlu1 %7873 }
0x413d   :  { %13587 = vrcp.f32 %v7874_v12  ;;  %v7871_v55 = vpop.xlane.xlu0 %7870  ;;  %v13665_v12 = vld [vmem:[%s16128_s3 + $0xe] ss:$0 sm:$0xff] }
0x413e   :  { %13589 = vrcp.f32 %v7871_v55 }
0x4147   :  { %v13588_v19 = vpop.eup %13587 }
0x4148   :  { %v13590_v43 = vpop.eup %13589  ;;  %v7878_v27 = vmul.f32 %v13588_v19, %v13584_v56 }
0x4149   :  { %v7877_v31 = vmul.f32 %v13590_v43, %v13586_v57  ;;  %v16219_v57 = vld [vmem:[#allocation17_spill] sm:$0xff]  ;;  %v13666_v43 = vld [vmem:[%s16128_s3 + $0x16] ss:$0 sm:$0xff] }
0x414b   :  { %12287 = vmatprep.mubr.msk.f32.mxu1 %vm564_vm4, %v7877_v31 }
0x414c   :  { %12288 = vmatmul.mubr.msk.f32.vlgmr.msra.gmra.mrb[56].mxu1 %vm564_vm4, %v7878_v27 }
0x414d   :  { %12291 = vmatpush3.msra.mxu1 %v13660_v13 }
0x414e   :  { %13100 = vmatprep.subr.bf16.mxu1 %v14565_v50 }
0x421f   :  { %v12289_v1 = vpop.f32.mrb[56].mxu1 }
0x4220   :  { %v7951_v7 = vpop.f32.mrb[57].mxu1 }
0x4221   :  { %12292 = vmatprep.mubr.msk.f32.mxu1 %vm474_vm2, %v7951_v7 }
0x4222   :  { %12293 = vmatmul.mubr.msk.f32.vlgmr.msra.gmra.mrb[58].mxu1 %vm474_vm2, %v12289_v1 }
0x4223   :  { %13102 = vmatpush3.bf16.msra.mxu1 %v14565_v50  ;;  %12314 = vmatprep.mubr.msk.f32.mxu1 %vm162_vm1, %v15258_v62  ;;  %v13663_v50 = vld [vmem:[%s16128_s3 + $0x11] ss:$0 sm:$0xff] }
0x4224   :  { %13104 = vmatprep.subr.bf16.mxu1 %v14574_v24 }
0x4227   :  { %13106 = vmatpush3.bf16.msra.mxu1 %v14574_v24  ;;  %v13664_v24 = vld [vmem:[%s16129_s4 + $0x28] sm:$0xff] }
0x422a   :  { %12315 = vmatmul.mubr.msk.f32.vlgmr.msra.gmra.mrb[60].mxu1 %vm162_vm1, %v15260_v4 }
0x422b   :  { %12332 = vmatprep.mubr.msk.f32.mxu1 %vm474_vm2, %v8110_v41  ;;  %v13667_v41 = vld [vmem:[%s16128_s3 + $0x12] ss:$0 sm:$0xff] }
0x42fd   :  { %v12316_v46 = vpop.f32.mrb[60].mxu1 }
0x42fe   :  { %v8190_v22 = vadd.f32 %v13663_v50, %v12316_v46  ;;  %v8184_v42 = vpop.f32.mrb[61].mxu1 }
0x42ff   :  { %v8185_v5 = vadd.f32 %v13663_v50, %v8184_v42 }
0x4301   :  { %v13115_v21 = vpack.c.bf16 %v8190_v22, %v8185_v5  ;;  %v13668_v5 = vld [vmem:[%s16129_s4 + $0x30] sm:$0xff] }
0x4303   :  { %13117 = vmatprep.subr.msk.bf16.mxu1 %vm13938_vm3, %v13115_v21 }
0x4304   :  { %13120 = vmatpush3.bf16.xpose.msk.msra.mxu1 %vm13938_vm3, %v13115_v21 }
0x4305   :  { %12342 = vmatprep.subr.mxu1 %v13664_v24 }
0x430b   :  { %12333 = vmatmul.mubr.msk.f32.vlgmr.msra.gmra.mrb[62].mxu1 %vm474_vm2, %v8115_v33 }
0x430c   :  { %12343 = vmatpush3.msra.mxu1 %v13664_v24 }
0x430d   :  { %13134 = vmatprep.subr.bf16.mxu1 %v16215_v52 }
0x43de   :  { %v12334_v0 = vpop.f32.mrb[62].mxu1 }
0x43df   :  { %v8356_v20 = vmul.f32 0.35355338, %v12334_v0  ;;  %v8346_v13 = vpop.f32.mrb[63].mxu1 }
0x43e0   :  { %v8355_v63 = vmul.f32 0.35355338, %v8346_v13 }
0x43e1   :  { %v8360_v28 = vsel %vm564_vm4, %v8356_v20, -inf }
0x43e2   :  { %8361 = vmax.xlane.f32.xlu1 %v8360_v28  ;;  %v8357_v32 = vsel %vm564_vm4, %v8355_v63, -inf }
0x43e3   :  { %8358 = vmax.xlane.f32.xlu0 %v8357_v32 }
0x446f   :  { %v8362_v8 = vpop.xlane.xlu1 %8361 }
0x4470   :  { %v8364_v15 = vsub.f32 %v8356_v20, %v8362_v8  ;;  %v8359_v30 = vpop.xlane.xlu0 %8358 }
0x4471   :  { %v8363_v39 = vsub.f32 %v8355_v63, %v8359_v30 }
0x4472   :  { %v8367_v2 = vmul.f32 1.442695, %v8364_v15 }
0x4473   :  { %v8365_v54 = vmul.f32 1.442695, %v8363_v39 }
0x4474   :  { %13591 = vpow2.f32 %v8367_v2 }
0x4475   :  { %13593 = vpow2.f32 %v8365_v54 }
0x447e   :  { %v13592_v23 = vpop.eup %13591 }
0x447f   :  { %v13594_v29 = vpop.eup %13593  ;;  %v8372_v34 = vsel %vm564_vm4, %v13592_v23, 0.0 }
0x4480   :  { %8373 = vadd.xlane.f32.xlu1 %v8372_v34  ;;  %v8369_v47 = vsel %vm564_vm4, %v13594_v29, 0.0 }
0x4481   :  { %8370 = vadd.xlane.f32.xlu0 %v8369_v47 }
0x450d   :  { %v8374_v38 = vpop.xlane.xlu1 %8373 }
0x450e   :  { %13595 = vrcp.f32 %v8374_v38  ;;  %v8371_v3 = vpop.xlane.xlu0 %8370 }
0x450f   :  { %13597 = vrcp.f32 %v8371_v3 }
0x4518   :  { %v13596_v25 = vpop.eup %13595 }
0x4519   :  { %v13598_v60 = vpop.eup %13597  ;;  %v8378_v26 = vmul.f32 %v13596_v25, %v13592_v23 }
0x451a   :  { %v8377_v44 = vmul.f32 %v13598_v60, %v13594_v29  ;;  %v16220_v60 = vld [vmem:[#allocation18_spill] sm:$0xff] }
0x451c   :  { %12339 = vmatprep.mubr.msk.f32.mxu0 %vm564_vm4, %v8377_v44  ;;  %v16221_v44 = vld [vmem:[#allocation19_spill] sm:$0xff] }
0x451d   :  { %12340 = vmatmul.mubr.msk.f32.vlgmr.msra.gmra.mrb[100].mxu0 %vm564_vm4, %v8378_v26  ;;  %v16222_v26 = vld [vmem:[#allocation20_spill] sm:$0xff] }
0x451e   :  { %13128 = vmatpush3.bf16.msra.mxu0 %v14608_v49  ;;  %12355 = vmatprep.mubr.msk.f32.mxu0 %vm162_vm1, %v15258_v62 }
0x451f   :  { %13130 = vmatprep.subr.bf16.mxu0 %v16216_v58 }
0x4522   :  { %13132 = vmatpush3.bf16.msra.mxu0 %v16216_v58 }
0x4523   :  { %13142 = vmatprep.subr.bf16.mxu0 %v16217_v45 }
0x4525   :  { %12356 = vmatmul.mubr.msk.f32.vlgmr.msra.gmra.mrb[102].mxu0 %vm162_vm1, %v15260_v4 }
0x4526   :  { %13144 = vmatpush3.bf16.msra.mxu0 %v16217_v45  ;;  %12377 = vmatprep.mubr.msk.f32.mxu0 %vm162_vm1, %v15258_v62  ;;  %v16223_v45 = vld [vmem:[#allocation21_spill] sm:$0xff] }
0x4527   :  { %13146 = vmatprep.subr.bf16.mxu0 %v16218_v17 }
0x452a   :  { %13148 = vmatpush3.bf16.msra.mxu0 %v16218_v17 }
0x452d   :  { %12378 = vmatmul.mubr.msk.f32.vlgmr.msra.gmra.mrb[104].mxu0 %vm162_vm1, %v15260_v4 }
0x45f0   :  { %v12341_v49 = vpop.f32.mrb[100].mxu0 }
0x45f1   :  { %v8451_v56 = vpop.f32.mrb[101].mxu0 }
0x45f2   :  { %12344 = vmatprep.mubr.msk.f32.mxu1 %vm474_vm2, %v8451_v56  ;;  %v13669_v56 = vld [vmem:[%s16128_s3 + $0xf] ss:$0 sm:$0xff] }
0x45f3   :  { %12345 = vmatmul.mubr.msk.f32.vlgmr.msra.gmra.mrb[58].mxu1 %vm474_vm2, %v12341_v49 }
0x45f4   :  { %13136 = vmatpush3.bf16.msra.mxu1 %v16215_v52  ;;  %12366 = vmatprep.mubr.msk.f32.mxu1 %vm162_vm1, %v15258_v62 }
0x45f5   :  { %13138 = vmatprep.subr.bf16.mxu1 %v16219_v57 }
0x45f8   :  { %v12357_v37 = vpop.f32.mrb[102].mxu0  ;;  %13140 = vmatpush3.bf16.msra.mxu1 %v16219_v57 }
0x45f9   :  { %v8609_v10 = vpop.f32.mrb[103].mxu0  ;;  %v8615_v21 = vadd.f32 %v13665_v12, %v12357_v37 }
0x45fa   :  { %v8610_v55 = vadd.f32 %v13665_v12, %v8609_v10 }
0x45fb   :  { %12367 = vmatmul.mubr.msk.f32.vlgmr.msra.gmra.mrb[64].mxu1 %vm162_vm1, %v15260_v4 }
0x45fc   :  { %12384 = vmatprep.mubr.msk.f32.mxu1 %vm474_vm2, %v8610_v55 }
0x4600   :  { %v12379_v19 = vpop.f32.mrb[104].mxu0 }
0x4601   :  { %v8765_v31 = vadd.f32 %v13666_v43, %v12379_v19  ;;  %v8759_v27 = vpop.f32.mrb[105].mxu0 }
0x4602   :  { %v8760_v1 = vadd.f32 %v13666_v43, %v8759_v27 }
0x4604   :  { %v13155_v7 = vpack.c.bf16 %v8765_v31, %v8760_v1 }
0x4606   :  { %13156 = vmatprep.subr.bf16.mxu0 %v13155_v7 }
0x4607   :  { %13158 = vmatpush3.bf16.msra.mxu0 %v13155_v7  ;;  %v13672_v7 = vld [vmem:[%s16129_s4 + $0x38] sm:$0xff]  ;;  %s13702_s4 = smov [#allocation2]  }
0x4608   :  { %13160 = vmatprep.subr.bf16.mxu0 %v14706_v6  ;;  %s10382_s9 = sshll.u32 %s13702_s4, 4  ;;  %s10383_s9 = int_to_ptr.vmem [resolvable:$true] %s10382_s9 }
0x4609   :  { %s13677_s7 = scalar_lea.vmem %s10383_s9, 32  ;;  %p13682_p1 = scmp.lt.s32.totalorder %s10383_s9, %s10383_s9 }
0x460a   :  { %p13678_p0 = scmp.ne.s32.totalorder %s10383_s9, %s13677_s7  ;;  %p13683_p2 = scmp.lt.s32.totalorder %s13677_s7, %s13677_s7 }
0x460c   :  { %p13684_p3 = por %p13683_p2, %p13682_p1 }
0x460e   :  { %p13685_p4 = pnand %p13684_p3, %p13678_p0 }
0x46ce   :  { %v12368_v35 = vpop.f32.mrb[64].mxu1 }
0x46cf   :  { %v8690_v46 = vadd.f32 %v13667_v41, %v12368_v35  ;;  %v8684_v50 = vpop.f32.mrb[65].mxu1 }
0x46d0   :  { %v8685_v22 = vadd.f32 %v13667_v41, %v8684_v50 }
0x46d2   :  { %v13149_v42 = vpack.c.bf16 %v8690_v46, %v8685_v22 }
0x46d4   :  { %13151 = vmatprep.subr.msk.bf16.mxu1 %vm13938_vm3, %v13149_v42 }
0x46d5   :  { %13154 = vmatpush3.bf16.xpose.msk.msra.mxu1 %vm13938_vm3, %v13149_v42 }
0x46d6   :  { %12394 = vmatprep.subr.mxu1 %v13668_v5 }
0x46dc   :  { %12385 = vmatmul.mubr.msk.f32.vlgmr.msra.gmra.mrb[66].mxu1 %vm474_vm2, %v8615_v21 }
0x46dd   :  { %12395 = vmatpush3.msra.mxu1 %v13668_v5 }
0x46de   :  { %13168 = vmatprep.subr.bf16.mxu1 %v14759_v18 }
0x47af   :  { %v12386_v24 = vpop.f32.mrb[66].mxu1 }
0x47b0   :  { %v8856_v33 = vmul.f32 0.35355338, %v12386_v24  ;;  %v8846_v52 = vpop.f32.mrb[67].mxu1 }
0x47b1   :  { %v8855_v0 = vmul.f32 0.35355338, %v8846_v52 }
0x47b2   :  { %v8860_v20 = vsel %vm564_vm4, %v8856_v33, -inf }
0x47b3   :  { %8861 = vmax.xlane.f32.xlu1 %v8860_v20  ;;  %v8857_v13 = vsel %vm564_vm4, %v8855_v0, -inf }
0x47b4   :  { %8858 = vmax.xlane.f32.xlu0 %v8857_v13 }
0x4840   :  { %v8862_v63 = vpop.xlane.xlu1 %8861 }
0x4841   :  { %v8864_v28 = vsub.f32 %v8856_v33, %v8862_v63  ;;  %v8859_v32 = vpop.xlane.xlu0 %8858 }
0x4842   :  { %v8863_v8 = vsub.f32 %v8855_v0, %v8859_v32 }
0x4843   :  { %v8867_v15 = vmul.f32 1.442695, %v8864_v28 }
0x4844   :  { %v8865_v30 = vmul.f32 1.442695, %v8863_v8 }
0x4845   :  { %13599 = vpow2.f32 %v8867_v15 }
0x4846   :  { %13601 = vpow2.f32 %v8865_v30 }
0x484f   :  { %v13600_v39 = vpop.eup %13599 }
0x4850   :  { %v13602_v2 = vpop.eup %13601  ;;  %v8872_v54 = vsel %vm564_vm4, %v13600_v39, 0.0 }
0x4851   :  { %8873 = vadd.xlane.f32.xlu1 %v8872_v54  ;;  %v8869_v23 = vsel %vm564_vm4, %v13602_v2, 0.0 }
0x4852   :  { %8870 = vadd.xlane.f32.xlu0 %v8869_v23 }
0x48de   :  { %v8874_v29 = vpop.xlane.xlu1 %8873 }
0x48df   :  { %13603 = vrcp.f32 %v8874_v29  ;;  %v8871_v34 = vpop.xlane.xlu0 %8870 }
0x48e0   :  { %13605 = vrcp.f32 %v8871_v34 }
0x48e9   :  { %v13604_v47 = vpop.eup %13603 }
0x48ea   :  { %v13606_v38 = vpop.eup %13605  ;;  %v8878_v25 = vmul.f32 %v13604_v47, %v13600_v39 }
0x48eb   :  { %v8877_v3 = vmul.f32 %v13606_v38, %v13602_v2 }
0x48ed   :  { %12391 = vmatprep.mubr.msk.f32.mxu0 %vm564_vm4, %v8877_v3 }
0x48ee   :  { %12392 = vmatmul.mubr.msk.f32.vlgmr.msra.gmra.mrb[106].mxu0 %vm564_vm4, %v8878_v25 }
0x48ef   :  { %13162 = vmatpush3.bf16.msra.mxu0 %v14706_v6  ;;  %12407 = vmatprep.mubr.msk.f32.mxu0 %vm162_vm1, %v15258_v62 }
0x48f0   :  { %13164 = vmatprep.subr.bf16.mxu0 %v16220_v60 }
0x48f3   :  { %13166 = vmatpush3.bf16.msra.mxu0 %v16220_v60 }
0x48f4   :  { %13176 = vmatprep.subr.bf16.mxu0 %v16221_v44 }
0x48f6   :  { %12408 = vmatmul.mubr.msk.f32.vlgmr.msra.gmra.mrb[108].mxu0 %vm162_vm1, %v15260_v4 }
0x48f7   :  { %13178 = vmatpush3.bf16.msra.mxu0 %v16221_v44  ;;  %12429 = vmatprep.mubr.msk.f32.mxu0 %vm162_vm1, %v15258_v62 }
0x48f8   :  { %13180 = vmatprep.subr.bf16.mxu0 %v16222_v26 }
0x48fb   :  { %13182 = vmatpush3.bf16.msra.mxu0 %v16222_v26 }
0x48fe   :  { %12430 = vmatmul.mubr.msk.f32.vlgmr.msra.gmra.mrb[110].mxu0 %vm162_vm1, %v15260_v4 }
0x49c1   :  { %v12393_v6 = vpop.f32.mrb[106].mxu0 }
0x49c2   :  { %v8951_v58 = vpop.f32.mrb[107].mxu0 }
0x49c3   :  { %12396 = vmatprep.mubr.msk.f32.mxu1 %vm474_vm2, %v8951_v58 }
0x49c4   :  { %12397 = vmatmul.mubr.msk.f32.vlgmr.msra.gmra.mrb[58].mxu1 %vm474_vm2, %v12393_v6  ;;  %v16227_v6 = vld [vmem:[#allocation22_spill] sm:$0xff] }
0x49c5   :  { %13170 = vmatpush3.bf16.msra.mxu1 %v14759_v18  ;;  %12418 = vmatprep.mubr.msk.f32.mxu1 %vm162_vm1, %v15258_v62  ;;  %v13670_v62 = vld [vmem:[%s16128_s3 + $0x17] ss:$0 sm:$0xff]  ;;  %v5115_v58 = vadd.f32 %v14973_v61, %v16227_v6 }
0x49c6   :  { %13172 = vmatprep.subr.bf16.mxu1 %v16223_v45 }
0x49c9   :  { %v12409_v17 = vpop.f32.mrb[108].mxu0  ;;  %13174 = vmatpush3.bf16.msra.mxu1 %v16223_v45  ;;  %v16228_v45 = vld [vmem:[#allocation23_spill] sm:$0xff] }
0x49ca   :  { %v9109_v49 = vpop.f32.mrb[109].mxu0  ;;  %v9115_v35 = vadd.f32 %v13669_v56, %v12409_v17 }
0x49cb   :  { %v9110_v57 = vadd.f32 %v13669_v56, %v9109_v49  ;;  %v15499_v56 = vld [vmem:[%s16130_s5 + $0xb] ss:$0 sm:$0xff] }
0x49cc   :  { %12419 = vmatmul.mubr.msk.f32.vlgmr.msra.gmra.mrb[68].mxu1 %vm162_vm1, %v15260_v4  ;;  %v13671_v4 = vld [vmem:[%s16128_s3 + $0x13] ss:$0 sm:$0xff] }
0x49cd   :  { %12436 = vmatprep.mubr.msk.f32.mxu1 %vm474_vm2, %v9110_v57 }
0x49d1   :  { %v12431_v18 = vpop.f32.mrb[110].mxu0 }
0x49d2   :  { %v9265_v37 = vadd.f32 %v13670_v62, %v12431_v18  ;;  %v9259_v10 = vpop.f32.mrb[111].mxu0 }
0x49d3   :  { %v9260_v12 = vadd.f32 %v13670_v62, %v9259_v10 }
0x49d5   :  { %v13189_v55 = vpack.c.bf16 %v9265_v37, %v9260_v12  ;;  %v5123_v37 = vadd.f32 %v15499_v56, %v5115_v58 }
0x49d7   :  { %13190 = vmatprep.subr.bf16.mxu0 %v13189_v55  ;;  %v5127_v12 = vsel %vm162_vm1, %v5123_v37, 0.0 }
0x49d8   :  { %13192 = vmatpush3.bf16.msra.mxu0 %v13189_v55 }
0x49d9   :  { %13194 = vmatprep.subr.bf16.mxu0 %v14828_v53 }
0x4a9f   :  { %v12420_v19 = vpop.f32.mrb[68].mxu1 }
0x4aa0   :  { %v9190_v43 = vadd.f32 %v13671_v4, %v12420_v19  ;;  %v9184_v31 = vpop.f32.mrb[69].mxu1 }
0x4aa1   :  { %v9185_v27 = vadd.f32 %v13671_v4, %v9184_v31 }
0x4aa3   :  { %v13183_v1 = vpack.c.bf16 %v9190_v43, %v9185_v27 }
0x4aa5   :  { %13185 = vmatprep.subr.msk.bf16.mxu1 %vm13938_vm3, %v13183_v1 }
0x4aa6   :  { %13188 = vmatpush3.bf16.xpose.msk.msra.mxu1 %vm13938_vm3, %v13183_v1 }
0x4aa7   :  { %12446 = vmatprep.subr.mxu1 %v13672_v7 }
0x4aad   :  { %12437 = vmatmul.mubr.msk.f32.vlgmr.msra.gmra.mrb[70].mxu1 %vm474_vm2, %v9115_v35 }
0x4aae   :  { %12447 = vmatpush3.msra.mxu1 %v13672_v7 }
0x4aaf   :  { %13202 = vmatprep.subr.bf16.mxu1 %v14877_v9 }
0x4b80   :  { %v12438_v41 = vpop.f32.mrb[70].mxu1 }
0x4b81   :  { %v9356_v46 = vmul.f32 0.35355338, %v12438_v41  ;;  %v9346_v50 = vpop.f32.mrb[71].mxu1 }
0x4b82   :  { %v9355_v22 = vmul.f32 0.35355338, %v9346_v50  ;;  %v13674_v50 = vld [vmem:[%s16130_s5 + $0x9] ss:$0 sm:$0xff] }
0x4b83   :  { %v9360_v42 = vsel %vm564_vm4, %v9356_v46, -inf }
0x4b84   :  { %9361 = vmax.xlane.f32.xlu1 %v9360_v42  ;;  %v9357_v16 = vsel %vm564_vm4, %v9355_v22, -inf }
0x4b85   :  { %9358 = vmax.xlane.f32.xlu0 %v9357_v16  ;;  %v13675_v16 = vld [vmem:[%s16130_s5 + $0xa] ss:$0 sm:$0xff] }
0x4c11   :  { %v9362_v5 = vpop.xlane.xlu1 %9361 }
0x4c12   :  { %v9364_v21 = vsub.f32 %v9356_v46, %v9362_v5  ;;  %v9359_v24 = vpop.xlane.xlu0 %9358 }
0x4c13   :  { %v9363_v33 = vsub.f32 %v9355_v22, %v9359_v24 }
0x4c14   :  { %v9367_v52 = vmul.f32 1.442695, %v9364_v21 }
0x4c15   :  { %v9365_v0 = vmul.f32 1.442695, %v9363_v33  ;;  %v13676_v33 = vld [vmem:[%s16133_s8 + $0x1] ss:$0 sm:$0xff] }
0x4c16   :  { %13607 = vpow2.f32 %v9367_v52 }
0x4c17   :  { %13609 = vpow2.f32 %v9365_v0 }
0x4c20   :  { %v13608_v20 = vpop.eup %13607 }
0x4c21   :  { %v13610_v13 = vpop.eup %13609  ;;  %v9372_v63 = vsel %vm564_vm4, %v13608_v20, 0.0 }
0x4c22   :  { %9373 = vadd.xlane.f32.xlu1 %v9372_v63  ;;  %v9369_v28 = vsel %vm564_vm4, %v13610_v13, 0.0 }
0x4c23   :  { %9370 = vadd.xlane.f32.xlu0 %v9369_v28 }
0x4caf   :  { %v9374_v32 = vpop.xlane.xlu1 %9373 }
0x4cb0   :  { %13611 = vrcp.f32 %v9374_v32  ;;  %v9371_v8 = vpop.xlane.xlu0 %9370 }
0x4cb1   :  { %13613 = vrcp.f32 %v9371_v8 }
0x4cba   :  { %v13612_v15 = vpop.eup %13611 }
0x4cbb   :  { %v13614_v30 = vpop.eup %13613  ;;  %v9378_v2 = vmul.f32 %v13612_v15, %v13608_v20 }
0x4cbc   :  { %v9377_v39 = vmul.f32 %v13614_v30, %v13610_v13 }
0x4cbe   :  { %12443 = vmatprep.mubr.msk.f32.mxu0 %vm564_vm4, %v9377_v39 }
0x4cbf   :  { %12444 = vmatmul.mubr.msk.f32.vlgmr.msra.gmra.mrb[112].mxu0 %vm564_vm4, %v9378_v2 }
0x4cc0   :  { %13196 = vmatpush3.bf16.msra.mxu0 %v14828_v53  ;;  %v16224_v53 = vld [vmem:[#allocation24_spill] sm:$0xff] }
0x4cc1   :  { %13198 = vmatprep.subr.bf16.mxu0 %v14838_v11 }
0x4cc4   :  { %13200 = vmatpush3.bf16.msra.mxu0 %v14838_v11  ;;  %v16225_v11 = vld [vmem:[#allocation25_spill] sm:$0xff] }
0x4d92   :  { %v12445_v54 = vpop.f32.mrb[112].mxu0 }
0x4d93   :  { %v9451_v23 = vpop.f32.mrb[113].mxu0 }
0x4d94   :  { %12448 = vmatprep.mubr.msk.f32.mxu1 %vm474_vm2, %v9451_v23 }
0x4d95   :  { %12449 = vmatmul.mubr.msk.f32.vlgmr.msra.gmra.mrb[58].mxu1 %vm474_vm2, %v12445_v54 }
0x4d96   :  { %13204 = vmatpush3.bf16.msra.mxu1 %v14877_v9  ;;  %v16226_v9 = vld [vmem:[#allocation26_spill] sm:$0xff] }
0x4d97   :  { %13206 = vmatprep.subr.bf16.mxu1 %v14887_v36 }
0x4d9a   :  { %13208 = vmatpush3.bf16.msra.mxu1 %v14887_v36 }
0x4d9b   :  { %13210 = vmatprep.subr.bf16.mxu1 %v14897_v59 }
0x4d9e   :  { %13212 = vmatpush3.bf16.msra.mxu1 %v14897_v59  ;;  %v13673_v59 = vld [vmem:[%s16130_s5 + $0x8] ss:$0 sm:$0xff] }
0x4d9f   :  { %13214 = vmatprep.subr.bf16.mxu1 %v14907_v51 }
0x4da2   :  { %13216 = vmatpush3.bf16.msra.mxu1 %v14907_v51 }
0x4da3   :  { %13218 = vmatprep.subr.bf16.mxu1 %v14917_v48 }
0x4da6   :  { %13220 = vmatpush3.bf16.msra.mxu1 %v14917_v48 }
0x4da7   :  { %13222 = vmatprep.subr.bf16.mxu1 %v16224_v53 }
0x4daa   :  { %13224 = vmatpush3.bf16.msra.mxu1 %v16224_v53 }
0x4dab   :  { %13226 = vmatprep.subr.bf16.mxu1 %v16225_v11 }
0x4dae   :  { %13228 = vmatpush3.bf16.msra.mxu1 %v16225_v11 }
0x4daf   :  { %13230 = vmatprep.subr.bf16.mxu1 %v16226_v9 }
0x4db2   :  { %13232 = vmatpush3.bf16.msra.mxu1 %v16226_v9 }
0x4e68   :  { %v12450_v36 = vpop.f32.mrb[58].mxu1 }
0x4e69   :  { %v13417_v51 = vadd.f32 %v13673_v59, %v12450_v36  ;;  %v9532_v29 = vpop.f32.mrb[59].mxu1 }
0x4e6a   :  { %v13418_v48 = vadd.f32 %v13673_v59, %v9532_v29 }
0x4e6b   :  { %v15481_v34 = vadd.f32 %v13417_v51, %v15240_v40 }
0x4e6c   :  { %v15484_v47 = vadd.f32 %v13418_v48, %v15242_v14  ;;  %v16229_v14 = vld [vmem:[#allocation27_spill] sm:$0xff] }
0x4e6d   :  { %v9548_v38 = vsel %vm162_vm1, %v15481_v34, 0.0  ;;  %v5114_v17 = vadd.f32 %v16229_v14, %v16228_v45 }
0x4e6e   :  { %9549 = vadd.xlane.f32.xlu1 %v9548_v38  ;;  %v9545_v3 = vsel %vm162_vm1, %v15484_v47, 0.0 }
0x4e6f   :  { %9546 = vadd.xlane.f32.xlu0 %v9545_v3  ;;  %v5122_v10 = vadd.f32 %v15499_v56, %v5114_v17 }
0x4e71   :  { %v5124_v55 = vsel %vm162_vm1, %v5122_v10, 0.0 }
0x4efb   :  { %v9550_v25 = vpop.xlane.xlu1 %9549 }
0x4efc   :  { %v9552_v60 = vmul.f32 0.03125, %v9550_v25  ;;  %v9547_v44 = vpop.xlane.xlu0 %9546 }
0x4efd   :  { %v9551_v26 = vmul.f32 0.03125, %v9547_v44 }
0x4efe   :  { %v9554_v40 = vsub.f32 %v15481_v34, %v9552_v60 }
0x4eff   :  { %v9553_v49 = vsub.f32 %v15484_v47, %v9551_v26 }
0x4f00   :  { %v9556_v57 = vmul.f32 %v9554_v40, %v9554_v40 }
0x4f01   :  { %v9555_v18 = vmul.f32 %v9553_v49, %v9553_v49 }
0x4f02   :  { %v9560_v62 = vsel %vm162_vm1, %v9556_v57, 0.0 }
0x4f03   :  { %9561 = vadd.xlane.f32.xlu1 %v9560_v62  ;;  %v9557_v61 = vsel %vm162_vm1, %v9555_v18, 0.0 }
0x4f04   :  { %9558 = vadd.xlane.f32.xlu0 %v9557_v61 }
0x4f07   :  { %5128 = vadd.xlane.f32.xlu1 %v5127_v12 }
0x4f08   :  { %5125 = vadd.xlane.f32.xlu0 %v5124_v55 }
0x4f90   :  { %v9562_v19 = vpop.xlane.xlu1 %9561 }
0x4f91   :  { %v9564_v4 = vmul.f32 0.03125, %v9562_v19  ;;  %v9559_v43 = vpop.xlane.xlu0 %9558 }
0x4f92   :  { %v9563_v31 = vmul.f32 0.03125, %v9559_v43 }
0x4f93   :  { %v9566_v27 = vadd.f32 1e-06, %v9564_v4 }
0x4f94   :  { %v9565_v1 = vadd.f32 1e-06, %v9563_v31  ;;  %v5129_v48 = vpop.xlane.xlu1 %5128  ;;  %v9799_v31 = vld [vmem:[%s16135_s10 + $0x8] sm:$0xff] }
0x4f95   :  { %13615 = vrsqrt.f32 %v9566_v27  ;;  %v5126_v38 = vpop.xlane.xlu0 %5125  ;;  %v5131_v3 = vmul.f32 0.03125, %v5129_v48  ;;  %v9803_v27 = vld [vmem:[%s16135_s10 + $0x28] sm:$0xff] }
0x4f96   :  { %13617 = vrsqrt.f32 %v9565_v1  ;;  %v5130_v25 = vmul.f32 0.03125, %v5126_v38  ;;  %v9798_v1 = vld [vmem:[%s16135_s10] sm:$0xff] }
0x4f97   :  { %v15518_v44 = vsub.f32 %v5123_v37, %v5131_v3  ;;  %v9996_v38 = vld [vmem:[%s16136_s11 + $0x60] sm:$0xff]  ;;  %v9998_v3 = vld [vmem:[%s16136_s11 + $0x70] sm:$0xff] }
0x4f98   :  { %v15521_v58 = vsub.f32 %v5122_v10, %v5130_v25  ;;  %v10001_v25 = vld [vmem:[%s16136_s11 + $0x88] sm:$0xff] }
0x4f9f   :  { %v13616_v7 = vpop.eup %13615 }
0x4fa0   :  { %v13618_v35 = vpop.eup %13617  ;;  %v9570_v41 = vmul.f32 %v13616_v7, %v9554_v40  ;;  %v13233_v7 = vpack.c.bf16 %v9803_v27, %v9799_v31  ;;  %v10012_v27 = vld [vmem:[%s16136_s11 + $0xe0] sm:$0xff] }
0x4fa1   :  { %v9569_v46 = vmul.f32 %v13618_v35, %v9553_v49  ;;  %v5135_v49 = vmul.f32 %v15518_v44, %v15518_v44  ;;  %v9802_v35 = vld [vmem:[%s16135_s10 + $0x20] sm:$0xff] }
0x4fa2   :  { %v9572_v22 = vmul.f32 %v13674_v50, %v9570_v41  ;;  %v9807_v41 = vld [vmem:[%s16135_s10 + $0x48] sm:$0xff]  ;;  %13234 = vmatprep.subr.bf16.mxu0 %v13233_v7 }
0x4fa3   :  { %v9571_v42 = vmul.f32 %v13674_v50, %v9569_v46  ;;  %v5139_v18 = vsel %vm162_vm1, %v5135_v49, 0.0  ;;  %v9811_v46 = vld [vmem:[%s16135_s10 + $0x68] sm:$0xff]  ;;  %v13701_v50 = vmov 0.0  }
0x4fa4   :  { %v9574_v21 = vadd.f32 %v13675_v16, %v9572_v22  ;;  %v13235_v22 = vpack.c.bf16 %v9802_v35, %v9798_v1  ;;  %v10014_v1 = vld [vmem:[%s16136_s11 + $0xf0] sm:$0xff]  ;;  %v10017_v7 = vld [vmem:[%s16136_s11 + $0x108] sm:$0xff]  ;;  %v10019_v35 = vld [vmem:[%s16136_s11 + $0x118] sm:$0xff] }
0x4fa5   :  { %v9573_v5 = vadd.f32 %v13675_v16, %v9571_v42  ;;  %v13237_v42 = vpack.c.bf16 %v9811_v46, %v9807_v41  ;;  %v9806_v16 = vld [vmem:[%s16135_s10 + $0x40] sm:$0xff]  ;;  %v13279_v41 = vpack.c.bf16 %v10014_v1, %v10012_v27  ;;  %v13281_v46 = vpack.c.bf16 %v10019_v35, %v10017_v7 }
0x4fa7   :  { %12459 = vmatprep.mubr.msk.f32.mxu0 %vm162_vm1, %v9573_v5  ;;  %v9810_v5 = vld [vmem:[%s16135_s10 + $0x60] sm:$0xff] }
0x4fa8   :  { %12460 = vmatmul.mubr.msk.f32.vlgmr.msra.gmra.mrb[114].mxu0 %vm162_vm1, %v9574_v21  ;;  %v9801_v21 = vld [vmem:[%s16135_s10 + $0x18] sm:$0xff] }
0x4fa9   :  { %9902 = vmatprep.mubr.f32.mxu0 %v13701_v50  ;;  %13236 = vmatpush1.bf16.msra.mxu0 %v13235_v22  ;;  %v10016_v22 = vld [vmem:[%s16136_s11 + $0x100] sm:$0xff] }
0x4faa   :  { %13238 = vmatprep.subr.bf16.mxu0 %v13237_v42  ;;  %v10018_v42 = vld [vmem:[%s16136_s11 + $0x110] sm:$0xff] }
0x507b   :  { %v12461_v24 = vpop.f32.mrb[114].mxu0 }
0x507c   :  { %v9653_v52 = vadd.f32 %v13676_v33, %v12461_v24  ;;  %v9647_v0 = vpop.f32.mrb[115].mxu0  ;;  %v9805_v24 = vld [vmem:[%s16135_s10 + $0x38] sm:$0xff] }
0x507d   :  { %v9648_v20 = vadd.f32 %v13676_v33, %v9647_v0  ;;  %v13239_v33 = vpack.c.bf16 %v9810_v5, %v9806_v16  ;;  %v9985_v0 = vld [vmem:[%s16136_s11 + $0x8] sm:$0xff]  ;;  %v10023_v5 = vld [vmem:[%s16136_s11 + $0x138] sm:$0xff] }
0x507e   :  { %v9657_v13 = vmul.f32 %v9653_v52, %v9653_v52  ;;  %v10021_v16 = vld [vmem:[%s16136_s11 + $0x128] sm:$0xff] }
0x507f   :  { %v9656_v63 = vmul.f32 %v9648_v20, %v9648_v20  ;;  %13240 = vmatpush1.bf16.msra.mxu0 %v13239_v33  ;;  %v10020_v33 = vld [vmem:[%s16136_s11 + $0x120] sm:$0xff] }
0x5080   :  { %v9659_v28 = vmul.f32 %v9657_v13, %v9653_v52  ;;  %v9984_v13 = vld [vmem:[%s16136_s11] sm:$0xff] }
0x5081   :  { %v9658_v32 = vmul.f32 %v9656_v63, %v9648_v20 }
0x5082   :  { %v9661_v8 = vmul.f32 0.044715, %v9659_v28  ;;  %v9986_v28 = vld [vmem:[%s16136_s11 + $0x10] sm:$0xff] }
0x5083   :  { %v9660_v15 = vmul.f32 0.044715, %v9658_v32  ;;  %v9989_v32 = vld [vmem:[%s16136_s11 + $0x28] sm:$0xff] }
0x5084   :  { %v9663_v30 = vadd.f32 %v9661_v8, %v9653_v52  ;;  %v9991_v8 = vld [vmem:[%s16136_s11 + $0x38] sm:$0xff] }
0x5085   :  { %v9662_v39 = vadd.f32 %v9660_v15, %v9648_v20  ;;  %v13251_v15 = vpack.c.bf16 %v9986_v28, %v9984_v13  ;;  %v10024_v28 = vld [vmem:[%s16136_s11 + $0x140] sm:$0xff] }
0x5086   :  { %v9665_v2 = vmul.f32 0.7978846, %v9663_v30  ;;  %v13253_v30 = vpack.c.bf16 %v9991_v8, %v9989_v32  ;;  %v10026_v32 = vld [vmem:[%s16136_s11 + $0x150] sm:$0xff]  ;;  %v10029_v8 = vld [vmem:[%s16136_s11 + $0x168] sm:$0xff] }
0x5087   :  { %v9664_v54 = vmul.f32 0.7978846, %v9662_v39  ;;  %v9988_v39 = vld [vmem:[%s16136_s11 + $0x20] sm:$0xff] }
0x5088   :  { %13619 = vtanh.f32 %v9665_v2  ;;  %v9990_v2 = vld [vmem:[%s16136_s11 + $0x30] sm:$0xff] }
0x5089   :  { %13621 = vtanh.f32 %v9664_v54  ;;  %v9993_v54 = vld [vmem:[%s16136_s11 + $0x48] sm:$0xff] }
0x5092   :  { %v13620_v23 = vpop.eup %13619 }
0x5093   :  { %v13622_v53 = vpop.eup %13621  ;;  %v9669_v11 = vadd.f32 1.0, %v13620_v23  ;;  %v9995_v23 = vld [vmem:[%s16136_s11 + $0x58] sm:$0xff] }
0x5094   :  { %v9668_v9 = vadd.f32 1.0, %v13622_v53  ;;  %v13255_v53 = vpack.c.bf16 %v9990_v2, %v9988_v39  ;;  %v10028_v2 = vld [vmem:[%s16136_s11 + $0x160] sm:$0xff] }
0x5095   :  { %v9671_v36 = vmul.f32 0.5, %v9669_v11  ;;  %v13257_v11 = vpack.c.bf16 %v9995_v23, %v9993_v54  ;;  %v10030_v54 = vld [vmem:[%s16136_s11 + $0x170] sm:$0xff]  ;;  %v10033_v23 = vld [vmem:[%s16136_s11 + $0x188] sm:$0xff] }
0x5096   :  { %v9670_v59 = vmul.f32 0.5, %v9668_v9  ;;  %v9992_v9 = vld [vmem:[%s16136_s11 + $0x40] sm:$0xff] }
0x5097   :  { %v9673_v29 = vmul.f32 %v9671_v36, %v9653_v52  ;;  %v13241_v52 = vpack.c.bf16 %v9805_v24, %v9801_v21  ;;  %v9994_v36 = vld [vmem:[%s16136_s11 + $0x50] sm:$0xff]  ;;  %v13283_v21 = vpack.c.bf16 %v10018_v42, %v10016_v22  ;;  %v13285_v24 = vpack.c.bf16 %v10023_v5, %v10021_v16 }
0x5098   :  { %v9672_v51 = vmul.f32 %v9670_v59, %v9648_v20  ;;  %v9987_v20 = vld [vmem:[%s16136_s11 + $0x18] sm:$0xff]  ;;  %v9997_v59 = vld [vmem:[%s16136_s11 + $0x68] sm:$0xff] }
0x5099   :  { %13242 = vmatprep.subr.bf16.mxu0 %v13241_v52  ;;  %v13249_v63 = vpack.c.bf16 %v9987_v20, %v9985_v0  ;;  %v10022_v52 = vld [vmem:[%s16136_s11 + $0x130] sm:$0xff]  ;;  %v10025_v0 = vld [vmem:[%s16136_s11 + $0x148] sm:$0xff]  ;;  %v10027_v20 = vld [vmem:[%s16136_s11 + $0x158] sm:$0xff] }
0x509a   :  { %12494 = vmatprep.mubr.f32.mxu1 %v9672_v51  ;;  %v9999_v51 = vld [vmem:[%s16136_s11 + $0x78] sm:$0xff]  ;;  %v13287_v13 = vpack.c.bf16 %v10022_v52, %v10020_v33 }
0x509b   :  { %12495 = vmatmul.mubr.f32.vlgmr.msra.gmra.mrb[72].mxu1 %v9673_v29  ;;  %13250 = vmatprep.subr.bf16.mxu1 %v13249_v63  ;;  %v13259_v29 = vpack.c.bf16 %v9994_v36, %v9992_v9  ;;  %v13261_v48 = vpack.c.bf16 %v9999_v51, %v9997_v59  ;;  %v13289_v63 = vpack.c.bf16 %v10027_v20, %v10025_v0  ;;  %v10032_v36 = vld [vmem:[%s16136_s11 + $0x180] sm:$0xff]  ;;  %v10034_v59 = vld [vmem:[%s16136_s11 + $0x190] sm:$0xff]  ;;  %v10037_v51 = vld [vmem:[%s16136_s11 + $0x1a8] sm:$0xff] }
0x509c   :  { %13252 = vmatpush1.bf16.msra.mxu1 %v13251_v15  ;;  %v10031_v15 = vld [vmem:[%s16136_s11 + $0x178] sm:$0xff] }
0x509d   :  { %13254 = vmatprep.subr.bf16.mxu1 %v13253_v30  ;;  %v13291_v30 = vpack.c.bf16 %v10026_v32, %v10024_v28  ;;  %v13293_v39 = vpack.c.bf16 %v10031_v15, %v10029_v8 }
0x50a0   :  { %13256 = vmatpush1.bf16.msra.mxu1 %v13255_v53  ;;  %v10035_v53 = vld [vmem:[%s16136_s11 + $0x198] sm:$0xff] }
0x50a1   :  { %13258 = vmatprep.subr.bf16.mxu1 %v13257_v11  ;;  %v13295_v11 = vpack.c.bf16 %v10030_v54, %v10028_v2  ;;  %v13297_v9 = vpack.c.bf16 %v10035_v53, %v10033_v23  ;;  %v9804_v53 = vld [vmem:[%s16135_s10 + $0x30] sm:$0xff] }
0x50a4   :  { %13260 = vmatpush1.bf16.msra.mxu1 %v13259_v29  ;;  %v10039_v29 = vld [vmem:[%s16136_s11 + $0x1b8] sm:$0xff] }
0x50a5   :  { %13262 = vmatprep.subr.bf16.mxu1 %v13261_v48  ;;  %v13299_v48 = vpack.c.bf16 %v10034_v59, %v10032_v36  ;;  %v9813_v36 = vld [vmem:[%s16135_s10 + $0x78] sm:$0xff] }
0x516e   :  { %v12496_v60 = vpop.f32.mrb[72].mxu1 }
0x516f   :  { %v9750_v26 = vadd.f32 %v12496_v60, %v15481_v34  ;;  %v9740_v6 = vpop.f32.mrb[73].mxu1  ;;  %v5134_v34 = vmul.f32 %v15521_v58, %v15521_v58  ;;  %v10003_v60 = vld [vmem:[%s16136_s11 + $0x98] sm:$0xff] }
0x5170   :  { %v9749_v40 = vadd.f32 %v9740_v6, %v15484_v47  ;;  %v13265_v6 = vpack.c.bf16 %v10003_v60, %v10001_v25  ;;  %v10036_v25 = vld [vmem:[%s16136_s11 + $0x1a0] sm:$0xff]  ;;  %v10038_v60 = vld [vmem:[%s16136_s11 + $0x1b0] sm:$0xff] }
0x5171   :  { %v9752_v45 = vadd.f32 %v15499_v56, %v9750_v26  ;;  %v5136_v47 = vsel %vm162_vm1, %v5134_v34, 0.0  ;;  %v13263_v26 = vpack.c.bf16 %v9998_v3, %v9996_v38  ;;  %v10004_v34 = vld [vmem:[%s16136_s11 + $0xa0] sm:$0xff]  ;;  %v13301_v3 = vpack.c.bf16 %v10039_v29, %v10037_v51 }
0x5172   :  { %v9751_v14 = vadd.f32 %v15499_v56, %v9749_v40  ;;  %v10000_v40 = vld [vmem:[%s16136_s11 + $0x80] sm:$0xff] }
0x5173   :  { %v9756_v17 = vsel %vm162_vm1, %v9752_v45, 0.0  ;;  %13264 = vmatpush1.bf16.msra.mxu1 %v13263_v26 }
0x5174   :  { %9757 = vadd.xlane.f32.xlu1 %v9756_v17  ;;  %v9753_v57 = vsel %vm162_vm1, %v9751_v14, 0.0  ;;  %v10007_v17 = vld [vmem:[%s16136_s11 + $0xb8] sm:$0xff]  ;;  %13266 = vmatprep.subr.bf16.mxu1 %v13265_v6  ;;  %v10041_v6 = vld [vmem:[%s16136_s11 + $0x1c8] sm:$0xff] }
0x5175   :  { %9754 = vadd.xlane.f32.xlu0 %v9753_v57 }
0x5178   :  { %5140 = vadd.xlane.f32.xlu1 %v5139_v18  ;;  %v10006_v18 = vld [vmem:[%s16136_s11 + $0xb0] sm:$0xff] }
0x5179   :  { %5137 = vadd.xlane.f32.xlu0 %v5136_v47  ;;  %v10009_v47 = vld [vmem:[%s16136_s11 + $0xc8] sm:$0xff] }
0x5201   :  { %v9758_v62 = vpop.xlane.xlu1 %9757 }
0x5202   :  { %v9760_v56 = vmul.f32 0.03125, %v9758_v62  ;;  %v9755_v37 = vpop.xlane.xlu0 %9754  ;;  %v10011_v62 = vld [vmem:[%s16136_s11 + $0xd8] sm:$0xff] }
0x5203   :  { %v9759_v61 = vmul.f32 0.03125, %v9755_v37  ;;  %v13273_v37 = vpack.c.bf16 %v10011_v62, %v10009_v47 }
0x5204   :  { %v15534_v10 = vsub.f32 %v9752_v45, %v9760_v56  ;;  %v10002_v45 = vld [vmem:[%s16136_s11 + $0x90] sm:$0xff]  ;;  %v13271_v56 = vpack.c.bf16 %v10006_v18, %v10004_v34 }
0x5205   :  { %v15536_v12 = vsub.f32 %v9751_v14, %v9759_v61  ;;  %v10005_v14 = vld [vmem:[%s16136_s11 + $0xa8] sm:$0xff]  ;;  %v13267_v49 = vpack.c.bf16 %v10002_v45, %v10000_v40  ;;  %v10008_v61 = vld [vmem:[%s16136_s11 + $0xc0] sm:$0xff]  ;;  %v5141_v38 = vpop.xlane.xlu1 %5140  ;;  %v10043_v40 = vld [vmem:[%s16136_s11 + $0x1d8] sm:$0xff] }
0x5206   :  { %v9764_v55 = vmul.f32 %v15534_v10, %v15534_v10  ;;  %v13269_v57 = vpack.c.bf16 %v10007_v17, %v10005_v14  ;;  %v5138_v26 = vpop.xlane.xlu0 %5137  ;;  %v5143_v45 = vmul.f32 0.03125, %v5141_v38  ;;  %v13303_v14 = vpack.c.bf16 %v10038_v60, %v10036_v25  ;;  %v9808_v38 = vld [vmem:[%s16135_s10 + $0x50] sm:$0xff]  ;;  %v10049_v60 = vld [vmem:[%s16136_s11 + $0x208] sm:$0xff] }
0x5207   :  { %v9763_v19 = vmul.f32 %v15536_v12, %v15536_v12  ;;  %13268 = vmatpush1.bf16.msra.mxu1 %v13267_v49  ;;  %v5142_v17 = vmul.f32 0.03125, %v5138_v26  ;;  %v13305_v49 = vpack.c.bf16 %v10043_v40, %v10041_v6  ;;  %v10051_v26 = vld [vmem:[%s16136_s11 + $0x218] sm:$0xff] }
0x5208   :  { %v9768_v4 = vsel %vm162_vm1, %v9764_v55, 0.0  ;;  %13270 = vmatprep.subr.bf16.mxu1 %v13269_v57  ;;  %v10010_v55 = vld [vmem:[%s16136_s11 + $0xd0] sm:$0xff]  ;;  %v5145_v57 = vadd.f32 1e-06, %v5143_v45  ;;  %v13313_v40 = vpack.c.bf16 %v10051_v26, %v10049_v60  ;;  %v10048_v45 = vld [vmem:[%s16136_s11 + $0x200] sm:$0xff] }
0x5209   :  { %9769 = vadd.xlane.f32.xlu1 %v9768_v4  ;;  %v9765_v43 = vsel %vm162_vm1, %v9763_v19, 0.0  ;;  %v10013_v19 = vld [vmem:[%s16136_s11 + $0xe8] sm:$0xff]  ;;  %v10015_v4 = vld [vmem:[%s16136_s11 + $0xf8] sm:$0xff]  ;;  %v5144_v34 = vadd.f32 1e-06, %v5142_v17  ;;  %v10088_v60 = vld [vmem:[%s16136_s11 + $0x340] sm:$0xff] }
0x520a   :  { %9766 = vadd.xlane.f32.xlu0 %v9765_v43  ;;  %v13275_v43 = vpack.c.bf16 %v10010_v55, %v10008_v61  ;;  %v13277_v31 = vpack.c.bf16 %v10015_v4, %v10013_v19  ;;  %13623 = vrsqrt.f32 %v5145_v57  ;;  %v10704_v19 = vld [vmem:[%s16131_s6 + $0x2] ss:$0 sm:$0xff]  ;;  %v10053_v17 = vld [vmem:[%s16136_s11 + $0x228] sm:$0xff]  ;;  %v10090_v26 = vld [vmem:[%s16136_s11 + $0x350] sm:$0xff] }
0x520b   :  { %13272 = vmatpush1.bf16.msra.mxu1 %v13271_v56  ;;  %13625 = vrsqrt.f32 %v5144_v34  ;;  %v10052_v34 = vld [vmem:[%s16136_s11 + $0x220] sm:$0xff] }
0x520c   :  { %13274 = vmatprep.subr.bf16.mxu1 %v13273_v37  ;;  %v10703_v37 = vld [vmem:[%s16131_s6 + $0x1] ss:$0 sm:$0xff] }
0x520f   :  { %13276 = vmatpush1.bf16.msra.mxu1 %v13275_v43 }
0x5210   :  { %13278 = vmatprep.subr.bf16.mxu1 %v13277_v31 }
0x5213   :  { %13280 = vmatpush1.bf16.msra.mxu1 %v13279_v41 }
0x5214   :  { %13282 = vmatprep.subr.bf16.mxu1 %v13281_v46  ;;  %v13624_v18 = vpop.eup %13623 }
0x5215   :  { %v13626_v47 = vpop.eup %13625  ;;  %v5149_v62 = vmul.f32 %v13624_v18, %v15518_v44  ;;  %v10054_v18 = vld [vmem:[%s16136_s11 + $0x230] sm:$0xff] }
0x5216   :  { %v5148_v56 = vmul.f32 %v13626_v47, %v15521_v58  ;;  %v10057_v47 = vld [vmem:[%s16136_s11 + $0x248] sm:$0xff] }
0x5217   :  { %13284 = vmatpush1.bf16.msra.mxu1 %v13283_v21  ;;  %v5157_v61 = vmul.f32 %v10703_v37, %v5149_v62  ;;  %v10059_v62 = vld [vmem:[%s16136_s11 + $0x258] sm:$0xff] }
0x5218   :  { %13286 = vmatprep.subr.bf16.mxu1 %v13285_v24  ;;  %v5156_v55 = vmul.f32 %v10703_v37, %v5148_v56  ;;  %v13319_v56 = vpack.c.bf16 %v10054_v18, %v10052_v34 }
0x5219   :  { %v5165_v1 = vadd.f32 %v10704_v19, %v5157_v61  ;;  %v10056_v61 = vld [vmem:[%s16136_s11 + $0x240] sm:$0xff] }
0x521a   :  { %v5164_v7 = vadd.f32 %v10704_v19, %v5156_v55  ;;  %v10058_v55 = vld [vmem:[%s16136_s11 + $0x250] sm:$0xff] }
0x521b   :  { %13288 = vmatpush1.bf16.msra.mxu1 %v13287_v13  ;;  %v5167_v41 = vsel %vm162_vm1, %v5165_v1, 0.0  ;;  %v10062_v1 = vld [vmem:[%s16136_s11 + $0x270] sm:$0xff] }
0x521c   :  { %13290 = vmatprep.subr.bf16.mxu1 %v13289_v63  ;;  %v5166_v58 = vsel %vm162_vm1, %v5164_v7, 0.0  ;;  %v10065_v7 = vld [vmem:[%s16136_s11 + $0x288] sm:$0xff] }
0x521d   :  { %v5168_v46 = vadd.f32 %v5167_v41, %v5166_v58  ;;  %v10064_v41 = vld [vmem:[%s16136_s11 + $0x280] sm:$0xff] }
0x521f   :  { %13292 = vmatpush1.bf16.msra.mxu1 %v13291_v30  ;;  %v5169_v22 = vrot.slane %v5168_v46, 4 }
0x5220   :  { %13294 = vmatprep.subr.bf16.mxu1 %v13293_v39 }
0x5221   :  { %v5170_v33 = vadd.f32 %v5169_v22, %v5168_v46  ;;  %v10066_v46 = vld [vmem:[%s16136_s11 + $0x290] sm:$0xff]  ;;  %v10069_v22 = vld [vmem:[%s16136_s11 + $0x2a8] sm:$0xff] }
0x5223   :  { %13296 = vmatpush1.bf16.msra.mxu1 %v13295_v11  ;;  %v5171_v13 = vrot.slane %v5170_v33, 2 }
0x5224   :  { %13298 = vmatprep.subr.bf16.mxu1 %v13297_v9  ;;  %v9809_v9 = vld [vmem:[%s16135_s10 + $0x58] sm:$0xff] }
0x5225   :  { %v5172_v8 = vadd.f32 %v5171_v13, %v5170_v33  ;;  %v10073_v33 = vld [vmem:[%s16136_s11 + $0x2c8] sm:$0xff]  ;;  %v10072_v13 = vld [vmem:[%s16136_s11 + $0x2c0] sm:$0xff] }
0x5227   :  { %13300 = vmatpush1.bf16.msra.mxu1 %v13299_v48  ;;  %v5173_v39 = vrot.slane %v5172_v8, 1  ;;  %v13245_v48 = vpack.c.bf16 %v9813_v36, %v9809_v9  ;;  %v10087_v9 = vld [vmem:[%s16136_s11 + $0x338] sm:$0xff] }
0x5228   :  { %13302 = vmatprep.subr.bf16.mxu1 %v13301_v3  ;;  %v9812_v3 = vld [vmem:[%s16135_s10 + $0x70] sm:$0xff] }
0x5229   :  { %v13247_v6 = vpack.c.bf16 %v9812_v3, %v9808_v38  ;;  %v10091_v38 = vld [vmem:[%s16136_s11 + $0x358] sm:$0xff] }
0x522b   :  { %13304 = vmatpush1.bf16.msra.mxu1 %v13303_v14  ;;  %v10050_v14 = vld [vmem:[%s16136_s11 + $0x210] sm:$0xff] }
0x522c   :  { %13306 = vmatprep.subr.bf16.mxu1 %v13305_v49  ;;  %v10055_v49 = vld [vmem:[%s16136_s11 + $0x238] sm:$0xff] }
0x522d   :  { %v13317_v57 = vpack.c.bf16 %v10055_v49, %v10053_v17  ;;  %v10092_v17 = vld [vmem:[%s16136_s11 + $0x360] sm:$0xff]  ;;  %v10094_v49 = vld [vmem:[%s16136_s11 + $0x370] sm:$0xff] }
0x522e   :  { %v13359_v34 = vpack.c.bf16 %v10094_v49, %v10092_v17  ;;  %v10287_v17 = vld [vmem:[%s16137_s12 + $0xa0] sm:$0xff]  ;;  %v10288_v49 = vld [vmem:[%s16137_s12 + $0xa8] sm:$0xff] }
0x5296   :  { %v9770_v4 = vpop.xlane.xlu1 %9769 }
0x5297   :  { %v9772_v43 = vmul.f32 0.03125, %v9770_v4  ;;  %v9767_v31 = vpop.xlane.xlu0 %9766  ;;  %v10063_v4 = vld [vmem:[%s16136_s11 + $0x278] sm:$0xff] }
0x5298   :  { %v9771_v27 = vmul.f32 0.03125, %v9767_v31 }
0x5299   :  { %v9774_v35 = vadd.f32 1e-06, %v9772_v43  ;;  %v13323_v43 = vpack.c.bf16 %v10058_v55, %v10056_v61  ;;  %v10042_v61 = vld [vmem:[%s16136_s11 + $0x1d0] sm:$0xff] }
0x529a   :  { %v9773_v44 = vadd.f32 1e-06, %v9771_v27  ;;  %v10060_v27 = vld [vmem:[%s16136_s11 + $0x260] sm:$0xff] }
0x529b   :  { %13627 = vrsqrt.f32 %v9774_v35  ;;  %v10067_v35 = vld [vmem:[%s16136_s11 + $0x298] sm:$0xff] }
0x529c   :  { %13629 = vrsqrt.f32 %v9773_v44  ;;  %v13327_v44 = vpack.c.bf16 %v10062_v1, %v10060_v27  ;;  %v13329_v58 = vpack.c.bf16 %v10067_v35, %v10065_v7  ;;  %v10047_v27 = vld [vmem:[%s16136_s11 + $0x1f8] sm:$0xff]  ;;  %v10100_v1 = vld [vmem:[%s16136_s11 + $0x3a0] sm:$0xff]  ;;  %v10102_v35 = vld [vmem:[%s16136_s11 + $0x3b0] sm:$0xff] }
0x52a5   :  { %v13628_v42 = vpop.eup %13627 }
0x52a6   :  { %v13630_v16 = vpop.eup %13629  ;;  %v9778_v5 = vmul.f32 %v13628_v42, %v15534_v10  ;;  %v5174_v10 = vadd.f32 %v5173_v39, %v5172_v8  ;;  %v10071_v42 = vld [vmem:[%s16136_s11 + $0x2b8] sm:$0xff]  ;;  %v10078_v39 = vld [vmem:[%s16136_s11 + $0x2f0] sm:$0xff] }
0x52a7   :  { %v9777_v21 = vmul.f32 %v13630_v16, %v15536_v12  ;;  %v9800_v12 = vld [vmem:[%s16135_s10 + $0x10] sm:$0xff]  ;;  %v13331_v16 = vpack.c.bf16 %v10066_v46, %v10064_v41  ;;  %v13367_v41 = vpack.c.bf16 %v10102_v35, %v10100_v1  ;;  %v10274_v1 = vld [vmem:[%s16137_s12 + $0x38] sm:$0xff]  ;;  %v10292_v35 = vld [vmem:[%s16137_s12 + $0xc8] sm:$0xff] }
0x52a8   :  { %v9780_v24 = vmul.f32 %v10703_v37, %v9778_v5  ;;  %v5176_v59 = vmul.f32 0.0625, %v5174_v10  ;;  %v13243_v29 = vpack.c.bf16 %v9804_v53, %v9800_v12  ;;  %v13333_v5 = vpack.c.bf16 %v10071_v42, %v10069_v22  ;;  %v10080_v12 = vld [vmem:[%s16136_s11 + $0x300] sm:$0xff]  ;;  %v10082_v53 = vld [vmem:[%s16136_s11 + $0x310] sm:$0xff]  ;;  %v10105_v22 = vld [vmem:[%s16136_s11 + $0x3c8] sm:$0xff] }
0x52a9   :  { %v9779_v52 = vmul.f32 %v10703_v37, %v9777_v21  ;;  %v13321_v37 = vpack.c.bf16 %v10059_v62, %v10057_v47  ;;  %v10068_v21 = vld [vmem:[%s16136_s11 + $0x2a0] sm:$0xff]  ;;  %v13347_v36 = vpack.c.bf16 %v10082_v53, %v10080_v12  ;;  %v10098_v62 = vld [vmem:[%s16136_s11 + $0x390] sm:$0xff]  ;;  %v10107_v42 = vld [vmem:[%s16136_s11 + $0x3d8] sm:$0xff] }
0x52aa   :  { %v9782_v0 = vadd.f32 %v10704_v19, %v9780_v24  ;;  %v10070_v24 = vld [vmem:[%s16136_s11 + $0x2b0] sm:$0xff]  ;;  %v10096_v47 = vld [vmem:[%s16136_s11 + $0x380] sm:$0xff] }
0x52ab   :  { %v9781_v20 = vadd.f32 %v10704_v19, %v9779_v52  ;;  %v10061_v19 = vld [vmem:[%s16136_s11 + $0x268] sm:$0xff]  ;;  %v10075_v52 = vld [vmem:[%s16136_s11 + $0x2d8] sm:$0xff] }
0x52ac   :  { %v9784_v63 = vsel %vm162_vm1, %v9782_v0, 0.0  ;;  %v13325_v31 = vpack.c.bf16 %v10063_v4, %v10061_v19  ;;  %v13335_v0 = vpack.c.bf16 %v10070_v24, %v10068_v21  ;;  %v10101_v19 = vld [vmem:[%s16136_s11 + $0x3a8] sm:$0xff]  ;;  %v10103_v4 = vld [vmem:[%s16136_s11 + $0x3b8] sm:$0xff]  ;;  %v10106_v21 = vld [vmem:[%s16136_s11 + $0x3d0] sm:$0xff] }
0x52ad   :  { %v9783_v28 = vsel %vm162_vm1, %v9781_v20, 0.0  ;;  %v13337_v20 = vpack.c.bf16 %v10075_v52, %v10073_v33  ;;  %v10109_v33 = vld [vmem:[%s16136_s11 + $0x3e8] sm:$0xff]  ;;  %v10111_v52 = vld [vmem:[%s16136_s11 + $0x3f8] sm:$0xff] }
0x52ae   :  { %v9785_v32 = vadd.f32 %v9784_v63, %v9783_v28  ;;  %v10074_v63 = vld [vmem:[%s16136_s11 + $0x2d0] sm:$0xff]  ;;  %v10077_v28 = vld [vmem:[%s16136_s11 + $0x2e8] sm:$0xff] }
0x52af   :  { %v13339_v8 = vpack.c.bf16 %v10074_v63, %v10072_v13  ;;  %v10110_v13 = vld [vmem:[%s16136_s11 + $0x3f0] sm:$0xff] }
0x52b0   :  { %v9786_v15 = vrot.slane %v9785_v32, 4 }
0x52b2   :  { %v9787_v30 = vadd.f32 %v9786_v15, %v9785_v32  ;;  %v10079_v32 = vld [vmem:[%s16136_s11 + $0x2f8] sm:$0xff] }
0x52b3   :  { %v13341_v15 = vpack.c.bf16 %v10079_v32, %v10077_v28  ;;  %v10283_v28 = vld [vmem:[%s16137_s12 + $0x80] sm:$0xff]  ;;  %v10284_v32 = vld [vmem:[%s16137_s12 + $0x88] sm:$0xff] }
0x52b4   :  { %v9788_v2 = vrot.slane %v9787_v30, 2 }
0x52b6   :  { %v9789_v54 = vadd.f32 %v9788_v2, %v9787_v30  ;;  %v10076_v30 = vld [vmem:[%s16136_s11 + $0x2e0] sm:$0xff]  ;;  %v10081_v2 = vld [vmem:[%s16136_s11 + $0x308] sm:$0xff] }
0x52b7   :  { %v13343_v10 = vpack.c.bf16 %v10078_v39, %v10076_v30 }
0x52b8   :  { %v9790_v23 = vrot.slane %v9789_v54, 1 }
0x52ba   :  { %v9791_v11 = vadd.f32 %v9790_v23, %v9789_v54  ;;  %v10083_v54 = vld [vmem:[%s16136_s11 + $0x318] sm:$0xff] }
0x52bb   :  { %v13345_v23 = vpack.c.bf16 %v10083_v54, %v10081_v2  ;;  %v9795_v2 = vld [vmem:[%s16138_s13] sm:$0xf] }
0x52bc   :  { %v9792_v51 = vmul.f32 0.0625, %v9791_v11  ;;  %v10085_v11 = vld [vmem:[%s16136_s11 + $0x328] sm:$0xff] }
0x52be   :  { %v9794_v25 = vsel %vm9793_vm5, %v5176_v59, %v9792_v51  ;;  %v13349_v59 = vpack.c.bf16 %v10087_v9, %v10085_v11  ;;  %v10084_v51 = vld [vmem:[%s16136_s11 + $0x320] sm:$0xff] }
0x52bf   :  { %10825 = vmatmul.mubr.msk.f32.vlgmr.msra.gmra.mrb[116].mxu0 %vm162_vm1, %v9794_v25 }
0x52c0   :  { %13244 = vmatpush1.bf16.msra.mxu0 %v13243_v29  ;;  %9973 = vmatprep.mubr.f32.mxu0 %v13701_v50  ;;  %v13315_v50 = vpack.c.bf16 %v10050_v14, %v10048_v45  ;;  %v10086_v29 = vld [vmem:[%s16136_s11 + $0x330] sm:$0xff]  ;;  %v13355_v45 = vpack.c.bf16 %v10090_v26, %v10088_v60 }
0x52c1   :  { %13246 = vmatprep.subr.bf16.mxu0 %v13245_v48  ;;  %v10089_v48 = vld [vmem:[%s16136_s11 + $0x348] sm:$0xff]  ;;  %v13351_v3 = vpack.c.bf16 %v10086_v29, %v10084_v51 }
0x52c4   :  { %13248 = vmatpush1.bf16.msra.mxu0 %v13247_v6  ;;  %v10093_v6 = vld [vmem:[%s16136_s11 + $0x368] sm:$0xff] }
0x52c5   :  { %13314 = vmatprep.subr.bf16.mxu0 %v13313_v40  ;;  %v10095_v40 = vld [vmem:[%s16136_s11 + $0x378] sm:$0xff] }
0x52c6   :  { %v13357_v14 = vpack.c.bf16 %v10095_v40, %v10093_v6  ;;  %v10269_v40 = vld [vmem:[%s16137_s12 + $0x10] sm:$0xff] }
0x52c7   :  { %10826 = vmatmul.mubr.msk.f32.vlgmr.msra.gmra.mrb[118].mxu0 %vm162_vm1, %v9794_v25  ;;  %v13353_v25 = vpack.c.bf16 %v10091_v38, %v10089_v48  ;;  %v10285_v48 = vld [vmem:[%s16137_s12 + $0x90] sm:$0xff]  ;;  %v10286_v38 = vld [vmem:[%s16137_s12 + $0x98] sm:$0xff] }
0x52c8   :  { %13316 = vmatpush1.bf16.msra.mxu0 %v13315_v50  ;;  %v10097_v50 = vld [vmem:[%s16136_s11 + $0x388] sm:$0xff]  ;;  %v13381_v6 = vpack.c.bf16 %v10286_v38, %v10285_v48 }
0x52c9   :  { %13318 = vmatprep.subr.bf16.mxu0 %v13317_v57  ;;  %v10099_v57 = vld [vmem:[%s16136_s11 + $0x398] sm:$0xff] }
0x52ca   :  { %v13361_v18 = vpack.c.bf16 %v10099_v57, %v10097_v50 }
0x52cc   :  { %13320 = vmatpush1.bf16.msra.mxu0 %v13319_v56  ;;  %v13363_v56 = vpack.c.bf16 %v10098_v62, %v10096_v47  ;;  %v13385_v47 = vpack.c.bf16 %v10288_v49, %v10287_v17  ;;  %v10271_v62 = vld [vmem:[%s16137_s12 + $0x20] sm:$0xff] }
0x52cd   :  { %13322 = vmatprep.subr.bf16.mxu0 %v13321_v37  ;;  %v10040_v37 = vld [vmem:[%s16136_s11 + $0x1c0] sm:$0xff] }
0x52ce   :  { %v13307_v55 = vpack.c.bf16 %v10042_v61, %v10040_v37  ;;  %v10289_v61 = vld [vmem:[%s16137_s12 + $0xb0] sm:$0xff] }
0x52d0   :  { %13324 = vmatpush1.bf16.msra.mxu0 %v13323_v43  ;;  %13308 = vmatpush1.bf16.msra.mxu1 %v13307_v55  ;;  %v13365_v43 = vpack.c.bf16 %v10103_v4, %v10101_v19  ;;  %v10290_v55 = vld [vmem:[%s16137_s12 + $0xb8] sm:$0xff] }
0x52d1   :  { %13326 = vmatprep.subr.bf16.mxu0 %v13325_v31  ;;  %v10045_v31 = vld [vmem:[%s16136_s11 + $0x1e8] sm:$0xff] }
0x52d2   :  { %v13309_v7 = vpack.c.bf16 %v10047_v27, %v10045_v31  ;;  %v13389_v31 = vpack.c.bf16 %v10290_v55, %v10289_v61  ;;  %v10273_v27 = vld [vmem:[%s16137_s12 + $0x30] sm:$0xff] }
0x52d4   :  { %13328 = vmatpush1.bf16.msra.mxu0 %v13327_v44  ;;  %v10044_v44 = vld [vmem:[%s16136_s11 + $0x1e0] sm:$0xff]  ;;  %13310 = vmatprep.subr.bf16.mxu1 %v13309_v7 }
0x52d5   :  { %13330 = vmatprep.subr.bf16.mxu0 %v13329_v58  ;;  %v10046_v58 = vld [vmem:[%s16136_s11 + $0x1f0] sm:$0xff]  ;;  %v10291_v7 = vld [vmem:[%s16137_s12 + $0xc0] sm:$0xff] }
0x52d6   :  { %v13311_v46 = vpack.c.bf16 %v10046_v58, %v10044_v44  ;;  %v13391_v44 = vpack.c.bf16 %v10274_v1, %v10273_v27  ;;  %v13393_v58 = vpack.c.bf16 %v10292_v35, %v10291_v7 }
0x52d8   :  { %13332 = vmatpush1.bf16.msra.mxu0 %v13331_v16  ;;  %13312 = vmatpush1.bf16.msra.mxu1 %v13311_v46  ;;  %v13369_v16 = vpack.c.bf16 %v10107_v42, %v10105_v22  ;;  %v10276_v46 = vld [vmem:[%s16137_s12 + $0x48] sm:$0xff]  ;;  %v10293_v42 = vld [vmem:[%s16137_s12 + $0xd0] sm:$0xff] }
0x52d9   :  { %13334 = vmatprep.subr.bf16.mxu0 %v13333_v5  ;;  %v10104_v5 = vld [vmem:[%s16136_s11 + $0x3c0] sm:$0xff] }
0x52da   :  { %v13371_v24 = vpack.c.bf16 %v10106_v21, %v10104_v5  ;;  %v10277_v21 = vld [vmem:[%s16137_s12 + $0x50] sm:$0xff] }
0x52dc   :  { %13336 = vmatpush1.bf16.msra.mxu0 %v13335_v0  ;;  %v13373_v0 = vpack.c.bf16 %v10111_v52, %v10109_v33  ;;  %v10295_v52 = vld [vmem:[%s16137_s12 + $0xe0] sm:$0xff] }
0x52dd   :  { %13338 = vmatprep.subr.bf16.mxu0 %v13337_v20  ;;  %v10108_v20 = vld [vmem:[%s16136_s11 + $0x3e0] sm:$0xff] }
0x52de   :  { %v13375_v63 = vpack.c.bf16 %v10110_v13, %v10108_v20  ;;  %v10279_v13 = vld [vmem:[%s16137_s12 + $0x60] sm:$0xff] }
0x52e0   :  { %13340 = vmatpush1.bf16.msra.mxu0 %v13339_v8  ;;  %v13377_v8 = vpack.c.bf16 %v10284_v32, %v10283_v28  ;;  %v10297_v32 = vld [vmem:[%s16137_s12 + $0xf0] sm:$0xff] }
0x52e1   :  { %13342 = vmatprep.subr.bf16.mxu0 %v13341_v15  ;;  %v9815_v15 = vlaneseq }
0x52e2   :  { %13378 = vmatprep.subr.bf16.mxu1 %v13377_v8  ;;  %v10298_v8 = vld [vmem:[%s16137_s12 + $0xf8] sm:$0xff] }
0x52e3   :  { %v16000_v30 = vshrl.u32 %v9815_v15, 7  ;;  %v13405_v15 = vpack.c.bf16 %v10298_v8, %v10297_v32 }
0x52e4   :  { %13344 = vmatpush1.bf16.msra.mxu0 %v13343_v10 }
0x52e5   :  { %13346 = vmatprep.subr.bf16.mxu0 %v13345_v23  ;;  %v9817_v39 = vsub.s32 0, %v16000_v30  ;;  %v9821_v54 = vsub.s32 1, %v16000_v30  ;;  %v9825_v9 = vsub.s32 2, %v16000_v30  ;;  %v9829_v29 = vsub.s32 3, %v16000_v30 }
0x52e7   :  { %v9818_v10 = vrot.slane %v9795_v2, %v9817_v39  ;;  %v9822_v23 = vrot.slane %v9795_v2, %v9821_v54  ;;  %v9826_v26 = vrot.slane %v9795_v2, %v9825_v9 }
0x52e8   :  { %13348 = vmatpush1.bf16.msra.mxu0 %v13347_v36  ;;  %v10267_v36 = vld [vmem:[%s16137_s12] sm:$0xff] }
0x52e9   :  { %13350 = vmatprep.subr.bf16.mxu0 %v13349_v59  ;;  %v10268_v59 = vld [vmem:[%s16137_s12 + $0x8] sm:$0xff] }
0x52ec   :  { %13352 = vmatpush1.bf16.msra.mxu0 %v13351_v3 }
0x52ed   :  { %13354 = vmatprep.subr.bf16.mxu0 %v13353_v25  ;;  %v13379_v25 = vpack.c.bf16 %v10268_v59, %v10267_v36 }
0x52f0   :  { %13356 = vmatpush1.bf16.msra.mxu0 %v13355_v45  ;;  %v10270_v45 = vld [vmem:[%s16137_s12 + $0x18] sm:$0xff] }
0x52f1   :  { %13358 = vmatprep.subr.bf16.mxu0 %v13357_v14  ;;  %v9830_v14 = vrot.slane %v9795_v2, %v9829_v29  ;;  %v13383_v57 = vpack.c.bf16 %v10270_v45, %v10269_v40  ;;  %v10281_v2 = vld [vmem:[%s16137_s12 + $0x70] sm:$0xff]  ;;  %v10827_v40 = vld [vmem:[%s16138_s13 + $0x6] ss:$0 sm:$0xff] }
0x52f4   :  { %13360 = vmatpush1.bf16.msra.mxu0 %v13359_v34 }
0x52f5   :  { %13362 = vmatprep.subr.bf16.mxu0 %v13361_v18 }
0x52f8   :  { %13364 = vmatpush1.bf16.msra.mxu0 %v13363_v56  ;;  %v10272_v56 = vld [vmem:[%s16137_s12 + $0x28] sm:$0xff] }
0x52f9   :  { %13366 = vmatprep.subr.bf16.mxu0 %v13365_v43  ;;  %v13387_v4 = vpack.c.bf16 %v10272_v56, %v10271_v62 }
0x52fc   :  { %13368 = vmatpush1.bf16.msra.mxu0 %v13367_v41  ;;  %v10275_v41 = vld [vmem:[%s16137_s12 + $0x40] sm:$0xff] }
0x52fd   :  { %13370 = vmatprep.subr.bf16.mxu0 %v13369_v16  ;;  %v13395_v22 = vpack.c.bf16 %v10276_v46, %v10275_v41  ;;  %v10294_v16 = vld [vmem:[%s16137_s12 + $0xd8] sm:$0xff] }
0x52fe   :  { %v13397_v5 = vpack.c.bf16 %v10294_v16, %v10293_v42 }
0x5300   :  { %13372 = vmatpush1.bf16.msra.mxu0 %v13371_v24  ;;  %v10278_v24 = vld [vmem:[%s16137_s12 + $0x58] sm:$0xff] }
0x5301   :  { %13374 = vmatprep.subr.bf16.mxu0 %v13373_v0  ;;  %v13399_v33 = vpack.c.bf16 %v10278_v24, %v10277_v21  ;;  %v10296_v0 = vld [vmem:[%s16137_s12 + $0xe8] sm:$0xff] }
0x5302   :  { %v13401_v20 = vpack.c.bf16 %v10296_v0, %v10295_v52 }
0x5304   :  { %13376 = vmatpush1.bf16.msra.mxu0 %v13375_v63  ;;  %v10280_v63 = vld [vmem:[%s16137_s12 + $0x68] sm:$0xff] }
0x5305   :  { %v13403_v28 = vpack.c.bf16 %v10280_v63, %v10279_v13 }
0x5392   :  { %v9904_v12 = vpop.f32.mrb[116].mxu0 }
0x5393   :  { %v9905_v53 = vadd.f32 %v9904_v12, %v9818_v10  ;;  %v9906_v11 = vpop.f32.mrb[117].mxu0  ;;  %v10282_v10 = vld [vmem:[%s16137_s12 + $0x78] sm:$0xff]  ;;  %v9796_v12 = vld [vmem:[%s16138_s13 + $0x4] sm:$0x3] }
0x5394   :  { %v9907_v51 = vadd.f32 %v9906_v11, %v9822_v23  ;;  %v13407_v23 = vpack.c.bf16 %v10282_v10, %v10281_v2  ;;  %v10116_v9 = vrot.slane %v9796_v12, %v9817_v39  ;;  %v10120_v36 = vrot.slane %v9796_v12, %v9821_v54 }
0x5395   :  { %v9980_v60 = vmax.f32 %v9905_v53, 0.0 }
0x5396   :  { %v9981_v3 = vmax.f32 %v9907_v51, 0.0 }
0x5398   :  { %10187 = vmatprep.mubr.f32.mxu1 %v9981_v3 }
0x5399   :  { %10188 = vmatmul.mubr.f32.vlgmr.msra.gmra.mrb[74].mxu1 %v9980_v60 }
0x539a   :  { %v9975_v50 = vpop.f32.mrb[118].mxu0  ;;  %13380 = vmatpush3.bf16.msra.mxu1 %v13379_v25 }
0x539b   :  { %v9976_v34 = vadd.f32 %v9975_v50, %v9826_v26  ;;  %v9977_v18 = vpop.f32.mrb[119].mxu0  ;;  %13382 = vmatprep.subr.bf16.mxu1 %v13381_v6 }
0x539c   :  { %v9978_v37 = vadd.f32 %v9977_v18, %v9830_v14 }
0x539d   :  { %v9982_v43 = vmax.f32 %v9976_v34, 0.0 }
0x539e   :  { %v9983_v19 = vmax.f32 %v9978_v37, 0.0  ;;  %13384 = vmatpush3.bf16.msra.mxu1 %v13383_v57 }
0x539f   :  { %13386 = vmatprep.subr.bf16.mxu1 %v13385_v47 }
0x53a0   :  { %10258 = vmatprep.mubr.f32.mxu0 %v9983_v19 }
0x53a1   :  { %10259 = vmatmul.mubr.f32.vlgmr.msra.gmra.mrb[120].mxu0 %v9982_v43 }
0x53a2   :  { %13388 = vmatpush3.bf16.msra.mxu1 %v13387_v4 }
0x53a3   :  { %13390 = vmatprep.subr.bf16.mxu1 %v13389_v31 }
0x53a6   :  { %13392 = vmatpush3.bf16.msra.mxu1 %v13391_v44 }
0x53a7   :  { %13394 = vmatprep.subr.bf16.mxu1 %v13393_v58 }
0x53aa   :  { %13396 = vmatpush3.bf16.msra.mxu1 %v13395_v22 }
0x53ab   :  { %13398 = vmatprep.subr.bf16.mxu1 %v13397_v5 }
0x53ae   :  { %13400 = vmatpush3.bf16.msra.mxu1 %v13399_v33 }
0x53af   :  { %13402 = vmatprep.subr.bf16.mxu1 %v13401_v20 }
0x53b2   :  { %13404 = vmatpush3.bf16.msra.mxu1 %v13403_v28 }
0x53b3   :  { %13406 = vmatprep.subr.bf16.mxu1 %v13405_v15 }
0x53b6   :  { %13408 = vmatpush3.bf16.msra.mxu1 %v13407_v23 }
0x546c   :  { %v10189_v53 = vpop.f32.mrb[74].mxu1 }
0x546d   :  { %v10191_v11 = vpop.f32.mrb[75].mxu1  ;;  %v10190_v59 = vadd.f32 %v10189_v53, %v10116_v9 }
0x546e   :  { %v10192_v51 = vadd.f32 %v10191_v11, %v10120_v36 }
0x5474   :  { %v10260_v29 = vpop.f32.mrb[120].mxu0 }
0x5475   :  { %v10261_v48 = vadd.f32 %v10260_v29, %v10190_v59  ;;  %v10262_v38 = vpop.f32.mrb[121].mxu0 }
0x5476   :  { %v10263_v3 = vadd.f32 %v10262_v38, %v10192_v51 }
0x5477   :  { %v10265_v60 = vmax.f32 %v10261_v48, 0.0 }
0x5478   :  { %v10266_v25 = vmax.f32 %v10263_v3, 0.0 }
0x547a   :  { %10369 = vmatprep.mubr.f32.mxu1 %v10266_v25 }
0x547b   :  { %10370 = vmatmul.mubr.f32.vlgmr.msra.gmra.mrb[76].mxu1 %v10265_v60 }
0x554e   :  { %v11440_v26 = vpop.f32.mrb[76].mxu1 }
0x554f   :  { %v11441_v6 = vpop.f32.mrb[77].mxu1 }
0x5550   :  { %v11442_v30 = vadd.f32 %v11441_v6, %v11440_v26 }
0x5552   :  { %v10372_v39 = vadd.f32 %v11442_v30, %v10827_v40 }
0x5554   :  { %10375 = vst [vmem:[#allocation2] sm:$0x3] %v10372_v39 }
0x5555   :  { %13688 = shalt.err (!%p13685_p4)
}
0x5556   :  { %s13689_s21 = scalar_lea.hbm %s16139_s14, 32 }
0x5557   :  { %p13690_p5 = scmp.ne.s32.totalorder %s16139_s14, %s13689_s21  ;;  %p13693_p6 = scmp.lt.u32.totalorder %s13689_s21, %s16139_s14 }
0x5559   :  { %p13695_p7 = pnand %p13693_p6, %p13690_p5 }
0x555b   :  { %13698 = shalt.err (!%p13695_p7)
}
0x555c   :  { %10385 = dma.vmem_to_hbm [thread:$0]  %s10383_s9, 32, %s16139_s14, [#allocation3]  }
0x555d   :  { %13699 = dma.done.wait [#allocation3], 32  }
0x555e   :  { %13700 = vsyncadd [#allocation3], 4294967264 }
0x555f   :  { %10389 = vsyncpa [#allocation3], 1 }

</bundles_post_ra>
